<compile_context>
chip_gen: v5e
topology: v5e:2x2
jax: 0.10.0
libtpu: 0.0.40
codegen_flags: <defaults>
</compile_context>

<pallas_src>
import functools

import numpy as np
import jax
import jax.numpy as jnp
from jax import lax
from jax.experimental import pallas as pl
from jax.experimental.pallas import tpu as pltpu


# ----------------------------------------------------------------------------
# Fused Conv2d (valid, stride 1) + bias + ReLU + MaxPool(P, P) kernel.
# Input / output layout: (N, H, C, W)  ("NHCW": C on sublanes, W on lanes).
# ----------------------------------------------------------------------------
def _conv_relu_pool_kernel(x_ref, w_ref, b_ref, s_ref, o_ref, *,
                           kh, kw, pool, normalize):
    cin = x_ref.shape[2]
    w_in = x_ref.shape[3]
    hp = o_ref.shape[1]          # pooled output rows
    cout = o_ref.shape[2]
    wout = w_in - kw + 1         # conv output width (pre-pool)

    if normalize:
        # Per-channel min/max over the whole (H, W) image, fused into conv1:
        # x -> 2 * (x - 0.5*(max+min)) / (max-min)   (no epsilon: PyTorch semantics)
        def mm_body(h, carry):
            mx, mn = carry
            row = x_ref[0, h]                            # (cin, w_in)
            return jnp.maximum(mx, row), jnp.minimum(mn, row)

        mx0 = jnp.full((cin, w_in), -jnp.inf, dtype=jnp.float32)
        mn0 = jnp.full((cin, w_in), jnp.inf, dtype=jnp.float32)
        mx, mn = lax.fori_loop(0, x_ref.shape[1], mm_body, (mx0, mn0))
        mx = jnp.max(mx, axis=1, keepdims=True)          # (cin, 1)
        mn = jnp.min(mn, axis=1, keepdims=True)
        off = 0.5 * (mx + mn)
        scl = 2.0 / (mx - mn)

    bias = b_ref[...]                                    # (cout, 1) -> broadcasts over W

    def row_body(ph, carry):
        base = ph * pool
        # Load the pool+kh-1 distinct input rows once (halo rows are shared).
        rows = []
        for r in range(pool + kh - 1):
            row = x_ref[0, base + r]                     # (cin, w_in)
            if normalize:
                row = (row - off) * scl
            rows.append(row)

        # conv + bias + ReLU for the `pool` conv rows of this window, then max.
        pooled = None
        for a in range(pool):
            acc = jnp.zeros((cout, wout), dtype=jnp.float32)
            for di in range(kh):
                row = rows[a + di]
                for dj in range(kw):
                    rhs = row[:, dj:dj + wout]           # (cin, wout) lane-shifted tap
                    acc = acc + jnp.dot(w_ref[di * kw + dj], rhs,
                                        preferred_element_type=jnp.float32)
            acc = jnp.maximum(acc + bias, 0.0)
            pooled = acc if pooled is None else jnp.maximum(pooled, acc)

        # W-direction max-pool: out[:, j] = max_b pooled[:, pool*j + b], done as
        # exact 0/1 selection matmuls (keeps everything on the MXU, no strided
        # lane gathers).
        out = None
        for b in range(pool):
            sel = jnp.dot(pooled, s_ref[b], preferred_element_type=jnp.float32)
            out = sel if out is None else jnp.maximum(out, sel)

        o_ref[0, ph] = out                               # (cout, wp)
        return carry

    lax.fori_loop(0, hp, row_body, 0)


def conv_relu_pool(x_nhcw, w_oihw, bias, *, pool, normalize=False):
    """x: (N, H, Cin, W) f32; w: (Cout, Cin, KH, KW) [PyTorch OIHW]; bias: (Cout,)."""
    n, h, cin, w_in = x_nhcw.shape
    cout, cin2, kh, kw = w_oihw.shape
    assert cin == cin2
    hout, wout = h - kh + 1, w_in - kw + 1
    hp, wp = hout // pool, wout // pool

    # (Cout, Cin, KH, KW) -> (KH*KW, Cout, Cin): one (Cout, Cin) matrix per tap.
    w_taps = jnp.transpose(w_oihw, (2, 3, 0, 1)).reshape(kh * kw, cout, cin)

    # Pool selection matrices: sel[b, i, j] = 1  iff  i == pool*j + b.
    sel_np = (np.arange(wout)[None, :, None]
              == pool * np.arange(wp)[None, None, :] + np.arange(pool)[:, None, None])
    sel = jnp.asarray(sel_np.astype(np.float32))

    kernel = functools.partial(_conv_relu_pool_kernel,
                               kh=kh, kw=kw, pool=pool, normalize=normalize)
    return pl.pallas_call(
        kernel,
        out_shape=jax.ShapeDtypeStruct((n, hp, cout, wp), jnp.float32),
        grid=(n,),
        in_specs=[
            pl.BlockSpec((1, h, cin, w_in), lambda i: (i, 0, 0, 0)),   # whole image
            pl.BlockSpec((kh * kw, cout, cin), lambda i: (0, 0, 0)),   # taps
            pl.BlockSpec((cout, 1), lambda i: (0, 0)),                 # bias
            pl.BlockSpec((pool, wout, wp), lambda i: (0, 0, 0)),       # pool selectors
        ],
        out_specs=pl.BlockSpec((1, hp, cout, wp), lambda i: (i, 0, 0, 0)),
        compiler_params=pltpu.CompilerParams(dimension_semantics=("parallel",)),
    )(x_nhcw, w_taps, bias.reshape(cout, 1), sel)


# ----------------------------------------------------------------------------
# Final Linear + row-wise L2 normalization (single tiny full-block kernel).
# ----------------------------------------------------------------------------
def _fc_l2_kernel(x_ref, w_ref, b_ref, o_ref):
    y = jnp.dot(x_ref[...], w_ref[...], preferred_element_type=jnp.float32)
    y = y + b_ref[...]
    o_ref[...] = y / jnp.sqrt(jnp.sum(y * y, axis=1, keepdims=True))


def linear_l2_normalize(feat, w, b):
    """feat: (N, K), w: (K, M), b: (M,) -> L2-row-normalized (N, M)."""
    n, k = feat.shape
    m = w.shape[1]
    return pl.pallas_call(
        _fc_l2_kernel,
        out_shape=jax.ShapeDtypeStruct((n, m), jnp.float32),
        grid=(1,),
        in_specs=[pl.BlockSpec((n, k), lambda i: (0, 0)),
                  pl.BlockSpec((k, m), lambda i: (0, 0)),
                  pl.BlockSpec((1, m), lambda i: (0, 0))],
        out_specs=pl.BlockSpec((n, m), lambda i: (0, 0)),
    )(feat, w, b.reshape(1, m))


# ----------------------------------------------------------------------------
# Parameters (deterministic, PyTorch-style uniform init, PyTorch layouts).
# ----------------------------------------------------------------------------
def _init_conv(key, cout, cin, kh, kw):
    kwk, kbk = jax.random.split(key)
    bound = 1.0 / (cin * kh * kw) ** 0.5
    w = jax.random.uniform(kwk, (cout, cin, kh, kw), jnp.float32, -bound, bound)
    b = jax.random.uniform(kbk, (cout,), jnp.float32, -bound, bound)
    return w, b


def init_params(key):
    k1, k2, k3, k4, k5 = jax.random.split(key, 5)
    w1, b1 = _init_conv(k1, 32, 3, 3, 3)
    w2, b2 = _init_conv(k2, 16, 32, 4, 4)
    w3, b3 = _init_conv(k3, 16, 16, 3, 3)
    w4, b4 = _init_conv(k4, 16, 16, 3, 3)
    kwk, kbk = jax.random.split(k5)
    bound = 1.0 / (16 * 7 * 7) ** 0.5
    w_fc = jax.random.uniform(kwk, (2, 16 * 7 * 7), jnp.float32, -bound, bound)
    b_fc = jax.random.uniform(kbk, (2,), jnp.float32, -bound, bound)
    return dict(w1=w1, b1=b1, w2=w2, b2=b2, w3=w3, b3=b3, w4=w4, b4=b4,
                w_fc=w_fc, b_fc=b_fc)


# ----------------------------------------------------------------------------
# Full forward pass (matches Network.forward, eval mode).
# ----------------------------------------------------------------------------
def network_forward(x_nchw, params):
    # NCHW -> NHCW (cheap metadata-ish transpose of the small input; the
    # min/max normalization itself is fused into the first conv kernel).
    x = jnp.transpose(x_nchw.astype(jnp.float32), (0, 2, 1, 3))

    x = conv_relu_pool(x, params["w1"], params["b1"], pool=2, normalize=True)  # 256->254->127
    x = conv_relu_pool(x, params["w2"], params["b2"], pool=2)                  # 127->124->62
    x = conv_relu_pool(x, params["w3"], params["b3"], pool=2)                  # 62->60->30
    x = conv_relu_pool(x, params["w4"], params["b4"], pool=4)                  # 30->28->7

    # Dropout(p=0.5) -> identity at inference time.
    n = x.shape[0]
    feat = x.reshape(n, -1)                       # (N, 7*16*7), (h, c, w) order
    # Reorder the PyTorch (c, h, w)-major Linear weight columns to (h, c, w).
    w_fc = params["w_fc"].reshape(2, 16, 7, 7).transpose(0, 2, 1, 3).reshape(2, -1)
    return linear_l2_normalize(feat, w_fc.T, params["b_fc"])


# ----------------------------------------------------------------------------
# Pure-JAX reference (mirrors the PyTorch module) for a numerical check.
# ----------------------------------------------------------------------------
def reference_forward(x, params):
    x = x.astype(jnp.float32)
    maxs = jnp.max(x, axis=(2, 3), keepdims=True)
    mins = jnp.min(x, axis=(2, 3), keepdims=True)
    x = 2.0 * (x - 0.5 * (maxs + mins)) / (maxs - mins)

    def conv(x, w, b):
        y = lax.conv_general_dilated(x, w, (1, 1), "VALID",
                                     dimension_numbers=("NCHW", "OIHW", "NCHW"),
                                     precision=lax.Precision.HIGHEST)
        return jnp.maximum(y + b.reshape(1, -1, 1, 1), 0.0)

    def pool(x, k):
        return lax.reduce_window(x, -jnp.inf, lax.max,
                                 (1, 1, k, k), (1, 1, k, k), "VALID")

    x = pool(conv(x, params["w1"], params["b1"]), 2)
    x = pool(conv(x, params["w2"], params["b2"]), 2)
    x = pool(conv(x, params["w3"], params["b3"]), 2)
    x = pool(conv(x, params["w4"], params["b4"]), 4)
    feat = x.reshape(x.shape[0], -1)
    logits = jnp.dot(feat, params["w_fc"].T,
                     precision=lax.Precision.HIGHEST) + params["b_fc"]
    return logits / jnp.sqrt(jnp.sum(logits * logits, axis=1, keepdims=True))


if __name__ == "__main__":
    key = jax.random.PRNGKey(0)
    k_x, k_p = jax.random.split(key)
    # 256x256 input is what the module implies (flattened feature = 16 * 7 * 7).
    x = jax.random.uniform(k_x, (2, 3, 256, 256), jnp.float32)
    params = init_params(k_p)

    out = jax.block_until_ready(jax.jit(network_forward)(x, params))

    assert out.shape == (2, 2), out.shape
    assert bool(jnp.all(jnp.isfinite(out)))
    # semantic invariant of the final L2 normalization
    assert bool(jnp.allclose(jnp.sum(out * out, axis=1), 1.0, atol=1e-4))

    ref = jax.block_until_ready(jax.jit(reference_forward)(x, params))
    assert bool(jnp.allclose(out, ref, atol=1e-2)), float(jnp.max(jnp.abs(out - ref)))
    print("KERNEL_OK")
</pallas_src>

<mosaic_0001>
module attributes {stable_mosaic.version = 11 : i64} {
  func.func @_conv_relu_pool_kernel(%arg0: i32, %arg1: memref<1x256x3x256xf32, #tpu.memory_space<vmem>>, %arg2: memref<9x32x3xf32, #tpu.memory_space<vmem>>, %arg3: memref<32x1xf32, #tpu.memory_space<vmem>>, %arg4: memref<2x254x127xf32, #tpu.memory_space<vmem>>, %arg5: memref<1x127x32x127xf32, #tpu.memory_space<vmem>>) attributes {dimension_semantics = [#tpu.dimension_semantics<parallel>], iteration_bounds = array<i64: 2>, scalar_prefetch = 0 : i64, scratch_operands = 0 : i64, tpu.core_type = #tpu.core_type<tc>, window_params = [{transform_indices = @transform_0, window_bounds = array<i64: 1, 256, 3, 256>}, {pipeline_mode = #tpu.pipeline_mode<synchronous>, transform_indices = @transform_1, window_bounds = array<i64: 9, 32, 3>}, {pipeline_mode = #tpu.pipeline_mode<synchronous>, transform_indices = @transform_2, window_bounds = array<i64: 32, 1>}, {pipeline_mode = #tpu.pipeline_mode<synchronous>, transform_indices = @transform_3, window_bounds = array<i64: 2, 254, 127>}, {transform_indices = @transform_4, window_bounds = array<i64: 1, 127, 32, 127>}]} {
    %cst = arith.constant 0xFF800000 : f32
    %0 = vector.broadcast %cst : f32 to vector<3x256xf32>
    %cst_0 = arith.constant 0x7F800000 : f32
    %1 = vector.broadcast %cst_0 : f32 to vector<3x256xf32>
    %c0_i32 = arith.constant 0 : i32
    %c256_i32 = arith.constant 256 : i32
    %2 = arith.addi %c0_i32, %c256_i32 : i32
    %c1_i32 = arith.constant 1 : i32
    %3:2 = scf.for %arg6 = %c0_i32 to %2 step %c1_i32 iter_args(%arg7 = %0, %arg8 = %1) -> (vector<3x256xf32>, vector<3x256xf32>)  : i32 {
      %c0_10 = arith.constant 0 : index
      %16 = arith.index_cast %arg6 : i32 to index
      %c0_11 = arith.constant 0 : index
      %c0_12 = arith.constant 0 : index
      %17 = vector.load %arg1[%c0_10, %16, %c0_11, %c0_12] : memref<1x256x3x256xf32, #tpu.memory_space<vmem>>, vector<1x1x3x256xf32>
      %18 = vector.shape_cast %17 : vector<1x1x3x256xf32> to vector<3x256xf32>
      %19 = arith.maximumf %arg7, %18 : vector<3x256xf32>
      %20 = arith.minimumf %arg8, %18 : vector<3x256xf32>
      scf.yield %19, %20 : vector<3x256xf32>, vector<3x256xf32>
    }
    %c256_i32_1 = arith.constant 256 : i32
    %cst_2 = arith.constant dense<0xFF800000> : vector<3xf32>
    %4 = vector.multi_reduction <maximumf>, %3#0, %cst_2 [1] : vector<3x256xf32> to vector<3xf32>
    %5 = vector.shape_cast %4 : vector<3xf32> to vector<3x1xf32>
    %cst_3 = arith.constant dense<0x7F800000> : vector<3xf32>
    %6 = vector.multi_reduction <minimumf>, %3#1, %cst_3 [1] : vector<3x256xf32> to vector<3xf32>
    %7 = vector.shape_cast %6 : vector<3xf32> to vector<3x1xf32>
    %8 = arith.addf %5, %7 : vector<3x1xf32>
    %cst_4 = arith.constant 5.000000e-01 : f32
    %9 = vector.broadcast %cst_4 : f32 to vector<3x1xf32>
    %10 = arith.mulf %9, %8 : vector<3x1xf32>
    %11 = arith.subf %5, %7 : vector<3x1xf32>
    %cst_5 = arith.constant 2.000000e+00 : f32
    %12 = vector.broadcast %cst_5 : f32 to vector<3x1xf32>
    %13 = arith.divf %12, %11 : vector<3x1xf32>
    %c0 = arith.constant 0 : index
    %c0_6 = arith.constant 0 : index
    %14 = vector.load %arg3[%c0, %c0_6] : memref<32x1xf32, #tpu.memory_space<vmem>>, vector<32x1xf32>
    %c0_i32_7 = arith.constant 0 : i32
    %c127_i32 = arith.constant 127 : i32
    %15 = arith.addi %c0_i32_7, %c127_i32 : i32
    %c1_i32_8 = arith.constant 1 : i32
    scf.for %arg6 = %c0_i32_7 to %15 step %c1_i32_8  : i32 {
      %c2_i32 = arith.constant 2 : i32
      %16 = arith.muli %arg6, %c2_i32 : i32
      %c0_i32_10 = arith.constant 0 : i32
      %17 = arith.addi %16, %c0_i32_10 : i32
      %c0_11 = arith.constant 0 : index
      %18 = arith.index_cast %17 : i32 to index
      %c0_12 = arith.constant 0 : index
      %c0_13 = arith.constant 0 : index
      %19 = vector.load %arg1[%c0_11, %18, %c0_12, %c0_13] : memref<1x256x3x256xf32, #tpu.memory_space<vmem>>, vector<1x1x3x256xf32>
      %20 = vector.shape_cast %19 : vector<1x1x3x256xf32> to vector<3x256xf32>
      %21 = vector.broadcast %10 : vector<3x1xf32> to vector<3x256xf32>
      %22 = arith.subf %20, %21 : vector<3x256xf32>
      %23 = vector.broadcast %13 : vector<3x1xf32> to vector<3x256xf32>
      %24 = arith.mulf %22, %23 : vector<3x256xf32>
      %c1_i32_14 = arith.constant 1 : i32
      %25 = arith.addi %16, %c1_i32_14 : i32
      %c0_15 = arith.constant 0 : index
      %26 = arith.index_cast %25 : i32 to index
      %c0_16 = arith.constant 0 : index
      %c0_17 = arith.constant 0 : index
      %27 = vector.load %arg1[%c0_15, %26, %c0_16, %c0_17] : memref<1x256x3x256xf32, #tpu.memory_space<vmem>>, vector<1x1x3x256xf32>
      %28 = vector.shape_cast %27 : vector<1x1x3x256xf32> to vector<3x256xf32>
      %29 = vector.broadcast %10 : vector<3x1xf32> to vector<3x256xf32>
      %30 = arith.subf %28, %29 : vector<3x256xf32>
      %31 = vector.broadcast %13 : vector<3x1xf32> to vector<3x256xf32>
      %32 = arith.mulf %30, %31 : vector<3x256xf32>
      %c2_i32_18 = arith.constant 2 : i32
      %33 = arith.addi %16, %c2_i32_18 : i32
      %c0_19 = arith.constant 0 : index
      %34 = arith.index_cast %33 : i32 to index
      %c0_20 = arith.constant 0 : index
      %c0_21 = arith.constant 0 : index
      %35 = vector.load %arg1[%c0_19, %34, %c0_20, %c0_21] : memref<1x256x3x256xf32, #tpu.memory_space<vmem>>, vector<1x1x3x256xf32>
      %36 = vector.shape_cast %35 : vector<1x1x3x256xf32> to vector<3x256xf32>
      %37 = vector.broadcast %10 : vector<3x1xf32> to vector<3x256xf32>
      %38 = arith.subf %36, %37 : vector<3x256xf32>
      %39 = vector.broadcast %13 : vector<3x1xf32> to vector<3x256xf32>
      %40 = arith.mulf %38, %39 : vector<3x256xf32>
      %c3_i32 = arith.constant 3 : i32
      %41 = arith.addi %16, %c3_i32 : i32
      %c0_22 = arith.constant 0 : index
      %42 = arith.index_cast %41 : i32 to index
      %c0_23 = arith.constant 0 : index
      %c0_24 = arith.constant 0 : index
      %43 = vector.load %arg1[%c0_22, %42, %c0_23, %c0_24] : memref<1x256x3x256xf32, #tpu.memory_space<vmem>>, vector<1x1x3x256xf32>
      %44 = vector.shape_cast %43 : vector<1x1x3x256xf32> to vector<3x256xf32>
      %45 = vector.broadcast %10 : vector<3x1xf32> to vector<3x256xf32>
      %46 = arith.subf %44, %45 : vector<3x256xf32>
      %47 = vector.broadcast %13 : vector<3x1xf32> to vector<3x256xf32>
      %48 = arith.mulf %46, %47 : vector<3x256xf32>
      %cst_25 = arith.constant 0.000000e+00 : f32
      %49 = vector.broadcast %cst_25 : f32 to vector<32x254xf32>
      %50 = vector.extract_strided_slice %24 {offsets = [0, 0], sizes = [3, 254], strides = [1, 1]} : vector<3x256xf32> to vector<3x254xf32>
      %c0_26 = arith.constant 0 : index
      %c0_27 = arith.constant 0 : index
      %c0_28 = arith.constant 0 : index
      %51 = vector.load %arg2[%c0_26, %c0_27, %c0_28] : memref<9x32x3xf32, #tpu.memory_space<vmem>>, vector<1x32x3xf32>
      %52 = vector.shape_cast %51 : vector<1x32x3xf32> to vector<32x3xf32>
      %cst_29 = arith.constant dense<0.000000e+00> : vector<32x254xf32>
      %53 = tpu.matmul %52, %50, %cst_29 {dimension_numbers = #tpu.dot_dimension_numbers<[1], [0], [0], [1], [0, 0, 1, 1], [], []>} : vector<32x3xf32>, vector<3x254xf32>, vector<32x254xf32> -> vector<32x254xf32>
      %54 = arith.addf %49, %53 : vector<32x254xf32>
      %55 = vector.extract_strided_slice %24 {offsets = [0, 1], sizes = [3, 254], strides = [1, 1]} : vector<3x256xf32> to vector<3x254xf32>
      %c1 = arith.constant 1 : index
      %c0_30 = arith.constant 0 : index
      %c0_31 = arith.constant 0 : index
      %56 = vector.load %arg2[%c1, %c0_30, %c0_31] : memref<9x32x3xf32, #tpu.memory_space<vmem>>, vector<1x32x3xf32>
      %57 = vector.shape_cast %56 : vector<1x32x3xf32> to vector<32x3xf32>
      %cst_32 = arith.constant dense<0.000000e+00> : vector<32x254xf32>
      %58 = tpu.matmul %57, %55, %cst_32 {dimension_numbers = #tpu.dot_dimension_numbers<[1], [0], [0], [1], [0, 0, 1, 1], [], []>} : vector<32x3xf32>, vector<3x254xf32>, vector<32x254xf32> -> vector<32x254xf32>
      %59 = arith.addf %54, %58 : vector<32x254xf32>
      %60 = vector.extract_strided_slice %24 {offsets = [0, 2], sizes = [3, 254], strides = [1, 1]} : vector<3x256xf32> to vector<3x254xf32>
      %c2 = arith.constant 2 : index
      %c0_33 = arith.constant 0 : index
      %c0_34 = arith.constant 0 : index
      %61 = vector.load %arg2[%c2, %c0_33, %c0_34] : memref<9x32x3xf32, #tpu.memory_space<vmem>>, vector<1x32x3xf32>
      %62 = vector.shape_cast %61 : vector<1x32x3xf32> to vector<32x3xf32>
      %cst_35 = arith.constant dense<0.000000e+00> : vector<32x254xf32>
      %63 = tpu.matmul %62, %60, %cst_35 {dimension_numbers = #tpu.dot_dimension_numbers<[1], [0], [0], [1], [0, 0, 1, 1], [], []>} : vector<32x3xf32>, vector<3x254xf32>, vector<32x254xf32> -> vector<32x254xf32>
      %64 = arith.addf %59, %63 : vector<32x254xf32>
      %65 = vector.extract_strided_slice %32 {offsets = [0, 0], sizes = [3, 254], strides = [1, 1]} : vector<3x256xf32> to vector<3x254xf32>
      %c3 = arith.constant 3 : index
      %c0_36 = arith.constant 0 : index
      %c0_37 = arith.constant 0 : index
      %66 = vector.load %arg2[%c3, %c0_36, %c0_37] : memref<9x32x3xf32, #tpu.memory_space<vmem>>, vector<1x32x3xf32>
      %67 = vector.shape_cast %66 : vector<1x32x3xf32> to vector<32x3xf32>
      %cst_38 = arith.constant dense<0.000000e+00> : vector<32x254xf32>
      %68 = tpu.matmul %67, %65, %cst_38 {dimension_numbers = #tpu.dot_dimension_numbers<[1], [0], [0], [1], [0, 0, 1, 1], [], []>} : vector<32x3xf32>, vector<3x254xf32>, vector<32x254xf32> -> vector<32x254xf32>
      %69 = arith.addf %64, %68 : vector<32x254xf32>
      %70 = vector.extract_strided_slice %32 {offsets = [0, 1], sizes = [3, 254], strides = [1, 1]} : vector<3x256xf32> to vector<3x254xf32>
      %c4 = arith.constant 4 : index
      %c0_39 = arith.constant 0 : index
      %c0_40 = arith.constant 0 : index
      %71 = vector.load %arg2[%c4, %c0_39, %c0_40] : memref<9x32x3xf32, #tpu.memory_space<vmem>>, vector<1x32x3xf32>
      %72 = vector.shape_cast %71 : vector<1x32x3xf32> to vector<32x3xf32>
      %cst_41 = arith.constant dense<0.000000e+00> : vector<32x254xf32>
      %73 = tpu.matmul %72, %70, %cst_41 {dimension_numbers = #tpu.dot_dimension_numbers<[1], [0], [0], [1], [0, 0, 1, 1], [], []>} : vector<32x3xf32>, vector<3x254xf32>, vector<32x254xf32> -> vector<32x254xf32>
      %74 = arith.addf %69, %73 : vector<32x254xf32>
      %75 = vector.extract_strided_slice %32 {offsets = [0, 2], sizes = [3, 254], strides = [1, 1]} : vector<3x256xf32> to vector<3x254xf32>
      %c5 = arith.constant 5 : index
      %c0_42 = arith.constant 0 : index
      %c0_43 = arith.constant 0 : index
      %76 = vector.load %arg2[%c5, %c0_42, %c0_43] : memref<9x32x3xf32, #tpu.memory_space<vmem>>, vector<1x32x3xf32>
      %77 = vector.shape_cast %76 : vector<1x32x3xf32> to vector<32x3xf32>
      %cst_44 = arith.constant dense<0.000000e+00> : vector<32x254xf32>
      %78 = tpu.matmul %77, %75, %cst_44 {dimension_numbers = #tpu.dot_dimension_numbers<[1], [0], [0], [1], [0, 0, 1, 1], [], []>} : vector<32x3xf32>, vector<3x254xf32>, vector<32x254xf32> -> vector<32x254xf32>
      %79 = arith.addf %74, %78 : vector<32x254xf32>
      %80 = vector.extract_strided_slice %40 {offsets = [0, 0], sizes = [3, 254], strides = [1, 1]} : vector<3x256xf32> to vector<3x254xf32>
      %c6 = arith.constant 6 : index
      %c0_45 = arith.constant 0 : index
      %c0_46 = arith.constant 0 : index
      %81 = vector.load %arg2[%c6, %c0_45, %c0_46] : memref<9x32x3xf32, #tpu.memory_space<vmem>>, vector<1x32x3xf32>
      %82 = vector.shape_cast %81 : vector<1x32x3xf32> to vector<32x3xf32>
      %cst_47 = arith.constant dense<0.000000e+00> : vector<32x254xf32>
      %83 = tpu.matmul %82, %80, %cst_47 {dimension_numbers = #tpu.dot_dimension_numbers<[1], [0], [0], [1], [0, 0, 1, 1], [], []>} : vector<32x3xf32>, vector<3x254xf32>, vector<32x254xf32> -> vector<32x254xf32>
      %84 = arith.addf %79, %83 : vector<32x254xf32>
      %85 = vector.extract_strided_slice %40 {offsets = [0, 1], sizes = [3, 254], strides = [1, 1]} : vector<3x256xf32> to vector<3x254xf32>
      %c7 = arith.constant 7 : index
      %c0_48 = arith.constant 0 : index
      %c0_49 = arith.constant 0 : index
      %86 = vector.load %arg2[%c7, %c0_48, %c0_49] : memref<9x32x3xf32, #tpu.memory_space<vmem>>, vector<1x32x3xf32>
      %87 = vector.shape_cast %86 : vector<1x32x3xf32> to vector<32x3xf32>
      %cst_50 = arith.constant dense<0.000000e+00> : vector<32x254xf32>
      %88 = tpu.matmul %87, %85, %cst_50 {dimension_numbers = #tpu.dot_dimension_numbers<[1], [0], [0], [1], [0, 0, 1, 1], [], []>} : vector<32x3xf32>, vector<3x254xf32>, vector<32x254xf32> -> vector<32x254xf32>
      %89 = arith.addf %84, %88 : vector<32x254xf32>
      %90 = vector.extract_strided_slice %40 {offsets = [0, 2], sizes = [3, 254], strides = [1, 1]} : vector<3x256xf32> to vector<3x254xf32>
      %c8 = arith.constant 8 : index
      %c0_51 = arith.constant 0 : index
      %c0_52 = arith.constant 0 : index
      %91 = vector.load %arg2[%c8, %c0_51, %c0_52] : memref<9x32x3xf32, #tpu.memory_space<vmem>>, vector<1x32x3xf32>
      %92 = vector.shape_cast %91 : vector<1x32x3xf32> to vector<32x3xf32>
      %cst_53 = arith.constant dense<0.000000e+00> : vector<32x254xf32>
      %93 = tpu.matmul %92, %90, %cst_53 {dimension_numbers = #tpu.dot_dimension_numbers<[1], [0], [0], [1], [0, 0, 1, 1], [], []>} : vector<32x3xf32>, vector<3x254xf32>, vector<32x254xf32> -> vector<32x254xf32>
      %94 = arith.addf %89, %93 : vector<32x254xf32>
      %95 = vector.broadcast %14 : vector<32x1xf32> to vector<32x254xf32>
      %96 = arith.addf %94, %95 : vector<32x254xf32>
      %cst_54 = arith.constant 0.000000e+00 : f32
      %97 = vector.broadcast %cst_54 : f32 to vector<32x254xf32>
      %98 = arith.maximumf %96, %97 : vector<32x254xf32>
      %cst_55 = arith.constant 0.000000e+00 : f32
      %99 = vector.broadcast %cst_55 : f32 to vector<32x254xf32>
      %100 = vector.extract_strided_slice %32 {offsets = [0, 0], sizes = [3, 254], strides = [1, 1]} : vector<3x256xf32> to vector<3x254xf32>
      %c0_56 = arith.constant 0 : index
      %c0_57 = arith.constant 0 : index
      %c0_58 = arith.constant 0 : index
      %101 = vector.load %arg2[%c0_56, %c0_57, %c0_58] : memref<9x32x3xf32, #tpu.memory_space<vmem>>, vector<1x32x3xf32>
      %102 = vector.shape_cast %101 : vector<1x32x3xf32> to vector<32x3xf32>
      %cst_59 = arith.constant dense<0.000000e+00> : vector<32x254xf32>
      %103 = tpu.matmul %102, %100, %cst_59 {dimension_numbers = #tpu.dot_dimension_numbers<[1], [0], [0], [1], [0, 0, 1, 1], [], []>} : vector<32x3xf32>, vector<3x254xf32>, vector<32x254xf32> -> vector<32x254xf32>
      %104 = arith.addf %99, %103 : vector<32x254xf32>
      %105 = vector.extract_strided_slice %32 {offsets = [0, 1], sizes = [3, 254], strides = [1, 1]} : vector<3x256xf32> to vector<3x254xf32>
      %c1_60 = arith.constant 1 : index
      %c0_61 = arith.constant 0 : index
      %c0_62 = arith.constant 0 : index
      %106 = vector.load %arg2[%c1_60, %c0_61, %c0_62] : memref<9x32x3xf32, #tpu.memory_space<vmem>>, vector<1x32x3xf32>
      %107 = vector.shape_cast %106 : vector<1x32x3xf32> to vector<32x3xf32>
      %cst_63 = arith.constant dense<0.000000e+00> : vector<32x254xf32>
      %108 = tpu.matmul %107, %105, %cst_63 {dimension_numbers = #tpu.dot_dimension_numbers<[1], [0], [0], [1], [0, 0, 1, 1], [], []>} : vector<32x3xf32>, vector<3x254xf32>, vector<32x254xf32> -> vector<32x254xf32>
      %109 = arith.addf %104, %108 : vector<32x254xf32>
      %110 = vector.extract_strided_slice %32 {offsets = [0, 2], sizes = [3, 254], strides = [1, 1]} : vector<3x256xf32> to vector<3x254xf32>
      %c2_64 = arith.constant 2 : index
      %c0_65 = arith.constant 0 : index
      %c0_66 = arith.constant 0 : index
      %111 = vector.load %arg2[%c2_64, %c0_65, %c0_66] : memref<9x32x3xf32, #tpu.memory_space<vmem>>, vector<1x32x3xf32>
      %112 = vector.shape_cast %111 : vector<1x32x3xf32> to vector<32x3xf32>
      %cst_67 = arith.constant dense<0.000000e+00> : vector<32x254xf32>
      %113 = tpu.matmul %112, %110, %cst_67 {dimension_numbers = #tpu.dot_dimension_numbers<[1], [0], [0], [1], [0, 0, 1, 1], [], []>} : vector<32x3xf32>, vector<3x254xf32>, vector<32x254xf32> -> vector<32x254xf32>
      %114 = arith.addf %109, %113 : vector<32x254xf32>
      %115 = vector.extract_strided_slice %40 {offsets = [0, 0], sizes = [3, 254], strides = [1, 1]} : vector<3x256xf32> to vector<3x254xf32>
      %c3_68 = arith.constant 3 : index
      %c0_69 = arith.constant 0 : index
      %c0_70 = arith.constant 0 : index
      %116 = vector.load %arg2[%c3_68, %c0_69, %c0_70] : memref<9x32x3xf32, #tpu.memory_space<vmem>>, vector<1x32x3xf32>
      %117 = vector.shape_cast %116 : vector<1x32x3xf32> to vector<32x3xf32>
      %cst_71 = arith.constant dense<0.000000e+00> : vector<32x254xf32>
      %118 = tpu.matmul %117, %115, %cst_71 {dimension_numbers = #tpu.dot_dimension_numbers<[1], [0], [0], [1], [0, 0, 1, 1], [], []>} : vector<32x3xf32>, vector<3x254xf32>, vector<32x254xf32> -> vector<32x254xf32>
      %119 = arith.addf %114, %118 : vector<32x254xf32>
      %120 = vector.extract_strided_slice %40 {offsets = [0, 1], sizes = [3, 254], strides = [1, 1]} : vector<3x256xf32> to vector<3x254xf32>
      %c4_72 = arith.constant 4 : index
      %c0_73 = arith.constant 0 : index
      %c0_74 = arith.constant 0 : index
      %121 = vector.load %arg2[%c4_72, %c0_73, %c0_74] : memref<9x32x3xf32, #tpu.memory_space<vmem>>, vector<1x32x3xf32>
      %122 = vector.shape_cast %121 : vector<1x32x3xf32> to vector<32x3xf32>
      %cst_75 = arith.constant dense<0.000000e+00> : vector<32x254xf32>
      %123 = tpu.matmul %122, %120, %cst_75 {dimension_numbers = #tpu.dot_dimension_numbers<[1], [0], [0], [1], [0, 0, 1, 1], [], []>} : vector<32x3xf32>, vector<3x254xf32>, vector<32x254xf32> -> vector<32x254xf32>
      %124 = arith.addf %119, %123 : vector<32x254xf32>
      %125 = vector.extract_strided_slice %40 {offsets = [0, 2], sizes = [3, 254], strides = [1, 1]} : vector<3x256xf32> to vector<3x254xf32>
      %c5_76 = arith.constant 5 : index
      %c0_77 = arith.constant 0 : index
      %c0_78 = arith.constant 0 : index
      %126 = vector.load %arg2[%c5_76, %c0_77, %c0_78] : memref<9x32x3xf32, #tpu.memory_space<vmem>>, vector<1x32x3xf32>
      %127 = vector.shape_cast %126 : vector<1x32x3xf32> to vector<32x3xf32>
      %cst_79 = arith.constant dense<0.000000e+00> : vector<32x254xf32>
      %128 = tpu.matmul %127, %125, %cst_79 {dimension_numbers = #tpu.dot_dimension_numbers<[1], [0], [0], [1], [0, 0, 1, 1], [], []>} : vector<32x3xf32>, vector<3x254xf32>, vector<32x254xf32> -> vector<32x254xf32>
      %129 = arith.addf %124, %128 : vector<32x254xf32>
      %130 = vector.extract_strided_slice %48 {offsets = [0, 0], sizes = [3, 254], strides = [1, 1]} : vector<3x256xf32> to vector<3x254xf32>
      %c6_80 = arith.constant 6 : index
      %c0_81 = arith.constant 0 : index
      %c0_82 = arith.constant 0 : index
      %131 = vector.load %arg2[%c6_80, %c0_81, %c0_82] : memref<9x32x3xf32, #tpu.memory_space<vmem>>, vector<1x32x3xf32>
      %132 = vector.shape_cast %131 : vector<1x32x3xf32> to vector<32x3xf32>
      %cst_83 = arith.constant dense<0.000000e+00> : vector<32x254xf32>
      %133 = tpu.matmul %132, %130, %cst_83 {dimension_numbers = #tpu.dot_dimension_numbers<[1], [0], [0], [1], [0, 0, 1, 1], [], []>} : vector<32x3xf32>, vector<3x254xf32>, vector<32x254xf32> -> vector<32x254xf32>
      %134 = arith.addf %129, %133 : vector<32x254xf32>
      %135 = vector.extract_strided_slice %48 {offsets = [0, 1], sizes = [3, 254], strides = [1, 1]} : vector<3x256xf32> to vector<3x254xf32>
      %c7_84 = arith.constant 7 : index
      %c0_85 = arith.constant 0 : index
      %c0_86 = arith.constant 0 : index
      %136 = vector.load %arg2[%c7_84, %c0_85, %c0_86] : memref<9x32x3xf32, #tpu.memory_space<vmem>>, vector<1x32x3xf32>
      %137 = vector.shape_cast %136 : vector<1x32x3xf32> to vector<32x3xf32>
      %cst_87 = arith.constant dense<0.000000e+00> : vector<32x254xf32>
      %138 = tpu.matmul %137, %135, %cst_87 {dimension_numbers = #tpu.dot_dimension_numbers<[1], [0], [0], [1], [0, 0, 1, 1], [], []>} : vector<32x3xf32>, vector<3x254xf32>, vector<32x254xf32> -> vector<32x254xf32>
      %139 = arith.addf %134, %138 : vector<32x254xf32>
      %140 = vector.extract_strided_slice %48 {offsets = [0, 2], sizes = [3, 254], strides = [1, 1]} : vector<3x256xf32> to vector<3x254xf32>
      %c8_88 = arith.constant 8 : index
      %c0_89 = arith.constant 0 : index
      %c0_90 = arith.constant 0 : index
      %141 = vector.load %arg2[%c8_88, %c0_89, %c0_90] : memref<9x32x3xf32, #tpu.memory_space<vmem>>, vector<1x32x3xf32>
      %142 = vector.shape_cast %141 : vector<1x32x3xf32> to vector<32x3xf32>
      %cst_91 = arith.constant dense<0.000000e+00> : vector<32x254xf32>
      %143 = tpu.matmul %142, %140, %cst_91 {dimension_numbers = #tpu.dot_dimension_numbers<[1], [0], [0], [1], [0, 0, 1, 1], [], []>} : vector<32x3xf32>, vector<3x254xf32>, vector<32x254xf32> -> vector<32x254xf32>
      %144 = arith.addf %139, %143 : vector<32x254xf32>
      %145 = vector.broadcast %14 : vector<32x1xf32> to vector<32x254xf32>
      %146 = arith.addf %144, %145 : vector<32x254xf32>
      %cst_92 = arith.constant 0.000000e+00 : f32
      %147 = vector.broadcast %cst_92 : f32 to vector<32x254xf32>
      %148 = arith.maximumf %146, %147 : vector<32x254xf32>
      %149 = arith.maximumf %98, %148 : vector<32x254xf32>
      %c0_93 = arith.constant 0 : index
      %c0_94 = arith.constant 0 : index
      %c0_95 = arith.constant 0 : index
      %150 = vector.load %arg4[%c0_93, %c0_94, %c0_95] : memref<2x254x127xf32, #tpu.memory_space<vmem>>, vector<1x254x127xf32>
      %151 = vector.shape_cast %150 : vector<1x254x127xf32> to vector<254x127xf32>
      %cst_96 = arith.constant dense<0.000000e+00> : vector<32x127xf32>
      %152 = tpu.matmul %149, %151, %cst_96 {dimension_numbers = #tpu.dot_dimension_numbers<[1], [0], [0], [1], [0, 0, 1, 1], [], []>} : vector<32x254xf32>, vector<254x127xf32>, vector<32x127xf32> -> vector<32x127xf32>
      %c1_97 = arith.constant 1 : index
      %c0_98 = arith.constant 0 : index
      %c0_99 = arith.constant 0 : index
      %153 = vector.load %arg4[%c1_97, %c0_98, %c0_99] : memref<2x254x127xf32, #tpu.memory_space<vmem>>, vector<1x254x127xf32>
      %154 = vector.shape_cast %153 : vector<1x254x127xf32> to vector<254x127xf32>
      %cst_100 = arith.constant dense<0.000000e+00> : vector<32x127xf32>
      %155 = tpu.matmul %149, %154, %cst_100 {dimension_numbers = #tpu.dot_dimension_numbers<[1], [0], [0], [1], [0, 0, 1, 1], [], []>} : vector<32x254xf32>, vector<254x127xf32>, vector<32x127xf32> -> vector<32x127xf32>
      %156 = arith.maximumf %152, %155 : vector<32x127xf32>
      %c0_101 = arith.constant 0 : index
      %157 = arith.index_cast %arg6 : i32 to index
      %c0_102 = arith.constant 0 : index
      %c0_103 = arith.constant 0 : index
      %158 = vector.load %arg5[%c0_101, %157, %c0_102, %c0_103] : memref<1x127x32x127xf32, #tpu.memory_space<vmem>>, vector<1x1x32x127xf32>
      %159 = vector.shape_cast %158 : vector<1x1x32x127xf32> to vector<32x127xf32>
      %160 = vector.shape_cast %156 : vector<32x127xf32> to vector<1x1x32x127xf32>
      tpu.vector_store %arg5[%c0_101, %157, %c0_102, %c0_103], %160 {strides = array<i32>} : memref<1x127x32x127xf32, #tpu.memory_space<vmem>>, vector<1x1x32x127xf32>,
    }
    %c127_i32_9 = arith.constant 127 : i32
    return
  }
  func.func @transform_0(%arg0: i32) -> (i32, i32, i32, i32) {
    %c0_i32 = arith.constant 0 : i32
    %c0_i32_0 = arith.constant 0 : i32
    %c0_i32_1 = arith.constant 0 : i32
    %c0_i32_2 = arith.constant 0 : i32
    return %arg0, %c0_i32, %c0_i32_0, %c0_i32_1 : i32, i32, i32, i32
  }
  func.func @transform_1(%arg0: i32) -> (i32, i32, i32) {
    %c0_i32 = arith.constant 0 : i32
    %c0_i32_0 = arith.constant 0 : i32
    %c0_i32_1 = arith.constant 0 : i32
    %c0_i32_2 = arith.constant 0 : i32
    return %c0_i32, %c0_i32_0, %c0_i32_1 : i32, i32, i32
  }
  func.func @transform_2(%arg0: i32) -> (i32, i32) {
    %c0_i32 = arith.constant 0 : i32
    %c0_i32_0 = arith.constant 0 : i32
    %c0_i32_1 = arith.constant 0 : i32
    return %c0_i32, %c0_i32_0 : i32, i32
  }
  func.func @transform_3(%arg0: i32) -> (i32, i32, i32) {
    %c0_i32 = arith.constant 0 : i32
    %c0_i32_0 = arith.constant 0 : i32
    %c0_i32_1 = arith.constant 0 : i32
    %c0_i32_2 = arith.constant 0 : i32
    return %c0_i32, %c0_i32_0, %c0_i32_1 : i32, i32, i32
  }
  func.func @transform_4(%arg0: i32) -> (i32, i32, i32, i32) {
    %c0_i32 = arith.constant 0 : i32
    %c0_i32_0 = arith.constant 0 : i32
    %c0_i32_1 = arith.constant 0 : i32
    %c0_i32_2 = arith.constant 0 : i32
    return %arg0, %c0_i32, %c0_i32_0, %c0_i32_1 : i32, i32, i32, i32
  }
}

module attributes {stable_mosaic.version = 11 : i64} {
  func.func @_conv_relu_pool_kernel(%arg0: i32, %arg1: memref<1x127x32x127xf32, #tpu.memory_space<vmem>>, %arg2: memref<16x16x32xf32, #tpu.memory_space<vmem>>, %arg3: memref<16x1xf32, #tpu.memory_space<vmem>>, %arg4: memref<2x124x62xf32, #tpu.memory_space<vmem>>, %arg5: memref<1x62x16x62xf32, #tpu.memory_space<vmem>>) attributes {dimension_semantics = [#tpu.dimension_semantics<parallel>], iteration_bounds = array<i64: 2>, scalar_prefetch = 0 : i64, scratch_operands = 0 : i64, tpu.core_type = #tpu.core_type<tc>, window_params = [{transform_indices = @transform_0, window_bounds = array<i64: 1, 127, 32, 127>}, {pipeline_mode = #tpu.pipeline_mode<synchronous>, transform_indices = @transform_1, window_bounds = array<i64: 16, 16, 32>}, {pipeline_mode = #tpu.pipeline_mode<synchronous>, transform_indices = @transform_2, window_bounds = array<i64: 16, 1>}, {pipeline_mode = #tpu.pipeline_mode<synchronous>, transform_indices = @transform_3, window_bounds = array<i64: 2, 124, 62>}, {transform_indices = @transform_4, window_bounds = array<i64: 1, 62, 16, 62>}]} {
    %c0 = arith.constant 0 : index
    %c0_0 = arith.constant 0 : index
    %0 = vector.load %arg3[%c0, %c0_0] : memref<16x1xf32, #tpu.memory_space<vmem>>, vector<16x1xf32>
    %c0_i32 = arith.constant 0 : i32
    %c62_i32 = arith.constant 62 : i32
    %1 = arith.addi %c0_i32, %c62_i32 : i32
    %c1_i32 = arith.constant 1 : i32
    scf.for %arg6 = %c0_i32 to %1 step %c1_i32  : i32 {
      %c2_i32 = arith.constant 2 : i32
      %2 = arith.muli %arg6, %c2_i32 : i32
      %c0_i32_2 = arith.constant 0 : i32
      %3 = arith.addi %2, %c0_i32_2 : i32
      %c0_3 = arith.constant 0 : index
      %4 = arith.index_cast %3 : i32 to index
      %c0_4 = arith.constant 0 : index
      %c0_5 = arith.constant 0 : index
      %5 = vector.load %arg1[%c0_3, %4, %c0_4, %c0_5] : memref<1x127x32x127xf32, #tpu.memory_space<vmem>>, vector<1x1x32x127xf32>
      %6 = vector.shape_cast %5 : vector<1x1x32x127xf32> to vector<32x127xf32>
      %c1_i32_6 = arith.constant 1 : i32
      %7 = arith.addi %2, %c1_i32_6 : i32
      %c0_7 = arith.constant 0 : index
      %8 = arith.index_cast %7 : i32 to index
      %c0_8 = arith.constant 0 : index
      %c0_9 = arith.constant 0 : index
      %9 = vector.load %arg1[%c0_7, %8, %c0_8, %c0_9] : memref<1x127x32x127xf32, #tpu.memory_space<vmem>>, vector<1x1x32x127xf32>
      %10 = vector.shape_cast %9 : vector<1x1x32x127xf32> to vector<32x127xf32>
      %c2_i32_10 = arith.constant 2 : i32
      %11 = arith.addi %2, %c2_i32_10 : i32
      %c0_11 = arith.constant 0 : index
      %12 = arith.index_cast %11 : i32 to index
      %c0_12 = arith.constant 0 : index
      %c0_13 = arith.constant 0 : index
      %13 = vector.load %arg1[%c0_11, %12, %c0_12, %c0_13] : memref<1x127x32x127xf32, #tpu.memory_space<vmem>>, vector<1x1x32x127xf32>
      %14 = vector.shape_cast %13 : vector<1x1x32x127xf32> to vector<32x127xf32>
      %c3_i32 = arith.constant 3 : i32
      %15 = arith.addi %2, %c3_i32 : i32
      %c0_14 = arith.constant 0 : index
      %16 = arith.index_cast %15 : i32 to index
      %c0_15 = arith.constant 0 : index
      %c0_16 = arith.constant 0 : index
      %17 = vector.load %arg1[%c0_14, %16, %c0_15, %c0_16] : memref<1x127x32x127xf32, #tpu.memory_space<vmem>>, vector<1x1x32x127xf32>
      %18 = vector.shape_cast %17 : vector<1x1x32x127xf32> to vector<32x127xf32>
      %c4_i32 = arith.constant 4 : i32
      %19 = arith.addi %2, %c4_i32 : i32
      %c0_17 = arith.constant 0 : index
      %20 = arith.index_cast %19 : i32 to index
      %c0_18 = arith.constant 0 : index
      %c0_19 = arith.constant 0 : index
      %21 = vector.load %arg1[%c0_17, %20, %c0_18, %c0_19] : memref<1x127x32x127xf32, #tpu.memory_space<vmem>>, vector<1x1x32x127xf32>
      %22 = vector.shape_cast %21 : vector<1x1x32x127xf32> to vector<32x127xf32>
      %cst = arith.constant 0.000000e+00 : f32
      %23 = vector.broadcast %cst : f32 to vector<16x124xf32>
      %24 = vector.extract_strided_slice %6 {offsets = [0, 0], sizes = [32, 124], strides = [1, 1]} : vector<32x127xf32> to vector<32x124xf32>
      %c0_20 = arith.constant 0 : index
      %c0_21 = arith.constant 0 : index
      %c0_22 = arith.constant 0 : index
      %25 = vector.load %arg2[%c0_20, %c0_21, %c0_22] : memref<16x16x32xf32, #tpu.memory_space<vmem>>, vector<1x16x32xf32>
      %26 = vector.shape_cast %25 : vector<1x16x32xf32> to vector<16x32xf32>
      %cst_23 = arith.constant dense<0.000000e+00> : vector<16x124xf32>
      %27 = tpu.matmul %26, %24, %cst_23 {dimension_numbers = #tpu.dot_dimension_numbers<[1], [0], [0], [1], [0, 0, 1, 1], [], []>} : vector<16x32xf32>, vector<32x124xf32>, vector<16x124xf32> -> vector<16x124xf32>
      %28 = arith.addf %23, %27 : vector<16x124xf32>
      %29 = vector.extract_strided_slice %6 {offsets = [0, 1], sizes = [32, 124], strides = [1, 1]} : vector<32x127xf32> to vector<32x124xf32>
      %c1 = arith.constant 1 : index
      %c0_24 = arith.constant 0 : index
      %c0_25 = arith.constant 0 : index
      %30 = vector.load %arg2[%c1, %c0_24, %c0_25] : memref<16x16x32xf32, #tpu.memory_space<vmem>>, vector<1x16x32xf32>
      %31 = vector.shape_cast %30 : vector<1x16x32xf32> to vector<16x32xf32>
      %cst_26 = arith.constant dense<0.000000e+00> : vector<16x124xf32>
      %32 = tpu.matmul %31, %29, %cst_26 {dimension_numbers = #tpu.dot_dimension_numbers<[1], [0], [0], [1], [0, 0, 1, 1], [], []>} : vector<16x32xf32>, vector<32x124xf32>, vector<16x124xf32> -> vector<16x124xf32>
      %33 = arith.addf %28, %32 : vector<16x124xf32>
      %34 = vector.extract_strided_slice %6 {offsets = [0, 2], sizes = [32, 124], strides = [1, 1]} : vector<32x127xf32> to vector<32x124xf32>
      %c2 = arith.constant 2 : index
      %c0_27 = arith.constant 0 : index
      %c0_28 = arith.constant 0 : index
      %35 = vector.load %arg2[%c2, %c0_27, %c0_28] : memref<16x16x32xf32, #tpu.memory_space<vmem>>, vector<1x16x32xf32>
      %36 = vector.shape_cast %35 : vector<1x16x32xf32> to vector<16x32xf32>
      %cst_29 = arith.constant dense<0.000000e+00> : vector<16x124xf32>
      %37 = tpu.matmul %36, %34, %cst_29 {dimension_numbers = #tpu.dot_dimension_numbers<[1], [0], [0], [1], [0, 0, 1, 1], [], []>} : vector<16x32xf32>, vector<32x124xf32>, vector<16x124xf32> -> vector<16x124xf32>
      %38 = arith.addf %33, %37 : vector<16x124xf32>
      %39 = vector.extract_strided_slice %6 {offsets = [0, 3], sizes = [32, 124], strides = [1, 1]} : vector<32x127xf32> to vector<32x124xf32>
      %c3 = arith.constant 3 : index
      %c0_30 = arith.constant 0 : index
      %c0_31 = arith.constant 0 : index
      %40 = vector.load %arg2[%c3, %c0_30, %c0_31] : memref<16x16x32xf32, #tpu.memory_space<vmem>>, vector<1x16x32xf32>
      %41 = vector.shape_cast %40 : vector<1x16x32xf32> to vector<16x32xf32>
      %cst_32 = arith.constant dense<0.000000e+00> : vector<16x124xf32>
      %42 = tpu.matmul %41, %39, %cst_32 {dimension_numbers = #tpu.dot_dimension_numbers<[1], [0], [0], [1], [0, 0, 1, 1], [], []>} : vector<16x32xf32>, vector<32x124xf32>, vector<16x124xf32> -> vector<16x124xf32>
      %43 = arith.addf %38, %42 : vector<16x124xf32>
      %44 = vector.extract_strided_slice %10 {offsets = [0, 0], sizes = [32, 124], strides = [1, 1]} : vector<32x127xf32> to vector<32x124xf32>
      %c4 = arith.constant 4 : index
      %c0_33 = arith.constant 0 : index
      %c0_34 = arith.constant 0 : index
      %45 = vector.load %arg2[%c4, %c0_33, %c0_34] : memref<16x16x32xf32, #tpu.memory_space<vmem>>, vector<1x16x32xf32>
      %46 = vector.shape_cast %45 : vector<1x16x32xf32> to vector<16x32xf32>
      %cst_35 = arith.constant dense<0.000000e+00> : vector<16x124xf32>
      %47 = tpu.matmul %46, %44, %cst_35 {dimension_numbers = #tpu.dot_dimension_numbers<[1], [0], [0], [1], [0, 0, 1, 1], [], []>} : vector<16x32xf32>, vector<32x124xf32>, vector<16x124xf32> -> vector<16x124xf32>
      %48 = arith.addf %43, %47 : vector<16x124xf32>
      %49 = vector.extract_strided_slice %10 {offsets = [0, 1], sizes = [32, 124], strides = [1, 1]} : vector<32x127xf32> to vector<32x124xf32>
      %c5 = arith.constant 5 : index
      %c0_36 = arith.constant 0 : index
      %c0_37 = arith.constant 0 : index
      %50 = vector.load %arg2[%c5, %c0_36, %c0_37] : memref<16x16x32xf32, #tpu.memory_space<vmem>>, vector<1x16x32xf32>
      %51 = vector.shape_cast %50 : vector<1x16x32xf32> to vector<16x32xf32>
      %cst_38 = arith.constant dense<0.000000e+00> : vector<16x124xf32>
      %52 = tpu.matmul %51, %49, %cst_38 {dimension_numbers = #tpu.dot_dimension_numbers<[1], [0], [0], [1], [0, 0, 1, 1], [], []>} : vector<16x32xf32>, vector<32x124xf32>, vector<16x124xf32> -> vector<16x124xf32>
      %53 = arith.addf %48, %52 : vector<16x124xf32>
      %54 = vector.extract_strided_slice %10 {offsets = [0, 2], sizes = [32, 124], strides = [1, 1]} : vector<32x127xf32> to vector<32x124xf32>
      %c6 = arith.constant 6 : index
      %c0_39 = arith.constant 0 : index
      %c0_40 = arith.constant 0 : index
      %55 = vector.load %arg2[%c6, %c0_39, %c0_40] : memref<16x16x32xf32, #tpu.memory_space<vmem>>, vector<1x16x32xf32>
      %56 = vector.shape_cast %55 : vector<1x16x32xf32> to vector<16x32xf32>
      %cst_41 = arith.constant dense<0.000000e+00> : vector<16x124xf32>
      %57 = tpu.matmul %56, %54, %cst_41 {dimension_numbers = #tpu.dot_dimension_numbers<[1], [0], [0], [1], [0, 0, 1, 1], [], []>} : vector<16x32xf32>, vector<32x124xf32>, vector<16x124xf32> -> vector<16x124xf32>
      %58 = arith.addf %53, %57 : vector<16x124xf32>
      %59 = vector.extract_strided_slice %10 {offsets = [0, 3], sizes = [32, 124], strides = [1, 1]} : vector<32x127xf32> to vector<32x124xf32>
      %c7 = arith.constant 7 : index
      %c0_42 = arith.constant 0 : index
      %c0_43 = arith.constant 0 : index
      %60 = vector.load %arg2[%c7, %c0_42, %c0_43] : memref<16x16x32xf32, #tpu.memory_space<vmem>>, vector<1x16x32xf32>
      %61 = vector.shape_cast %60 : vector<1x16x32xf32> to vector<16x32xf32>
      %cst_44 = arith.constant dense<0.000000e+00> : vector<16x124xf32>
      %62 = tpu.matmul %61, %59, %cst_44 {dimension_numbers = #tpu.dot_dimension_numbers<[1], [0], [0], [1], [0, 0, 1, 1], [], []>} : vector<16x32xf32>, vector<32x124xf32>, vector<16x124xf32> -> vector<16x124xf32>
      %63 = arith.addf %58, %62 : vector<16x124xf32>
      %64 = vector.extract_strided_slice %14 {offsets = [0, 0], sizes = [32, 124], strides = [1, 1]} : vector<32x127xf32> to vector<32x124xf32>
      %c8 = arith.constant 8 : index
      %c0_45 = arith.constant 0 : index
      %c0_46 = arith.constant 0 : index
      %65 = vector.load %arg2[%c8, %c0_45, %c0_46] : memref<16x16x32xf32, #tpu.memory_space<vmem>>, vector<1x16x32xf32>
      %66 = vector.shape_cast %65 : vector<1x16x32xf32> to vector<16x32xf32>
      %cst_47 = arith.constant dense<0.000000e+00> : vector<16x124xf32>
      %67 = tpu.matmul %66, %64, %cst_47 {dimension_numbers = #tpu.dot_dimension_numbers<[1], [0], [0], [1], [0, 0, 1, 1], [], []>} : vector<16x32xf32>, vector<32x124xf32>, vector<16x124xf32> -> vector<16x124xf32>
      %68 = arith.addf %63, %67 : vector<16x124xf32>
      %69 = vector.extract_strided_slice %14 {offsets = [0, 1], sizes = [32, 124], strides = [1, 1]} : vector<32x127xf32> to vector<32x124xf32>
      %c9 = arith.constant 9 : index
      %c0_48 = arith.constant 0 : index
      %c0_49 = arith.constant 0 : index
      %70 = vector.load %arg2[%c9, %c0_48, %c0_49] : memref<16x16x32xf32, #tpu.memory_space<vmem>>, vector<1x16x32xf32>
      %71 = vector.shape_cast %70 : vector<1x16x32xf32> to vector<16x32xf32>
      %cst_50 = arith.constant dense<0.000000e+00> : vector<16x124xf32>
      %72 = tpu.matmul %71, %69, %cst_50 {dimension_numbers = #tpu.dot_dimension_numbers<[1], [0], [0], [1], [0, 0, 1, 1], [], []>} : vector<16x32xf32>, vector<32x124xf32>, vector<16x124xf32> -> vector<16x124xf32>
      %73 = arith.addf %68, %72 : vector<16x124xf32>
      %74 = vector.extract_strided_slice %14 {offsets = [0, 2], sizes = [32, 124], strides = [1, 1]} : vector<32x127xf32> to vector<32x124xf32>
      %c10 = arith.constant 10 : index
      %c0_51 = arith.constant 0 : index
      %c0_52 = arith.constant 0 : index
      %75 = vector.load %arg2[%c10, %c0_51, %c0_52] : memref<16x16x32xf32, #tpu.memory_space<vmem>>, vector<1x16x32xf32>
      %76 = vector.shape_cast %75 : vector<1x16x32xf32> to vector<16x32xf32>
      %cst_53 = arith.constant dense<0.000000e+00> : vector<16x124xf32>
      %77 = tpu.matmul %76, %74, %cst_53 {dimension_numbers = #tpu.dot_dimension_numbers<[1], [0], [0], [1], [0, 0, 1, 1], [], []>} : vector<16x32xf32>, vector<32x124xf32>, vector<16x124xf32> -> vector<16x124xf32>
      %78 = arith.addf %73, %77 : vector<16x124xf32>
      %79 = vector.extract_strided_slice %14 {offsets = [0, 3], sizes = [32, 124], strides = [1, 1]} : vector<32x127xf32> to vector<32x124xf32>
      %c11 = arith.constant 11 : index
      %c0_54 = arith.constant 0 : index
      %c0_55 = arith.constant 0 : index
      %80 = vector.load %arg2[%c11, %c0_54, %c0_55] : memref<16x16x32xf32, #tpu.memory_space<vmem>>, vector<1x16x32xf32>
      %81 = vector.shape_cast %80 : vector<1x16x32xf32> to vector<16x32xf32>
      %cst_56 = arith.constant dense<0.000000e+00> : vector<16x124xf32>
      %82 = tpu.matmul %81, %79, %cst_56 {dimension_numbers = #tpu.dot_dimension_numbers<[1], [0], [0], [1], [0, 0, 1, 1], [], []>} : vector<16x32xf32>, vector<32x124xf32>, vector<16x124xf32> -> vector<16x124xf32>
      %83 = arith.addf %78, %82 : vector<16x124xf32>
      %84 = vector.extract_strided_slice %18 {offsets = [0, 0], sizes = [32, 124], strides = [1, 1]} : vector<32x127xf32> to vector<32x124xf32>
      %c12 = arith.constant 12 : index
      %c0_57 = arith.constant 0 : index
      %c0_58 = arith.constant 0 : index
      %85 = vector.load %arg2[%c12, %c0_57, %c0_58] : memref<16x16x32xf32, #tpu.memory_space<vmem>>, vector<1x16x32xf32>
      %86 = vector.shape_cast %85 : vector<1x16x32xf32> to vector<16x32xf32>
      %cst_59 = arith.constant dense<0.000000e+00> : vector<16x124xf32>
      %87 = tpu.matmul %86, %84, %cst_59 {dimension_numbers = #tpu.dot_dimension_numbers<[1], [0], [0], [1], [0, 0, 1, 1], [], []>} : vector<16x32xf32>, vector<32x124xf32>, vector<16x124xf32> -> vector<16x124xf32>
      %88 = arith.addf %83, %87 : vector<16x124xf32>
      %89 = vector.extract_strided_slice %18 {offsets = [0, 1], sizes = [32, 124], strides = [1, 1]} : vector<32x127xf32> to vector<32x124xf32>
      %c13 = arith.constant 13 : index
      %c0_60 = arith.constant 0 : index
      %c0_61 = arith.constant 0 : index
      %90 = vector.load %arg2[%c13, %c0_60, %c0_61] : memref<16x16x32xf32, #tpu.memory_space<vmem>>, vector<1x16x32xf32>
      %91 = vector.shape_cast %90 : vector<1x16x32xf32> to vector<16x32xf32>
      %cst_62 = arith.constant dense<0.000000e+00> : vector<16x124xf32>
      %92 = tpu.matmul %91, %89, %cst_62 {dimension_numbers = #tpu.dot_dimension_numbers<[1], [0], [0], [1], [0, 0, 1, 1], [], []>} : vector<16x32xf32>, vector<32x124xf32>, vector<16x124xf32> -> vector<16x124xf32>
      %93 = arith.addf %88, %92 : vector<16x124xf32>
      %94 = vector.extract_strided_slice %18 {offsets = [0, 2], sizes = [32, 124], strides = [1, 1]} : vector<32x127xf32> to vector<32x124xf32>
      %c14 = arith.constant 14 : index
      %c0_63 = arith.constant 0 : index
      %c0_64 = arith.constant 0 : index
      %95 = vector.load %arg2[%c14, %c0_63, %c0_64] : memref<16x16x32xf32, #tpu.memory_space<vmem>>, vector<1x16x32xf32>
      %96 = vector.shape_cast %95 : vector<1x16x32xf32> to vector<16x32xf32>
      %cst_65 = arith.constant dense<0.000000e+00> : vector<16x124xf32>
      %97 = tpu.matmul %96, %94, %cst_65 {dimension_numbers = #tpu.dot_dimension_numbers<[1], [0], [0], [1], [0, 0, 1, 1], [], []>} : vector<16x32xf32>, vector<32x124xf32>, vector<16x124xf32> -> vector<16x124xf32>
      %98 = arith.addf %93, %97 : vector<16x124xf32>
      %99 = vector.extract_strided_slice %18 {offsets = [0, 3], sizes = [32, 124], strides = [1, 1]} : vector<32x127xf32> to vector<32x124xf32>
      %c15 = arith.constant 15 : index
      %c0_66 = arith.constant 0 : index
      %c0_67 = arith.constant 0 : index
      %100 = vector.load %arg2[%c15, %c0_66, %c0_67] : memref<16x16x32xf32, #tpu.memory_space<vmem>>, vector<1x16x32xf32>
      %101 = vector.shape_cast %100 : vector<1x16x32xf32> to vector<16x32xf32>
      %cst_68 = arith.constant dense<0.000000e+00> : vector<16x124xf32>
      %102 = tpu.matmul %101, %99, %cst_68 {dimension_numbers = #tpu.dot_dimension_numbers<[1], [0], [0], [1], [0, 0, 1, 1], [], []>} : vector<16x32xf32>, vector<32x124xf32>, vector<16x124xf32> -> vector<16x124xf32>
      %103 = arith.addf %98, %102 : vector<16x124xf32>
      %104 = vector.broadcast %0 : vector<16x1xf32> to vector<16x124xf32>
      %105 = arith.addf %103, %104 : vector<16x124xf32>
      %cst_69 = arith.constant 0.000000e+00 : f32
      %106 = vector.broadcast %cst_69 : f32 to vector<16x124xf32>
      %107 = arith.maximumf %105, %106 : vector<16x124xf32>
      %cst_70 = arith.constant 0.000000e+00 : f32
      %108 = vector.broadcast %cst_70 : f32 to vector<16x124xf32>
      %109 = vector.extract_strided_slice %10 {offsets = [0, 0], sizes = [32, 124], strides = [1, 1]} : vector<32x127xf32> to vector<32x124xf32>
      %c0_71 = arith.constant 0 : index
      %c0_72 = arith.constant 0 : index
      %c0_73 = arith.constant 0 : index
      %110 = vector.load %arg2[%c0_71, %c0_72, %c0_73] : memref<16x16x32xf32, #tpu.memory_space<vmem>>, vector<1x16x32xf32>
      %111 = vector.shape_cast %110 : vector<1x16x32xf32> to vector<16x32xf32>
      %cst_74 = arith.constant dense<0.000000e+00> : vector<16x124xf32>
      %112 = tpu.matmul %111, %109, %cst_74 {dimension_numbers = #tpu.dot_dimension_numbers<[1], [0], [0], [1], [0, 0, 1, 1], [], []>} : vector<16x32xf32>, vector<32x124xf32>, vector<16x124xf32> -> vector<16x124xf32>
      %113 = arith.addf %108, %112 : vector<16x124xf32>
      %114 = vector.extract_strided_slice %10 {offsets = [0, 1], sizes = [32, 124], strides = [1, 1]} : vector<32x127xf32> to vector<32x124xf32>
      %c1_75 = arith.constant 1 : index
      %c0_76 = arith.constant 0 : index
      %c0_77 = arith.constant 0 : index
      %115 = vector.load %arg2[%c1_75, %c0_76, %c0_77] : memref<16x16x32xf32, #tpu.memory_space<vmem>>, vector<1x16x32xf32>
      %116 = vector.shape_cast %115 : vector<1x16x32xf32> to vector<16x32xf32>
      %cst_78 = arith.constant dense<0.000000e+00> : vector<16x124xf32>
      %117 = tpu.matmul %116, %114, %cst_78 {dimension_numbers = #tpu.dot_dimension_numbers<[1], [0], [0], [1], [0, 0, 1, 1], [], []>} : vector<16x32xf32>, vector<32x124xf32>, vector<16x124xf32> -> vector<16x124xf32>
      %118 = arith.addf %113, %117 : vector<16x124xf32>
      %119 = vector.extract_strided_slice %10 {offsets = [0, 2], sizes = [32, 124], strides = [1, 1]} : vector<32x127xf32> to vector<32x124xf32>
      %c2_79 = arith.constant 2 : index
      %c0_80 = arith.constant 0 : index
      %c0_81 = arith.constant 0 : index
      %120 = vector.load %arg2[%c2_79, %c0_80, %c0_81] : memref<16x16x32xf32, #tpu.memory_space<vmem>>, vector<1x16x32xf32>
      %121 = vector.shape_cast %120 : vector<1x16x32xf32> to vector<16x32xf32>
      %cst_82 = arith.constant dense<0.000000e+00> : vector<16x124xf32>
      %122 = tpu.matmul %121, %119, %cst_82 {dimension_numbers = #tpu.dot_dimension_numbers<[1], [0], [0], [1], [0, 0, 1, 1], [], []>} : vector<16x32xf32>, vector<32x124xf32>, vector<16x124xf32> -> vector<16x124xf32>
      %123 = arith.addf %118, %122 : vector<16x124xf32>
      %124 = vector.extract_strided_slice %10 {offsets = [0, 3], sizes = [32, 124], strides = [1, 1]} : vector<32x127xf32> to vector<32x124xf32>
      %c3_83 = arith.constant 3 : index
      %c0_84 = arith.constant 0 : index
      %c0_85 = arith.constant 0 : index
      %125 = vector.load %arg2[%c3_83, %c0_84, %c0_85] : memref<16x16x32xf32, #tpu.memory_space<vmem>>, vector<1x16x32xf32>
      %126 = vector.shape_cast %125 : vector<1x16x32xf32> to vector<16x32xf32>
      %cst_86 = arith.constant dense<0.000000e+00> : vector<16x124xf32>
      %127 = tpu.matmul %126, %124, %cst_86 {dimension_numbers = #tpu.dot_dimension_numbers<[1], [0], [0], [1], [0, 0, 1, 1], [], []>} : vector<16x32xf32>, vector<32x124xf32>, vector<16x124xf32> -> vector<16x124xf32>
      %128 = arith.addf %123, %127 : vector<16x124xf32>
      %129 = vector.extract_strided_slice %14 {offsets = [0, 0], sizes = [32, 124], strides = [1, 1]} : vector<32x127xf32> to vector<32x124xf32>
      %c4_87 = arith.constant 4 : index
      %c0_88 = arith.constant 0 : index
      %c0_89 = arith.constant 0 : index
      %130 = vector.load %arg2[%c4_87, %c0_88, %c0_89] : memref<16x16x32xf32, #tpu.memory_space<vmem>>, vector<1x16x32xf32>
      %131 = vector.shape_cast %130 : vector<1x16x32xf32> to vector<16x32xf32>
      %cst_90 = arith.constant dense<0.000000e+00> : vector<16x124xf32>
      %132 = tpu.matmul %131, %129, %cst_90 {dimension_numbers = #tpu.dot_dimension_numbers<[1], [0], [0], [1], [0, 0, 1, 1], [], []>} : vector<16x32xf32>, vector<32x124xf32>, vector<16x124xf32> -> vector<16x124xf32>
      %133 = arith.addf %128, %132 : vector<16x124xf32>
      %134 = vector.extract_strided_slice %14 {offsets = [0, 1], sizes = [32, 124], strides = [1, 1]} : vector<32x127xf32> to vector<32x124xf32>
      %c5_91 = arith.constant 5 : index
      %c0_92 = arith.constant 0 : index
      %c0_93 = arith.constant 0 : index
      %135 = vector.load %arg2[%c5_91, %c0_92, %c0_93] : memref<16x16x32xf32, #tpu.memory_space<vmem>>, vector<1x16x32xf32>
      %136 = vector.shape_cast %135 : vector<1x16x32xf32> to vector<16x32xf32>
      %cst_94 = arith.constant dense<0.000000e+00> : vector<16x124xf32>
      %137 = tpu.matmul %136, %134, %cst_94 {dimension_numbers = #tpu.dot_dimension_numbers<[1], [0], [0], [1], [0, 0, 1, 1], [], []>} : vector<16x32xf32>, vector<32x124xf32>, vector<16x124xf32> -> vector<16x124xf32>
      %138 = arith.addf %133, %137 : vector<16x124xf32>
      %139 = vector.extract_strided_slice %14 {offsets = [0, 2], sizes = [32, 124], strides = [1, 1]} : vector<32x127xf32> to vector<32x124xf32>
      %c6_95 = arith.constant 6 : index
      %c0_96 = arith.constant 0 : index
      %c0_97 = arith.constant 0 : index
      %140 = vector.load %arg2[%c6_95, %c0_96, %c0_97] : memref<16x16x32xf32, #tpu.memory_space<vmem>>, vector<1x16x32xf32>
      %141 = vector.shape_cast %140 : vector<1x16x32xf32> to vector<16x32xf32>
      %cst_98 = arith.constant dense<0.000000e+00> : vector<16x124xf32>
      %142 = tpu.matmul %141, %139, %cst_98 {dimension_numbers = #tpu.dot_dimension_numbers<[1], [0], [0], [1], [0, 0, 1, 1], [], []>} : vector<16x32xf32>, vector<32x124xf32>, vector<16x124xf32> -> vector<16x124xf32>
      %143 = arith.addf %138, %142 : vector<16x124xf32>
      %144 = vector.extract_strided_slice %14 {offsets = [0, 3], sizes = [32, 124], strides = [1, 1]} : vector<32x127xf32> to vector<32x124xf32>
      %c7_99 = arith.constant 7 : index
      %c0_100 = arith.constant 0 : index
      %c0_101 = arith.constant 0 : index
      %145 = vector.load %arg2[%c7_99, %c0_100, %c0_101] : memref<16x16x32xf32, #tpu.memory_space<vmem>>, vector<1x16x32xf32>
      %146 = vector.shape_cast %145 : vector<1x16x32xf32> to vector<16x32xf32>
      %cst_102 = arith.constant dense<0.000000e+00> : vector<16x124xf32>
      %147 = tpu.matmul %146, %144, %cst_102 {dimension_numbers = #tpu.dot_dimension_numbers<[1], [0], [0], [1], [0, 0, 1, 1], [], []>} : vector<16x32xf32>, vector<32x124xf32>, vector<16x124xf32> -> vector<16x124xf32>
      %148 = arith.addf %143, %147 : vector<16x124xf32>
      %149 = vector.extract_strided_slice %18 {offsets = [0, 0], sizes = [32, 124], strides = [1, 1]} : vector<32x127xf32> to vector<32x124xf32>
      %c8_103 = arith.constant 8 : index
      %c0_104 = arith.constant 0 : index
      %c0_105 = arith.constant 0 : index
      %150 = vector.load %arg2[%c8_103, %c0_104, %c0_105] : memref<16x16x32xf32, #tpu.memory_space<vmem>>, vector<1x16x32xf32>
      %151 = vector.shape_cast %150 : vector<1x16x32xf32> to vector<16x32xf32>
      %cst_106 = arith.constant dense<0.000000e+00> : vector<16x124xf32>
      %152 = tpu.matmul %151, %149, %cst_106 {dimension_numbers = #tpu.dot_dimension_numbers<[1], [0], [0], [1], [0, 0, 1, 1], [], []>} : vector<16x32xf32>, vector<32x124xf32>, vector<16x124xf32> -> vector<16x124xf32>
      %153 = arith.addf %148, %152 : vector<16x124xf32>
      %154 = vector.extract_strided_slice %18 {offsets = [0, 1], sizes = [32, 124], strides = [1, 1]} : vector<32x127xf32> to vector<32x124xf32>
      %c9_107 = arith.constant 9 : index
      %c0_108 = arith.constant 0 : index
      %c0_109 = arith.constant 0 : index
      %155 = vector.load %arg2[%c9_107, %c0_108, %c0_109] : memref<16x16x32xf32, #tpu.memory_space<vmem>>, vector<1x16x32xf32>
      %156 = vector.shape_cast %155 : vector<1x16x32xf32> to vector<16x32xf32>
      %cst_110 = arith.constant dense<0.000000e+00> : vector<16x124xf32>
      %157 = tpu.matmul %156, %154, %cst_110 {dimension_numbers = #tpu.dot_dimension_numbers<[1], [0], [0], [1], [0, 0, 1, 1], [], []>} : vector<16x32xf32>, vector<32x124xf32>, vector<16x124xf32> -> vector<16x124xf32>
      %158 = arith.addf %153, %157 : vector<16x124xf32>
      %159 = vector.extract_strided_slice %18 {offsets = [0, 2], sizes = [32, 124], strides = [1, 1]} : vector<32x127xf32> to vector<32x124xf32>
      %c10_111 = arith.constant 10 : index
      %c0_112 = arith.constant 0 : index
      %c0_113 = arith.constant 0 : index
      %160 = vector.load %arg2[%c10_111, %c0_112, %c0_113] : memref<16x16x32xf32, #tpu.memory_space<vmem>>, vector<1x16x32xf32>
      %161 = vector.shape_cast %160 : vector<1x16x32xf32> to vector<16x32xf32>
      %cst_114 = arith.constant dense<0.000000e+00> : vector<16x124xf32>
      %162 = tpu.matmul %161, %159, %cst_114 {dimension_numbers = #tpu.dot_dimension_numbers<[1], [0], [0], [1], [0, 0, 1, 1], [], []>} : vector<16x32xf32>, vector<32x124xf32>, vector<16x124xf32> -> vector<16x124xf32>
      %163 = arith.addf %158, %162 : vector<16x124xf32>
      %164 = vector.extract_strided_slice %18 {offsets = [0, 3], sizes = [32, 124], strides = [1, 1]} : vector<32x127xf32> to vector<32x124xf32>
      %c11_115 = arith.constant 11 : index
      %c0_116 = arith.constant 0 : index
      %c0_117 = arith.constant 0 : index
      %165 = vector.load %arg2[%c11_115, %c0_116, %c0_117] : memref<16x16x32xf32, #tpu.memory_space<vmem>>, vector<1x16x32xf32>
      %166 = vector.shape_cast %165 : vector<1x16x32xf32> to vector<16x32xf32>
      %cst_118 = arith.constant dense<0.000000e+00> : vector<16x124xf32>
      %167 = tpu.matmul %166, %164, %cst_118 {dimension_numbers = #tpu.dot_dimension_numbers<[1], [0], [0], [1], [0, 0, 1, 1], [], []>} : vector<16x32xf32>, vector<32x124xf32>, vector<16x124xf32> -> vector<16x124xf32>
      %168 = arith.addf %163, %167 : vector<16x124xf32>
      %169 = vector.extract_strided_slice %22 {offsets = [0, 0], sizes = [32, 124], strides = [1, 1]} : vector<32x127xf32> to vector<32x124xf32>
      %c12_119 = arith.constant 12 : index
      %c0_120 = arith.constant 0 : index
      %c0_121 = arith.constant 0 : index
      %170 = vector.load %arg2[%c12_119, %c0_120, %c0_121] : memref<16x16x32xf32, #tpu.memory_space<vmem>>, vector<1x16x32xf32>
      %171 = vector.shape_cast %170 : vector<1x16x32xf32> to vector<16x32xf32>
      %cst_122 = arith.constant dense<0.000000e+00> : vector<16x124xf32>
      %172 = tpu.matmul %171, %169, %cst_122 {dimension_numbers = #tpu.dot_dimension_numbers<[1], [0], [0], [1], [0, 0, 1, 1], [], []>} : vector<16x32xf32>, vector<32x124xf32>, vector<16x124xf32> -> vector<16x124xf32>
      %173 = arith.addf %168, %172 : vector<16x124xf32>
      %174 = vector.extract_strided_slice %22 {offsets = [0, 1], sizes = [32, 124], strides = [1, 1]} : vector<32x127xf32> to vector<32x124xf32>
      %c13_123 = arith.constant 13 : index
      %c0_124 = arith.constant 0 : index
      %c0_125 = arith.constant 0 : index
      %175 = vector.load %arg2[%c13_123, %c0_124, %c0_125] : memref<16x16x32xf32, #tpu.memory_space<vmem>>, vector<1x16x32xf32>
      %176 = vector.shape_cast %175 : vector<1x16x32xf32> to vector<16x32xf32>
      %cst_126 = arith.constant dense<0.000000e+00> : vector<16x124xf32>
      %177 = tpu.matmul %176, %174, %cst_126 {dimension_numbers = #tpu.dot_dimension_numbers<[1], [0], [0], [1], [0, 0, 1, 1], [], []>} : vector<16x32xf32>, vector<32x124xf32>, vector<16x124xf32> -> vector<16x124xf32>
      %178 = arith.addf %173, %177 : vector<16x124xf32>
      %179 = vector.extract_strided_slice %22 {offsets = [0, 2], sizes = [32, 124], strides = [1, 1]} : vector<32x127xf32> to vector<32x124xf32>
      %c14_127 = arith.constant 14 : index
      %c0_128 = arith.constant 0 : index
      %c0_129 = arith.constant 0 : index
      %180 = vector.load %arg2[%c14_127, %c0_128, %c0_129] : memref<16x16x32xf32, #tpu.memory_space<vmem>>, vector<1x16x32xf32>
      %181 = vector.shape_cast %180 : vector<1x16x32xf32> to vector<16x32xf32>
      %cst_130 = arith.constant dense<0.000000e+00> : vector<16x124xf32>
      %182 = tpu.matmul %181, %179, %cst_130 {dimension_numbers = #tpu.dot_dimension_numbers<[1], [0], [0], [1], [0, 0, 1, 1], [], []>} : vector<16x32xf32>, vector<32x124xf32>, vector<16x124xf32> -> vector<16x124xf32>
      %183 = arith.addf %178, %182 : vector<16x124xf32>
      %184 = vector.extract_strided_slice %22 {offsets = [0, 3], sizes = [32, 124], strides = [1, 1]} : vector<32x127xf32> to vector<32x124xf32>
      %c15_131 = arith.constant 15 : index
      %c0_132 = arith.constant 0 : index
      %c0_133 = arith.constant 0 : index
      %185 = vector.load %arg2[%c15_131, %c0_132, %c0_133] : memref<16x16x32xf32, #tpu.memory_space<vmem>>, vector<1x16x32xf32>
      %186 = vector.shape_cast %185 : vector<1x16x32xf32> to vector<16x32xf32>
      %cst_134 = arith.constant dense<0.000000e+00> : vector<16x124xf32>
      %187 = tpu.matmul %186, %184, %cst_134 {dimension_numbers = #tpu.dot_dimension_numbers<[1], [0], [0], [1], [0, 0, 1, 1], [], []>} : vector<16x32xf32>, vector<32x124xf32>, vector<16x124xf32> -> vector<16x124xf32>
      %188 = arith.addf %183, %187 : vector<16x124xf32>
      %189 = vector.broadcast %0 : vector<16x1xf32> to vector<16x124xf32>
      %190 = arith.addf %188, %189 : vector<16x124xf32>
      %cst_135 = arith.constant 0.000000e+00 : f32
      %191 = vector.broadcast %cst_135 : f32 to vector<16x124xf32>
      %192 = arith.maximumf %190, %191 : vector<16x124xf32>
      %193 = arith.maximumf %107, %192 : vector<16x124xf32>
      %c0_136 = arith.constant 0 : index
      %c0_137 = arith.constant 0 : index
      %c0_138 = arith.constant 0 : index
      %194 = vector.load %arg4[%c0_136, %c0_137, %c0_138] : memref<2x124x62xf32, #tpu.memory_space<vmem>>, vector<1x124x62xf32>
      %195 = vector.shape_cast %194 : vector<1x124x62xf32> to vector<124x62xf32>
      %cst_139 = arith.constant dense<0.000000e+00> : vector<16x62xf32>
      %196 = tpu.matmul %193, %195, %cst_139 {dimension_numbers = #tpu.dot_dimension_numbers<[1], [0], [0], [1], [0, 0, 1, 1], [], []>} : vector<16x124xf32>, vector<124x62xf32>, vector<16x62xf32> -> vector<16x62xf32>
      %c1_140 = arith.constant 1 : index
      %c0_141 = arith.constant 0 : index
      %c0_142 = arith.constant 0 : index
      %197 = vector.load %arg4[%c1_140, %c0_141, %c0_142] : memref<2x124x62xf32, #tpu.memory_space<vmem>>, vector<1x124x62xf32>
      %198 = vector.shape_cast %197 : vector<1x124x62xf32> to vector<124x62xf32>
      %cst_143 = arith.constant dense<0.000000e+00> : vector<16x62xf32>
      %199 = tpu.matmul %193, %198, %cst_143 {dimension_numbers = #tpu.dot_dimension_numbers<[1], [0], [0], [1], [0, 0, 1, 1], [], []>} : vector<16x124xf32>, vector<124x62xf32>, vector<16x62xf32> -> vector<16x62xf32>
      %200 = arith.maximumf %196, %199 : vector<16x62xf32>
      %c0_144 = arith.constant 0 : index
      %201 = arith.index_cast %arg6 : i32 to index
      %c0_145 = arith.constant 0 : index
      %c0_146 = arith.constant 0 : index
      %202 = vector.load %arg5[%c0_144, %201, %c0_145, %c0_146] : memref<1x62x16x62xf32, #tpu.memory_space<vmem>>, vector<1x1x16x62xf32>
      %203 = vector.shape_cast %202 : vector<1x1x16x62xf32> to vector<16x62xf32>
      %204 = vector.shape_cast %200 : vector<16x62xf32> to vector<1x1x16x62xf32>
      tpu.vector_store %arg5[%c0_144, %201, %c0_145, %c0_146], %204 {strides = array<i32>} : memref<1x62x16x62xf32, #tpu.memory_space<vmem>>, vector<1x1x16x62xf32>,
    }
    %c62_i32_1 = arith.constant 62 : i32
    return
  }
  func.func @transform_0(%arg0: i32) -> (i32, i32, i32, i32) {
    %c0_i32 = arith.constant 0 : i32
    %c0_i32_0 = arith.constant 0 : i32
    %c0_i32_1 = arith.constant 0 : i32
    %c0_i32_2 = arith.constant 0 : i32
    return %arg0, %c0_i32, %c0_i32_0, %c0_i32_1 : i32, i32, i32, i32
  }
  func.func @transform_1(%arg0: i32) -> (i32, i32, i32) {
    %c0_i32 = arith.constant 0 : i32
    %c0_i32_0 = arith.constant 0 : i32
    %c0_i32_1 = arith.constant 0 : i32
    %c0_i32_2 = arith.constant 0 : i32
    return %c0_i32, %c0_i32_0, %c0_i32_1 : i32, i32, i32
  }
  func.func @transform_2(%arg0: i32) -> (i32, i32) {
    %c0_i32 = arith.constant 0 : i32
    %c0_i32_0 = arith.constant 0 : i32
    %c0_i32_1 = arith.constant 0 : i32
    return %c0_i32, %c0_i32_0 : i32, i32
  }
  func.func @transform_3(%arg0: i32) -> (i32, i32, i32) {
    %c0_i32 = arith.constant 0 : i32
    %c0_i32_0 = arith.constant 0 : i32
    %c0_i32_1 = arith.constant 0 : i32
    %c0_i32_2 = arith.constant 0 : i32
    return %c0_i32, %c0_i32_0, %c0_i32_1 : i32, i32, i32
  }
  func.func @transform_4(%arg0: i32) -> (i32, i32, i32, i32) {
    %c0_i32 = arith.constant 0 : i32
    %c0_i32_0 = arith.constant 0 : i32
    %c0_i32_1 = arith.constant 0 : i32
    %c0_i32_2 = arith.constant 0 : i32
    return %arg0, %c0_i32, %c0_i32_0, %c0_i32_1 : i32, i32, i32, i32
  }
}

module attributes {stable_mosaic.version = 11 : i64} {
  func.func @_conv_relu_pool_kernel(%arg0: i32, %arg1: memref<1x62x16x62xf32, #tpu.memory_space<vmem>>, %arg2: memref<9x16x16xf32, #tpu.memory_space<vmem>>, %arg3: memref<16x1xf32, #tpu.memory_space<vmem>>, %arg4: memref<2x60x30xf32, #tpu.memory_space<vmem>>, %arg5: memref<1x30x16x30xf32, #tpu.memory_space<vmem>>) attributes {dimension_semantics = [#tpu.dimension_semantics<parallel>], iteration_bounds = array<i64: 2>, scalar_prefetch = 0 : i64, scratch_operands = 0 : i64, tpu.core_type = #tpu.core_type<tc>, window_params = [{transform_indices = @transform_0, window_bounds = array<i64: 1, 62, 16, 62>}, {pipeline_mode = #tpu.pipeline_mode<synchronous>, transform_indices = @transform_1, window_bounds = array<i64: 9, 16, 16>}, {pipeline_mode = #tpu.pipeline_mode<synchronous>, transform_indices = @transform_2, window_bounds = array<i64: 16, 1>}, {pipeline_mode = #tpu.pipeline_mode<synchronous>, transform_indices = @transform_3, window_bounds = array<i64: 2, 60, 30>}, {transform_indices = @transform_4, window_bounds = array<i64: 1, 30, 16, 30>}]} {
    %c0 = arith.constant 0 : index
    %c0_0 = arith.constant 0 : index
    %0 = vector.load %arg3[%c0, %c0_0] : memref<16x1xf32, #tpu.memory_space<vmem>>, vector<16x1xf32>
    %c0_i32 = arith.constant 0 : i32
    %c30_i32 = arith.constant 30 : i32
    %1 = arith.addi %c0_i32, %c30_i32 : i32
    %c1_i32 = arith.constant 1 : i32
    scf.for %arg6 = %c0_i32 to %1 step %c1_i32  : i32 {
      %c2_i32 = arith.constant 2 : i32
      %2 = arith.muli %arg6, %c2_i32 : i32
      %c0_i32_2 = arith.constant 0 : i32
      %3 = arith.addi %2, %c0_i32_2 : i32
      %c0_3 = arith.constant 0 : index
      %4 = arith.index_cast %3 : i32 to index
      %c0_4 = arith.constant 0 : index
      %c0_5 = arith.constant 0 : index
      %5 = vector.load %arg1[%c0_3, %4, %c0_4, %c0_5] : memref<1x62x16x62xf32, #tpu.memory_space<vmem>>, vector<1x1x16x62xf32>
      %6 = vector.shape_cast %5 : vector<1x1x16x62xf32> to vector<16x62xf32>
      %c1_i32_6 = arith.constant 1 : i32
      %7 = arith.addi %2, %c1_i32_6 : i32
      %c0_7 = arith.constant 0 : index
      %8 = arith.index_cast %7 : i32 to index
      %c0_8 = arith.constant 0 : index
      %c0_9 = arith.constant 0 : index
      %9 = vector.load %arg1[%c0_7, %8, %c0_8, %c0_9] : memref<1x62x16x62xf32, #tpu.memory_space<vmem>>, vector<1x1x16x62xf32>
      %10 = vector.shape_cast %9 : vector<1x1x16x62xf32> to vector<16x62xf32>
      %c2_i32_10 = arith.constant 2 : i32
      %11 = arith.addi %2, %c2_i32_10 : i32
      %c0_11 = arith.constant 0 : index
      %12 = arith.index_cast %11 : i32 to index
      %c0_12 = arith.constant 0 : index
      %c0_13 = arith.constant 0 : index
      %13 = vector.load %arg1[%c0_11, %12, %c0_12, %c0_13] : memref<1x62x16x62xf32, #tpu.memory_space<vmem>>, vector<1x1x16x62xf32>
      %14 = vector.shape_cast %13 : vector<1x1x16x62xf32> to vector<16x62xf32>
      %c3_i32 = arith.constant 3 : i32
      %15 = arith.addi %2, %c3_i32 : i32
      %c0_14 = arith.constant 0 : index
      %16 = arith.index_cast %15 : i32 to index
      %c0_15 = arith.constant 0 : index
      %c0_16 = arith.constant 0 : index
      %17 = vector.load %arg1[%c0_14, %16, %c0_15, %c0_16] : memref<1x62x16x62xf32, #tpu.memory_space<vmem>>, vector<1x1x16x62xf32>
      %18 = vector.shape_cast %17 : vector<1x1x16x62xf32> to vector<16x62xf32>
      %cst = arith.constant 0.000000e+00 : f32
      %19 = vector.broadcast %cst : f32 to vector<16x60xf32>
      %20 = vector.extract_strided_slice %6 {offsets = [0, 0], sizes = [16, 60], strides = [1, 1]} : vector<16x62xf32> to vector<16x60xf32>
      %c0_17 = arith.constant 0 : index
      %c0_18 = arith.constant 0 : index
      %c0_19 = arith.constant 0 : index
      %21 = vector.load %arg2[%c0_17, %c0_18, %c0_19] : memref<9x16x16xf32, #tpu.memory_space<vmem>>, vector<1x16x16xf32>
      %22 = vector.shape_cast %21 : vector<1x16x16xf32> to vector<16x16xf32>
      %cst_20 = arith.constant dense<0.000000e+00> : vector<16x60xf32>
      %23 = tpu.matmul %22, %20, %cst_20 {dimension_numbers = #tpu.dot_dimension_numbers<[1], [0], [0], [1], [0, 0, 1, 1], [], []>} : vector<16x16xf32>, vector<16x60xf32>, vector<16x60xf32> -> vector<16x60xf32>
      %24 = arith.addf %19, %23 : vector<16x60xf32>
      %25 = vector.extract_strided_slice %6 {offsets = [0, 1], sizes = [16, 60], strides = [1, 1]} : vector<16x62xf32> to vector<16x60xf32>
      %c1 = arith.constant 1 : index
      %c0_21 = arith.constant 0 : index
      %c0_22 = arith.constant 0 : index
      %26 = vector.load %arg2[%c1, %c0_21, %c0_22] : memref<9x16x16xf32, #tpu.memory_space<vmem>>, vector<1x16x16xf32>
      %27 = vector.shape_cast %26 : vector<1x16x16xf32> to vector<16x16xf32>
      %cst_23 = arith.constant dense<0.000000e+00> : vector<16x60xf32>
      %28 = tpu.matmul %27, %25, %cst_23 {dimension_numbers = #tpu.dot_dimension_numbers<[1], [0], [0], [1], [0, 0, 1, 1], [], []>} : vector<16x16xf32>, vector<16x60xf32>, vector<16x60xf32> -> vector<16x60xf32>
      %29 = arith.addf %24, %28 : vector<16x60xf32>
      %30 = vector.extract_strided_slice %6 {offsets = [0, 2], sizes = [16, 60], strides = [1, 1]} : vector<16x62xf32> to vector<16x60xf32>
      %c2 = arith.constant 2 : index
      %c0_24 = arith.constant 0 : index
      %c0_25 = arith.constant 0 : index
      %31 = vector.load %arg2[%c2, %c0_24, %c0_25] : memref<9x16x16xf32, #tpu.memory_space<vmem>>, vector<1x16x16xf32>
      %32 = vector.shape_cast %31 : vector<1x16x16xf32> to vector<16x16xf32>
      %cst_26 = arith.constant dense<0.000000e+00> : vector<16x60xf32>
      %33 = tpu.matmul %32, %30, %cst_26 {dimension_numbers = #tpu.dot_dimension_numbers<[1], [0], [0], [1], [0, 0, 1, 1], [], []>} : vector<16x16xf32>, vector<16x60xf32>, vector<16x60xf32> -> vector<16x60xf32>
      %34 = arith.addf %29, %33 : vector<16x60xf32>
      %35 = vector.extract_strided_slice %10 {offsets = [0, 0], sizes = [16, 60], strides = [1, 1]} : vector<16x62xf32> to vector<16x60xf32>
      %c3 = arith.constant 3 : index
      %c0_27 = arith.constant 0 : index
      %c0_28 = arith.constant 0 : index
      %36 = vector.load %arg2[%c3, %c0_27, %c0_28] : memref<9x16x16xf32, #tpu.memory_space<vmem>>, vector<1x16x16xf32>
      %37 = vector.shape_cast %36 : vector<1x16x16xf32> to vector<16x16xf32>
      %cst_29 = arith.constant dense<0.000000e+00> : vector<16x60xf32>
      %38 = tpu.matmul %37, %35, %cst_29 {dimension_numbers = #tpu.dot_dimension_numbers<[1], [0], [0], [1], [0, 0, 1, 1], [], []>} : vector<16x16xf32>, vector<16x60xf32>, vector<16x60xf32> -> vector<16x60xf32>
      %39 = arith.addf %34, %38 : vector<16x60xf32>
      %40 = vector.extract_strided_slice %10 {offsets = [0, 1], sizes = [16, 60], strides = [1, 1]} : vector<16x62xf32> to vector<16x60xf32>
      %c4 = arith.constant 4 : index
      %c0_30 = arith.constant 0 : index
      %c0_31 = arith.constant 0 : index
      %41 = vector.load %arg2[%c4, %c0_30, %c0_31] : memref<9x16x16xf32, #tpu.memory_space<vmem>>, vector<1x16x16xf32>
      %42 = vector.shape_cast %41 : vector<1x16x16xf32> to vector<16x16xf32>
      %cst_32 = arith.constant dense<0.000000e+00> : vector<16x60xf32>
      %43 = tpu.matmul %42, %40, %cst_32 {dimension_numbers = #tpu.dot_dimension_numbers<[1], [0], [0], [1], [0, 0, 1, 1], [], []>} : vector<16x16xf32>, vector<16x60xf32>, vector<16x60xf32> -> vector<16x60xf32>
      %44 = arith.addf %39, %43 : vector<16x60xf32>
      %45 = vector.extract_strided_slice %10 {offsets = [0, 2], sizes = [16, 60], strides = [1, 1]} : vector<16x62xf32> to vector<16x60xf32>
      %c5 = arith.constant 5 : index
      %c0_33 = arith.constant 0 : index
      %c0_34 = arith.constant 0 : index
      %46 = vector.load %arg2[%c5, %c0_33, %c0_34] : memref<9x16x16xf32, #tpu.memory_space<vmem>>, vector<1x16x16xf32>
      %47 = vector.shape_cast %46 : vector<1x16x16xf32> to vector<16x16xf32>
      %cst_35 = arith.constant dense<0.000000e+00> : vector<16x60xf32>
      %48 = tpu.matmul %47, %45, %cst_35 {dimension_numbers = #tpu.dot_dimension_numbers<[1], [0], [0], [1], [0, 0, 1, 1], [], []>} : vector<16x16xf32>, vector<16x60xf32>, vector<16x60xf32> -> vector<16x60xf32>
      %49 = arith.addf %44, %48 : vector<16x60xf32>
      %50 = vector.extract_strided_slice %14 {offsets = [0, 0], sizes = [16, 60], strides = [1, 1]} : vector<16x62xf32> to vector<16x60xf32>
      %c6 = arith.constant 6 : index
      %c0_36 = arith.constant 0 : index
      %c0_37 = arith.constant 0 : index
      %51 = vector.load %arg2[%c6, %c0_36, %c0_37] : memref<9x16x16xf32, #tpu.memory_space<vmem>>, vector<1x16x16xf32>
      %52 = vector.shape_cast %51 : vector<1x16x16xf32> to vector<16x16xf32>
      %cst_38 = arith.constant dense<0.000000e+00> : vector<16x60xf32>
      %53 = tpu.matmul %52, %50, %cst_38 {dimension_numbers = #tpu.dot_dimension_numbers<[1], [0], [0], [1], [0, 0, 1, 1], [], []>} : vector<16x16xf32>, vector<16x60xf32>, vector<16x60xf32> -> vector<16x60xf32>
      %54 = arith.addf %49, %53 : vector<16x60xf32>
      %55 = vector.extract_strided_slice %14 {offsets = [0, 1], sizes = [16, 60], strides = [1, 1]} : vector<16x62xf32> to vector<16x60xf32>
      %c7 = arith.constant 7 : index
      %c0_39 = arith.constant 0 : index
      %c0_40 = arith.constant 0 : index
      %56 = vector.load %arg2[%c7, %c0_39, %c0_40] : memref<9x16x16xf32, #tpu.memory_space<vmem>>, vector<1x16x16xf32>
      %57 = vector.shape_cast %56 : vector<1x16x16xf32> to vector<16x16xf32>
      %cst_41 = arith.constant dense<0.000000e+00> : vector<16x60xf32>
      %58 = tpu.matmul %57, %55, %cst_41 {dimension_numbers = #tpu.dot_dimension_numbers<[1], [0], [0], [1], [0, 0, 1, 1], [], []>} : vector<16x16xf32>, vector<16x60xf32>, vector<16x60xf32> -> vector<16x60xf32>
      %59 = arith.addf %54, %58 : vector<16x60xf32>
      %60 = vector.extract_strided_slice %14 {offsets = [0, 2], sizes = [16, 60], strides = [1, 1]} : vector<16x62xf32> to vector<16x60xf32>
      %c8 = arith.constant 8 : index
      %c0_42 = arith.constant 0 : index
      %c0_43 = arith.constant 0 : index
      %61 = vector.load %arg2[%c8, %c0_42, %c0_43] : memref<9x16x16xf32, #tpu.memory_space<vmem>>, vector<1x16x16xf32>
      %62 = vector.shape_cast %61 : vector<1x16x16xf32> to vector<16x16xf32>
      %cst_44 = arith.constant dense<0.000000e+00> : vector<16x60xf32>
      %63 = tpu.matmul %62, %60, %cst_44 {dimension_numbers = #tpu.dot_dimension_numbers<[1], [0], [0], [1], [0, 0, 1, 1], [], []>} : vector<16x16xf32>, vector<16x60xf32>, vector<16x60xf32> -> vector<16x60xf32>
      %64 = arith.addf %59, %63 : vector<16x60xf32>
      %65 = vector.broadcast %0 : vector<16x1xf32> to vector<16x60xf32>
      %66 = arith.addf %64, %65 : vector<16x60xf32>
      %cst_45 = arith.constant 0.000000e+00 : f32
      %67 = vector.broadcast %cst_45 : f32 to vector<16x60xf32>
      %68 = arith.maximumf %66, %67 : vector<16x60xf32>
      %cst_46 = arith.constant 0.000000e+00 : f32
      %69 = vector.broadcast %cst_46 : f32 to vector<16x60xf32>
      %70 = vector.extract_strided_slice %10 {offsets = [0, 0], sizes = [16, 60], strides = [1, 1]} : vector<16x62xf32> to vector<16x60xf32>
      %c0_47 = arith.constant 0 : index
      %c0_48 = arith.constant 0 : index
      %c0_49 = arith.constant 0 : index
      %71 = vector.load %arg2[%c0_47, %c0_48, %c0_49] : memref<9x16x16xf32, #tpu.memory_space<vmem>>, vector<1x16x16xf32>
      %72 = vector.shape_cast %71 : vector<1x16x16xf32> to vector<16x16xf32>
      %cst_50 = arith.constant dense<0.000000e+00> : vector<16x60xf32>
      %73 = tpu.matmul %72, %70, %cst_50 {dimension_numbers = #tpu.dot_dimension_numbers<[1], [0], [0], [1], [0, 0, 1, 1], [], []>} : vector<16x16xf32>, vector<16x60xf32>, vector<16x60xf32> -> vector<16x60xf32>
      %74 = arith.addf %69, %73 : vector<16x60xf32>
      %75 = vector.extract_strided_slice %10 {offsets = [0, 1], sizes = [16, 60], strides = [1, 1]} : vector<16x62xf32> to vector<16x60xf32>
      %c1_51 = arith.constant 1 : index
      %c0_52 = arith.constant 0 : index
      %c0_53 = arith.constant 0 : index
      %76 = vector.load %arg2[%c1_51, %c0_52, %c0_53] : memref<9x16x16xf32, #tpu.memory_space<vmem>>, vector<1x16x16xf32>
      %77 = vector.shape_cast %76 : vector<1x16x16xf32> to vector<16x16xf32>
      %cst_54 = arith.constant dense<0.000000e+00> : vector<16x60xf32>
      %78 = tpu.matmul %77, %75, %cst_54 {dimension_numbers = #tpu.dot_dimension_numbers<[1], [0], [0], [1], [0, 0, 1, 1], [], []>} : vector<16x16xf32>, vector<16x60xf32>, vector<16x60xf32> -> vector<16x60xf32>
      %79 = arith.addf %74, %78 : vector<16x60xf32>
      %80 = vector.extract_strided_slice %10 {offsets = [0, 2], sizes = [16, 60], strides = [1, 1]} : vector<16x62xf32> to vector<16x60xf32>
      %c2_55 = arith.constant 2 : index
      %c0_56 = arith.constant 0 : index
      %c0_57 = arith.constant 0 : index
      %81 = vector.load %arg2[%c2_55, %c0_56, %c0_57] : memref<9x16x16xf32, #tpu.memory_space<vmem>>, vector<1x16x16xf32>
      %82 = vector.shape_cast %81 : vector<1x16x16xf32> to vector<16x16xf32>
      %cst_58 = arith.constant dense<0.000000e+00> : vector<16x60xf32>
      %83 = tpu.matmul %82, %80, %cst_58 {dimension_numbers = #tpu.dot_dimension_numbers<[1], [0], [0], [1], [0, 0, 1, 1], [], []>} : vector<16x16xf32>, vector<16x60xf32>, vector<16x60xf32> -> vector<16x60xf32>
      %84 = arith.addf %79, %83 : vector<16x60xf32>
      %85 = vector.extract_strided_slice %14 {offsets = [0, 0], sizes = [16, 60], strides = [1, 1]} : vector<16x62xf32> to vector<16x60xf32>
      %c3_59 = arith.constant 3 : index
      %c0_60 = arith.constant 0 : index
      %c0_61 = arith.constant 0 : index
      %86 = vector.load %arg2[%c3_59, %c0_60, %c0_61] : memref<9x16x16xf32, #tpu.memory_space<vmem>>, vector<1x16x16xf32>
      %87 = vector.shape_cast %86 : vector<1x16x16xf32> to vector<16x16xf32>
      %cst_62 = arith.constant dense<0.000000e+00> : vector<16x60xf32>
      %88 = tpu.matmul %87, %85, %cst_62 {dimension_numbers = #tpu.dot_dimension_numbers<[1], [0], [0], [1], [0, 0, 1, 1], [], []>} : vector<16x16xf32>, vector<16x60xf32>, vector<16x60xf32> -> vector<16x60xf32>
      %89 = arith.addf %84, %88 : vector<16x60xf32>
      %90 = vector.extract_strided_slice %14 {offsets = [0, 1], sizes = [16, 60], strides = [1, 1]} : vector<16x62xf32> to vector<16x60xf32>
      %c4_63 = arith.constant 4 : index
      %c0_64 = arith.constant 0 : index
      %c0_65 = arith.constant 0 : index
      %91 = vector.load %arg2[%c4_63, %c0_64, %c0_65] : memref<9x16x16xf32, #tpu.memory_space<vmem>>, vector<1x16x16xf32>
      %92 = vector.shape_cast %91 : vector<1x16x16xf32> to vector<16x16xf32>
      %cst_66 = arith.constant dense<0.000000e+00> : vector<16x60xf32>
      %93 = tpu.matmul %92, %90, %cst_66 {dimension_numbers = #tpu.dot_dimension_numbers<[1], [0], [0], [1], [0, 0, 1, 1], [], []>} : vector<16x16xf32>, vector<16x60xf32>, vector<16x60xf32> -> vector<16x60xf32>
      %94 = arith.addf %89, %93 : vector<16x60xf32>
      %95 = vector.extract_strided_slice %14 {offsets = [0, 2], sizes = [16, 60], strides = [1, 1]} : vector<16x62xf32> to vector<16x60xf32>
      %c5_67 = arith.constant 5 : index
      %c0_68 = arith.constant 0 : index
      %c0_69 = arith.constant 0 : index
      %96 = vector.load %arg2[%c5_67, %c0_68, %c0_69] : memref<9x16x16xf32, #tpu.memory_space<vmem>>, vector<1x16x16xf32>
      %97 = vector.shape_cast %96 : vector<1x16x16xf32> to vector<16x16xf32>
      %cst_70 = arith.constant dense<0.000000e+00> : vector<16x60xf32>
      %98 = tpu.matmul %97, %95, %cst_70 {dimension_numbers = #tpu.dot_dimension_numbers<[1], [0], [0], [1], [0, 0, 1, 1], [], []>} : vector<16x16xf32>, vector<16x60xf32>, vector<16x60xf32> -> vector<16x60xf32>
      %99 = arith.addf %94, %98 : vector<16x60xf32>
      %100 = vector.extract_strided_slice %18 {offsets = [0, 0], sizes = [16, 60], strides = [1, 1]} : vector<16x62xf32> to vector<16x60xf32>
      %c6_71 = arith.constant 6 : index
      %c0_72 = arith.constant 0 : index
      %c0_73 = arith.constant 0 : index
      %101 = vector.load %arg2[%c6_71, %c0_72, %c0_73] : memref<9x16x16xf32, #tpu.memory_space<vmem>>, vector<1x16x16xf32>
      %102 = vector.shape_cast %101 : vector<1x16x16xf32> to vector<16x16xf32>
      %cst_74 = arith.constant dense<0.000000e+00> : vector<16x60xf32>
      %103 = tpu.matmul %102, %100, %cst_74 {dimension_numbers = #tpu.dot_dimension_numbers<[1], [0], [0], [1], [0, 0, 1, 1], [], []>} : vector<16x16xf32>, vector<16x60xf32>, vector<16x60xf32> -> vector<16x60xf32>
      %104 = arith.addf %99, %103 : vector<16x60xf32>
      %105 = vector.extract_strided_slice %18 {offsets = [0, 1], sizes = [16, 60], strides = [1, 1]} : vector<16x62xf32> to vector<16x60xf32>
      %c7_75 = arith.constant 7 : index
      %c0_76 = arith.constant 0 : index
      %c0_77 = arith.constant 0 : index
      %106 = vector.load %arg2[%c7_75, %c0_76, %c0_77] : memref<9x16x16xf32, #tpu.memory_space<vmem>>, vector<1x16x16xf32>
      %107 = vector.shape_cast %106 : vector<1x16x16xf32> to vector<16x16xf32>
      %cst_78 = arith.constant dense<0.000000e+00> : vector<16x60xf32>
      %108 = tpu.matmul %107, %105, %cst_78 {dimension_numbers = #tpu.dot_dimension_numbers<[1], [0], [0], [1], [0, 0, 1, 1], [], []>} : vector<16x16xf32>, vector<16x60xf32>, vector<16x60xf32> -> vector<16x60xf32>
      %109 = arith.addf %104, %108 : vector<16x60xf32>
      %110 = vector.extract_strided_slice %18 {offsets = [0, 2], sizes = [16, 60], strides = [1, 1]} : vector<16x62xf32> to vector<16x60xf32>
      %c8_79 = arith.constant 8 : index
      %c0_80 = arith.constant 0 : index
      %c0_81 = arith.constant 0 : index
      %111 = vector.load %arg2[%c8_79, %c0_80, %c0_81] : memref<9x16x16xf32, #tpu.memory_space<vmem>>, vector<1x16x16xf32>
      %112 = vector.shape_cast %111 : vector<1x16x16xf32> to vector<16x16xf32>
      %cst_82 = arith.constant dense<0.000000e+00> : vector<16x60xf32>
      %113 = tpu.matmul %112, %110, %cst_82 {dimension_numbers = #tpu.dot_dimension_numbers<[1], [0], [0], [1], [0, 0, 1, 1], [], []>} : vector<16x16xf32>, vector<16x60xf32>, vector<16x60xf32> -> vector<16x60xf32>
      %114 = arith.addf %109, %113 : vector<16x60xf32>
      %115 = vector.broadcast %0 : vector<16x1xf32> to vector<16x60xf32>
      %116 = arith.addf %114, %115 : vector<16x60xf32>
      %cst_83 = arith.constant 0.000000e+00 : f32
      %117 = vector.broadcast %cst_83 : f32 to vector<16x60xf32>
      %118 = arith.maximumf %116, %117 : vector<16x60xf32>
      %119 = arith.maximumf %68, %118 : vector<16x60xf32>
      %c0_84 = arith.constant 0 : index
      %c0_85 = arith.constant 0 : index
      %c0_86 = arith.constant 0 : index
      %120 = vector.load %arg4[%c0_84, %c0_85, %c0_86] : memref<2x60x30xf32, #tpu.memory_space<vmem>>, vector<1x60x30xf32>
      %121 = vector.shape_cast %120 : vector<1x60x30xf32> to vector<60x30xf32>
      %cst_87 = arith.constant dense<0.000000e+00> : vector<16x30xf32>
      %122 = tpu.matmul %119, %121, %cst_87 {dimension_numbers = #tpu.dot_dimension_numbers<[1], [0], [0], [1], [0, 0, 1, 1], [], []>} : vector<16x60xf32>, vector<60x30xf32>, vector<16x30xf32> -> vector<16x30xf32>
      %c1_88 = arith.constant 1 : index
      %c0_89 = arith.constant 0 : index
      %c0_90 = arith.constant 0 : index
      %123 = vector.load %arg4[%c1_88, %c0_89, %c0_90] : memref<2x60x30xf32, #tpu.memory_space<vmem>>, vector<1x60x30xf32>
      %124 = vector.shape_cast %123 : vector<1x60x30xf32> to vector<60x30xf32>
      %cst_91 = arith.constant dense<0.000000e+00> : vector<16x30xf32>
      %125 = tpu.matmul %119, %124, %cst_91 {dimension_numbers = #tpu.dot_dimension_numbers<[1], [0], [0], [1], [0, 0, 1, 1], [], []>} : vector<16x60xf32>, vector<60x30xf32>, vector<16x30xf32> -> vector<16x30xf32>
      %126 = arith.maximumf %122, %125 : vector<16x30xf32>
      %c0_92 = arith.constant 0 : index
      %127 = arith.index_cast %arg6 : i32 to index
      %c0_93 = arith.constant 0 : index
      %c0_94 = arith.constant 0 : index
      %128 = vector.load %arg5[%c0_92, %127, %c0_93, %c0_94] : memref<1x30x16x30xf32, #tpu.memory_space<vmem>>, vector<1x1x16x30xf32>
      %129 = vector.shape_cast %128 : vector<1x1x16x30xf32> to vector<16x30xf32>
      %130 = vector.shape_cast %126 : vector<16x30xf32> to vector<1x1x16x30xf32>
      tpu.vector_store %arg5[%c0_92, %127, %c0_93, %c0_94], %130 {strides = array<i32>} : memref<1x30x16x30xf32, #tpu.memory_space<vmem>>, vector<1x1x16x30xf32>,
    }
    %c30_i32_1 = arith.constant 30 : i32
    return
  }
  func.func @transform_0(%arg0: i32) -> (i32, i32, i32, i32) {
    %c0_i32 = arith.constant 0 : i32
    %c0_i32_0 = arith.constant 0 : i32
    %c0_i32_1 = arith.constant 0 : i32
    %c0_i32_2 = arith.constant 0 : i32
    return %arg0, %c0_i32, %c0_i32_0, %c0_i32_1 : i32, i32, i32, i32
  }
  func.func @transform_1(%arg0: i32) -> (i32, i32, i32) {
    %c0_i32 = arith.constant 0 : i32
    %c0_i32_0 = arith.constant 0 : i32
    %c0_i32_1 = arith.constant 0 : i32
    %c0_i32_2 = arith.constant 0 : i32
    return %c0_i32, %c0_i32_0, %c0_i32_1 : i32, i32, i32
  }
  func.func @transform_2(%arg0: i32) -> (i32, i32) {
    %c0_i32 = arith.constant 0 : i32
    %c0_i32_0 = arith.constant 0 : i32
    %c0_i32_1 = arith.constant 0 : i32
    return %c0_i32, %c0_i32_0 : i32, i32
  }
  func.func @transform_3(%arg0: i32) -> (i32, i32, i32) {
    %c0_i32 = arith.constant 0 : i32
    %c0_i32_0 = arith.constant 0 : i32
    %c0_i32_1 = arith.constant 0 : i32
    %c0_i32_2 = arith.constant 0 : i32
    return %c0_i32, %c0_i32_0, %c0_i32_1 : i32, i32, i32
  }
  func.func @transform_4(%arg0: i32) -> (i32, i32, i32, i32) {
    %c0_i32 = arith.constant 0 : i32
    %c0_i32_0 = arith.constant 0 : i32
    %c0_i32_1 = arith.constant 0 : i32
    %c0_i32_2 = arith.constant 0 : i32
    return %arg0, %c0_i32, %c0_i32_0, %c0_i32_1 : i32, i32, i32, i32
  }
}

module attributes {stable_mosaic.version = 11 : i64} {
  func.func @_conv_relu_pool_kernel(%arg0: i32, %arg1: memref<1x30x16x30xf32, #tpu.memory_space<vmem>>, %arg2: memref<9x16x16xf32, #tpu.memory_space<vmem>>, %arg3: memref<16x1xf32, #tpu.memory_space<vmem>>, %arg4: memref<4x28x7xf32, #tpu.memory_space<vmem>>, %arg5: memref<1x7x16x7xf32, #tpu.memory_space<vmem>>) attributes {dimension_semantics = [#tpu.dimension_semantics<parallel>], iteration_bounds = array<i64: 2>, scalar_prefetch = 0 : i64, scratch_operands = 0 : i64, tpu.core_type = #tpu.core_type<tc>, window_params = [{transform_indices = @transform_0, window_bounds = array<i64: 1, 30, 16, 30>}, {pipeline_mode = #tpu.pipeline_mode<synchronous>, transform_indices = @transform_1, window_bounds = array<i64: 9, 16, 16>}, {pipeline_mode = #tpu.pipeline_mode<synchronous>, transform_indices = @transform_2, window_bounds = array<i64: 16, 1>}, {pipeline_mode = #tpu.pipeline_mode<synchronous>, transform_indices = @transform_3, window_bounds = array<i64: 4, 28, 7>}, {transform_indices = @transform_4, window_bounds = array<i64: 1, 7, 16, 7>}]} {
    %c0 = arith.constant 0 : index
    %c0_0 = arith.constant 0 : index
    %0 = vector.load %arg3[%c0, %c0_0] : memref<16x1xf32, #tpu.memory_space<vmem>>, vector<16x1xf32>
    %c0_i32 = arith.constant 0 : i32
    %c7_i32 = arith.constant 7 : i32
    %1 = arith.addi %c0_i32, %c7_i32 : i32
    %c1_i32 = arith.constant 1 : i32
    scf.for %arg6 = %c0_i32 to %1 step %c1_i32  : i32 {
      %c4_i32 = arith.constant 4 : i32
      %2 = arith.muli %arg6, %c4_i32 : i32
      %c0_i32_2 = arith.constant 0 : i32
      %3 = arith.addi %2, %c0_i32_2 : i32
      %c0_3 = arith.constant 0 : index
      %4 = arith.index_cast %3 : i32 to index
      %c0_4 = arith.constant 0 : index
      %c0_5 = arith.constant 0 : index
      %5 = vector.load %arg1[%c0_3, %4, %c0_4, %c0_5] : memref<1x30x16x30xf32, #tpu.memory_space<vmem>>, vector<1x1x16x30xf32>
      %6 = vector.shape_cast %5 : vector<1x1x16x30xf32> to vector<16x30xf32>
      %c1_i32_6 = arith.constant 1 : i32
      %7 = arith.addi %2, %c1_i32_6 : i32
      %c0_7 = arith.constant 0 : index
      %8 = arith.index_cast %7 : i32 to index
      %c0_8 = arith.constant 0 : index
      %c0_9 = arith.constant 0 : index
      %9 = vector.load %arg1[%c0_7, %8, %c0_8, %c0_9] : memref<1x30x16x30xf32, #tpu.memory_space<vmem>>, vector<1x1x16x30xf32>
      %10 = vector.shape_cast %9 : vector<1x1x16x30xf32> to vector<16x30xf32>
      %c2_i32 = arith.constant 2 : i32
      %11 = arith.addi %2, %c2_i32 : i32
      %c0_10 = arith.constant 0 : index
      %12 = arith.index_cast %11 : i32 to index
      %c0_11 = arith.constant 0 : index
      %c0_12 = arith.constant 0 : index
      %13 = vector.load %arg1[%c0_10, %12, %c0_11, %c0_12] : memref<1x30x16x30xf32, #tpu.memory_space<vmem>>, vector<1x1x16x30xf32>
      %14 = vector.shape_cast %13 : vector<1x1x16x30xf32> to vector<16x30xf32>
      %c3_i32 = arith.constant 3 : i32
      %15 = arith.addi %2, %c3_i32 : i32
      %c0_13 = arith.constant 0 : index
      %16 = arith.index_cast %15 : i32 to index
      %c0_14 = arith.constant 0 : index
      %c0_15 = arith.constant 0 : index
      %17 = vector.load %arg1[%c0_13, %16, %c0_14, %c0_15] : memref<1x30x16x30xf32, #tpu.memory_space<vmem>>, vector<1x1x16x30xf32>
      %18 = vector.shape_cast %17 : vector<1x1x16x30xf32> to vector<16x30xf32>
      %c4_i32_16 = arith.constant 4 : i32
      %19 = arith.addi %2, %c4_i32_16 : i32
      %c0_17 = arith.constant 0 : index
      %20 = arith.index_cast %19 : i32 to index
      %c0_18 = arith.constant 0 : index
      %c0_19 = arith.constant 0 : index
      %21 = vector.load %arg1[%c0_17, %20, %c0_18, %c0_19] : memref<1x30x16x30xf32, #tpu.memory_space<vmem>>, vector<1x1x16x30xf32>
      %22 = vector.shape_cast %21 : vector<1x1x16x30xf32> to vector<16x30xf32>
      %c5_i32 = arith.constant 5 : i32
      %23 = arith.addi %2, %c5_i32 : i32
      %c0_20 = arith.constant 0 : index
      %24 = arith.index_cast %23 : i32 to index
      %c0_21 = arith.constant 0 : index
      %c0_22 = arith.constant 0 : index
      %25 = vector.load %arg1[%c0_20, %24, %c0_21, %c0_22] : memref<1x30x16x30xf32, #tpu.memory_space<vmem>>, vector<1x1x16x30xf32>
      %26 = vector.shape_cast %25 : vector<1x1x16x30xf32> to vector<16x30xf32>
      %cst = arith.constant 0.000000e+00 : f32
      %27 = vector.broadcast %cst : f32 to vector<16x28xf32>
      %28 = vector.extract_strided_slice %6 {offsets = [0, 0], sizes = [16, 28], strides = [1, 1]} : vector<16x30xf32> to vector<16x28xf32>
      %c0_23 = arith.constant 0 : index
      %c0_24 = arith.constant 0 : index
      %c0_25 = arith.constant 0 : index
      %29 = vector.load %arg2[%c0_23, %c0_24, %c0_25] : memref<9x16x16xf32, #tpu.memory_space<vmem>>, vector<1x16x16xf32>
      %30 = vector.shape_cast %29 : vector<1x16x16xf32> to vector<16x16xf32>
      %cst_26 = arith.constant dense<0.000000e+00> : vector<16x28xf32>
      %31 = tpu.matmul %30, %28, %cst_26 {dimension_numbers = #tpu.dot_dimension_numbers<[1], [0], [0], [1], [0, 0, 1, 1], [], []>} : vector<16x16xf32>, vector<16x28xf32>, vector<16x28xf32> -> vector<16x28xf32>
      %32 = arith.addf %27, %31 : vector<16x28xf32>
      %33 = vector.extract_strided_slice %6 {offsets = [0, 1], sizes = [16, 28], strides = [1, 1]} : vector<16x30xf32> to vector<16x28xf32>
      %c1 = arith.constant 1 : index
      %c0_27 = arith.constant 0 : index
      %c0_28 = arith.constant 0 : index
      %34 = vector.load %arg2[%c1, %c0_27, %c0_28] : memref<9x16x16xf32, #tpu.memory_space<vmem>>, vector<1x16x16xf32>
      %35 = vector.shape_cast %34 : vector<1x16x16xf32> to vector<16x16xf32>
      %cst_29 = arith.constant dense<0.000000e+00> : vector<16x28xf32>
      %36 = tpu.matmul %35, %33, %cst_29 {dimension_numbers = #tpu.dot_dimension_numbers<[1], [0], [0], [1], [0, 0, 1, 1], [], []>} : vector<16x16xf32>, vector<16x28xf32>, vector<16x28xf32> -> vector<16x28xf32>
      %37 = arith.addf %32, %36 : vector<16x28xf32>
      %38 = vector.extract_strided_slice %6 {offsets = [0, 2], sizes = [16, 28], strides = [1, 1]} : vector<16x30xf32> to vector<16x28xf32>
      %c2 = arith.constant 2 : index
      %c0_30 = arith.constant 0 : index
      %c0_31 = arith.constant 0 : index
      %39 = vector.load %arg2[%c2, %c0_30, %c0_31] : memref<9x16x16xf32, #tpu.memory_space<vmem>>, vector<1x16x16xf32>
      %40 = vector.shape_cast %39 : vector<1x16x16xf32> to vector<16x16xf32>
      %cst_32 = arith.constant dense<0.000000e+00> : vector<16x28xf32>
      %41 = tpu.matmul %40, %38, %cst_32 {dimension_numbers = #tpu.dot_dimension_numbers<[1], [0], [0], [1], [0, 0, 1, 1], [], []>} : vector<16x16xf32>, vector<16x28xf32>, vector<16x28xf32> -> vector<16x28xf32>
      %42 = arith.addf %37, %41 : vector<16x28xf32>
      %43 = vector.extract_strided_slice %10 {offsets = [0, 0], sizes = [16, 28], strides = [1, 1]} : vector<16x30xf32> to vector<16x28xf32>
      %c3 = arith.constant 3 : index
      %c0_33 = arith.constant 0 : index
      %c0_34 = arith.constant 0 : index
      %44 = vector.load %arg2[%c3, %c0_33, %c0_34] : memref<9x16x16xf32, #tpu.memory_space<vmem>>, vector<1x16x16xf32>
      %45 = vector.shape_cast %44 : vector<1x16x16xf32> to vector<16x16xf32>
      %cst_35 = arith.constant dense<0.000000e+00> : vector<16x28xf32>
      %46 = tpu.matmul %45, %43, %cst_35 {dimension_numbers = #tpu.dot_dimension_numbers<[1], [0], [0], [1], [0, 0, 1, 1], [], []>} : vector<16x16xf32>, vector<16x28xf32>, vector<16x28xf32> -> vector<16x28xf32>
      %47 = arith.addf %42, %46 : vector<16x28xf32>
      %48 = vector.extract_strided_slice %10 {offsets = [0, 1], sizes = [16, 28], strides = [1, 1]} : vector<16x30xf32> to vector<16x28xf32>
      %c4 = arith.constant 4 : index
      %c0_36 = arith.constant 0 : index
      %c0_37 = arith.constant 0 : index
      %49 = vector.load %arg2[%c4, %c0_36, %c0_37] : memref<9x16x16xf32, #tpu.memory_space<vmem>>, vector<1x16x16xf32>
      %50 = vector.shape_cast %49 : vector<1x16x16xf32> to vector<16x16xf32>
      %cst_38 = arith.constant dense<0.000000e+00> : vector<16x28xf32>
      %51 = tpu.matmul %50, %48, %cst_38 {dimension_numbers = #tpu.dot_dimension_numbers<[1], [0], [0], [1], [0, 0, 1, 1], [], []>} : vector<16x16xf32>, vector<16x28xf32>, vector<16x28xf32> -> vector<16x28xf32>
      %52 = arith.addf %47, %51 : vector<16x28xf32>
      %53 = vector.extract_strided_slice %10 {offsets = [0, 2], sizes = [16, 28], strides = [1, 1]} : vector<16x30xf32> to vector<16x28xf32>
      %c5 = arith.constant 5 : index
      %c0_39 = arith.constant 0 : index
      %c0_40 = arith.constant 0 : index
      %54 = vector.load %arg2[%c5, %c0_39, %c0_40] : memref<9x16x16xf32, #tpu.memory_space<vmem>>, vector<1x16x16xf32>
      %55 = vector.shape_cast %54 : vector<1x16x16xf32> to vector<16x16xf32>
      %cst_41 = arith.constant dense<0.000000e+00> : vector<16x28xf32>
      %56 = tpu.matmul %55, %53, %cst_41 {dimension_numbers = #tpu.dot_dimension_numbers<[1], [0], [0], [1], [0, 0, 1, 1], [], []>} : vector<16x16xf32>, vector<16x28xf32>, vector<16x28xf32> -> vector<16x28xf32>
      %57 = arith.addf %52, %56 : vector<16x28xf32>
      %58 = vector.extract_strided_slice %14 {offsets = [0, 0], sizes = [16, 28], strides = [1, 1]} : vector<16x30xf32> to vector<16x28xf32>
      %c6 = arith.constant 6 : index
      %c0_42 = arith.constant 0 : index
      %c0_43 = arith.constant 0 : index
      %59 = vector.load %arg2[%c6, %c0_42, %c0_43] : memref<9x16x16xf32, #tpu.memory_space<vmem>>, vector<1x16x16xf32>
      %60 = vector.shape_cast %59 : vector<1x16x16xf32> to vector<16x16xf32>
      %cst_44 = arith.constant dense<0.000000e+00> : vector<16x28xf32>
      %61 = tpu.matmul %60, %58, %cst_44 {dimension_numbers = #tpu.dot_dimension_numbers<[1], [0], [0], [1], [0, 0, 1, 1], [], []>} : vector<16x16xf32>, vector<16x28xf32>, vector<16x28xf32> -> vector<16x28xf32>
      %62 = arith.addf %57, %61 : vector<16x28xf32>
      %63 = vector.extract_strided_slice %14 {offsets = [0, 1], sizes = [16, 28], strides = [1, 1]} : vector<16x30xf32> to vector<16x28xf32>
      %c7 = arith.constant 7 : index
      %c0_45 = arith.constant 0 : index
      %c0_46 = arith.constant 0 : index
      %64 = vector.load %arg2[%c7, %c0_45, %c0_46] : memref<9x16x16xf32, #tpu.memory_space<vmem>>, vector<1x16x16xf32>
      %65 = vector.shape_cast %64 : vector<1x16x16xf32> to vector<16x16xf32>
      %cst_47 = arith.constant dense<0.000000e+00> : vector<16x28xf32>
      %66 = tpu.matmul %65, %63, %cst_47 {dimension_numbers = #tpu.dot_dimension_numbers<[1], [0], [0], [1], [0, 0, 1, 1], [], []>} : vector<16x16xf32>, vector<16x28xf32>, vector<16x28xf32> -> vector<16x28xf32>
      %67 = arith.addf %62, %66 : vector<16x28xf32>
      %68 = vector.extract_strided_slice %14 {offsets = [0, 2], sizes = [16, 28], strides = [1, 1]} : vector<16x30xf32> to vector<16x28xf32>
      %c8 = arith.constant 8 : index
      %c0_48 = arith.constant 0 : index
      %c0_49 = arith.constant 0 : index
      %69 = vector.load %arg2[%c8, %c0_48, %c0_49] : memref<9x16x16xf32, #tpu.memory_space<vmem>>, vector<1x16x16xf32>
      %70 = vector.shape_cast %69 : vector<1x16x16xf32> to vector<16x16xf32>
      %cst_50 = arith.constant dense<0.000000e+00> : vector<16x28xf32>
      %71 = tpu.matmul %70, %68, %cst_50 {dimension_numbers = #tpu.dot_dimension_numbers<[1], [0], [0], [1], [0, 0, 1, 1], [], []>} : vector<16x16xf32>, vector<16x28xf32>, vector<16x28xf32> -> vector<16x28xf32>
      %72 = arith.addf %67, %71 : vector<16x28xf32>
      %73 = vector.broadcast %0 : vector<16x1xf32> to vector<16x28xf32>
      %74 = arith.addf %72, %73 : vector<16x28xf32>
      %cst_51 = arith.constant 0.000000e+00 : f32
      %75 = vector.broadcast %cst_51 : f32 to vector<16x28xf32>
      %76 = arith.maximumf %74, %75 : vector<16x28xf32>
      %cst_52 = arith.constant 0.000000e+00 : f32
      %77 = vector.broadcast %cst_52 : f32 to vector<16x28xf32>
      %78 = vector.extract_strided_slice %10 {offsets = [0, 0], sizes = [16, 28], strides = [1, 1]} : vector<16x30xf32> to vector<16x28xf32>
      %c0_53 = arith.constant 0 : index
      %c0_54 = arith.constant 0 : index
      %c0_55 = arith.constant 0 : index
      %79 = vector.load %arg2[%c0_53, %c0_54, %c0_55] : memref<9x16x16xf32, #tpu.memory_space<vmem>>, vector<1x16x16xf32>
      %80 = vector.shape_cast %79 : vector<1x16x16xf32> to vector<16x16xf32>
      %cst_56 = arith.constant dense<0.000000e+00> : vector<16x28xf32>
      %81 = tpu.matmul %80, %78, %cst_56 {dimension_numbers = #tpu.dot_dimension_numbers<[1], [0], [0], [1], [0, 0, 1, 1], [], []>} : vector<16x16xf32>, vector<16x28xf32>, vector<16x28xf32> -> vector<16x28xf32>
      %82 = arith.addf %77, %81 : vector<16x28xf32>
      %83 = vector.extract_strided_slice %10 {offsets = [0, 1], sizes = [16, 28], strides = [1, 1]} : vector<16x30xf32> to vector<16x28xf32>
      %c1_57 = arith.constant 1 : index
      %c0_58 = arith.constant 0 : index
      %c0_59 = arith.constant 0 : index
      %84 = vector.load %arg2[%c1_57, %c0_58, %c0_59] : memref<9x16x16xf32, #tpu.memory_space<vmem>>, vector<1x16x16xf32>
      %85 = vector.shape_cast %84 : vector<1x16x16xf32> to vector<16x16xf32>
      %cst_60 = arith.constant dense<0.000000e+00> : vector<16x28xf32>
      %86 = tpu.matmul %85, %83, %cst_60 {dimension_numbers = #tpu.dot_dimension_numbers<[1], [0], [0], [1], [0, 0, 1, 1], [], []>} : vector<16x16xf32>, vector<16x28xf32>, vector<16x28xf32> -> vector<16x28xf32>
      %87 = arith.addf %82, %86 : vector<16x28xf32>
      %88 = vector.extract_strided_slice %10 {offsets = [0, 2], sizes = [16, 28], strides = [1, 1]} : vector<16x30xf32> to vector<16x28xf32>
      %c2_61 = arith.constant 2 : index
      %c0_62 = arith.constant 0 : index
      %c0_63 = arith.constant 0 : index
      %89 = vector.load %arg2[%c2_61, %c0_62, %c0_63] : memref<9x16x16xf32, #tpu.memory_space<vmem>>, vector<1x16x16xf32>
      %90 = vector.shape_cast %89 : vector<1x16x16xf32> to vector<16x16xf32>
      %cst_64 = arith.constant dense<0.000000e+00> : vector<16x28xf32>
      %91 = tpu.matmul %90, %88, %cst_64 {dimension_numbers = #tpu.dot_dimension_numbers<[1], [0], [0], [1], [0, 0, 1, 1], [], []>} : vector<16x16xf32>, vector<16x28xf32>, vector<16x28xf32> -> vector<16x28xf32>
      %92 = arith.addf %87, %91 : vector<16x28xf32>
      %93 = vector.extract_strided_slice %14 {offsets = [0, 0], sizes = [16, 28], strides = [1, 1]} : vector<16x30xf32> to vector<16x28xf32>
      %c3_65 = arith.constant 3 : index
      %c0_66 = arith.constant 0 : index
      %c0_67 = arith.constant 0 : index
      %94 = vector.load %arg2[%c3_65, %c0_66, %c0_67] : memref<9x16x16xf32, #tpu.memory_space<vmem>>, vector<1x16x16xf32>
      %95 = vector.shape_cast %94 : vector<1x16x16xf32> to vector<16x16xf32>
      %cst_68 = arith.constant dense<0.000000e+00> : vector<16x28xf32>
      %96 = tpu.matmul %95, %93, %cst_68 {dimension_numbers = #tpu.dot_dimension_numbers<[1], [0], [0], [1], [0, 0, 1, 1], [], []>} : vector<16x16xf32>, vector<16x28xf32>, vector<16x28xf32> -> vector<16x28xf32>
      %97 = arith.addf %92, %96 : vector<16x28xf32>
      %98 = vector.extract_strided_slice %14 {offsets = [0, 1], sizes = [16, 28], strides = [1, 1]} : vector<16x30xf32> to vector<16x28xf32>
      %c4_69 = arith.constant 4 : index
      %c0_70 = arith.constant 0 : index
      %c0_71 = arith.constant 0 : index
      %99 = vector.load %arg2[%c4_69, %c0_70, %c0_71] : memref<9x16x16xf32, #tpu.memory_space<vmem>>, vector<1x16x16xf32>
      %100 = vector.shape_cast %99 : vector<1x16x16xf32> to vector<16x16xf32>
      %cst_72 = arith.constant dense<0.000000e+00> : vector<16x28xf32>
      %101 = tpu.matmul %100, %98, %cst_72 {dimension_numbers = #tpu.dot_dimension_numbers<[1], [0], [0], [1], [0, 0, 1, 1], [], []>} : vector<16x16xf32>, vector<16x28xf32>, vector<16x28xf32> -> vector<16x28xf32>
      %102 = arith.addf %97, %101 : vector<16x28xf32>
      %103 = vector.extract_strided_slice %14 {offsets = [0, 2], sizes = [16, 28], strides = [1, 1]} : vector<16x30xf32> to vector<16x28xf32>
      %c5_73 = arith.constant 5 : index
      %c0_74 = arith.constant 0 : index
      %c0_75 = arith.constant 0 : index
      %104 = vector.load %arg2[%c5_73, %c0_74, %c0_75] : memref<9x16x16xf32, #tpu.memory_space<vmem>>, vector<1x16x16xf32>
      %105 = vector.shape_cast %104 : vector<1x16x16xf32> to vector<16x16xf32>
      %cst_76 = arith.constant dense<0.000000e+00> : vector<16x28xf32>
      %106 = tpu.matmul %105, %103, %cst_76 {dimension_numbers = #tpu.dot_dimension_numbers<[1], [0], [0], [1], [0, 0, 1, 1], [], []>} : vector<16x16xf32>, vector<16x28xf32>, vector<16x28xf32> -> vector<16x28xf32>
      %107 = arith.addf %102, %106 : vector<16x28xf32>
      %108 = vector.extract_strided_slice %18 {offsets = [0, 0], sizes = [16, 28], strides = [1, 1]} : vector<16x30xf32> to vector<16x28xf32>
      %c6_77 = arith.constant 6 : index
      %c0_78 = arith.constant 0 : index
      %c0_79 = arith.constant 0 : index
      %109 = vector.load %arg2[%c6_77, %c0_78, %c0_79] : memref<9x16x16xf32, #tpu.memory_space<vmem>>, vector<1x16x16xf32>
      %110 = vector.shape_cast %109 : vector<1x16x16xf32> to vector<16x16xf32>
      %cst_80 = arith.constant dense<0.000000e+00> : vector<16x28xf32>
      %111 = tpu.matmul %110, %108, %cst_80 {dimension_numbers = #tpu.dot_dimension_numbers<[1], [0], [0], [1], [0, 0, 1, 1], [], []>} : vector<16x16xf32>, vector<16x28xf32>, vector<16x28xf32> -> vector<16x28xf32>
      %112 = arith.addf %107, %111 : vector<16x28xf32>
      %113 = vector.extract_strided_slice %18 {offsets = [0, 1], sizes = [16, 28], strides = [1, 1]} : vector<16x30xf32> to vector<16x28xf32>
      %c7_81 = arith.constant 7 : index
      %c0_82 = arith.constant 0 : index
      %c0_83 = arith.constant 0 : index
      %114 = vector.load %arg2[%c7_81, %c0_82, %c0_83] : memref<9x16x16xf32, #tpu.memory_space<vmem>>, vector<1x16x16xf32>
      %115 = vector.shape_cast %114 : vector<1x16x16xf32> to vector<16x16xf32>
      %cst_84 = arith.constant dense<0.000000e+00> : vector<16x28xf32>
      %116 = tpu.matmul %115, %113, %cst_84 {dimension_numbers = #tpu.dot_dimension_numbers<[1], [0], [0], [1], [0, 0, 1, 1], [], []>} : vector<16x16xf32>, vector<16x28xf32>, vector<16x28xf32> -> vector<16x28xf32>
      %117 = arith.addf %112, %116 : vector<16x28xf32>
      %118 = vector.extract_strided_slice %18 {offsets = [0, 2], sizes = [16, 28], strides = [1, 1]} : vector<16x30xf32> to vector<16x28xf32>
      %c8_85 = arith.constant 8 : index
      %c0_86 = arith.constant 0 : index
      %c0_87 = arith.constant 0 : index
      %119 = vector.load %arg2[%c8_85, %c0_86, %c0_87] : memref<9x16x16xf32, #tpu.memory_space<vmem>>, vector<1x16x16xf32>
      %120 = vector.shape_cast %119 : vector<1x16x16xf32> to vector<16x16xf32>
      %cst_88 = arith.constant dense<0.000000e+00> : vector<16x28xf32>
      %121 = tpu.matmul %120, %118, %cst_88 {dimension_numbers = #tpu.dot_dimension_numbers<[1], [0], [0], [1], [0, 0, 1, 1], [], []>} : vector<16x16xf32>, vector<16x28xf32>, vector<16x28xf32> -> vector<16x28xf32>
      %122 = arith.addf %117, %121 : vector<16x28xf32>
      %123 = vector.broadcast %0 : vector<16x1xf32> to vector<16x28xf32>
      %124 = arith.addf %122, %123 : vector<16x28xf32>
      %cst_89 = arith.constant 0.000000e+00 : f32
      %125 = vector.broadcast %cst_89 : f32 to vector<16x28xf32>
      %126 = arith.maximumf %124, %125 : vector<16x28xf32>
      %127 = arith.maximumf %76, %126 : vector<16x28xf32>
      %cst_90 = arith.constant 0.000000e+00 : f32
      %128 = vector.broadcast %cst_90 : f32 to vector<16x28xf32>
      %129 = vector.extract_strided_slice %14 {offsets = [0, 0], sizes = [16, 28], strides = [1, 1]} : vector<16x30xf32> to vector<16x28xf32>
      %c0_91 = arith.constant 0 : index
      %c0_92 = arith.constant 0 : index
      %c0_93 = arith.constant 0 : index
      %130 = vector.load %arg2[%c0_91, %c0_92, %c0_93] : memref<9x16x16xf32, #tpu.memory_space<vmem>>, vector<1x16x16xf32>
      %131 = vector.shape_cast %130 : vector<1x16x16xf32> to vector<16x16xf32>
      %cst_94 = arith.constant dense<0.000000e+00> : vector<16x28xf32>
      %132 = tpu.matmul %131, %129, %cst_94 {dimension_numbers = #tpu.dot_dimension_numbers<[1], [0], [0], [1], [0, 0, 1, 1], [], []>} : vector<16x16xf32>, vector<16x28xf32>, vector<16x28xf32> -> vector<16x28xf32>
      %133 = arith.addf %128, %132 : vector<16x28xf32>
      %134 = vector.extract_strided_slice %14 {offsets = [0, 1], sizes = [16, 28], strides = [1, 1]} : vector<16x30xf32> to vector<16x28xf32>
      %c1_95 = arith.constant 1 : index
      %c0_96 = arith.constant 0 : index
      %c0_97 = arith.constant 0 : index
      %135 = vector.load %arg2[%c1_95, %c0_96, %c0_97] : memref<9x16x16xf32, #tpu.memory_space<vmem>>, vector<1x16x16xf32>
      %136 = vector.shape_cast %135 : vector<1x16x16xf32> to vector<16x16xf32>
      %cst_98 = arith.constant dense<0.000000e+00> : vector<16x28xf32>
      %137 = tpu.matmul %136, %134, %cst_98 {dimension_numbers = #tpu.dot_dimension_numbers<[1], [0], [0], [1], [0, 0, 1, 1], [], []>} : vector<16x16xf32>, vector<16x28xf32>, vector<16x28xf32> -> vector<16x28xf32>
      %138 = arith.addf %133, %137 : vector<16x28xf32>
      %139 = vector.extract_strided_slice %14 {offsets = [0, 2], sizes = [16, 28], strides = [1, 1]} : vector<16x30xf32> to vector<16x28xf32>
      %c2_99 = arith.constant 2 : index
      %c0_100 = arith.constant 0 : index
      %c0_101 = arith.constant 0 : index
      %140 = vector.load %arg2[%c2_99, %c0_100, %c0_101] : memref<9x16x16xf32, #tpu.memory_space<vmem>>, vector<1x16x16xf32>
      %141 = vector.shape_cast %140 : vector<1x16x16xf32> to vector<16x16xf32>
      %cst_102 = arith.constant dense<0.000000e+00> : vector<16x28xf32>
      %142 = tpu.matmul %141, %139, %cst_102 {dimension_numbers = #tpu.dot_dimension_numbers<[1], [0], [0], [1], [0, 0, 1, 1], [], []>} : vector<16x16xf32>, vector<16x28xf32>, vector<16x28xf32> -> vector<16x28xf32>
      %143 = arith.addf %138, %142 : vector<16x28xf32>
      %144 = vector.extract_strided_slice %18 {offsets = [0, 0], sizes = [16, 28], strides = [1, 1]} : vector<16x30xf32> to vector<16x28xf32>
      %c3_103 = arith.constant 3 : index
      %c0_104 = arith.constant 0 : index
      %c0_105 = arith.constant 0 : index
      %145 = vector.load %arg2[%c3_103, %c0_104, %c0_105] : memref<9x16x16xf32, #tpu.memory_space<vmem>>, vector<1x16x16xf32>
      %146 = vector.shape_cast %145 : vector<1x16x16xf32> to vector<16x16xf32>
      %cst_106 = arith.constant dense<0.000000e+00> : vector<16x28xf32>
      %147 = tpu.matmul %146, %144, %cst_106 {dimension_numbers = #tpu.dot_dimension_numbers<[1], [0], [0], [1], [0, 0, 1, 1], [], []>} : vector<16x16xf32>, vector<16x28xf32>, vector<16x28xf32> -> vector<16x28xf32>
      %148 = arith.addf %143, %147 : vector<16x28xf32>
      %149 = vector.extract_strided_slice %18 {offsets = [0, 1], sizes = [16, 28], strides = [1, 1]} : vector<16x30xf32> to vector<16x28xf32>
      %c4_107 = arith.constant 4 : index
      %c0_108 = arith.constant 0 : index
      %c0_109 = arith.constant 0 : index
      %150 = vector.load %arg2[%c4_107, %c0_108, %c0_109] : memref<9x16x16xf32, #tpu.memory_space<vmem>>, vector<1x16x16xf32>
      %151 = vector.shape_cast %150 : vector<1x16x16xf32> to vector<16x16xf32>
      %cst_110 = arith.constant dense<0.000000e+00> : vector<16x28xf32>
      %152 = tpu.matmul %151, %149, %cst_110 {dimension_numbers = #tpu.dot_dimension_numbers<[1], [0], [0], [1], [0, 0, 1, 1], [], []>} : vector<16x16xf32>, vector<16x28xf32>, vector<16x28xf32> -> vector<16x28xf32>
      %153 = arith.addf %148, %152 : vector<16x28xf32>
      %154 = vector.extract_strided_slice %18 {offsets = [0, 2], sizes = [16, 28], strides = [1, 1]} : vector<16x30xf32> to vector<16x28xf32>
      %c5_111 = arith.constant 5 : index
      %c0_112 = arith.constant 0 : index
      %c0_113 = arith.constant 0 : index
      %155 = vector.load %arg2[%c5_111, %c0_112, %c0_113] : memref<9x16x16xf32, #tpu.memory_space<vmem>>, vector<1x16x16xf32>
      %156 = vector.shape_cast %155 : vector<1x16x16xf32> to vector<16x16xf32>
      %cst_114 = arith.constant dense<0.000000e+00> : vector<16x28xf32>
      %157 = tpu.matmul %156, %154, %cst_114 {dimension_numbers = #tpu.dot_dimension_numbers<[1], [0], [0], [1], [0, 0, 1, 1], [], []>} : vector<16x16xf32>, vector<16x28xf32>, vector<16x28xf32> -> vector<16x28xf32>
      %158 = arith.addf %153, %157 : vector<16x28xf32>
      %159 = vector.extract_strided_slice %22 {offsets = [0, 0], sizes = [16, 28], strides = [1, 1]} : vector<16x30xf32> to vector<16x28xf32>
      %c6_115 = arith.constant 6 : index
      %c0_116 = arith.constant 0 : index
      %c0_117 = arith.constant 0 : index
      %160 = vector.load %arg2[%c6_115, %c0_116, %c0_117] : memref<9x16x16xf32, #tpu.memory_space<vmem>>, vector<1x16x16xf32>
      %161 = vector.shape_cast %160 : vector<1x16x16xf32> to vector<16x16xf32>
      %cst_118 = arith.constant dense<0.000000e+00> : vector<16x28xf32>
      %162 = tpu.matmul %161, %159, %cst_118 {dimension_numbers = #tpu.dot_dimension_numbers<[1], [0], [0], [1], [0, 0, 1, 1], [], []>} : vector<16x16xf32>, vector<16x28xf32>, vector<16x28xf32> -> vector<16x28xf32>
      %163 = arith.addf %158, %162 : vector<16x28xf32>
      %164 = vector.extract_strided_slice %22 {offsets = [0, 1], sizes = [16, 28], strides = [1, 1]} : vector<16x30xf32> to vector<16x28xf32>
      %c7_119 = arith.constant 7 : index
      %c0_120 = arith.constant 0 : index
      %c0_121 = arith.constant 0 : index
      %165 = vector.load %arg2[%c7_119, %c0_120, %c0_121] : memref<9x16x16xf32, #tpu.memory_space<vmem>>, vector<1x16x16xf32>
      %166 = vector.shape_cast %165 : vector<1x16x16xf32> to vector<16x16xf32>
      %cst_122 = arith.constant dense<0.000000e+00> : vector<16x28xf32>
      %167 = tpu.matmul %166, %164, %cst_122 {dimension_numbers = #tpu.dot_dimension_numbers<[1], [0], [0], [1], [0, 0, 1, 1], [], []>} : vector<16x16xf32>, vector<16x28xf32>, vector<16x28xf32> -> vector<16x28xf32>
      %168 = arith.addf %163, %167 : vector<16x28xf32>
      %169 = vector.extract_strided_slice %22 {offsets = [0, 2], sizes = [16, 28], strides = [1, 1]} : vector<16x30xf32> to vector<16x28xf32>
      %c8_123 = arith.constant 8 : index
      %c0_124 = arith.constant 0 : index
      %c0_125 = arith.constant 0 : index
      %170 = vector.load %arg2[%c8_123, %c0_124, %c0_125] : memref<9x16x16xf32, #tpu.memory_space<vmem>>, vector<1x16x16xf32>
      %171 = vector.shape_cast %170 : vector<1x16x16xf32> to vector<16x16xf32>
      %cst_126 = arith.constant dense<0.000000e+00> : vector<16x28xf32>
      %172 = tpu.matmul %171, %169, %cst_126 {dimension_numbers = #tpu.dot_dimension_numbers<[1], [0], [0], [1], [0, 0, 1, 1], [], []>} : vector<16x16xf32>, vector<16x28xf32>, vector<16x28xf32> -> vector<16x28xf32>
      %173 = arith.addf %168, %172 : vector<16x28xf32>
      %174 = vector.broadcast %0 : vector<16x1xf32> to vector<16x28xf32>
      %175 = arith.addf %173, %174 : vector<16x28xf32>
      %cst_127 = arith.constant 0.000000e+00 : f32
      %176 = vector.broadcast %cst_127 : f32 to vector<16x28xf32>
      %177 = arith.maximumf %175, %176 : vector<16x28xf32>
      %178 = arith.maximumf %127, %177 : vector<16x28xf32>
      %cst_128 = arith.constant 0.000000e+00 : f32
      %179 = vector.broadcast %cst_128 : f32 to vector<16x28xf32>
      %180 = vector.extract_strided_slice %18 {offsets = [0, 0], sizes = [16, 28], strides = [1, 1]} : vector<16x30xf32> to vector<16x28xf32>
      %c0_129 = arith.constant 0 : index
      %c0_130 = arith.constant 0 : index
      %c0_131 = arith.constant 0 : index
      %181 = vector.load %arg2[%c0_129, %c0_130, %c0_131] : memref<9x16x16xf32, #tpu.memory_space<vmem>>, vector<1x16x16xf32>
      %182 = vector.shape_cast %181 : vector<1x16x16xf32> to vector<16x16xf32>
      %cst_132 = arith.constant dense<0.000000e+00> : vector<16x28xf32>
      %183 = tpu.matmul %182, %180, %cst_132 {dimension_numbers = #tpu.dot_dimension_numbers<[1], [0], [0], [1], [0, 0, 1, 1], [], []>} : vector<16x16xf32>, vector<16x28xf32>, vector<16x28xf32> -> vector<16x28xf32>
      %184 = arith.addf %179, %183 : vector<16x28xf32>
      %185 = vector.extract_strided_slice %18 {offsets = [0, 1], sizes = [16, 28], strides = [1, 1]} : vector<16x30xf32> to vector<16x28xf32>
      %c1_133 = arith.constant 1 : index
      %c0_134 = arith.constant 0 : index
      %c0_135 = arith.constant 0 : index
      %186 = vector.load %arg2[%c1_133, %c0_134, %c0_135] : memref<9x16x16xf32, #tpu.memory_space<vmem>>, vector<1x16x16xf32>
      %187 = vector.shape_cast %186 : vector<1x16x16xf32> to vector<16x16xf32>
      %cst_136 = arith.constant dense<0.000000e+00> : vector<16x28xf32>
      %188 = tpu.matmul %187, %185, %cst_136 {dimension_numbers = #tpu.dot_dimension_numbers<[1], [0], [0], [1], [0, 0, 1, 1], [], []>} : vector<16x16xf32>, vector<16x28xf32>, vector<16x28xf32> -> vector<16x28xf32>
      %189 = arith.addf %184, %188 : vector<16x28xf32>
      %190 = vector.extract_strided_slice %18 {offsets = [0, 2], sizes = [16, 28], strides = [1, 1]} : vector<16x30xf32> to vector<16x28xf32>
      %c2_137 = arith.constant 2 : index
      %c0_138 = arith.constant 0 : index
      %c0_139 = arith.constant 0 : index
      %191 = vector.load %arg2[%c2_137, %c0_138, %c0_139] : memref<9x16x16xf32, #tpu.memory_space<vmem>>, vector<1x16x16xf32>
      %192 = vector.shape_cast %191 : vector<1x16x16xf32> to vector<16x16xf32>
      %cst_140 = arith.constant dense<0.000000e+00> : vector<16x28xf32>
      %193 = tpu.matmul %192, %190, %cst_140 {dimension_numbers = #tpu.dot_dimension_numbers<[1], [0], [0], [1], [0, 0, 1, 1], [], []>} : vector<16x16xf32>, vector<16x28xf32>, vector<16x28xf32> -> vector<16x28xf32>
      %194 = arith.addf %189, %193 : vector<16x28xf32>
      %195 = vector.extract_strided_slice %22 {offsets = [0, 0], sizes = [16, 28], strides = [1, 1]} : vector<16x30xf32> to vector<16x28xf32>
      %c3_141 = arith.constant 3 : index
      %c0_142 = arith.constant 0 : index
      %c0_143 = arith.constant 0 : index
      %196 = vector.load %arg2[%c3_141, %c0_142, %c0_143] : memref<9x16x16xf32, #tpu.memory_space<vmem>>, vector<1x16x16xf32>
      %197 = vector.shape_cast %196 : vector<1x16x16xf32> to vector<16x16xf32>
      %cst_144 = arith.constant dense<0.000000e+00> : vector<16x28xf32>
      %198 = tpu.matmul %197, %195, %cst_144 {dimension_numbers = #tpu.dot_dimension_numbers<[1], [0], [0], [1], [0, 0, 1, 1], [], []>} : vector<16x16xf32>, vector<16x28xf32>, vector<16x28xf32> -> vector<16x28xf32>
      %199 = arith.addf %194, %198 : vector<16x28xf32>
      %200 = vector.extract_strided_slice %22 {offsets = [0, 1], sizes = [16, 28], strides = [1, 1]} : vector<16x30xf32> to vector<16x28xf32>
      %c4_145 = arith.constant 4 : index
      %c0_146 = arith.constant 0 : index
      %c0_147 = arith.constant 0 : index
      %201 = vector.load %arg2[%c4_145, %c0_146, %c0_147] : memref<9x16x16xf32, #tpu.memory_space<vmem>>, vector<1x16x16xf32>
      %202 = vector.shape_cast %201 : vector<1x16x16xf32> to vector<16x16xf32>
      %cst_148 = arith.constant dense<0.000000e+00> : vector<16x28xf32>
      %203 = tpu.matmul %202, %200, %cst_148 {dimension_numbers = #tpu.dot_dimension_numbers<[1], [0], [0], [1], [0, 0, 1, 1], [], []>} : vector<16x16xf32>, vector<16x28xf32>, vector<16x28xf32> -> vector<16x28xf32>
      %204 = arith.addf %199, %203 : vector<16x28xf32>
      %205 = vector.extract_strided_slice %22 {offsets = [0, 2], sizes = [16, 28], strides = [1, 1]} : vector<16x30xf32> to vector<16x28xf32>
      %c5_149 = arith.constant 5 : index
      %c0_150 = arith.constant 0 : index
      %c0_151 = arith.constant 0 : index
      %206 = vector.load %arg2[%c5_149, %c0_150, %c0_151] : memref<9x16x16xf32, #tpu.memory_space<vmem>>, vector<1x16x16xf32>
      %207 = vector.shape_cast %206 : vector<1x16x16xf32> to vector<16x16xf32>
      %cst_152 = arith.constant dense<0.000000e+00> : vector<16x28xf32>
      %208 = tpu.matmul %207, %205, %cst_152 {dimension_numbers = #tpu.dot_dimension_numbers<[1], [0], [0], [1], [0, 0, 1, 1], [], []>} : vector<16x16xf32>, vector<16x28xf32>, vector<16x28xf32> -> vector<16x28xf32>
      %209 = arith.addf %204, %208 : vector<16x28xf32>
      %210 = vector.extract_strided_slice %26 {offsets = [0, 0], sizes = [16, 28], strides = [1, 1]} : vector<16x30xf32> to vector<16x28xf32>
      %c6_153 = arith.constant 6 : index
      %c0_154 = arith.constant 0 : index
      %c0_155 = arith.constant 0 : index
      %211 = vector.load %arg2[%c6_153, %c0_154, %c0_155] : memref<9x16x16xf32, #tpu.memory_space<vmem>>, vector<1x16x16xf32>
      %212 = vector.shape_cast %211 : vector<1x16x16xf32> to vector<16x16xf32>
      %cst_156 = arith.constant dense<0.000000e+00> : vector<16x28xf32>
      %213 = tpu.matmul %212, %210, %cst_156 {dimension_numbers = #tpu.dot_dimension_numbers<[1], [0], [0], [1], [0, 0, 1, 1], [], []>} : vector<16x16xf32>, vector<16x28xf32>, vector<16x28xf32> -> vector<16x28xf32>
      %214 = arith.addf %209, %213 : vector<16x28xf32>
      %215 = vector.extract_strided_slice %26 {offsets = [0, 1], sizes = [16, 28], strides = [1, 1]} : vector<16x30xf32> to vector<16x28xf32>
      %c7_157 = arith.constant 7 : index
      %c0_158 = arith.constant 0 : index
      %c0_159 = arith.constant 0 : index
      %216 = vector.load %arg2[%c7_157, %c0_158, %c0_159] : memref<9x16x16xf32, #tpu.memory_space<vmem>>, vector<1x16x16xf32>
      %217 = vector.shape_cast %216 : vector<1x16x16xf32> to vector<16x16xf32>
      %cst_160 = arith.constant dense<0.000000e+00> : vector<16x28xf32>
      %218 = tpu.matmul %217, %215, %cst_160 {dimension_numbers = #tpu.dot_dimension_numbers<[1], [0], [0], [1], [0, 0, 1, 1], [], []>} : vector<16x16xf32>, vector<16x28xf32>, vector<16x28xf32> -> vector<16x28xf32>
      %219 = arith.addf %214, %218 : vector<16x28xf32>
      %220 = vector.extract_strided_slice %26 {offsets = [0, 2], sizes = [16, 28], strides = [1, 1]} : vector<16x30xf32> to vector<16x28xf32>
      %c8_161 = arith.constant 8 : index
      %c0_162 = arith.constant 0 : index
      %c0_163 = arith.constant 0 : index
      %221 = vector.load %arg2[%c8_161, %c0_162, %c0_163] : memref<9x16x16xf32, #tpu.memory_space<vmem>>, vector<1x16x16xf32>
      %222 = vector.shape_cast %221 : vector<1x16x16xf32> to vector<16x16xf32>
      %cst_164 = arith.constant dense<0.000000e+00> : vector<16x28xf32>
      %223 = tpu.matmul %222, %220, %cst_164 {dimension_numbers = #tpu.dot_dimension_numbers<[1], [0], [0], [1], [0, 0, 1, 1], [], []>} : vector<16x16xf32>, vector<16x28xf32>, vector<16x28xf32> -> vector<16x28xf32>
      %224 = arith.addf %219, %223 : vector<16x28xf32>
      %225 = vector.broadcast %0 : vector<16x1xf32> to vector<16x28xf32>
      %226 = arith.addf %224, %225 : vector<16x28xf32>
      %cst_165 = arith.constant 0.000000e+00 : f32
      %227 = vector.broadcast %cst_165 : f32 to vector<16x28xf32>
      %228 = arith.maximumf %226, %227 : vector<16x28xf32>
      %229 = arith.maximumf %178, %228 : vector<16x28xf32>
      %c0_166 = arith.constant 0 : index
      %c0_167 = arith.constant 0 : index
      %c0_168 = arith.constant 0 : index
      %230 = vector.load %arg4[%c0_166, %c0_167, %c0_168] : memref<4x28x7xf32, #tpu.memory_space<vmem>>, vector<1x28x7xf32>
      %231 = vector.shape_cast %230 : vector<1x28x7xf32> to vector<28x7xf32>
      %cst_169 = arith.constant dense<0.000000e+00> : vector<16x7xf32>
      %232 = tpu.matmul %229, %231, %cst_169 {dimension_numbers = #tpu.dot_dimension_numbers<[1], [0], [0], [1], [0, 0, 1, 1], [], []>} : vector<16x28xf32>, vector<28x7xf32>, vector<16x7xf32> -> vector<16x7xf32>
      %c1_170 = arith.constant 1 : index
      %c0_171 = arith.constant 0 : index
      %c0_172 = arith.constant 0 : index
      %233 = vector.load %arg4[%c1_170, %c0_171, %c0_172] : memref<4x28x7xf32, #tpu.memory_space<vmem>>, vector<1x28x7xf32>
      %234 = vector.shape_cast %233 : vector<1x28x7xf32> to vector<28x7xf32>
      %cst_173 = arith.constant dense<0.000000e+00> : vector<16x7xf32>
      %235 = tpu.matmul %229, %234, %cst_173 {dimension_numbers = #tpu.dot_dimension_numbers<[1], [0], [0], [1], [0, 0, 1, 1], [], []>} : vector<16x28xf32>, vector<28x7xf32>, vector<16x7xf32> -> vector<16x7xf32>
      %236 = arith.maximumf %232, %235 : vector<16x7xf32>
      %c2_174 = arith.constant 2 : index
      %c0_175 = arith.constant 0 : index
      %c0_176 = arith.constant 0 : index
      %237 = vector.load %arg4[%c2_174, %c0_175, %c0_176] : memref<4x28x7xf32, #tpu.memory_space<vmem>>, vector<1x28x7xf32>
      %238 = vector.shape_cast %237 : vector<1x28x7xf32> to vector<28x7xf32>
      %cst_177 = arith.constant dense<0.000000e+00> : vector<16x7xf32>
      %239 = tpu.matmul %229, %238, %cst_177 {dimension_numbers = #tpu.dot_dimension_numbers<[1], [0], [0], [1], [0, 0, 1, 1], [], []>} : vector<16x28xf32>, vector<28x7xf32>, vector<16x7xf32> -> vector<16x7xf32>
      %240 = arith.maximumf %236, %239 : vector<16x7xf32>
      %c3_178 = arith.constant 3 : index
      %c0_179 = arith.constant 0 : index
      %c0_180 = arith.constant 0 : index
      %241 = vector.load %arg4[%c3_178, %c0_179, %c0_180] : memref<4x28x7xf32, #tpu.memory_space<vmem>>, vector<1x28x7xf32>
      %242 = vector.shape_cast %241 : vector<1x28x7xf32> to vector<28x7xf32>
      %cst_181 = arith.constant dense<0.000000e+00> : vector<16x7xf32>
      %243 = tpu.matmul %229, %242, %cst_181 {dimension_numbers = #tpu.dot_dimension_numbers<[1], [0], [0], [1], [0, 0, 1, 1], [], []>} : vector<16x28xf32>, vector<28x7xf32>, vector<16x7xf32> -> vector<16x7xf32>
      %244 = arith.maximumf %240, %243 : vector<16x7xf32>
      %c0_182 = arith.constant 0 : index
      %245 = arith.index_cast %arg6 : i32 to index
      %c0_183 = arith.constant 0 : index
      %c0_184 = arith.constant 0 : index
      %246 = vector.load %arg5[%c0_182, %245, %c0_183, %c0_184] : memref<1x7x16x7xf32, #tpu.memory_space<vmem>>, vector<1x1x16x7xf32>
      %247 = vector.shape_cast %246 : vector<1x1x16x7xf32> to vector<16x7xf32>
      %248 = vector.shape_cast %244 : vector<16x7xf32> to vector<1x1x16x7xf32>
      tpu.vector_store %arg5[%c0_182, %245, %c0_183, %c0_184], %248 {strides = array<i32>} : memref<1x7x16x7xf32, #tpu.memory_space<vmem>>, vector<1x1x16x7xf32>,
    }
    %c7_i32_1 = arith.constant 7 : i32
    return
  }
  func.func @transform_0(%arg0: i32) -> (i32, i32, i32, i32) {
    %c0_i32 = arith.constant 0 : i32
    %c0_i32_0 = arith.constant 0 : i32
    %c0_i32_1 = arith.constant 0 : i32
    %c0_i32_2 = arith.constant 0 : i32
    return %arg0, %c0_i32, %c0_i32_0, %c0_i32_1 : i32, i32, i32, i32
  }
  func.func @transform_1(%arg0: i32) -> (i32, i32, i32) {
    %c0_i32 = arith.constant 0 : i32
    %c0_i32_0 = arith.constant 0 : i32
    %c0_i32_1 = arith.constant 0 : i32
    %c0_i32_2 = arith.constant 0 : i32
    return %c0_i32, %c0_i32_0, %c0_i32_1 : i32, i32, i32
  }
  func.func @transform_2(%arg0: i32) -> (i32, i32) {
    %c0_i32 = arith.constant 0 : i32
    %c0_i32_0 = arith.constant 0 : i32
    %c0_i32_1 = arith.constant 0 : i32
    return %c0_i32, %c0_i32_0 : i32, i32
  }
  func.func @transform_3(%arg0: i32) -> (i32, i32, i32) {
    %c0_i32 = arith.constant 0 : i32
    %c0_i32_0 = arith.constant 0 : i32
    %c0_i32_1 = arith.constant 0 : i32
    %c0_i32_2 = arith.constant 0 : i32
    return %c0_i32, %c0_i32_0, %c0_i32_1 : i32, i32, i32
  }
  func.func @transform_4(%arg0: i32) -> (i32, i32, i32, i32) {
    %c0_i32 = arith.constant 0 : i32
    %c0_i32_0 = arith.constant 0 : i32
    %c0_i32_1 = arith.constant 0 : i32
    %c0_i32_2 = arith.constant 0 : i32
    return %arg0, %c0_i32, %c0_i32_0, %c0_i32_1 : i32, i32, i32, i32
  }
}

module attributes {stable_mosaic.version = 11 : i64} {
  func.func @_fc_l2_kernel(%arg0: i32, %arg1: memref<2x784xf32, #tpu.memory_space<vmem>>, %arg2: memref<784x2xf32, #tpu.memory_space<vmem>>, %arg3: memref<1x2xf32, #tpu.memory_space<vmem>>, %arg4: memref<2x2xf32, #tpu.memory_space<vmem>>) attributes {dimension_semantics = [#tpu.dimension_semantics<arbitrary>], iteration_bounds = array<i64: 1>, scalar_prefetch = 0 : i64, scratch_operands = 0 : i64, tpu.core_type = #tpu.core_type<tc>, window_params = [{pipeline_mode = #tpu.pipeline_mode<synchronous>, transform_indices = @transform_0, window_bounds = array<i64: 2, 784>}, {pipeline_mode = #tpu.pipeline_mode<synchronous>, transform_indices = @transform_1, window_bounds = array<i64: 784, 2>}, {pipeline_mode = #tpu.pipeline_mode<synchronous>, transform_indices = @transform_2, window_bounds = array<i64: 1, 2>}, {pipeline_mode = #tpu.pipeline_mode<synchronous>, transform_indices = @transform_3, window_bounds = array<i64: 2, 2>}]} {
    %c0 = arith.constant 0 : index
    %c0_0 = arith.constant 0 : index
    %0 = vector.load %arg1[%c0, %c0_0] : memref<2x784xf32, #tpu.memory_space<vmem>>, vector<2x784xf32>
    %c0_1 = arith.constant 0 : index
    %c0_2 = arith.constant 0 : index
    %1 = vector.load %arg2[%c0_1, %c0_2] : memref<784x2xf32, #tpu.memory_space<vmem>>, vector<784x2xf32>
    %cst = arith.constant dense<0.000000e+00> : vector<2x2xf32>
    %2 = tpu.matmul %0, %1, %cst {dimension_numbers = #tpu.dot_dimension_numbers<[1], [0], [0], [1], [0, 0, 1, 1], [], []>} : vector<2x784xf32>, vector<784x2xf32>, vector<2x2xf32> -> vector<2x2xf32>
    %c0_3 = arith.constant 0 : index
    %c0_4 = arith.constant 0 : index
    %3 = vector.load %arg3[%c0_3, %c0_4] : memref<1x2xf32, #tpu.memory_space<vmem>>, vector<1x2xf32>
    %4 = vector.broadcast %3 : vector<1x2xf32> to vector<2x2xf32>
    %5 = arith.addf %2, %4 : vector<2x2xf32>
    %6 = arith.mulf %5, %5 : vector<2x2xf32>
    %cst_5 = arith.constant dense<0.000000e+00> : vector<2xf32>
    %7 = vector.multi_reduction <add>, %6, %cst_5 [1] : vector<2x2xf32> to vector<2xf32>
    %8 = vector.shape_cast %7 : vector<2xf32> to vector<2x1xf32>
    %9 = math.sqrt %8 : vector<2x1xf32>
    %10 = vector.broadcast %9 : vector<2x1xf32> to vector<2x2xf32>
    %11 = arith.divf %5, %10 : vector<2x2xf32>
    %c0_6 = arith.constant 0 : index
    %c0_7 = arith.constant 0 : index
    %12 = vector.load %arg4[%c0_6, %c0_7] : memref<2x2xf32, #tpu.memory_space<vmem>>, vector<2x2xf32>
    tpu.vector_store %arg4[%c0_6, %c0_7], %11 {strides = array<i32>} : memref<2x2xf32, #tpu.memory_space<vmem>>, vector<2x2xf32>,
    return
  }
  func.func @transform_0(%arg0: i32) -> (i32, i32) {
    %c0_i32 = arith.constant 0 : i32
    %c0_i32_0 = arith.constant 0 : i32
    %c0_i32_1 = arith.constant 0 : i32
    return %c0_i32, %c0_i32_0 : i32, i32
  }
  func.func @transform_1(%arg0: i32) -> (i32, i32) {
    %c0_i32 = arith.constant 0 : i32
    %c0_i32_0 = arith.constant 0 : i32
    %c0_i32_1 = arith.constant 0 : i32
    return %c0_i32, %c0_i32_0 : i32, i32
  }
  func.func @transform_2(%arg0: i32) -> (i32, i32) {
    %c0_i32 = arith.constant 0 : i32
    %c0_i32_0 = arith.constant 0 : i32
    %c0_i32_1 = arith.constant 0 : i32
    return %c0_i32, %c0_i32_0 : i32, i32
  }
  func.func @transform_3(%arg0: i32) -> (i32, i32) {
    %c0_i32 = arith.constant 0 : i32
    %c0_i32_0 = arith.constant 0 : i32
    %c0_i32_1 = arith.constant 0 : i32
    return %c0_i32, %c0_i32_0 : i32, i32
  }
}

</mosaic_0001>

<bundles_post_ra>
// kernel: network_forward.7
= control target key start
LH: loop header
LB: loop body
LE: loop exit
PB: predicated region body
PF: predicated region fallthrough
CT: control target
= control target key end

     0   :  { %s1186_s15 = smov 0   ;;  %s1444_s0 = inlined_call_operand.vmem [shape: f32[2,62,16,62], index: 0, kind: input, shape index: {}]   ;;  %s1445_s1 = inlined_call_operand.vmem [shape: f32[9,16,16], index: 1, kind: input, shape index: {}]   ;;  %s1446_s2 = inlined_call_operand.vmem [shape: f32[16,1], index: 2, kind: input, shape index: {}]   ;;  %s1447_s3 = inlined_call_operand.vmem [shape: f32[2,60,30], index: 3, kind: input, shape index: {}]   ;;  %s1448_s4 = inlined_call_operand.vmem [shape: f32[2,30,16,30], index: 4, kind: output, shape index: {}]  }
   0x1 LB: > { %s985_s16 = sadd.s32 4294967295, %s1152_s15   ;;  %p989_p0 = scmp.ge.s32.totalorder %s1152_s15, 1  ;;  %s1152_s15 = sphi %s1186_s15, %s14_s15  }
   0x2   : > { %p162_p1 = scmp.lt.s32.totalorder %s1152_s15, 3 }
   0x4   : > { %p163_p2 = pnand %p989_p0, %p162_p1 }
   0x5   : > { %p188_p3 = scmp.lt.s32.totalorder (!%p163_p2), %s985_s16, 1  ;;  %s1214_s29 = smov (!%p163_p2), 0  }
   0x6   : > { %166 = sbr.rel (%p163_p2) target bundleno = 487 (0x1e7), region = 36 }
   0xb   : > { %v1197_v0 = vld [vmem:[%s1446_s2] sm:$0xff]  ;;  %v1202_v1 = vld [vmem:[%s1446_s2 + $0x8] sm:$0xff]  ;;  %s1450_s16 = smov (!%p188_p3, %s985_s16), 1 }
   0xc   : > { %s1079_s21 = smul.u32 992, %s1450_s16 }
   0xd   : > { %s1080_s22 = smul.u32 480, %s1450_s16 }
   0xe   : > { %s1207_s25 = scalar_lea.vmem %s1444_s0, %s1079_s21 }
   0xf   : > { %s1212_s28 = scalar_lea.vmem %s1448_s4, %s1080_s22 }
  0x10 LB: >> { %s1075_s30 = sshll.u32 %s1156_s29, 5  ;;  %s1158_s6 = smov 127   ;;  %v1244_v14 = vld [vmem:[%s1445_s1] sm:$0xff]  ;;  %vm239_vm0 = vcmask 130048   ;;  %v1251_v16 = vld [vmem:[%s1445_s1 + $0x8] sm:$0xff]  ;;  %v1258_v19 = vld [vmem:[%s1445_s1 + $0x30] sm:$0xff]  ;;  %s1156_s29 = sphi %s1214_s29, %s205_s29  }
  0x11   : >> { %s208_s5 = scalar_lea.vmem %s1207_s25, %s1075_s30  ;;  %s1159_s7 = smov 126   ;;  %v1265_v20 = vld [vmem:[%s1445_s1 + $0x38] sm:$0xff]  ;;  %v1272_v22 = vld [vmem:[%s1445_s1 + $0x70] sm:$0xff]  ;;  %v1012_v39 = vld [vmem:[%s1445_s1 + $0x20] sm:$0xff]  ;;  %v1160_v46 = vmov 0   ;;  %vm840_vm1 = vcmask 1043456  }
  0x12   : >> { %v1221_v2 = vld [vmem:[%s208_s5 + $0x10] sm:$0xff]  ;;  %v1223_v3 = vld [vmem:[%s208_s5 + $0x18] sm:$0xff]  ;;  %v209_v4 = vld [vmem:[%s208_s5] sm:$0xff]  ;;  %1141 = vset.pattern.permute.xlu0 %v1160_v46  ;;  %1140 = vset.pattern.permute.xlu2 %v1160_v46  ;;  %vm833_vm2 = vcmask 490496   ;;  %s1072_s10 = sshll.u32 %s1156_s29, 4  ;;  %vm906_vm3 = vcmask 244736  }
  0x13   : >> { %v1110_v5 = vpack.i.bf16 %v1221_v2, %v1223_v3  ;;  %v210_v6 = vld [vmem:[%s208_s5 + $0x8] sm:$0xff]  ;;  %v1227_v7 = vld [vmem:[%s208_s5 + $0x20] sm:$0xff]  ;;  %361 = vmatpush.msra.mxu3 %v1223_v3  ;;  %v1235_v11 = vld [vmem:[%s208_s5 + $0x30] sm:$0xff]  ;;  %s905_s11 = scalar_lea.vmem %s1212_s28, %s1072_s10  ;;  %s205_s29 = sadd.s32 1, %s1156_s29  }
  0x14   : >> { %v1229_v8 = vld [vmem:[%s208_s5 + $0x28] sm:$0xff]  ;;  %v1100_v9 = vpack.i.bf16 %v209_v4, %v210_v6  ;;  %289 = vmatpush.msra.mxu1 %v210_v6  ;;  %v1237_v12 = vld [vmem:[%s208_s5 + $0x38] sm:$0xff]  ;;  %v1006_v28 = vld [vmem:[%s1445_s1 + $0x10] sm:$0xff]  ;;  %p202_p4 = scmp.ge.s32.totalorder %s205_s29, 30  }
  0x15   : >> { %v1120_v10 = vpack.i.bf16 %v1227_v7, %v1229_v8  ;;  %1111 = vrot.lane.b32.xlu1 %v1110_v5, %s1158_s6  ;;  %362 = vmatpush.msra.mxu3 %v1221_v2  ;;  %v1135_v13 = vpack.i.bf16 %v1235_v11, %v1237_v12  ;;  %v1285_v31 = vld [vmem:[%s1445_s1 + $0x78] sm:$0xff]  ;;  %v1297_v40 = vld [vmem:[%s1445_s1 + $0x50] sm:$0xff]  ;;  %v1013_v42 = vld [vmem:[%s1445_s1 + $0x28] sm:$0xff] }
  0x16   : >> { %1101 = vrot.lane.b32.xlu0 %v1100_v9, %s1158_s6  ;;  %290 = vmatpush.msra.mxu1 %v209_v4  ;;  %v1007_v41 = vld [vmem:[%s1445_s1 + $0x18] sm:$0xff]  ;;  %v1020_v44 = vld [vmem:[%s1445_s1 + $0x40] sm:$0xff]  ;;  %v1021_v48 = vld [vmem:[%s1445_s1 + $0x48] sm:$0xff] }
  0x17   : >> { %1121 = vrot.lane.b32.xlu2 %v1120_v10, %s1158_s6  ;;  %1010 = vmatmul.msk.f32.vlgmr.msra.gmra.mxu1 %vm239_vm0, %v1244_v14  ;;  %v1025_v43 = vld [vmem:[%s1445_s1 + $0x58] sm:$0xff]  ;;  %v1028_v47 = vld [vmem:[%s1445_s1 + $0x60] sm:$0xff]  ;;  %v1029_v52 = vld [vmem:[%s1445_s1 + $0x68] sm:$0xff] }
  0x18   : >> { %1018 = vmatmul.msk.f32.vlgmr.msra.gmra.mxu3 %vm239_vm0, %v1258_v19  ;;  %v1036_v53 = vld [vmem:[%s1445_s1 + $0x80] sm:$0xff]  ;;  %v1037_v56 = vld [vmem:[%s1445_s1 + $0x88] sm:$0xff] }
  0x1d   : >> { %1116 = vrot.lane.b32.xlu1 %v1110_v5, %s1159_s7 }
  0x1e   : >> { %1106 = vrot.lane.b32.xlu0 %v1100_v9, %s1159_s7  ;;  %v832_v9 = vld [vmem:[%s1447_s3 + $0x38] sm:$0xf] }
  0x1f   : >> { %1126 = vrot.lane.b32.xlu2 %v1120_v10, %s1159_s7  ;;  %1011 = vmatmul.msk.f32.gmra.mxu1 %vm239_vm0, %v1251_v16  ;;  %v1068_v10 = vld [vmem:[%s1447_s3 + $0x78] sm:$0xf] }
  0x20   : >> { %1019 = vmatmul.msk.f32.gmra.mxu3 %vm239_vm0, %v1265_v20 }
  0x25   : >> { %1136 = vrot.lane.b32.xlu1 %v1135_v13, %s1159_s7 }
  0x26   : >> { %1131 = vrot.lane.b32.xlu0 %v1135_v13, %s1158_s6  ;;  %v831_v13 = vld [vmem:[%s1447_s3 + $0x30] sm:$0xff] }
  0x27   : >> { %572 = vperm.xlu2 %1140, %v1197_v0  }
  0x2e   : >> { %577 = vperm.xlu0 %1141, %v1202_v1  }
  0x71   : >> { %v1122_v15 = vpop.permute.xlu2 %1121 }
  0x72   : >> { %v1123_v17 = vunpack.i.l.bf16 %v1122_v15  ;;  %v1124_v18 = vunpack.i.h.bf16 %v1122_v15 }
  0x74   : >> { %519 = vmatpush.msrb.mxu3 %v1123_v17 }
  0x76   : >> { %520 = vmatpush.msrb.mxu3 %v1124_v18 }
  0x77   : >> { %1034 = vmatmul.msk.f32.vlgmr.msrb.gmra.mxu3 %vm239_vm0, %v1272_v22 }
  0x79   : >> { %v1276_v26 = vpop.permute.xlu2 %1126 }
  0x7a   : >> { %v1128_v30 = vunpack.i.l.bf16 %v1276_v26  ;;  %v1129_v33 = vunpack.i.h.bf16 %v1276_v26 }
  0x7f   : >> { %1035 = vmatmul.msk.f32.gmra.mxu3 %vm239_vm0, %v1285_v31 }
  0x87   : >> { %v1112_v21 = vpop.permute.xlu1 %1111 }
  0x88   : >> { %v1102_v23 = vpop.permute.xlu0 %1101  ;;  %v1113_v25 = vunpack.i.l.bf16 %v1112_v21  ;;  %v1114_v29 = vunpack.i.h.bf16 %v1112_v21  ;;  %v828_v21 = vld [vmem:[%s1447_s3 + $0x18] sm:$0xff] }
  0x89   : >> { %v1103_v24 = vunpack.i.l.bf16 %v1102_v23  ;;  %v1104_v27 = vunpack.i.h.bf16 %v1102_v23 }
  0x8b   : >> { %260 = vmatpush.msra.mxu0 %v1103_v24  ;;  %v827_v24 = vld [vmem:[%s1447_s3 + $0x10] sm:$0xff] }
  0x8d   : >> { %261 = vmatpush.msra.mxu0 %v1104_v27 }
  0x8e   : >> { %1008 = vmatmul.msk.f32.vlgmr.msra.gmra.mxu0 %vm239_vm0, %v1006_v28 }
  0x8f   : >> { %403 = vmatpush.msrb.mxu0 %v1113_v25  ;;  %v1117_v32 = vpop.permute.xlu1 %1116 }
  0x90   : >> { %v1107_v34 = vpop.permute.xlu0 %1106  ;;  %v1118_v35 = vunpack.i.l.bf16 %v1117_v32  ;;  %v1119_v36 = vunpack.i.h.bf16 %v1117_v32  ;;  %v825_v32 = vld [vmem:[%s1447_s3] sm:$0xff] }
  0x91   : >> { %404 = vmatpush.msrb.mxu0 %v1114_v29  ;;  %v1108_v37 = vunpack.i.l.bf16 %v1107_v34  ;;  %v1109_v38 = vunpack.i.h.bf16 %v1107_v34 }
  0x92   : >> { %443 = vmatpush.msrb.mxu1 %v1118_v35  ;;  %644 = vmatpush.msra.mxu3 %v1118_v35 }
  0x93   : >> { %559 = vmatpush.msra.mxu0 %v1128_v30  ;;  %327 = vmatpush.msra.mxu2 %v1108_v37 }
  0x94   : >> { %444 = vmatpush.msrb.mxu1 %v1119_v36  ;;  %645 = vmatpush.msra.mxu3 %v1119_v36  ;;  %v292_v57 = vpop.f32.mrf.mxu1 }
  0x95   : >> { %560 = vmatpush.msra.mxu0 %v1129_v33  ;;  %328 = vmatpush.msra.mxu2 %v1109_v38 }
  0x96   : >> { %598 = vmatpush.msra.mxu1 %v1113_v25  ;;  %1014 = vmatmul.msk.f32.vlgmr.msra.gmra.mxu2 %vm239_vm0, %v1012_v39  ;;  %v1063_v25 = vld [vmem:[%s1447_s3 + $0x50] sm:$0xff] }
  0x97   : >> { %1026 = vmatmul.msk.f32.vlgmr.msrb.gmra.mxu1 %vm239_vm0, %v1297_v40  ;;  %477 = vmatpush.msrb.mxu2 %v1229_v8  ;;  %v1137_v45 = vpop.permute.xlu1 %1136 }
  0x98   : >> { %1009 = vmatmul.msk.f32.gmra.mxu0 %vm239_vm0, %v1007_v41  ;;  %599 = vmatpush.msra.mxu1 %v1114_v29  ;;  %v1138_v49 = vunpack.i.l.bf16 %v1137_v45  ;;  %v1139_v50 = vunpack.i.h.bf16 %v1137_v45  ;;  %v1132_v51 = vpop.permute.xlu0 %1131  ;;  %v826_v29 = vld [vmem:[%s1447_s3 + $0x8] sm:$0xff] }
  0x99   : >> { %1044 = vmatmul.msk.f32.vlgmr.msra.gmra.mxu3 %vm239_vm0, %v1012_v39  ;;  %478 = vmatpush.msrb.mxu2 %v1227_v7  ;;  %v1133_v54 = vunpack.i.l.bf16 %v1132_v51  ;;  %v1134_v55 = vunpack.i.h.bf16 %v1132_v51 }
  0x9a   : >> { %694 = vmatpush.msrb.mxu1 %v1123_v17  ;;  %744 = vmatpush.msrb.mxu3 %v1237_v12  ;;  %v1066_v17 = vld [vmem:[%s1447_s3 + $0x68] sm:$0xff] }
  0x9b   : >> { %621 = vmatpush.msra.mxu2 %v1223_v3  ;;  %v364_v59 = vpop.f32.mrf.mxu3 }
  0x9c   : >> { %695 = vmatpush.msrb.mxu1 %v1124_v18  ;;  %745 = vmatpush.msrb.mxu3 %v1235_v11  ;;  %v295_v58 = vpop.f32.mrf.mxu1 }
  0x9d   : >> { %622 = vmatpush.msra.mxu2 %v1221_v2 }
  0x9e   : >> { %1015 = vmatmul.msk.f32.gmra.mxu2 %vm239_vm0, %v1013_v42  ;;  %1069 = vmatpush.msk.msra.mxu3 %vm840_vm1, %v1068_v10 }
  0x9f   : >> { %1027 = vmatmul.msk.f32.gmra.mxu1 %vm239_vm0, %v1025_v43 }
  0xa0   : >> { %1022 = vmatmul.msk.f32.vlgmr.msrb.gmra.mxu0 %vm239_vm0, %v1020_v44 }
  0xa1   : >> { %669 = vmatpush.msrb.mxu0 %v1229_v8  ;;  %1045 = vmatmul.msk.f32.gmra.mxu3 %vm239_vm0, %v1013_v42 }
  0xa3   : >> { %670 = vmatpush.msrb.mxu0 %v1227_v7  ;;  %v1375_v63 = vpop.f32.mrf.mxu3 }
  0xa6   : >> { %1030 = vmatmul.msk.f32.vlgmr.msrb.gmra.mxu2 %vm239_vm0, %v1028_v47 }
  0xa7   : >> { %1040 = vmatmul.msk.f32.vlgmr.msra.gmra.mxu1 %vm239_vm0, %v1006_v28  ;;  %719 = vmatpush.msrb.mxu2 %v1128_v30  ;;  %v1062_v30 = vld [vmem:[%s1447_s3 + $0x48] sm:$0xff] }
  0xa8   : >> { %1023 = vmatmul.msk.f32.gmra.mxu0 %vm239_vm0, %v1021_v48  ;;  %808 = vmatpush.msra.mxu1 %v1138_v49 }
  0xa9   : >> { %1052 = vmatmul.msk.f32.vlgmr.msrb.gmra.mxu3 %vm239_vm0, %v1028_v47  ;;  %720 = vmatpush.msrb.mxu2 %v1129_v33  ;;  %v1061_v33 = vld [vmem:[%s1447_s3 + $0x40] sm:$0xff] }
  0xaa   : >> { %809 = vmatpush.msra.mxu1 %v1139_v50 }
  0xae   : >> { %1031 = vmatmul.msk.f32.gmra.mxu2 %vm239_vm0, %v1029_v52 }
  0xaf   : >> { %1041 = vmatmul.msk.f32.gmra.mxu1 %vm239_vm0, %v1007_v41 }
  0xb0   : >> { %1038 = vmatmul.msk.f32.vlgmr.msra.gmra.mxu0 %vm239_vm0, %v1036_v53 }
  0xb1   : >> { %777 = vmatpush.msra.mxu0 %v1133_v54  ;;  %1053 = vmatmul.msk.f32.gmra.mxu3 %vm239_vm0, %v1029_v52 }
  0xb3   : >> { %778 = vmatpush.msra.mxu0 %v1134_v55 }
  0xb6   : >> { %1042 = vmatmul.msk.f32.vlgmr.msra.gmra.mxu2 %vm239_vm0, %v1244_v14  ;;  %v1067_v14 = vld [vmem:[%s1447_s3 + $0x70] sm:$0xff] }
  0xb7   : >> { %1048 = vmatmul.msk.f32.vlgmr.msrb.gmra.mxu1 %vm239_vm0, %v1020_v44  ;;  %1058 = vmatpush.msk.msra.mxu2 %vm840_vm1, %v832_v9 }
  0xb8   : >> { %1039 = vmatmul.msk.f32.gmra.mxu0 %vm239_vm0, %v1037_v56  ;;  %888 = vmatpush.msra.mxu3 %v1067_v14 }
  0xb9   : >> { %853 = vmatpush.msra.mxu2 %v831_v13 }
  0xba   : >> { %889 = vmatpush.msra.mxu3 %v1066_v17 }
  0xbe   : >> { %1043 = vmatmul.msk.f32.gmra.mxu2 %vm239_vm0, %v1251_v16  ;;  %v830_v16 = vld [vmem:[%s1447_s3 + $0x28] sm:$0xff] }
  0xbf   : >> { %1049 = vmatmul.msk.f32.gmra.mxu1 %vm239_vm0, %v1021_v48  ;;  %854 = vmatpush.msra.mxu2 %v830_v16 }
  0xc0   : >> { %1046 = vmatmul.msk.f32.vlgmr.msrb.gmra.mxu0 %vm239_vm0, %v1258_v19  ;;  %v829_v19 = vld [vmem:[%s1447_s3 + $0x20] sm:$0xff] }
  0xc1   : >> { %855 = vmatpush.msra.mxu2 %v829_v19 }
  0xc3   : >> { %856 = vmatpush.msra.mxu2 %v828_v21 }
  0xc5   : >> { %857 = vmatpush.msra.mxu2 %v827_v24 }
  0xc6   : >> { %1050 = vmatmul.msk.f32.vlgmr.msrb.gmra.mxu2 %vm239_vm0, %v1297_v40 }
  0xc7   : >> { %1056 = vmatmul.msk.f32.vlgmr.msra.gmra.mxu1 %vm239_vm0, %v1036_v53  ;;  %858 = vmatpush.msra.mxu2 %v826_v29 }
  0xc8   : >> { %1047 = vmatmul.msk.f32.gmra.mxu0 %vm239_vm0, %v1265_v20  ;;  %v1065_v20 = vld [vmem:[%s1447_s3 + $0x60] sm:$0xff] }
  0xc9   : >> { %890 = vmatpush.msra.mxu3 %v1065_v20  ;;  %859 = vmatpush.msra.mxu2 %v825_v32  ;;  %v578_v20 = vpop.permute.xlu0 %577 }
  0xce   : >> { %1051 = vmatmul.msk.f32.gmra.mxu2 %vm239_vm0, %v1025_v43 }
  0xcf   : >> { %1057 = vmatmul.msk.f32.gmra.mxu1 %vm239_vm0, %v1037_v56 }
  0xd0   : >> { %1054 = vmatmul.msk.f32.vlgmr.msra.gmra.mxu0 %vm239_vm0, %v1272_v22  ;;  %v1064_v22 = vld [vmem:[%s1447_s3 + $0x58] sm:$0xff] }
  0xd1   : >> { %891 = vmatpush.msra.mxu3 %v1064_v22 }
  0xd3   : >> { %892 = vmatpush.msra.mxu3 %v1063_v25 }
  0xd5   : >> { %893 = vmatpush.msra.mxu3 %v1062_v30 }
  0xd7   : >> { %894 = vmatpush.msra.mxu3 %v1061_v33 }
  0xd8   : >> { %1055 = vmatmul.msk.f32.gmra.mxu0 %vm239_vm0, %v1285_v31 }
  0xfa   : >> { %v1379_v5 = vpop.f32.mrf.mxu3 }
 0x102   : >> { %v1387_v12 = vpop.f32.mrf.mxu3 }
 0x10b   : >> { %v263_v60 = vpop.f32.mrf.mxu0 }
 0x10c   : >> { %v293_v27 = vadd.f32 %v292_v57, %v263_v60 }
 0x114   : >> { %v1373_v61 = vpop.f32.mrf.mxu1 }
 0x115   : >> { %v266_v62 = vpop.f32.mrf.mxu0 }
 0x116   : >> { %v296_v37 = vadd.f32 %v295_v58, %v266_v62 }
 0x119   : >> { %v330_v2 = vpop.f32.mrf.mxu2 }
 0x11a   : >> { %v336_v31 = vadd.f32 %v330_v2, %v293_v27 }
 0x11c   : >> { %v1377_v3 = vpop.f32.mrf.mxu1  ;;  %v647_v26 = vpop.f32.mrf.mxu3  ;;  %v370_v36 = vadd.f32 %v364_v59, %v336_v31 }
 0x11d   : >> { %v406_v4 = vpop.f32.mrf.mxu0 }
 0x11e   : >> { %v412_v41 = vadd.f32 %v406_v4, %v370_v36 }
 0x120   : >> { %v452_v46 = vadd.f32 %v1373_v61, %v412_v41 }
 0x121   : >> { %v333_v6 = vpop.f32.mrf.mxu2 }
 0x122   : >> { %v337_v42 = vadd.f32 %v333_v6, %v296_v37  ;;  %v573_v6 = vpop.permute.xlu2 %572 }
 0x124   : >> { %v601_v7 = vpop.f32.mrf.mxu1  ;;  %v650_v40 = vpop.f32.mrf.mxu3  ;;  %v371_v47 = vadd.f32 %v1375_v63, %v337_v42 }
 0x125   : >> { %v409_v8 = vpop.f32.mrf.mxu0 }
 0x126   : >> { %v413_v52 = vadd.f32 %v409_v8, %v371_v47 }
 0x128   : >> { %v453_v58 = vadd.f32 %v1377_v3, %v413_v52 }
 0x129   : >> { %v480_v11 = vpop.f32.mrf.mxu2 }
 0x12a   : >> { %v486_v48 = vadd.f32 %v480_v11, %v452_v46 }
 0x12c   : >> { %v604_v18 = vpop.f32.mrf.mxu1  ;;  %v747_v53 = vpop.f32.mrf.mxu3  ;;  %v528_v54 = vadd.f32 %v1379_v5, %v486_v48 }
 0x12d   : >> { %v562_v15 = vpop.f32.mrf.mxu0 }
 0x12e   : >> { %v568_v62 = vadd.f32 %v562_v15, %v528_v54 }
 0x130   : >> { %v580_v9 = vadd.f32 %v573_v6, %v568_v62 }
 0x131   : >> { %v483_v23 = vpop.f32.mrf.mxu2 }
 0x132   : >> { %v487_v2 = vadd.f32 %v483_v23, %v453_v58  ;;  %v582_v17 = vmax.f32 %v580_v9, 0.0 }
 0x134   : >> { %v697_v34 = vpop.f32.mrf.mxu1  ;;  %v529_v8 = vadd.f32 %v1387_v12, %v487_v2  ;;  %v750_v13 = vpop.f32.mrf.mxu3 }
 0x135   : >> { %v565_v28 = vpop.f32.mrf.mxu0 }
 0x136   : >> { %v569_v3 = vadd.f32 %v565_v28, %v529_v8 }
 0x138   : >> { %v581_v24 = vadd.f32 %v578_v20, %v569_v3 }
 0x139   : >> { %v624_v35 = vpop.f32.mrf.mxu2 }
 0x13a   : >> { %v625_v38 = vadd.f32 %v624_v35, %v601_v7 }
 0x13c   : >> { %v653_v43 = vadd.f32 %v647_v26, %v625_v38  ;;  %v700_v45 = vpop.f32.mrf.mxu1  ;;  %v583_v26 = vmax.f32 %v581_v24, 0.0 }
 0x13d   : >> { %v672_v39 = vpop.f32.mrf.mxu0 }
 0x13e   : >> { %v678_v49 = vadd.f32 %v672_v39, %v653_v43 }
 0x140   : >> { %v703_v55 = vadd.f32 %v697_v34, %v678_v49 }
 0x141   : >> { %v627_v44 = vpop.f32.mrf.mxu2 }
 0x142   : >> { %v628_v50 = vadd.f32 %v627_v44, %v604_v18 }
 0x144   : >> { %v654_v56 = vadd.f32 %v650_v40, %v628_v50  ;;  %v811_v60 = vpop.f32.mrf.mxu1 }
 0x145   : >> { %v675_v51 = vpop.f32.mrf.mxu0 }
 0x146   : >> { %v679_v61 = vadd.f32 %v675_v51, %v654_v56 }
 0x148   : >> { %v704_v10 = vadd.f32 %v700_v45, %v679_v61 }
 0x149   : >> { %v722_v57 = vpop.f32.mrf.mxu2 }
 0x14a   : >> { %v728_v59 = vadd.f32 %v722_v57, %v703_v55 }
 0x14c   : >> { %v753_v4 = vadd.f32 %v747_v53, %v728_v59  ;;  %v814_v21 = vpop.f32.mrf.mxu1 }
 0x14d   : >> { %v780_v63 = vpop.f32.mrf.mxu0 }
 0x14e   : >> { %v786_v7 = vadd.f32 %v780_v63, %v753_v4 }
 0x150   : >> { %v817_v11 = vadd.f32 %v811_v60, %v786_v7 }
 0x151   : >> { %v725_v5 = vpop.f32.mrf.mxu2 }
 0x152   : >> { %v819_v14 = vadd.f32 %v817_v11, %v573_v6  ;;  %v729_v16 = vadd.f32 %v725_v5, %v704_v10 }
 0x154   : >> { %v821_v18 = vmax.f32 %v819_v14, 0.0  ;;  %v754_v19 = vadd.f32 %v750_v13, %v729_v16 }
 0x155   : >> { %v783_v15 = vpop.f32.mrf.mxu0 }
 0x156   : >> { %v823_v22 = vmax.f32 %v582_v17, %v821_v18  ;;  %v787_v23 = vadd.f32 %v783_v15, %v754_v19 }
 0x158   : >> { %v818_v12 = vadd.f32 %v814_v21, %v787_v23  ;;  %1059 = vmatmul.msk.f32.vlgmr.msra.gmra.mxu2 %vm833_vm2, %v823_v22  ;;  %1070 = vmatmul.msk.f32.vlgmr.msra.gmra.mxu3 %vm833_vm2, %v823_v22 }
 0x15a   : >> { %v820_v25 = vadd.f32 %v818_v12, %v578_v20 }
 0x15c   : >> { %v822_v27 = vmax.f32 %v820_v25, 0.0 }
 0x15e   : >> { %v824_v29 = vmax.f32 %v583_v26, %v822_v27 }
 0x160   : >> { %1060 = vmatmul.msk.f32.gmra.mxu2 %vm833_vm2, %v824_v29  ;;  %1071 = vmatmul.msk.f32.gmra.mxu3 %vm833_vm2, %v824_v29 }
 0x1db   : >> { %v861_v28 = vpop.f32.mrf.mxu2  ;;  %v896_v30 = vpop.f32.mrf.mxu3 }
 0x1dc   : >> { %v902_v31 = vmax.f32 %v861_v28, %v896_v30 }
 0x1de   : >> { %907 = vst.msk [vmem:[%s905_s11] sm:$0xff] %vm906_vm3, %v902_v31 }
 0x1e2   : > { %204 = sbr.rel (!%p202_p4) target bundleno = 16 (0x10), region = 87 }
 0x1e3   : >> { %v864_v32 = vpop.f32.mrf.mxu2  ;;  %v899_v33 = vpop.f32.mrf.mxu3 }
 0x1e4   : >> { %v903_v34 = vmax.f32 %v864_v32, %v899_v33 }
 0x1e6   : >> { %908 = vst.msk [vmem:[%s905_s11 + $0x8] sm:$0xff] %vm906_vm3, %v903_v34 }
 0x1e7 PF: > { %s14_s15 = sadd.s32 1, %s1152_s15  }
 0x1e8   : > { %p11_p5 = scmp.ge.s32.totalorder %s14_s15, 4  }
 0x1ea   :  { %13 = sbr.rel (!%p11_p5) target bundleno = 1 (0x1), region = 98 }

// kernel: network_forward.6
= control target key start
LH: loop header
LB: loop body
LE: loop exit
PB: predicated region body
PF: predicated region fallthrough
CT: control target
= control target key end

     0   :  { %s1953_s15 = smov 0   ;;  %s2719_s0 = inlined_call_operand.vmem [shape: f32[2,127,32,127], index: 0, kind: input, shape index: {}]   ;;  %s2720_s1 = inlined_call_operand.vmem [shape: f32[16,16,32], index: 1, kind: input, shape index: {}]   ;;  %s2721_s2 = inlined_call_operand.vmem [shape: f32[16,1], index: 2, kind: input, shape index: {}]   ;;  %s2722_s3 = inlined_call_operand.vmem [shape: f32[2,124,62], index: 3, kind: input, shape index: {}]   ;;  %s2723_s4 = inlined_call_operand.vmem [shape: f32[2,62,16,62], index: 4, kind: output, shape index: {}]  }
   0x1 LB: > { %s1577_s16 = sadd.s32 4294967295, %s1918_s15   ;;  %p1581_p0 = scmp.ge.s32.totalorder %s1918_s15, 1  ;;  %s1918_s15 = sphi %s1953_s15, %s14_s15  }
   0x2   : > { %p162_p1 = scmp.lt.s32.totalorder %s1918_s15, 3 }
   0x4   : > { %p163_p2 = pnand %p1581_p0, %p162_p1 }
   0x5   : > { %p188_p3 = scmp.lt.s32.totalorder (!%p163_p2), %s1577_s16, 1  ;;  %s1981_s29 = smov (!%p163_p2), 0  }
   0x6   : > { %166 = sbr.rel (%p163_p2) target bundleno = 557 (0x22d), region = 36 }
   0xb   : > { %v1964_v0 = vld [vmem:[%s2721_s2] sm:$0xff]  ;;  %v1969_v1 = vld [vmem:[%s2721_s2 + $0x8] sm:$0xff]  ;;  %s2755_s16 = smov (!%p188_p3, %s1577_s16), 1 }
   0xc   : > { %s1734_s21 = smul.u32 4064, %s2755_s16 }
   0xd   : > { %s1735_s22 = smul.u32 992, %s2755_s16 }
   0xe   : > { %s1974_s25 = scalar_lea.vmem %s2719_s0, %s1734_s21 }
   0xf   : > { %s1979_s28 = scalar_lea.vmem %s2723_s4, %s1735_s22 }
  0x10 LB: >> { %s1729_s30 = sshll.u32 %s1922_s29, 6  ;;  %s1924_s6 = smov 126   ;;  %v2077_v26 = vld [vmem:[%s2720_s1] sm:$0xff]  ;;  %vm262_vm0 = vcmask 261120   ;;  %v2093_v30 = vld [vmem:[%s2720_s1 + $0x8] sm:$0xff]  ;;  %v2141_v49 = vld [vmem:[%s2720_s1 + $0x50] sm:$0xff]  ;;  %s1922_s29 = sphi %s1981_s29, %s205_s29  }
  0x11   : >> { %s1988_s5 = scalar_lea.vmem %s1974_s25, %s1729_s30  ;;  %s1925_s7 = smov 127   ;;  %v2109_v34 = vld [vmem:[%s2720_s1 + $0x40] sm:$0xff]  ;;  %v2125_v37 = vld [vmem:[%s2720_s1 + $0x48] sm:$0xff]  ;;  %v2153_v59 = vld [vmem:[%s2720_s1 + $0x10] sm:$0xff]  ;;  %vm1420_vm1 = vcmask 1043456   ;;  %vm1413_vm2 = vcmask 1014784  }
  0x12   : >> { %v211_v2 = vld [vmem:[%s1988_s5 + $0x10] sm:$0xff]  ;;  %v212_v3 = vld [vmem:[%s1988_s5 + $0x18] sm:$0xff]  ;;  %v209_v4 = vld [vmem:[%s1988_s5] sm:$0xff]  ;;  %s1926_s8 = smov 125   ;;  %vm1494_vm3 = vcmask 506880  }
  0x13   : >> { %v1766_v5 = vpack.i.bf16 %v211_v2, %v212_v3  ;;  %v210_v6 = vld [vmem:[%s1988_s5 + $0x8] sm:$0xff]  ;;  %v1995_v7 = vld [vmem:[%s1988_s5 + $0x38] sm:$0xff]  ;;  %310 = vmatpush.msra.mxu3 %v212_v3  ;;  %v2002_v9 = vld [vmem:[%s1988_s5 + $0x30] sm:$0xff] }
  0x14   : >> { %v1776_v8 = vpack.i.bf16 %v209_v4, %v210_v6  ;;  %434 = vmatpush.msra.mxu0 %v1995_v7  ;;  %v2006_v10 = vld [vmem:[%s1988_s5 + $0x28] sm:$0xff]  ;;  %v2010_v11 = vld [vmem:[%s1988_s5 + $0x20] sm:$0xff]  ;;  %v2013_v12 = vld [vmem:[%s1988_s5 + $0x58] sm:$0xff]  ;;  %v1791_v15 = vpack.i.bf16 %v2002_v9, %v1995_v7 }
  0x15   : >> { %1767 = vrot.lane.b32.xlu1 %v1766_v5, %s1924_s6  ;;  %1757 = vrot.lane.b32.xlu0 %v1766_v5, %s1925_s7  ;;  %v2020_v13 = vld [vmem:[%s1988_s5 + $0x50] sm:$0xff]  ;;  %v2025_v14 = vld [vmem:[%s1988_s5 + $0x48] sm:$0xff]  ;;  %v1806_v17 = vpack.i.bf16 %v2010_v11, %v2006_v10 }
  0x16   : >> { %1777 = vrot.lane.b32.xlu2 %v1776_v8, %s1924_s6  ;;  %311 = vmatpush.msra.mxu3 %v211_v2  ;;  %v2031_v16 = vld [vmem:[%s1988_s5 + $0x40] sm:$0xff]  ;;  %v1821_v18 = vpack.i.bf16 %v2020_v13, %v2013_v12  ;;  %v2053_v20 = vld [vmem:[%s1988_s5 + $0x70] sm:$0xff]  ;;  %v2056_v21 = vld [vmem:[%s1988_s5 + $0x78] sm:$0xff] }
  0x17   : >> { %435 = vmatpush.msra.mxu0 %v2002_v9  ;;  %v1836_v19 = vpack.i.bf16 %v2031_v16, %v2025_v14  ;;  %v1851_v22 = vpack.i.bf16 %v2053_v20, %v2056_v21  ;;  %v2064_v23 = vld [vmem:[%s1988_s5 + $0x60] sm:$0xff]  ;;  %v2067_v24 = vld [vmem:[%s1988_s5 + $0x68] sm:$0xff]  ;;  %v2082_v27 = vld [vmem:[%s1988_s5 + $0x90] sm:$0xff] }
  0x18   : >> { %312 = vmatpush.msra.mxu3 %v210_v6  ;;  %v1866_v25 = vpack.i.bf16 %v2064_v23, %v2067_v24  ;;  %v2085_v28 = vld [vmem:[%s1988_s5 + $0x98] sm:$0xff]  ;;  %v2101_v32 = vld [vmem:[%s1988_s5 + $0x80] sm:$0xff]  ;;  %v2104_v33 = vld [vmem:[%s1988_s5 + $0x88] sm:$0xff]  ;;  %s1726_s5 = sshll.u32 %s1922_s29, 4  ;;  %s205_s29 = sadd.s32 1, %s1922_s29  }
  0x19   : >> { %436 = vmatpush.msra.mxu0 %v2006_v10  ;;  %v1876_v29 = vpack.i.bf16 %v2082_v27, %v2085_v28  ;;  %v1891_v35 = vpack.i.bf16 %v2101_v32, %v2104_v33  ;;  %v2133_v41 = vld [vmem:[%s2720_s1 + $0x80] sm:$0xff]  ;;  %v2162_v2 = vld [vmem:[%s2720_s1 + $0x58] sm:$0xff]  ;;  %p202_p4 = scmp.ge.s32.totalorder %s205_s29, 62  }
  0x1a   : >> { %313 = vmatpush.msra.mxu3 %v209_v4  ;;  %v2172_v4 = vld [vmem:[%s2720_s1 + $0x30] sm:$0xff] }
  0x1b   : >> { %437 = vmatpush.msra.mxu0 %v2010_v11  ;;  %1614 = vmatmul.msk.f32.vlgmr.msra.gmra.mxu3 %vm262_vm0, %v2077_v26 }
  0x1c   : >> { %1626 = vmatmul.msk.f32.vlgmr.msra.gmra.mxu0 %vm262_vm0, %v2109_v34 }
  0x1d   : >> { %610 = vmatpush.msrb.mxu0 %v2013_v12  ;;  %1772 = vrot.lane.b32.xlu1 %v1766_v5, %s1926_s8 }
  0x1e   : >> { %1762 = vrot.lane.b32.xlu0 %v1776_v8, %s1925_s7  ;;  %1782 = vrot.lane.b32.xlu2 %v1776_v8, %s1926_s8 }
  0x1f   : >> { %611 = vmatpush.msrb.mxu0 %v2020_v13 }
  0x21   : >> { %612 = vmatpush.msrb.mxu0 %v2025_v14 }
  0x23   : >> { %613 = vmatpush.msrb.mxu0 %v2031_v16  ;;  %1615 = vmatmul.msk.f32.gmra.mxu3 %vm262_vm0, %v2093_v30 }
  0x24   : >> { %1627 = vmatmul.msk.f32.gmra.mxu0 %vm262_vm0, %v2125_v37 }
  0x25   : >> { %1792 = vrot.lane.b32.xlu1 %v1791_v15, %s1926_s8  ;;  %786 = vmatpush.msra.mxu0 %v2056_v21 }
  0x26   : >> { %1787 = vrot.lane.b32.xlu0 %v1791_v15, %s1924_s6  ;;  %1797 = vrot.lane.b32.xlu2 %v1791_v15, %s1925_s7 }
  0x27   : >> { %787 = vmatpush.msra.mxu0 %v2053_v20 }
  0x29   : >> { %788 = vmatpush.msra.mxu0 %v2067_v24 }
  0x2b   : >> { %789 = vmatpush.msra.mxu0 %v2064_v23 }
  0x2c   : >> { %1642 = vmatmul.msk.f32.vlgmr.msrb.gmra.mxu0 %vm262_vm0, %v2133_v41 }
  0x2d   : >> { %1807 = vrot.lane.b32.xlu1 %v1806_v17, %s1926_s8 }
  0x2e   : >> { %1802 = vrot.lane.b32.xlu0 %v1806_v17, %s1924_s6  ;;  %1812 = vrot.lane.b32.xlu2 %v1806_v17, %s1925_s7 }
  0x35   : >> { %1822 = vrot.lane.b32.xlu1 %v1821_v18, %s1926_s8 }
  0x36   : >> { %1817 = vrot.lane.b32.xlu0 %v1821_v18, %s1924_s6  ;;  %1827 = vrot.lane.b32.xlu2 %v1821_v18, %s1925_s7 }
  0x3d   : >> { %1837 = vrot.lane.b32.xlu1 %v1836_v19, %s1926_s8 }
  0x3e   : >> { %1832 = vrot.lane.b32.xlu0 %v1836_v19, %s1924_s6  ;;  %1842 = vrot.lane.b32.xlu2 %v1836_v19, %s1925_s7 }
  0x45   : >> { %1852 = vrot.lane.b32.xlu1 %v1851_v22, %s1926_s8 }
  0x46   : >> { %1847 = vrot.lane.b32.xlu0 %v1851_v22, %s1924_s6  ;;  %1857 = vrot.lane.b32.xlu2 %v1851_v22, %s1925_s7 }
  0x4d   : >> { %1867 = vrot.lane.b32.xlu1 %v1866_v25, %s1926_s8 }
  0x4e   : >> { %1862 = vrot.lane.b32.xlu0 %v1866_v25, %s1924_s6  ;;  %1872 = vrot.lane.b32.xlu2 %v1866_v25, %s1925_s7 }
  0x55   : >> { %1882 = vrot.lane.b32.xlu1 %v1876_v29, %s1926_s8 }
  0x56   : >> { %1877 = vrot.lane.b32.xlu0 %v1876_v29, %s1924_s6  ;;  %1887 = vrot.lane.b32.xlu2 %v1876_v29, %s1925_s7  ;;  %v2193_v29 = vld [vmem:[%s2720_s1 + $0x18] sm:$0xff] }
  0x5d   : >> { %1897 = vrot.lane.b32.xlu1 %v1891_v35, %s1926_s8 }
  0x5e   : >> { %1892 = vrot.lane.b32.xlu0 %v1891_v35, %s1924_s6  ;;  %1902 = vrot.lane.b32.xlu2 %v1891_v35, %s1925_s7  ;;  %v2205_v35 = vld [vmem:[%s2720_s1 + $0x90] sm:$0xff]  ;;  %s1493_s6 = scalar_lea.vmem %s1979_s28, %s1726_s5 }
  0x70   : >> { %v2095_v31 = vpop.permute.xlu2 %1777 }
  0x71   : >> { %v1779_v3 = vunpack.i.l.bf16 %v2095_v31  ;;  %v1780_v18 = vunpack.i.h.bf16 %v2095_v31 }
  0x78   : >> { %v2115_v36 = vpop.permute.xlu2 %1782 }
  0x79   : >> { %v1784_v61 = vunpack.i.l.bf16 %v2115_v36  ;;  %v1785_v63 = vunpack.i.h.bf16 %v2115_v36  ;;  %v2214_v36 = vld [vmem:[%s2720_s1 + $0x38] sm:$0xff] }
  0x80   : >> { %v1798_v38 = vpop.permute.xlu2 %1797 }
  0x81   : >> { %v1799_v39 = vunpack.i.l.bf16 %v1798_v38  ;;  %v1800_v40 = vunpack.i.h.bf16 %v1798_v38 }
  0x83   : >> { %484 = vmatpush.msra.mxu1 %v1799_v39  ;;  %967 = vmatpush.msrb.mxu0 %v1799_v39 }
  0x85   : >> { %485 = vmatpush.msra.mxu1 %v1800_v40  ;;  %968 = vmatpush.msrb.mxu0 %v1800_v40 }
  0x87   : >> { %v1768_v42 = vpop.permute.xlu1 %1767  ;;  %v1758_v43 = vpop.permute.xlu0 %1757 }
  0x88   : >> { %v1759_v44 = vunpack.i.l.bf16 %v1758_v43  ;;  %v1813_v45 = vpop.permute.xlu2 %1812  ;;  %v1760_v48 = vunpack.i.h.bf16 %v1758_v43  ;;  %v1769_v60 = vunpack.i.l.bf16 %v1768_v42  ;;  %v1770_v62 = vunpack.i.h.bf16 %v1768_v42 }
  0x89   : >> { %v1814_v46 = vunpack.i.l.bf16 %v1813_v45  ;;  %v1815_v47 = vunpack.i.h.bf16 %v1813_v45 }
  0x8a   : >> { %281 = vmatpush.msra.mxu2 %v1759_v44 }
  0x8b   : >> { %486 = vmatpush.msra.mxu1 %v1814_v46  ;;  %969 = vmatpush.msrb.mxu0 %v1814_v46 }
  0x8c   : >> { %282 = vmatpush.msra.mxu2 %v1760_v48  ;;  %v2239_v48 = vld [vmem:[%s2720_s1 + $0x20] sm:$0xff] }
  0x8d   : >> { %487 = vmatpush.msra.mxu1 %v1815_v47  ;;  %970 = vmatpush.msrb.mxu0 %v1815_v47 }
  0x8e   : >> { %1630 = vmatmul.msk.f32.vlgmr.msra.gmra.mxu1 %vm262_vm0, %v2141_v49 }
  0x8f   : >> { %v1773_v50 = vpop.permute.xlu1 %1772 }
  0x90   : >> { %v1763_v51 = vpop.permute.xlu0 %1762  ;;  %v2145_v52 = vpop.permute.xlu2 %1827  ;;  %v1774_v54 = vunpack.i.l.bf16 %v1773_v50  ;;  %v1775_v55 = vunpack.i.h.bf16 %v1773_v50  ;;  %v2254_v50 = vld [vmem:[%s2720_s1 + $0x98] sm:$0xff] }
  0x91   : >> { %v1764_v53 = vunpack.i.l.bf16 %v1763_v51  ;;  %v1829_v56 = vunpack.i.l.bf16 %v2145_v52  ;;  %v1830_v57 = vunpack.i.h.bf16 %v2145_v52  ;;  %v1765_v58 = vunpack.i.h.bf16 %v1763_v51  ;;  %v2263_v51 = vld [vmem:[%s2720_s1 + $0x70] sm:$0xff]  ;;  %v2414_v52 = vld [vmem:[%s2720_s1 + $0xb8] sm:$0xff] }
  0x92   : >> { %400 = vmatpush.msrb.mxu3 %v1774_v54 }
  0x93   : >> { %283 = vmatpush.msra.mxu2 %v1764_v53  ;;  %660 = vmatpush.msrb.mxu1 %v1829_v56  ;;  %v2268_v53 = vld [vmem:[%s2720_s1 + $0x88] sm:$0xff] }
  0x94   : >> { %401 = vmatpush.msrb.mxu3 %v1775_v55  ;;  %1643 = vmatmul.msk.f32.gmra.mxu0 %vm262_vm0, %v2268_v53 }
  0x95   : >> { %284 = vmatpush.msra.mxu2 %v1765_v58  ;;  %661 = vmatpush.msrb.mxu1 %v1830_v57 }
  0x96   : >> { %1612 = vmatmul.msk.f32.vlgmr.msra.gmra.mxu2 %vm262_vm0, %v2153_v59  ;;  %402 = vmatpush.msrb.mxu3 %v1784_v61 }
  0x97   : >> { %354 = vmatpush.msrb.mxu2 %v1769_v60  ;;  %v2174_v5 = vpop.permute.xlu1 %1792  ;;  %1631 = vmatmul.msk.f32.gmra.mxu1 %vm262_vm0, %v2162_v2 }
  0x98   : >> { %v2176_v6 = vpop.permute.xlu0 %1787  ;;  %v1795_v8 = vunpack.i.h.bf16 %v2174_v5  ;;  %v1794_v15 = vunpack.i.l.bf16 %v2174_v5  ;;  %403 = vmatpush.msrb.mxu3 %v1785_v63  ;;  %v2182_v17 = vpop.permute.xlu2 %1842 }
  0x99   : >> { %355 = vmatpush.msrb.mxu2 %v1770_v62  ;;  %1622 = vmatmul.msk.f32.vlgmr.msrb.gmra.mxu3 %vm262_vm0, %v2172_v4  ;;  %v1844_v19 = vunpack.i.l.bf16 %v2182_v17  ;;  %v1845_v22 = vunpack.i.h.bf16 %v2182_v17  ;;  %v1789_v25 = vunpack.i.l.bf16 %v2176_v6  ;;  %v2733_v31 = vunpack.i.h.bf16 %v2176_v6 }
  0x9a   : >> { %576 = vmatpush.msra.mxu3 %v1794_v15 }
  0x9b   : >> { %356 = vmatpush.msrb.mxu2 %v1779_v3  ;;  %662 = vmatpush.msrb.mxu1 %v1844_v19 }
  0x9c   : >> { %577 = vmatpush.msra.mxu3 %v1795_v8 }
  0x9d   : >> { %357 = vmatpush.msrb.mxu2 %v1780_v18  ;;  %663 = vmatpush.msrb.mxu1 %v1845_v22 }
  0x9e   : >> { %1613 = vmatmul.msk.f32.gmra.mxu2 %vm262_vm0, %v2193_v29 }
  0x9f   : >> { %530 = vmatpush.msra.mxu2 %v1789_v25  ;;  %v2218_v38 = vpop.permute.xlu1 %1807  ;;  %1646 = vmatmul.msk.f32.vlgmr.msrb.gmra.mxu1 %vm262_vm0, %v2205_v35 }
  0xa0   : >> { %v2220_v39 = vpop.permute.xlu0 %1802  ;;  %v2724_v40 = vunpack.i.h.bf16 %v2218_v38  ;;  %v2730_v42 = vunpack.i.l.bf16 %v2218_v38  ;;  %v2228_v45 = vpop.permute.xlu2 %1857  ;;  %v2742_v5 = vunpack.i.l.bf16 %v2218_v38 }
  0xa1   : >> { %v2725_v43 = vunpack.i.h.bf16 %v2220_v39  ;;  %v2731_v44 = vunpack.i.l.bf16 %v2220_v39  ;;  %531 = vmatpush.msra.mxu2 %v2733_v31  ;;  %1623 = vmatmul.msk.f32.gmra.mxu3 %vm262_vm0, %v2214_v36  ;;  %v1860_v46 = vunpack.i.h.bf16 %v2228_v45  ;;  %v1859_v47 = vunpack.i.l.bf16 %v2228_v45  ;;  %v2343_v31 = vld [vmem:[%s2720_s1 + $0x60] sm:$0xff] }
  0xa2   : >> { %578 = vmatpush.msra.mxu3 %v2730_v42 }
  0xa3   : >> { %532 = vmatpush.msra.mxu2 %v2731_v44  ;;  %836 = vmatpush.msra.mxu1 %v1859_v47 }
  0xa4   : >> { %579 = vmatpush.msra.mxu3 %v2724_v40  ;;  %v2291_v40 = vld [vmem:[%s2720_s1 + $0x28] sm:$0xff] }
  0xa5   : >> { %533 = vmatpush.msra.mxu2 %v2725_v43  ;;  %837 = vmatpush.msra.mxu1 %v1860_v46  ;;  %v2306_v43 = vld [vmem:[%s2720_s1 + $0xd0] sm:$0xff] }
  0xa6   : >> { %1618 = vmatmul.msk.f32.vlgmr.msrb.gmra.mxu2 %vm262_vm0, %v2239_v48 }
  0xa7   : >> { %v2270_v54 = vpop.permute.xlu1 %1822  ;;  %1647 = vmatmul.msk.f32.gmra.mxu1 %vm262_vm0, %v2254_v50 }
  0xa8   : >> { %v2272_v55 = vpop.permute.xlu0 %1817  ;;  %v2727_v58 = vunpack.i.h.bf16 %v2270_v54  ;;  %v2729_v60 = vunpack.i.l.bf16 %v2270_v54  ;;  %v2282_v63 = vpop.permute.xlu2 %1872  ;;  %v2746_v45 = vunpack.i.h.bf16 %v2270_v54 }
  0xa9   : >> { %v2728_v61 = vunpack.i.h.bf16 %v2272_v55  ;;  %v2726_v62 = vunpack.i.l.bf16 %v2272_v55  ;;  %1638 = vmatmul.msk.f32.vlgmr.msra.gmra.mxu3 %vm262_vm0, %v2263_v51  ;;  %v2732_v3 = vunpack.i.h.bf16 %v2282_v63  ;;  %v1874_v18 = vunpack.i.l.bf16 %v2282_v63 }
  0xaa   : >> { %752 = vmatpush.msrb.mxu3 %v2729_v60  ;;  %v2327_v60 = vld [vmem:[%s2720_s1 + $0xc0] sm:$0xff] }
  0xab   : >> { %706 = vmatpush.msrb.mxu2 %v2726_v62  ;;  %838 = vmatpush.msra.mxu1 %v1874_v18  ;;  %v2316_v62 = vld [vmem:[%s2720_s1 + $0x78] sm:$0xff] }
  0xac   : >> { %753 = vmatpush.msrb.mxu3 %v2727_v58  ;;  %1658 = vmatmul.msk.f32.vlgmr.msra.gmra.mxu0 %vm262_vm0, %v2327_v60 }
  0xad   : >> { %707 = vmatpush.msrb.mxu2 %v2728_v61  ;;  %839 = vmatpush.msra.mxu1 %v2732_v3 }
  0xae   : >> { %1619 = vmatmul.msk.f32.gmra.mxu2 %vm262_vm0, %v2291_v40  ;;  %1063 = vmatpush.msra.mxu0 %v2013_v12 }
  0xaf   : >> { %990 = vmatpush.msrb.mxu1 %v1995_v7  ;;  %v2318_v58 = vpop.permute.xlu1 %1837 }
  0xb0   : >> { %v2320_v61 = vpop.permute.xlu0 %1832  ;;  %1662 = vmatmul.msk.f32.vlgmr.msra.gmra.mxu1 %vm262_vm0, %v2306_v43  ;;  %v2736_v42 = vunpack.i.h.bf16 %v2318_v58  ;;  %v1839_v7 = vunpack.i.l.bf16 %v2318_v58  ;;  %1064 = vmatpush.msra.mxu0 %v2020_v13 }
  0xb1   : >> { %v2734_v44 = vunpack.i.l.bf16 %v2320_v61  ;;  %991 = vmatpush.msrb.mxu1 %v2002_v9  ;;  %1639 = vmatmul.msk.f32.gmra.mxu3 %vm262_vm0, %v2316_v62  ;;  %v2735_v3 = vunpack.i.h.bf16 %v2320_v61  ;;  %v2360_v9 = vld [vmem:[%s2720_s1 + $0xd8] sm:$0xff] }
  0xb2   : >> { %754 = vmatpush.msrb.mxu3 %v1839_v7  ;;  %1065 = vmatpush.msra.mxu0 %v2025_v14  ;;  %v2396_v14 = vld [vmem:[%s2720_s1 + $0x68] sm:$0xff] }
  0xb3   : >> { %992 = vmatpush.msrb.mxu1 %v2006_v10  ;;  %708 = vmatpush.msrb.mxu2 %v2734_v44  ;;  %v2365_v10 = vld [vmem:[%s2720_s1 + $0xb0] sm:$0xff] }
  0xb4   : >> { %755 = vmatpush.msrb.mxu3 %v2736_v42  ;;  %1066 = vmatpush.msra.mxu0 %v2031_v16 }
  0xb5   : >> { %993 = vmatpush.msrb.mxu1 %v2010_v11  ;;  %709 = vmatpush.msrb.mxu2 %v2735_v3  ;;  %v2372_v11 = vld [vmem:[%s2720_s1 + $0xc8] sm:$0xff] }
  0xb6   : >> { %1634 = vmatmul.msk.f32.vlgmr.msra.gmra.mxu2 %vm262_vm0, %v2343_v31  ;;  %1659 = vmatmul.msk.f32.gmra.mxu0 %vm262_vm0, %v2372_v11 }
  0xb7   : >> { %1088 = vmatpush.msra.mxu1 %v1829_v56  ;;  %v2375_v12 = vpop.permute.xlu1 %1852 }
  0xb8   : >> { %v2377_v13 = vpop.permute.xlu0 %1847  ;;  %v1855_v56 = vunpack.i.h.bf16 %v2375_v12  ;;  %v1854_v44 = vunpack.i.l.bf16 %v2375_v12  ;;  %1663 = vmatmul.msk.f32.gmra.mxu1 %vm262_vm0, %v2360_v9 }
  0xb9   : >> { %1089 = vmatpush.msra.mxu1 %v1830_v57  ;;  %v2737_v3 = vunpack.i.h.bf16 %v2377_v13  ;;  %v2738_v42 = vunpack.i.l.bf16 %v2377_v13  ;;  %1654 = vmatmul.msk.f32.vlgmr.msrb.gmra.mxu3 %vm262_vm0, %v2365_v10 }
  0xba   : >> { %928 = vmatpush.msra.mxu3 %v1854_v44 }
  0xbb   : >> { %1090 = vmatpush.msra.mxu1 %v1844_v19  ;;  %882 = vmatpush.msra.mxu2 %v2738_v42  ;;  %v2439_v42 = vld [vmem:[%s2720_s1 + $0xa0] sm:$0xff] }
  0xbc   : >> { %929 = vmatpush.msra.mxu3 %v1855_v56 }
  0xbd   : >> { %1091 = vmatpush.msra.mxu1 %v1845_v22  ;;  %883 = vmatpush.msra.mxu2 %v2737_v3 }
  0xbe   : >> { %1635 = vmatmul.msk.f32.gmra.mxu2 %vm262_vm0, %v2396_v14  ;;  %1672 = vmatmul.msk.f32.vlgmr.msrb.gmra.mxu0 %vm262_vm0, %v2153_v59  ;;  %v2740_v59 = vunpack.i.h.bf16 %v2282_v63 }
  0xbf   : >> { %v2416_v57 = vpop.permute.xlu1 %1867  ;;  %1163 = vmatpush.msrb.mxu0 %v2056_v21  ;;  %v2739_v21 = vunpack.i.h.bf16 %v2176_v6  ;;  %v1927_v6 = vmov 0  }
  0xc0   : >> { %v2418_v17 = vpop.permute.xlu0 %1862  ;;  %v1870_v16 = vunpack.i.h.bf16 %v2416_v57  ;;  %v1869_v19 = vunpack.i.l.bf16 %v2416_v57  ;;  %1674 = vmatmul.msk.f32.vlgmr.msrb.gmra.mxu1 %vm262_vm0, %v2077_v26  ;;  %v2457_v26 = vld [vmem:[%s2720_s1 + $0xf0] sm:$0xff]  ;;  %1906 = vset.pattern.permute.xlu0 %v1927_v6 }
  0xc1   : >> { %v1865_v22 = vunpack.i.h.bf16 %v2418_v17  ;;  %v1864_v3 = vunpack.i.l.bf16 %v2418_v17  ;;  %1655 = vmatmul.msk.f32.gmra.mxu3 %vm262_vm0, %v2414_v52  ;;  %1188 = vmatpush.msrb.mxu1 %v1859_v47 }
  0xc2   : >> { %930 = vmatpush.msra.mxu3 %v1869_v19  ;;  %1164 = vmatpush.msrb.mxu0 %v2053_v20  ;;  %v2479_v20 = vld [vmem:[%s2720_s1 + $0xa8] sm:$0xff] }
  0xc3   : >> { %884 = vmatpush.msra.mxu2 %v1864_v3  ;;  %1189 = vmatpush.msrb.mxu1 %v1860_v46 }
  0xc4   : >> { %931 = vmatpush.msra.mxu3 %v1870_v16  ;;  %943 = vperm.xlu0 %1906, %v1964_v0  }
  0xc5   : >> { %885 = vmatpush.msra.mxu2 %v1865_v22  ;;  %1190 = vmatpush.msrb.mxu1 %v1874_v18 }
  0xc6   : >> { %1650 = vmatmul.msk.f32.vlgmr.msrb.gmra.mxu2 %vm262_vm0, %v2439_v42  ;;  %1038 = vmatpush.msrb.mxu3 %v1794_v15  ;;  %v2741_v15 = vunpack.i.l.bf16 %v2220_v39 }
  0xc7   : >> { %1013 = vmatpush.msrb.mxu2 %v1789_v25  ;;  %1191 = vmatpush.msrb.mxu1 %v2740_v59  ;;  %v2744_v25 = vunpack.i.h.bf16 %v2218_v38  ;;  %v2510_v38 = vld [vmem:[%s2720_s1 + $0xe0] sm:$0xff] }
  0xc8   : >> { %1039 = vmatpush.msrb.mxu3 %v1795_v8  ;;  %1673 = vmatmul.msk.f32.gmra.mxu0 %vm262_vm0, %v2193_v29  ;;  %v2743_v8 = vunpack.i.h.bf16 %v2220_v39  ;;  %v2745_v29 = vunpack.i.l.bf16 %v2270_v54  ;;  %v2747_v39 = vunpack.i.h.bf16 %v2318_v58 }
  0xc9   : >> { %1014 = vmatpush.msrb.mxu2 %v2739_v21  ;;  %1670 = vmatmul.msk.f32.vlgmr.msra.gmra.mxu3 %vm262_vm0, %v2457_v26 }
  0xca   : >> { %1040 = vmatpush.msrb.mxu3 %v2742_v5  ;;  %1675 = vmatmul.msk.f32.gmra.mxu1 %vm262_vm0, %v2093_v30  ;;  %v2497_v30 = vld [vmem:[%s2720_s1 + $0xf8] sm:$0xff] }
  0xcb   : >> { %1015 = vmatpush.msrb.mxu2 %v2741_v15  ;;  %1907 = vset.pattern.permute.xlu1 %v1927_v6 }
  0xcc   : >> { %1041 = vmatpush.msrb.mxu3 %v2744_v25  ;;  %948 = vperm.xlu1 %1907, %v1969_v1  }
  0xcd   : >> { %1016 = vmatpush.msrb.mxu2 %v2743_v8  ;;  %1165 = vmatpush.msrb.mxu0 %v2067_v24  ;;  %v2748_v24 = vunpack.i.l.bf16 %v2272_v55 }
  0xce   : >> { %1138 = vmatpush.msra.mxu3 %v2745_v29  ;;  %1651 = vmatmul.msk.f32.gmra.mxu2 %vm262_vm0, %v2479_v20 }
  0xcf   : >> { %1166 = vmatpush.msrb.mxu0 %v2064_v23  ;;  %v2750_v23 = vunpack.i.l.bf16 %v2320_v61 }
  0xd0   : >> { %1139 = vmatpush.msra.mxu3 %v2746_v45  ;;  %1680 = vmatmul.msk.f32.vlgmr.msra.gmra.mxu0 %vm262_vm0, %v2109_v34  ;;  %v2749_v34 = vunpack.i.h.bf16 %v2272_v55 }
  0xd1   : >> { %1671 = vmatmul.msk.f32.gmra.mxu3 %vm262_vm0, %v2497_v30  ;;  %1263 = vmatpush.msra.mxu0 %v2085_v28  ;;  %v2535_v28 = vld [vmem:[%s2720_s1 + $0xe8] sm:$0xff] }
  0xd2   : >> { %1140 = vmatpush.msra.mxu3 %v1839_v7  ;;  %1682 = vmatmul.msk.f32.vlgmr.msra.gmra.mxu1 %vm262_vm0, %v2141_v49 }
  0xd3   : >> { %1264 = vmatpush.msra.mxu0 %v2082_v27  ;;  %v2751_v27 = vunpack.i.h.bf16 %v2320_v61 }
  0xd4   : >> { %1141 = vmatpush.msra.mxu3 %v2747_v39 }
  0xd5   : >> { %1265 = vmatpush.msra.mxu0 %v2104_v33  ;;  %v1888_v33 = vpop.permute.xlu2 %1887 }
  0xd6   : >> { %1666 = vmatmul.msk.f32.vlgmr.msra.gmra.mxu2 %vm262_vm0, %v2510_v38  ;;  %v1889_v49 = vunpack.i.l.bf16 %v1888_v33 }
  0xd7   : >> { %1113 = vmatpush.msra.mxu2 %v2748_v24  ;;  %1266 = vmatpush.msra.mxu0 %v2101_v32  ;;  %v1883_v32 = vpop.permute.xlu1 %1882 }
  0xd8   : >> { %1681 = vmatmul.msk.f32.gmra.mxu0 %vm262_vm0, %v2125_v37  ;;  %v1890_v37 = vunpack.i.h.bf16 %v1888_v33  ;;  %1304 = vmatpush.msra.mxu1 %v1889_v49 }
  0xd9   : >> { %1114 = vmatpush.msra.mxu2 %v2749_v34  ;;  %1678 = vmatmul.msk.f32.vlgmr.msrb.gmra.mxu3 %vm262_vm0, %v2172_v4  ;;  %v1884_v4 = vunpack.i.l.bf16 %v1883_v32 }
  0xda   : >> { %1238 = vmatpush.msrb.mxu3 %v1854_v44  ;;  %1683 = vmatmul.msk.f32.gmra.mxu1 %vm262_vm0, %v2162_v2  ;;  %v2752_v2 = vunpack.i.l.bf16 %v2377_v13  ;;  %v1885_v44 = vunpack.i.h.bf16 %v1883_v32 }
  0xdb   : >> { %1115 = vmatpush.msra.mxu2 %v2750_v23  ;;  %1305 = vmatpush.msra.mxu1 %v1890_v37 }
  0xdc   : >> { %1239 = vmatpush.msrb.mxu3 %v1855_v56 }
  0xdd   : >> { %1116 = vmatpush.msra.mxu2 %v2751_v27 }
  0xde   : >> { %1667 = vmatmul.msk.f32.gmra.mxu2 %vm262_vm0, %v2535_v28  ;;  %1240 = vmatpush.msrb.mxu3 %v1869_v19 }
  0xdf   : >> { %v1898_v46 = vpop.permute.xlu1 %1897 }
  0xe0   : >> { %1241 = vmatpush.msrb.mxu3 %v1870_v16  ;;  %1688 = vmatmul.msk.f32.vlgmr.msrb.gmra.mxu0 %vm262_vm0, %v2133_v41  ;;  %v2753_v41 = vunpack.i.h.bf16 %v2377_v13  ;;  %v1899_v54 = vunpack.i.l.bf16 %v1898_v46 }
  0xe1   : >> { %1679 = vmatmul.msk.f32.gmra.mxu3 %vm262_vm0, %v2214_v36  ;;  %v1878_v36 = vpop.permute.xlu0 %1877 }
  0xe2   : >> { %1690 = vmatmul.msk.f32.vlgmr.msrb.gmra.mxu1 %vm262_vm0, %v2205_v35  ;;  %v1903_v35 = vpop.permute.xlu2 %1902  ;;  %v1880_v55 = vunpack.i.h.bf16 %v1878_v36 }
  0xe3   : >> { %v1905_v47 = vunpack.i.h.bf16 %v1903_v35 }
  0xe6   : >> { %1676 = vmatmul.msk.f32.vlgmr.msrb.gmra.mxu2 %vm262_vm0, %v2239_v48  ;;  %v1904_v48 = vunpack.i.l.bf16 %v1903_v35 }
  0xe7   : >> { %1213 = vmatpush.msrb.mxu2 %v2752_v2 }
  0xe8   : >> { %1689 = vmatmul.msk.f32.gmra.mxu0 %vm262_vm0, %v2268_v53  ;;  %v1900_v53 = vunpack.i.h.bf16 %v1898_v46  ;;  %1306 = vmatpush.msra.mxu1 %v1904_v48 }
  0xe9   : >> { %1214 = vmatpush.msrb.mxu2 %v2753_v41  ;;  %1686 = vmatmul.msk.f32.vlgmr.msra.gmra.mxu3 %vm262_vm0, %v2263_v51  ;;  %v1893_v51 = vpop.permute.xlu0 %1892 }
  0xea   : >> { %1378 = vmatpush.msra.mxu3 %v1884_v4  ;;  %1691 = vmatmul.msk.f32.gmra.mxu1 %vm262_vm0, %v2254_v50  ;;  %v1879_v50 = vunpack.i.l.bf16 %v1878_v36  ;;  %v1895_v58 = vunpack.i.h.bf16 %v1893_v51 }
  0xeb   : >> { %1215 = vmatpush.msrb.mxu2 %v1864_v3  ;;  %1307 = vmatpush.msra.mxu1 %v1905_v47 }
  0xec   : >> { %1379 = vmatpush.msra.mxu3 %v1885_v44 }
  0xed   : >> { %1216 = vmatpush.msrb.mxu2 %v1865_v22 }
  0xee   : >> { %1677 = vmatmul.msk.f32.gmra.mxu2 %vm262_vm0, %v2291_v40  ;;  %1380 = vmatpush.msra.mxu3 %v1899_v54  ;;  %v1894_v40 = vunpack.i.l.bf16 %v1893_v51 }
  0xf0   : >> { %1696 = vmatmul.msk.f32.vlgmr.msra.gmra.mxu0 %vm262_vm0, %v2327_v60  ;;  %1381 = vmatpush.msra.mxu3 %v1900_v53  ;;  %v439_v60 = vpop.f32.mrf.mxu0 }
  0xf1   : >> { %1687 = vmatmul.msk.f32.gmra.mxu3 %vm262_vm0, %v2316_v62 }
  0xf2   : >> { %1698 = vmatmul.msk.f32.vlgmr.msra.gmra.mxu1 %vm262_vm0, %v2306_v43 }
  0xf6   : >> { %1684 = vmatmul.msk.f32.vlgmr.msra.gmra.mxu2 %vm262_vm0, %v2343_v31  ;;  %v315_v31 = vpop.f32.mrf.mxu3 }
  0xf7   : >> { %1341 = vmatpush.msra.mxu2 %v1879_v50 }
  0xf8   : >> { %1697 = vmatmul.msk.f32.gmra.mxu0 %vm262_vm0, %v2372_v11  ;;  %v442_v18 = vpop.f32.mrf.mxu0 }
  0xf9   : >> { %1342 = vmatpush.msra.mxu2 %v1880_v55  ;;  %1694 = vmatmul.msk.f32.vlgmr.msrb.gmra.mxu3 %vm262_vm0, %v2365_v10 }
  0xfa   : >> { %1699 = vmatmul.msk.f32.gmra.mxu1 %vm262_vm0, %v2360_v9 }
  0xfb   : >> { %1343 = vmatpush.msra.mxu2 %v1894_v40 }
  0xfd   : >> { %1344 = vmatpush.msra.mxu2 %v1895_v58 }
  0xfe   : >> { %1685 = vmatmul.msk.f32.gmra.mxu2 %vm262_vm0, %v2396_v14  ;;  %v318_v43 = vpop.f32.mrf.mxu3 }
 0x100   : >> { %v615_v13 = vpop.f32.mrf.mxu0 }
 0x101   : >> { %1695 = vmatmul.msk.f32.gmra.mxu3 %vm262_vm0, %v2414_v52 }
 0x106   : >> { %1692 = vmatmul.msk.f32.vlgmr.msrb.gmra.mxu2 %vm262_vm0, %v2439_v42 }
 0x109   : >> { %1702 = vmatmul.msk.f32.vlgmr.msra.gmra.mxu3 %vm262_vm0, %v2457_v26 }
 0x10b   : >> { %v489_v63 = vpop.f32.mrf.mxu1 }
 0x10e   : >> { %1693 = vmatmul.msk.f32.gmra.mxu2 %vm262_vm0, %v2479_v20 }
 0x111   : >> { %1703 = vmatmul.msk.f32.gmra.mxu3 %vm262_vm0, %v2497_v30  ;;  %v618_v21 = vpop.f32.mrf.mxu0 }
 0x114   : >> { %v492_v10 = vpop.f32.mrf.mxu1 }
 0x116   : >> { %1700 = vmatmul.msk.f32.vlgmr.msra.gmra.mxu2 %vm262_vm0, %v2510_v38 }
 0x119   : >> { %v286_v61 = vpop.f32.mrf.mxu2 }
 0x11a   : >> { %v316_v62 = vadd.f32 %v315_v31, %v286_v61 }
 0x11c   : >> { %v405_v3 = vpop.f32.mrf.mxu3  ;;  %v665_v57 = vpop.f32.mrf.mxu1 }
 0x11e   : >> { %1701 = vmatmul.msk.f32.gmra.mxu2 %vm262_vm0, %v2535_v28 }
 0x121   : >> { %v289_v42 = vpop.f32.mrf.mxu2 }
 0x122   : >> { %v319_v7 = vadd.f32 %v318_v43, %v289_v42  ;;  %v1722_v42 = vld [vmem:[%s2722_s3 + $0xf8] sm:$0xf] }
 0x123   : >> { %1723 = vmatpush.msk.msrb.mxu1 %vm1420_vm1, %v1722_v42 }
 0x124   : >> { %v408_v9 = vpop.f32.mrf.mxu3  ;;  %v668_v20 = vpop.f32.mrf.mxu1 }
 0x129   : >> { %v359_v11 = vpop.f32.mrf.mxu2  ;;  %v791_v45 = vpop.f32.mrf.mxu0 }
 0x12a   : >> { %v365_v12 = vadd.f32 %v359_v11, %v316_v62  ;;  %v1410_v11 = vld [vmem:[%s2722_s3 + $0x68] sm:$0xff] }
 0x12c   : >> { %v411_v56 = vadd.f32 %v405_v3, %v365_v12  ;;  %v581_v14 = vpop.f32.mrf.mxu3  ;;  %v1412_v3 = vld [vmem:[%s2722_s3 + $0x78] sm:$0xf]  ;;  %v1720_v12 = vld [vmem:[%s2722_s3 + $0xe8] sm:$0xff] }
 0x12d   : >> { %v841_v24 = vpop.f32.mrf.mxu1  ;;  %1704 = vmatpush.msk.msrb.mxu0 %vm1420_vm1, %v1412_v3 }
 0x12e   : >> { %v445_v52 = vadd.f32 %v439_v60, %v411_v56  ;;  %v1409_v56 = vld [vmem:[%s2722_s3 + $0x60] sm:$0xff] }
 0x130   : >> { %v495_v17 = vadd.f32 %v489_v63, %v445_v52 }
 0x131   : >> { %v362_v16 = vpop.f32.mrf.mxu2 }
 0x132   : >> { %v366_v19 = vadd.f32 %v362_v16, %v319_v7  ;;  %v1411_v7 = vld [vmem:[%s2722_s3 + $0x70] sm:$0xff] }
 0x133   : >> { %v794_v33 = vpop.f32.mrf.mxu0  ;;  %1425 = vmatpush.msrb.mxu0 %v1411_v7 }
 0x134   : >> { %v412_v22 = vadd.f32 %v408_v9, %v366_v19  ;;  %v584_v26 = vpop.f32.mrf.mxu3  ;;  %v1721_v9 = vld [vmem:[%s2722_s3 + $0xf0] sm:$0xff] }
 0x135   : >> { %v844_v2 = vpop.f32.mrf.mxu1  ;;  %1468 = vmatpush.msrb.mxu1 %v1721_v9  ;;  %1426 = vmatpush.msrb.mxu0 %v1410_v11 }
 0x136   : >> { %v446_v59 = vadd.f32 %v442_v18, %v412_v22  ;;  %v1407_v22 = vld [vmem:[%s2722_s3 + $0x50] sm:$0xff] }
 0x137   : >> { %1469 = vmatpush.msrb.mxu1 %v1720_v12  ;;  %1427 = vmatpush.msrb.mxu0 %v1409_v56 }
 0x138   : >> { %v496_v15 = vadd.f32 %v492_v10, %v446_v59 }
 0x139   : >> { %v535_v5 = vpop.f32.mrf.mxu2 }
 0x13a   : >> { %v541_v6 = vadd.f32 %v535_v5, %v495_v17  ;;  %v1718_v17 = vld [vmem:[%s2722_s3 + $0xd8] sm:$0xff]  ;;  %v1716_v5 = vld [vmem:[%s2722_s3 + $0xc8] sm:$0xff] }
 0x13b   : >> { %v972_v46 = vpop.f32.mrf.mxu0 }
 0x13c   : >> { %v587_v8 = vadd.f32 %v581_v14, %v541_v6  ;;  %v757_v25 = vpop.f32.mrf.mxu3  ;;  %v1719_v14 = vld [vmem:[%s2722_s3 + $0xe0] sm:$0xff] }
 0x13d   : >> { %v995_v54 = vpop.f32.mrf.mxu1  ;;  %1470 = vmatpush.msrb.mxu1 %v1719_v14  ;;  %v1405_v6 = vld [vmem:[%s2722_s3 + $0x40] sm:$0xff] }
 0x13e   : >> { %v621_v29 = vadd.f32 %v615_v13, %v587_v8  ;;  %v996_v52 = vadd.f32 %v995_v54, %v972_v46  ;;  %v1715_v8 = vld [vmem:[%s2722_s3 + $0xc0] sm:$0xff] }
 0x13f   : >> { %1471 = vmatpush.msrb.mxu1 %v1718_v17 }
 0x140   : >> { %v671_v30 = vadd.f32 %v665_v57, %v621_v29  ;;  %v1408_v57 = vld [vmem:[%s2722_s3 + $0x58] sm:$0xff] }
 0x141   : >> { %v538_v38 = vpop.f32.mrf.mxu2  ;;  %1428 = vmatpush.msrb.mxu0 %v1408_v57 }
 0x142   : >> { %v542_v39 = vadd.f32 %v538_v38, %v496_v15  ;;  %v1406_v15 = vld [vmem:[%s2722_s3 + $0x48] sm:$0xff] }
 0x143   : >> { %1429 = vmatpush.msrb.mxu0 %v1407_v22 }
 0x144   : >> { %v588_v34 = vadd.f32 %v584_v26, %v542_v39  ;;  %v760_v23 = vpop.f32.mrf.mxu3  ;;  %v1717_v26 = vld [vmem:[%s2722_s3 + $0xd0] sm:$0xff] }
 0x145   : >> { %v975_v58 = vpop.f32.mrf.mxu0  ;;  %1472 = vmatpush.msrb.mxu1 %v1717_v26  ;;  %1430 = vmatpush.msrb.mxu0 %v1406_v15 }
 0x146   : >> { %v622_v28 = vadd.f32 %v618_v21, %v588_v34  ;;  %v1713_v34 = vld [vmem:[%s2722_s3 + $0xb0] sm:$0xff] }
 0x147   : >> { %v998_v60 = vpop.f32.mrf.mxu1  ;;  %1473 = vmatpush.msrb.mxu1 %v1716_v5  ;;  %1431 = vmatpush.msrb.mxu0 %v1405_v6 }
 0x148   : >> { %v672_v27 = vadd.f32 %v668_v20, %v622_v28  ;;  %v999_v29 = vadd.f32 %v998_v60, %v975_v58 }
 0x149   : >> { %v711_v32 = vpop.f32.mrf.mxu2  ;;  %1474 = vmatpush.msrb.mxu1 %v1715_v8 }
 0x14a   : >> { %v717_v37 = vadd.f32 %v711_v32, %v671_v30  ;;  %v1714_v30 = vld [vmem:[%s2722_s3 + $0xb8] sm:$0xff]  ;;  %v1712_v32 = vld [vmem:[%s2722_s3 + $0xa8] sm:$0xff] }
 0x14b   : >> { %1475 = vmatpush.msrb.mxu1 %v1714_v30 }
 0x14c   : >> { %v763_v49 = vadd.f32 %v757_v25, %v717_v37  ;;  %v933_v4 = vpop.f32.mrf.mxu3 }
 0x14d   : >> { %v1068_v18 = vpop.f32.mrf.mxu0  ;;  %1476 = vmatpush.msrb.mxu1 %v1713_v34 }
 0x14e   : >> { %v797_v41 = vadd.f32 %v791_v45, %v763_v49  ;;  %v1404_v45 = vld [vmem:[%s2722_s3 + $0x38] sm:$0xff] }
 0x14f   : >> { %v1093_v13 = vpop.f32.mrf.mxu1  ;;  %1432 = vmatpush.msrb.mxu0 %v1404_v45  ;;  %1477 = vmatpush.msrb.mxu1 %v1712_v32  ;;  %v949_v45 = vpop.permute.xlu1 %948 }
 0x150   : >> { %v847_v36 = vadd.f32 %v841_v24, %v797_v41  ;;  %v1403_v24 = vld [vmem:[%s2722_s3 + $0x30] sm:$0xff] }
 0x151   : >> { %v714_v44 = vpop.f32.mrf.mxu2  ;;  %1433 = vmatpush.msrb.mxu0 %v1403_v24 }
 0x152   : >> { %v718_v35 = vadd.f32 %v714_v44, %v672_v27  ;;  %v1402_v27 = vld [vmem:[%s2722_s3 + $0x28] sm:$0xff]  ;;  %v1710_v44 = vld [vmem:[%s2722_s3 + $0x98] sm:$0xff] }
 0x153   : >> { %1434 = vmatpush.msrb.mxu0 %v1402_v27 }
 0x154   : >> { %v764_v47 = vadd.f32 %v760_v23, %v718_v35  ;;  %v936_v53 = vpop.f32.mrf.mxu3 }
 0x155   : >> { %v1071_v59 = vpop.f32.mrf.mxu0 }
 0x156   : >> { %v798_v48 = vadd.f32 %v794_v33, %v764_v47  ;;  %v1399_v47 = vld [vmem:[%s2722_s3 + $0x10] sm:$0xff] }
 0x157   : >> { %v1096_v25 = vpop.f32.mrf.mxu1 }
 0x158   : >> { %v848_v50 = vadd.f32 %v844_v2, %v798_v48  ;;  %v1401_v2 = vld [vmem:[%s2722_s3 + $0x20] sm:$0xff]  ;;  %v1709_v48 = vld [vmem:[%s2722_s3 + $0x90] sm:$0xff] }
 0x159   : >> { %v887_v51 = vpop.f32.mrf.mxu2  ;;  %1435 = vmatpush.msrb.mxu0 %v1401_v2 }
 0x15a   : >> { %v893_v55 = vadd.f32 %v887_v51, %v847_v36  ;;  %v1400_v36 = vld [vmem:[%s2722_s3 + $0x18] sm:$0xff]  ;;  %v1708_v51 = vld [vmem:[%s2722_s3 + $0x88] sm:$0xff] }
 0x15b   : >> { %1436 = vmatpush.msrb.mxu0 %v1400_v36 }
 0x15c   : >> { %v2606_v40 = vadd.f32 %v933_v4, %v893_v55  ;;  %v1043_v31 = vpop.f32.mrf.mxu3  ;;  %v1711_v4 = vld [vmem:[%s2722_s3 + $0xa0] sm:$0xff] }
 0x15d   : >> { %v1168_v33 = vpop.f32.mrf.mxu0  ;;  %1478 = vmatpush.msrb.mxu1 %v1711_v4  ;;  %1437 = vmatpush.msrb.mxu0 %v1399_v47 }
 0x15f   : >> { %v1193_v35 = vpop.f32.mrf.mxu1  ;;  %1479 = vmatpush.msrb.mxu1 %v1710_v44 }
 0x161   : >> { %v890_v43 = vpop.f32.mrf.mxu2  ;;  %1480 = vmatpush.msrb.mxu1 %v1709_v48 }
 0x162   : >> { %v894_v61 = vadd.f32 %v890_v43, %v848_v50  ;;  %v1398_v50 = vld [vmem:[%s2722_s3 + $0x8] sm:$0xff]  ;;  %v1707_v43 = vld [vmem:[%s2722_s3 + $0x80] sm:$0xff] }
 0x163   : >> { %1438 = vmatpush.msrb.mxu0 %v1398_v50  ;;  %1481 = vmatpush.msrb.mxu1 %v1708_v51 }
 0x164   : >> { %v2608_v62 = vadd.f32 %v936_v53, %v894_v61  ;;  %v2610_v63 = vpop.f32.mrf.mxu3 }
 0x165   : >> { %v1171_v60 = vpop.f32.mrf.mxu0  ;;  %1482 = vmatpush.msrb.mxu1 %v1707_v43 }
 0x167   : >> { %v1196_v3 = vpop.f32.mrf.mxu1 }
 0x169   : >> { %v1018_v10 = vpop.f32.mrf.mxu2 }
 0x16a   : >> { %v1024_v19 = vadd.f32 %v1018_v10, %v996_v52 }
 0x16c   : >> { %v1143_v16 = vpop.f32.mrf.mxu3  ;;  %v1049_v20 = vadd.f32 %v1043_v31, %v1024_v19  ;;  %v1397_v31 = vld [vmem:[%s2722_s3] sm:$0xff]  ;;  %v944_v19 = vpop.permute.xlu0 %943 }
 0x16d   : >> { %1439 = vmatpush.msrb.mxu0 %v1397_v31  ;;  %v1268_v12 = vpop.f32.mrf.mxu0  ;;  %v951_v5 = vadd.f32 %v944_v19, %v2606_v40 }
 0x16e   : >> { %v1074_v38 = vadd.f32 %v1068_v18, %v1049_v20 }
 0x16f   : >> { %v1309_v52 = vpop.f32.mrf.mxu1 }
 0x170   : >> { %v1099_v37 = vadd.f32 %v1093_v13, %v1074_v38 }
 0x171   : >> { %v1021_v21 = vpop.f32.mrf.mxu2 }
 0x172   : >> { %v1025_v39 = vadd.f32 %v1021_v21, %v999_v29  ;;  %v953_v29 = vmax.f32 %v951_v5, 0.0 }
 0x174   : >> { %v1146_v28 = vpop.f32.mrf.mxu3  ;;  %v1050_v49 = vadd.f32 %v2610_v63, %v1025_v39 }
 0x175   : >> { %v1271_v21 = vpop.f32.mrf.mxu0 }
 0x176   : >> { %v1075_v46 = vadd.f32 %v1071_v59, %v1050_v49 }
 0x177   : >> { %v1312_v8 = vpop.f32.mrf.mxu1 }
 0x178   : >> { %v1100_v58 = vadd.f32 %v1096_v25, %v1075_v46 }
 0x179   : >> { %v1118_v23 = vpop.f32.mrf.mxu2 }
 0x17a   : >> { %v1124_v41 = vadd.f32 %v1118_v23, %v1099_v37 }
 0x17c   : >> { %v1149_v54 = vadd.f32 %v1143_v16, %v1124_v41  ;;  %v1243_v55 = vpop.f32.mrf.mxu3 }
 0x17e   : >> { %v1174_v61 = vadd.f32 %v1168_v33, %v1149_v54 }
 0x180   : >> { %v1199_v18 = vadd.f32 %v1193_v35, %v1174_v61 }
 0x181   : >> { %v1121_v53 = vpop.f32.mrf.mxu2 }
 0x182   : >> { %v1125_v63 = vadd.f32 %v1121_v53, %v1100_v58 }
 0x184   : >> { %v1150_v7 = vadd.f32 %v1146_v28, %v1125_v63  ;;  %v1246_v10 = vpop.f32.mrf.mxu3  ;;  %v952_v28 = vadd.f32 %v949_v45, %v2608_v62 }
 0x186   : >> { %v1175_v11 = vadd.f32 %v1171_v60, %v1150_v7  ;;  %v954_v32 = vmax.f32 %v952_v28, 0.0 }
 0x188   : >> { %v1200_v14 = vadd.f32 %v1196_v3, %v1175_v11 }
 0x189   : >> { %v1218_v42 = vpop.f32.mrf.mxu2 }
 0x18a   : >> { %v1224_v9 = vadd.f32 %v1218_v42, %v1199_v18 }
 0x18c   : >> { %v1249_v13 = vadd.f32 %v1243_v55, %v1224_v9  ;;  %v1383_v16 = vpop.f32.mrf.mxu3 }
 0x18e   : >> { %v1274_v57 = vadd.f32 %v1268_v12, %v1249_v13 }
 0x190   : >> { %v1315_v22 = vadd.f32 %v1309_v52, %v1274_v57 }
 0x191   : >> { %v1221_v56 = vpop.f32.mrf.mxu2 }
 0x192   : >> { %v1225_v17 = vadd.f32 %v1221_v56, %v1200_v14 }
 0x194   : >> { %v1250_v26 = vadd.f32 %v1246_v10, %v1225_v17  ;;  %v1386_v24 = vpop.f32.mrf.mxu3 }
 0x196   : >> { %v1275_v20 = vadd.f32 %v1271_v21, %v1250_v26 }
 0x198   : >> { %v1316_v30 = vadd.f32 %v1312_v8, %v1275_v20 }
 0x199   : >> { %v1346_v59 = vpop.f32.mrf.mxu2 }
 0x19a   : >> { %v1352_v15 = vadd.f32 %v1346_v59, %v1315_v22 }
 0x19c   : >> { %v1389_v6 = vadd.f32 %v1383_v16, %v1352_v15 }
 0x19e   : >> { %v1391_v25 = vadd.f32 %v1389_v6, %v944_v19 }
 0x1a0   : >> { %v1393_v38 = vmax.f32 %v1391_v25, 0.0 }
 0x1a1   : >> { %v1349_v39 = vpop.f32.mrf.mxu2 }
 0x1a2   : >> { %v1395_v34 = vmax.f32 %v953_v29, %v1393_v38  ;;  %v1353_v23 = vadd.f32 %v1349_v39, %v1316_v30 }
 0x1a4   : >> { %v1390_v27 = vadd.f32 %v1386_v24, %v1353_v23  ;;  %1705 = vmatmul.msk.f32.vlgmr.msrb.gmra.mxu0 %vm1413_vm2, %v1395_v34  ;;  %1724 = vmatmul.msk.f32.vlgmr.msrb.gmra.mxu1 %vm1413_vm2, %v1395_v34 }
 0x1a6   : >> { %v1392_v40 = vadd.f32 %v1390_v27, %v949_v45 }
 0x1a8   : >> { %v1394_v33 = vmax.f32 %v1392_v40, 0.0 }
 0x1aa   : >> { %v1396_v37 = vmax.f32 %v954_v32, %v1394_v33 }
 0x1ac   : >> { %1706 = vmatmul.msk.f32.gmra.mxu0 %vm1413_vm2, %v1396_v37  ;;  %1725 = vmatmul.msk.f32.gmra.mxu1 %vm1413_vm2, %v1396_v37 }
 0x221   : >> { %v1441_v49 = vpop.f32.mrf.mxu0  ;;  %v1484_v2 = vpop.f32.mrf.mxu1 }
 0x222   : >> { %v1490_v4 = vmax.f32 %v1441_v49, %v1484_v2 }
 0x224   : >> { %1495 = vst.msk [vmem:[%s1493_s6] sm:$0xff] %vm1494_vm3, %v1490_v4 }
 0x228   : > { %204 = sbr.rel (!%p202_p4) target bundleno = 16 (0x10), region = 95 }
 0x229   : >> { %v1444_v41 = vpop.f32.mrf.mxu0  ;;  %v1487_v36 = vpop.f32.mrf.mxu1 }
 0x22a   : >> { %v1491_v44 = vmax.f32 %v1444_v41, %v1487_v36 }
 0x22c   : >> { %1496 = vst.msk [vmem:[%s1493_s6 + $0x8] sm:$0xff] %vm1494_vm3, %v1491_v44 }
 0x22d PF: > { %s14_s15 = sadd.s32 1, %s1918_s15  }
 0x22e   : > { %p11_p5 = scmp.ge.s32.totalorder %s14_s15, 4  }
 0x230   :  { %13 = sbr.rel (!%p11_p5) target bundleno = 1 (0x1), region = 106 }

// kernel: network_forward.5
= control target key start
LH: loop header
LB: loop body
LE: loop exit
PB: predicated region body
PF: predicated region fallthrough
CT: control target
= control target key end

     0   :  { %s2568_s15 = smov 0   ;;  %s3648_s0 = inlined_call_operand.vmem [shape: f32[2,256,3,256], index: 0, kind: input, shape index: {}]   ;;  %s3649_s1 = inlined_call_operand.vmem [shape: f32[9,32,3], index: 1, kind: input, shape index: {}]   ;;  %s3650_s2 = inlined_call_operand.vmem [shape: f32[32,1], index: 2, kind: input, shape index: {}]   ;;  %s3651_s3 = inlined_call_operand.vmem [shape: f32[2,254,127], index: 3, kind: input, shape index: {}]   ;;  %s3652_s4 = inlined_call_operand.vmem [shape: f32[2,127,32,127], index: 4, kind: output, shape index: {}]  }
   0x1 LB: > { %s2163_s16 = sadd.s32 4294967295, %s2521_s15   ;;  %p2167_p0 = scmp.ge.s32.totalorder %s2521_s15, 1  ;;  %s2521_s15 = sphi %s2568_s15, %s14_s15  }
   0x2   : > { %p162_p1 = scmp.lt.s32.totalorder %s2521_s15, 3 }
   0x4   : > { %p163_p2 = pnand %p2167_p0, %p162_p1 }
   0x5   : > { %p188_p3 = scmp.lt.s32.totalorder (!%p163_p2), %s2163_s16, 1  ;;  %s2531_s25 = smov (!%p163_p2), 0  }
   0x6   : > { %166 = sbr.rel (%p163_p2) target bundleno = 872 (0x368), region = 36 }
   0xb   : > { %s3662_s16 = smov (!%p188_p3, %s2163_s16), 1  ;;  %v2523_v0 = vmov inf   ;;  %v2527_v1 = vmov -inf  }
   0xc   : > { %s2442_s17 = sshll.u32 %s3662_s16, 11  ;;  %s2449_s18 = smul.u32 4064, %s3662_s16 }
   0xd   : > { %s2579_s21 = scalar_lea.vmem %s3648_s0, %s2442_s17 }
   0xe   : > { %s2584_s24 = scalar_lea.vmem %s3652_s4, %s2449_s18 }
   0xf LB: >> { %s2443_s26 = sshll.u32 %s2533_s25, 3  ;;  %s203_s25 = sadd.s32 1, %s2533_s25   ;;  %s2533_s25 = sphi %s2531_s25, %s203_s25   ;;  %v2529_v1 = vphi %v2527_v1, %v2528_v1   ;;  %v2525_v0 = vphi %v2523_v0, %v2524_v0  }
  0x10   : >> { %s208_s27 = scalar_lea.vmem %s2579_s21, %s2443_s26  ;;  %p200_p4 = scmp.ge.s32.totalorder %s203_s25, 256  }
  0x11   : >> { %v209_v2 = vld [vmem:[%s208_s27] sm:$0x77]  ;;  %vm218_vm0 = vcmask (%p200_p4), 1042432   ;;  %v2599_v16 = vld [vmem:[%s3650_s2 + $0x8] sm:$0xff] (%p200_p4)  ;;  %v2604_v17 = vld [vmem:[%s3650_s2 + $0x10] sm:$0xff] (%p200_p4)  ;;  %s2615_s10 = smov (%p200_p4), 0  }
  0x12   : >> { %v210_v3 = vmax.f32 %v2529_v1, %v209_v2   ;;  %v211_v4 = vmin.f32 %v2525_v0, %v209_v2   ;;  %202 = sbr.rel (!%p200_p4) target bundleno = 15 (0xf), region = 95  ;;  %v2594_v15 = vld [vmem:[%s3650_s2] sm:$0xff] (%p200_p4)  ;;  %3654 = vst [vmem:[#allocation3_spill] sm:$0xff] (%p200_p4), %v2599_v16  ;;  %v2609_v18 = vld [vmem:[%s3650_s2 + $0x18] sm:$0xff] (%p200_p4) }
  0x13   : > { %3653 = vst [vmem:[#allocation2_spill] sm:$0xff] (%p200_p4), %v2594_v15 }
  0x14   : >> { %v2524_v0 = vmov %v211_v4   ;;  %v2528_v1 = vmov %v210_v3   ;;  %213 = vst [vmem:[#allocation1] ss:$2 sm:$0xff] (%p200_p4), %v210_v3 }
  0x15   : > { %3655 = vst [vmem:[#allocation4_spill] sm:$0xff] (%p200_p4), %v2604_v17 }
  0x16   : > { %3656 = vst [vmem:[#allocation5_spill] sm:$0xff] (%p200_p4), %v2609_v18 }
  0x1b   : > { %v214_v5 = vld.sshfl [vmem:[#allocation1] sm:$0xff pattern:$0x75316420]  ;;  %v215_v6 = vld.sshfl [vmem:[#allocation1 + $0x8] sm:$0xff pattern:$0x75316420] }
  0x1c   : > { %v219_v7 = vsel %vm218_vm0, %v214_v5, -inf  ;;  %v220_v8 = vsel %vm218_vm0, %v215_v6, -inf  ;;  %225 = vst [vmem:[#allocation1] ss:$2 sm:$0xff] %v211_v4 }
  0x1d   : > { %v221_v9 = vmax.f32 %v219_v7, %v220_v8 }
  0x1f   : > { %222 = vmax.xlane.f32.xlu0 %v221_v9 }
  0x23   : > { %v226_v10 = vld.sshfl [vmem:[#allocation1] sm:$0xff pattern:$0x75316420]  ;;  %v227_v11 = vld.sshfl [vmem:[#allocation1 + $0x8] sm:$0xff pattern:$0x75316420] }
  0x24   : > { %v230_v12 = vsel %vm218_vm0, %v226_v10, inf  ;;  %v231_v13 = vsel %vm218_vm0, %v227_v11, inf }
  0x25   : > { %v232_v14 = vmin.f32 %v230_v12, %v231_v13 }
  0x27   : > { %233 = vmin.xlane.f32.xlu0 %v232_v14 }
  0x92   : > { %v223_v19 = vpop.xlane.xlu0 %222 }
  0x9a   : > { %v234_v20 = vpop.xlane.xlu0 %233 }
  0x9b   : > { %v235_v21 = vadd.f32 %v234_v20, %v223_v19  ;;  %v237_v22 = vsub.f32 %v223_v19, %v234_v20 }
  0x9d   : > { %v2611_v23 = vmul.f32 0.5, %v235_v21  ;;  %2494 = vrcp.f32 %v237_v22  ;;  %v249_v27 = vand.u32 2147483648, %v237_v22  ;;  %v247_v29 = vand.u32 2147483647, %v237_v22 }
  0x9e   : > { %vm243_vm2 = vweird.f32 %v237_v22 }
  0x9f   : > { %v250_v31 = vor.u32 1.1754944e-38, %v249_v27  ;;  %vm248_vm4 = vcmp.eq.f32.partialorder %v247_v29, 8.507059e+37 }
  0xa3   : > { %v2495_v24 = vpop.eup %2494 }
  0xa4   : > { %v239_v25 = vmul.f32 %v2495_v24, %v237_v22  ;;  %vm244_vm1 = vweird.f32 %v2495_v24 }
  0xa5   : > { %vm245_vm3 = vmor %vm243_vm2, %vm244_vm1 }
  0xa6   : > { %v240_v26 = vsub.f32 1.0, %v239_v25 }
  0xa8   : > { %v241_v28 = vmul.f32 %v2495_v24, %v240_v26 }
  0xaa   : > { %v242_v30 = vadd.f32 %v2495_v24, %v241_v28 }
  0xac   : > { %v246_v32 = vsel %vm245_vm3, %v2495_v24, %v242_v30 }
  0xad   : > { %v251_v33 = vsel %vm248_vm4, %v250_v31, %v246_v32 }
  0xae   : > { %v2613_v34 = vmul.f32 2.0, %v251_v33 }
  0xaf LB: >> { %v2539_v35 = vmov 839922192   ;;  %s2445_s11 = sshll.u32 %s2537_s10, 4  ;;  %s2540_s13 = smov 127   ;;  %v2661_v7 = vld [vmem:[%s3649_s1] sm:$0xff]  ;;  %vm322_vm5 = vcmask 23552   ;;  %s2537_s10 = sphi %s2615_s10, %s262_s10  }
  0xb0   : >> { %v270_v36 = vunpack.c.l.s4 %v2539_v35  ;;  %s2622_s12 = scalar_lea.vmem %s2579_s21, %s2445_s11  ;;  %s2541_s14 = smov 126   ;;  %v2670_v8 = vld [vmem:[%s3649_s1 + $0x8] sm:$0xff]  ;;  %v2679_v9 = vld [vmem:[%s3649_s1 + $0x10] sm:$0xff]  ;;  %v2693_v13 = vld [vmem:[%s3649_s1 + $0x18] sm:$0xff]  ;;  %vm320_vm6 = vcmask 1039360   ;;  %vm486_vm7 = vcmask 1031168  }
  0xb1   : >> { %v267_v38 = vld [vmem:[%s2622_s12] sm:$0x77]  ;;  %v2184_v41 = vld [vmem:[%s2622_s12 + $0x18] sm:$0x77]  ;;  %v2178_v48 = vld [vmem:[%s2622_s12 + $0x8] sm:$0x77] }
  0xb2   : >> { %v271_v37 = vunpack.c.0.s8 %v270_v36  ;;  %v2181_v57 = vld [vmem:[%s2622_s12 + $0x10] sm:$0x77]  ;;  %v2702_v20 = vld [vmem:[%s3649_s1 + $0x60] sm:$0xff]  ;;  %v2724_v25 = vld [vmem:[%s3649_s1 + $0x68] sm:$0xff]  ;;  %vm1908_vm8 = vcmask 1045504   ;;  %s2439_s23 = sshll.u32 %s2537_s10, 5 }
  0xb3   : >> { %v2712_v21 = vld [vmem:[%s3649_s1 + $0x20] sm:$0xff]  ;;  %v2733_v26 = vld [vmem:[%s3649_s1 + $0x28] sm:$0xff]  ;;  %v2742_v29 = vld [vmem:[%s3649_s1 + $0x70] sm:$0xff]  ;;  %s2069_s25 = scalar_lea.vmem %s2584_s24, %s2439_s23  ;;  %s262_s10 = sadd.s32 1, %s2537_s10  }
  0xb4   : >> { %v272_v39 = vperm.slane %v2611_v23, %v271_v37  ;;  %v279_v40 = vperm.slane %v2613_v34, %v271_v37  ;;  %v2751_v30 = vld [vmem:[%s3649_s1 + $0x30] sm:$0xff]  ;;  %v2767_v37 = vld [vmem:[%s3649_s1 + $0x78] sm:$0xff]  ;;  %v3657_v15 = vld [vmem:[#allocation2_spill] sm:$0xff]  ;;  %p259_p5 = scmp.ge.s32.totalorder %s262_s10, 127  }
  0xb5   : >> { %v3658_v16 = vld [vmem:[#allocation3_spill] sm:$0xff]  ;;  %v3659_v18 = vld [vmem:[#allocation5_spill] sm:$0xff]  ;;  %v3660_v17 = vld [vmem:[#allocation4_spill] sm:$0xff] }
  0xb6   : >> { %v274_v42 = vsub.f32 %v267_v38, %v272_v39  ;;  %v301_v43 = vsub.f32 %v2184_v41, %v272_v39  ;;  %v287_v51 = vsub.f32 %v2178_v48, %v272_v39  ;;  %v294_v60 = vsub.f32 %v2181_v57, %v272_v39  ;;  %v2777_v38 = vld [vmem:[%s3649_s1 + $0x38] sm:$0xff]  ;;  %v2813_v48 = vld [vmem:[%s3649_s1 + $0xa8] sm:$0xff] }
  0xb7   : >> { %v2867_v57 = vld [vmem:[%s3649_s1 + $0x58] sm:$0xff] }
  0xb8   : >> { %v281_v44 = vmul.f32 %v279_v40, %v274_v42  ;;  %v2628_v45 = vmul.f32 %v301_v43, %v279_v40  ;;  %v288_v52 = vmul.f32 %v287_v51, %v279_v40  ;;  %v2642_v61 = vmul.f32 %v294_v60, %v279_v40 }
  0xba   : >> { %313 = vst [vmem:[#allocation1] ss:$2 sm:$0xff] %v281_v44 }
  0xc1   : >> { %v314_v46 = vld.sshfl [vmem:[#allocation1] sm:$0xff pattern:$0x75316420]  ;;  %v315_v47 = vld.sshfl [vmem:[#allocation1 + $0x8] sm:$0xff pattern:$0x75316420] }
  0xc2   : >> { %316 = vrot.lane.b32.xlu0 %v314_v46, %s2540_s13  ;;  %397 = vst [vmem:[#allocation1] ss:$2 sm:$0xff] %v281_v44  ;;  %v2803_v46 = vld [vmem:[%s3649_s1 + $0x40] sm:$0xff] }
  0xc9   : >> { %v398_v49 = vld.sshfl [vmem:[#allocation1] sm:$0xff pattern:$0x75316420]  ;;  %v399_v50 = vld.sshfl [vmem:[#allocation1 + $0x8] sm:$0xff pattern:$0x75316420] }
  0xca   : >> { %318 = vrot.lane.b32.xlu0 %v315_v47, %s2540_s13  ;;  %479 = vst [vmem:[#allocation1] ss:$2 sm:$0xff] %v281_v44  ;;  %2204 = vmatpush.msk.msra.mxu3 %vm218_vm0, %v399_v50  ;;  %v2794_v44 = vld [vmem:[%s3649_s1 + $0xa0] sm:$0xff]  ;;  %v2835_v50 = vld [vmem:[%s3649_s1 + $0xb0] sm:$0xff] }
  0xcb   : >> { %2199 = vmatpush.msk.msra.mxu2 %vm218_vm0, %v398_v49  ;;  %2205 = vmatmul.msk.f32.vlgmr.msra.gmra.mxu3 %vm322_vm5, %v2661_v7  ;;  %v2826_v49 = vld [vmem:[%s3649_s1 + $0x48] sm:$0xff] }
  0xcc   : >> { %2200 = vmatmul.msk.f32.vlgmr.msra.gmra.mxu2 %vm322_vm5, %v2661_v7 }
  0xd1   : >> { %v480_v53 = vld.sshfl [vmem:[#allocation1] sm:$0xff pattern:$0x75316420]  ;;  %v481_v54 = vld.sshfl [vmem:[#allocation1 + $0x8] sm:$0xff pattern:$0x75316420] }
  0xd2   : >> { %482 = vrot.lane.b32.xlu1 %v480_v53, %s2541_s14  ;;  %576 = vst [vmem:[#allocation1] ss:$2 sm:$0xff] %v288_v52 }
  0xd3   : >> { %2206 = vmatmul.msk.f32.gmra.mxu3 %vm322_vm5, %v2670_v8 }
  0xd4   : >> { %2201 = vmatmul.msk.f32.gmra.mxu2 %vm322_vm5, %v2670_v8 }
  0xd9   : >> { %v577_v55 = vld.sshfl [vmem:[#allocation1] sm:$0xff pattern:$0x75316420]  ;;  %v578_v56 = vld.sshfl [vmem:[#allocation1 + $0x8] sm:$0xff pattern:$0x75316420] }
  0xda   : >> { %484 = vrot.lane.b32.xlu1 %v481_v54, %s2541_s14  ;;  %666 = vst [vmem:[#allocation1] ss:$2 sm:$0xff] %v288_v52  ;;  %2232 = vmatpush.msk.msrb.mxu3 %vm218_vm0, %v578_v56  ;;  %v2858_v56 = vld [vmem:[%s3649_s1 + $0xb8] sm:$0xff] }
  0xdb   : >> { %2227 = vmatpush.msk.msrb.mxu2 %vm218_vm0, %v577_v55  ;;  %2207 = vmatmul.msk.f32.gmra.mxu3 %vm322_vm5, %v2679_v9 }
  0xdc   : >> { %2202 = vmatmul.msk.f32.gmra.mxu2 %vm322_vm5, %v2679_v9 }
  0xe1   : >> { %v668_v58 = vld.sshfl [vmem:[#allocation1 + $0x8] sm:$0xff pattern:$0x75316420]  ;;  %v667_v59 = vld.sshfl [vmem:[#allocation1] sm:$0xff pattern:$0x75316420] }
  0xe2   : >> { %671 = vrot.lane.b32.xlu1 %v668_v58, %s2540_s13  ;;  %669 = vrot.lane.b32.xlu0 %v667_v59, %s2540_s13  ;;  %761 = vst [vmem:[#allocation1] ss:$2 sm:$0xff] %v288_v52  ;;  %v2876_v58 = vld [vmem:[%s3649_s1 + $0xe0] sm:$0xff] }
  0xe3   : >> { %2208 = vmatmul.msk.f32.gmra.mxu3 %vm322_vm5, %v2693_v13 }
  0xe4   : >> { %2203 = vmatmul.msk.f32.gmra.mxu2 %vm322_vm5, %v2693_v13 }
  0xe9   : >> { %v762_v62 = vld.sshfl [vmem:[#allocation1] sm:$0xff pattern:$0x75316420]  ;;  %v763_v63 = vld.sshfl [vmem:[#allocation1 + $0x8] sm:$0xff pattern:$0x75316420] }
  0xea   : >> { %764 = vrot.lane.b32.xlu2 %v762_v62, %s2541_s14  ;;  %857 = vst [vmem:[#allocation1] ss:$2 sm:$0xff] %v2642_v61  ;;  %v2897_v62 = vld [vmem:[%s3649_s1 + $0xe8] sm:$0xff] }
  0xeb   : >> { %2233 = vmatmul.msk.f32.vlgmr.msrb.gmra.mxu3 %vm322_vm5, %v2702_v20 }
  0xec   : >> { %2228 = vmatmul.msk.f32.vlgmr.msrb.gmra.mxu2 %vm322_vm5, %v2702_v20 }
  0xf1   : >> { %v2646_v0 = vld.sshfl [vmem:[#allocation1] sm:$0xff pattern:$0x75316420]  ;;  %v2648_v1 = vld.sshfl [vmem:[#allocation1 + $0x8] sm:$0xff pattern:$0x75316420] }
  0xf2   : >> { %766 = vrot.lane.b32.xlu2 %v763_v63, %s2541_s14  ;;  %947 = vst [vmem:[#allocation1] ss:$2 sm:$0xff] %v2642_v61 }
  0xf3   : >> { %2234 = vmatmul.msk.f32.gmra.mxu3 %vm322_vm5, %v2724_v25 }
  0xf4   : >> { %2229 = vmatmul.msk.f32.gmra.mxu2 %vm322_vm5, %v2724_v25 }
  0xf9   : >> { %v949_v2 = vld.sshfl [vmem:[#allocation1 + $0x8] sm:$0xff pattern:$0x75316420]  ;;  %v948_v3 = vld.sshfl [vmem:[#allocation1] sm:$0xff pattern:$0x75316420] }
  0xfa   : >> { %952 = vrot.lane.b32.xlu0 %v949_v2, %s2540_s13  ;;  %950 = vrot.lane.b32.xlu2 %v948_v3, %s2540_s13  ;;  %1042 = vst [vmem:[#allocation1] ss:$2 sm:$0xff] %v2642_v61  ;;  %v2911_v3 = vld [vmem:[%s3649_s1 + $0x88] sm:$0xff] }
  0xfb   : >> { %2235 = vmatmul.msk.f32.gmra.mxu3 %vm322_vm5, %v2742_v29 }
  0xfc   : >> { %2230 = vmatmul.msk.f32.gmra.mxu2 %vm322_vm5, %v2742_v29 }
 0x101   : >> { %v1043_v4 = vld.sshfl [vmem:[#allocation1] sm:$0xff pattern:$0x75316420]  ;;  %v1044_v5 = vld.sshfl [vmem:[#allocation1 + $0x8] sm:$0xff pattern:$0x75316420] }
 0x102   : >> { %1168 = vst [vmem:[#allocation1] ss:$2 sm:$0xff] %v288_v52  ;;  %1045 = vrot.lane.b32.xlu0 %v1043_v4, %s2541_s14 }
 0x103   : >> { %2236 = vmatmul.msk.f32.gmra.mxu3 %vm322_vm5, %v2767_v37 }
 0x104   : >> { %2231 = vmatmul.msk.f32.gmra.mxu2 %vm322_vm5, %v2767_v37 }
 0x109   : >> { %v1169_v6 = vld.sshfl [vmem:[#allocation1] sm:$0xff pattern:$0x75316420]  ;;  %v1170_v10 = vld.sshfl [vmem:[#allocation1 + $0x8] sm:$0xff pattern:$0x75316420] }
 0x10a   : >> { %1171 = vrot.lane.b32.xlu1 %v1169_v6, %s2540_s13  ;;  %1173 = vrot.lane.b32.xlu2 %v1170_v10, %s2540_s13  ;;  %1238 = vst [vmem:[#allocation1] ss:$2 sm:$0xff] %v288_v52 }
 0x111   : >> { %v2686_v11 = vld.sshfl [vmem:[#allocation1] sm:$0xff pattern:$0x75316420]  ;;  %v2688_v12 = vld.sshfl [vmem:[#allocation1 + $0x8] sm:$0xff pattern:$0x75316420] }
 0x112   : >> { %1047 = vrot.lane.b32.xlu1 %v1044_v5, %s2541_s14  ;;  %1303 = vst [vmem:[#allocation1] ss:$2 sm:$0xff] %v288_v52  ;;  %v2844_v52 = vld [vmem:[%s3649_s1 + $0x50] sm:$0xff] }
 0x113   : >> { %v2923_v5 = vld [vmem:[%s3649_s1 + $0xf0] sm:$0xff] }
 0x119   : >> { %v1305_v19 = vld.sshfl [vmem:[#allocation1 + $0x8] sm:$0xff pattern:$0x75316420]  ;;  %v1304_v36 = vld.sshfl [vmem:[#allocation1] sm:$0xff pattern:$0x75316420] }
 0x11a   : >> { %1308 = vrot.lane.b32.xlu0 %v1305_v19, %s2541_s14  ;;  %1381 = vst [vmem:[#allocation1] ss:$2 sm:$0xff] %v2642_v61  ;;  %1306 = vrot.lane.b32.xlu2 %v1304_v36, %s2541_s14 }
 0x121   : >> { %v2784_v42 = vld.sshfl [vmem:[#allocation1] sm:$0xff pattern:$0x75316420]  ;;  %v2786_v43 = vld.sshfl [vmem:[#allocation1 + $0x8] sm:$0xff pattern:$0x75316420] }
 0x122   : >> { %1454 = vst [vmem:[#allocation1] ss:$2 sm:$0xff] %v2642_v61 }
 0x129   : >> { %v1455_v47 = vld.sshfl [vmem:[#allocation1] sm:$0xff pattern:$0x75316420]  ;;  %v1456_v55 = vld.sshfl [vmem:[#allocation1 + $0x8] sm:$0xff pattern:$0x75316420] }
 0x12a   : >> { %1457 = vrot.lane.b32.xlu1 %v1455_v47, %s2540_s13  ;;  %1459 = vrot.lane.b32.xlu2 %v1456_v55, %s2540_s13  ;;  %1532 = vst [vmem:[#allocation1] ss:$2 sm:$0xff] %v2642_v61  ;;  %v2888_v61 = vld [vmem:[%s3649_s1 + $0x80] sm:$0xff] }
 0x12b   : >> { %v3050_v55 = vld [vmem:[%s3649_s1 + $0x100] sm:$0xff] }
 0x131   : >> { %v1534_v59 = vld.sshfl [vmem:[#allocation1 + $0x8] sm:$0xff pattern:$0x75316420]  ;;  %v1533_v60 = vld.sshfl [vmem:[#allocation1] sm:$0xff pattern:$0x75316420] }
 0x132   : >> { %1537 = vrot.lane.b32.xlu1 %v1534_v59, %s2541_s14  ;;  %1535 = vrot.lane.b32.xlu0 %v1533_v60, %s2541_s14  ;;  %1611 = vst [vmem:[#allocation1] ss:$2 sm:$0xff] %v2628_v45 }
 0x134   : >> { %v317_v14 = vpop.permute.xlu0 %316 }
 0x13c   : >> { %v319_v22 = vpop.permute.xlu0 %318 }
 0x13d   : >> { %2194 = vmatpush.msk.msra.mxu1 %vm218_vm0, %v319_v22  ;;  %v321_v24 = vsel %vm320_vm6, %v317_v14, %v319_v22 }
 0x13e   : >> { %2189 = vmatpush.msk.msra.mxu0 %vm218_vm0, %v321_v24  ;;  %2195 = vmatmul.msk.f32.vlgmr.msra.gmra.mxu1 %vm322_vm5, %v2712_v21  ;;  %v2937_v24 = vld [vmem:[%s3649_s1 + $0x90] sm:$0xff] }
 0x13f   : >> { %2190 = vmatmul.msk.f32.vlgmr.msra.gmra.mxu0 %vm322_vm5, %v2712_v21 }
 0x144   : >> { %v483_v27 = vpop.permute.xlu1 %482  ;;  %v765_v28 = vpop.permute.xlu2 %764 }
 0x146   : >> { %2196 = vmatmul.msk.f32.gmra.mxu1 %vm322_vm5, %v2733_v26 }
 0x147   : >> { %2191 = vmatmul.msk.f32.gmra.mxu0 %vm322_vm5, %v2733_v26 }
 0x14c   : >> { %v485_v31 = vpop.permute.xlu1 %484  ;;  %v767_v32 = vpop.permute.xlu2 %766 }
 0x14d   : >> { %2218 = vmatpush.msk.msrb.mxu1 %vm218_vm0, %v485_v31  ;;  %v487_v33 = vsel %vm486_vm7, %v483_v27, %v485_v31  ;;  %v768_v35 = vsel %vm486_vm7, %v765_v28, %v767_v32  ;;  %2260 = vmatpush.msk.msra.mxu3 %vm218_vm0, %v767_v32  ;;  %v2956_v28 = vld [vmem:[%s3649_s1 + $0x98] sm:$0xff]  ;;  %v2969_v31 = vld [vmem:[%s3649_s1 + $0xc0] sm:$0xff] }
 0x14e   : >> { %2197 = vmatmul.msk.f32.gmra.mxu1 %vm322_vm5, %v2751_v30  ;;  %2213 = vmatpush.msk.msrb.mxu0 %vm218_vm0, %v487_v33  ;;  %v2971_v32 = vpop.f32.mrf.mxu3 }
 0x14f   : >> { %2192 = vmatmul.msk.f32.gmra.mxu0 %vm322_vm5, %v2751_v30  ;;  %2255 = vmatpush.msk.msra.mxu2 %vm218_vm0, %v768_v35  ;;  %v2973_v33 = vpop.f32.mrf.mxu2 }
 0x150   : >> { %2261 = vmatmul.msk.f32.vlgmr.msra.gmra.mxu3 %vm322_vm5, %v2794_v44  ;;  %2256 = vmatmul.msk.f32.vlgmr.msra.gmra.mxu2 %vm322_vm5, %v2794_v44 }
 0x154   : >> { %v672_v39 = vpop.permute.xlu1 %671  ;;  %v670_v40 = vpop.permute.xlu0 %669 }
 0x155   : >> { %v673_v41 = vsel %vm320_vm6, %v670_v40, %v672_v39  ;;  %2246 = vmatpush.msk.msra.mxu1 %vm218_vm0, %v672_v39  ;;  %v951_v51 = vpop.permute.xlu2 %950  ;;  %v3009_v40 = vld [vmem:[%s3649_s1 + $0xd0] sm:$0xff] }
 0x156   : >> { %2198 = vmatmul.msk.f32.gmra.mxu1 %vm322_vm5, %v2777_v38  ;;  %2241 = vmatpush.msk.msra.mxu0 %vm218_vm0, %v673_v41  ;;  %v2992_v35 = vpop.f32.mrf.mxu3 }
 0x157   : >> { %2193 = vmatmul.msk.f32.gmra.mxu0 %vm322_vm5, %v2777_v38  ;;  %v2994_v36 = vpop.f32.mrf.mxu2 }
 0x158   : >> { %2262 = vmatmul.msk.f32.gmra.mxu3 %vm322_vm5, %v2813_v48  ;;  %2257 = vmatmul.msk.f32.gmra.mxu2 %vm322_vm5, %v2813_v48 }
 0x15e   : >> { %2219 = vmatmul.msk.f32.vlgmr.msrb.gmra.mxu1 %vm322_vm5, %v2803_v46  ;;  %v3015_v47 = vpop.f32.mrf.mxu3 }
 0x15f   : >> { %2214 = vmatmul.msk.f32.vlgmr.msrb.gmra.mxu0 %vm322_vm5, %v2803_v46  ;;  %2274 = vmatpush.msk.msrb.mxu1 %vm218_vm0, %v2648_v1  ;;  %v2901_v1 = vld.sshfl [vmem:[#allocation1 + $0x8] sm:$0xff pattern:$0x75316420] }
 0x160   : >> { %2269 = vmatpush.msk.msrb.mxu0 %vm218_vm0, %v2646_v0  ;;  %2263 = vmatmul.msk.f32.gmra.mxu3 %vm322_vm5, %v2835_v50  ;;  %v2899_v0 = vld.sshfl [vmem:[#allocation1] sm:$0xff pattern:$0x75316420] }
 0x161   : >> { %2258 = vmatmul.msk.f32.gmra.mxu2 %vm322_vm5, %v2835_v50  ;;  %1684 = vst [vmem:[#allocation1] ss:$2 sm:$0xff] %v2628_v45 }
 0x164   : >> { %v1174_v2 = vpop.permute.xlu2 %1173 }
 0x166   : >> { %2220 = vmatmul.msk.f32.gmra.mxu1 %vm322_vm5, %v2826_v49 }
 0x167   : >> { %2215 = vmatmul.msk.f32.gmra.mxu0 %vm322_vm5, %v2826_v49 }
 0x168   : >> { %2264 = vmatmul.msk.f32.gmra.mxu3 %vm322_vm5, %v2858_v56  ;;  %v1685_v14 = vld.sshfl [vmem:[#allocation1] sm:$0xff pattern:$0x75316420]  ;;  %v1686_v19 = vld.sshfl [vmem:[#allocation1 + $0x8] sm:$0xff pattern:$0x75316420] }
 0x169   : >> { %2259 = vmatmul.msk.f32.gmra.mxu2 %vm322_vm5, %v2858_v56  ;;  %1762 = vst [vmem:[#allocation1] ss:$2 sm:$0xff] %v2628_v45  ;;  %1687 = vrot.lane.b32.xlu1 %v1685_v14, %s2540_s13  ;;  %v2946_v45 = vld [vmem:[%s3649_s1 + $0xf8] sm:$0xff] }
 0x16c   : >> { %v953_v53 = vpop.permute.xlu0 %952 }
 0x16d   : >> { %v954_v54 = vsel %vm320_vm6, %v951_v51, %v953_v53  ;;  %2288 = vmatpush.msk.msrb.mxu3 %vm218_vm0, %v953_v53  ;;  %v3017_v51 = vpop.f32.mrf.mxu2  ;;  %v3034_v53 = vpop.f32.mrf.mxu3 }
 0x16e   : >> { %2221 = vmatmul.msk.f32.gmra.mxu1 %vm322_vm5, %v2844_v52  ;;  %2283 = vmatpush.msk.msrb.mxu2 %vm218_vm0, %v954_v54 }
 0x16f   : >> { %2216 = vmatmul.msk.f32.gmra.mxu0 %vm322_vm5, %v2844_v52  ;;  %2312 = vmatpush.msk.msra.mxu3 %vm218_vm0, %v1174_v2 }
 0x170   : >> { %2289 = vmatmul.msk.f32.vlgmr.msrb.gmra.mxu3 %vm322_vm5, %v2876_v58  ;;  %v1764_v27 = vld.sshfl [vmem:[#allocation1 + $0x8] sm:$0xff pattern:$0x75316420] }
 0x171   : >> { %2284 = vmatmul.msk.f32.vlgmr.msrb.gmra.mxu2 %vm322_vm5, %v2876_v58  ;;  %1767 = vrot.lane.b32.xlu0 %v1764_v27, %s2541_s14 }
 0x174   : >> { %v1046_v6 = vpop.permute.xlu0 %1045  ;;  %v1307_v39 = vpop.permute.xlu2 %1306 }
 0x175   : >> { %v3038_v54 = vpop.f32.mrf.mxu2  ;;  %v641_v60 = vpop.f32.mrf.mxu3 }
 0x176   : >> { %2222 = vmatmul.msk.f32.gmra.mxu1 %vm322_vm5, %v2867_v57 }
 0x177   : >> { %2217 = vmatmul.msk.f32.gmra.mxu0 %vm322_vm5, %v2867_v57 }
 0x178   : >> { %2290 = vmatmul.msk.f32.gmra.mxu3 %vm322_vm5, %v2897_v62 }
 0x179   : >> { %2285 = vmatmul.msk.f32.gmra.mxu2 %vm322_vm5, %v2897_v62 }
 0x17c   : >> { %v1172_v63 = vpop.permute.xlu1 %1171 }
 0x17d   : >> { %v1175_v4 = vsel %vm320_vm6, %v1172_v63, %v1174_v2  ;;  %v612_v63 = vpop.f32.mrf.mxu2  ;;  %v3067_v2 = vld [vmem:[%s3649_s1 + $0x108] sm:$0xff] }
 0x17e   : >> { %2247 = vmatmul.msk.f32.vlgmr.msra.gmra.mxu1 %vm322_vm5, %v2888_v61  ;;  %2307 = vmatpush.msk.msra.mxu2 %vm218_vm0, %v1175_v4 }
 0x17f   : >> { %2242 = vmatmul.msk.f32.vlgmr.msra.gmra.mxu0 %vm322_vm5, %v2888_v61 }
 0x180   : >> { %2291 = vmatmul.msk.f32.gmra.mxu3 %vm322_vm5, %v2923_v5 }
 0x181   : >> { %2286 = vmatmul.msk.f32.gmra.mxu2 %vm322_vm5, %v2923_v5 }
 0x184   : >> { %v1048_v10 = vpop.permute.xlu1 %1047 }
 0x185   : >> { %v1049_v22 = vsel %vm486_vm7, %v1046_v6, %v1048_v10  ;;  %2302 = vmatpush.msk.msra.mxu1 %vm218_vm0, %v1048_v10  ;;  %v644_v6 = vpop.f32.mrf.mxu3  ;;  %v3081_v10 = vld [vmem:[%s3649_s1 + $0x110] sm:$0xff] }
 0x186   : >> { %2248 = vmatmul.msk.f32.gmra.mxu1 %vm322_vm5, %v2911_v3  ;;  %2297 = vmatpush.msk.msra.mxu0 %vm218_vm0, %v1049_v22 }
 0x187   : >> { %2243 = vmatmul.msk.f32.gmra.mxu0 %vm322_vm5, %v2911_v3 }
 0x188   : >> { %2292 = vmatmul.msk.f32.gmra.mxu3 %vm322_vm5, %v2946_v45 }
 0x189   : >> { %2287 = vmatmul.msk.f32.gmra.mxu2 %vm322_vm5, %v2946_v45 }
 0x18e   : >> { %2249 = vmatmul.msk.f32.gmra.mxu1 %vm322_vm5, %v2937_v24 }
 0x18f   : >> { %2244 = vmatmul.msk.f32.gmra.mxu0 %vm322_vm5, %v2937_v24 }
 0x190   : >> { %2313 = vmatmul.msk.f32.vlgmr.msra.gmra.mxu3 %vm322_vm5, %v2712_v21 }
 0x191   : >> { %2308 = vmatmul.msk.f32.vlgmr.msra.gmra.mxu2 %vm322_vm5, %v2712_v21  ;;  %v2990_v21 = vld [vmem:[%s3649_s1 + $0xc8] sm:$0xff] }
 0x196   : >> { %2250 = vmatmul.msk.f32.gmra.mxu1 %vm322_vm5, %v2956_v28 }
 0x197   : >> { %2245 = vmatmul.msk.f32.gmra.mxu0 %vm322_vm5, %v2956_v28 }
 0x198   : >> { %2314 = vmatmul.msk.f32.gmra.mxu3 %vm322_vm5, %v2733_v26 }
 0x199   : >> { %2309 = vmatmul.msk.f32.gmra.mxu2 %vm322_vm5, %v2733_v26  ;;  %v1309_v26 = vpop.permute.xlu0 %1308 }
 0x19a   : >> { %v1310_v41 = vsel %vm486_vm7, %v1307_v39, %v1309_v26  ;;  %2332 = vmatpush.msk.msrb.mxu3 %vm218_vm0, %v1309_v26 }
 0x19b   : >> { %2327 = vmatpush.msk.msrb.mxu2 %vm218_vm0, %v1310_v41 }
 0x19c   : >> { %v1458_v27 = vpop.permute.xlu1 %1457 }
 0x19e   : >> { %2275 = vmatmul.msk.f32.vlgmr.msrb.gmra.mxu1 %vm322_vm5, %v2969_v31 }
 0x19f   : >> { %2270 = vmatmul.msk.f32.vlgmr.msrb.gmra.mxu0 %vm322_vm5, %v2969_v31  ;;  %2322 = vmatpush.msk.msrb.mxu1 %vm218_vm0, %v2688_v12  ;;  %v2542_v12 = vmov 0  }
 0x1a0   : >> { %2317 = vmatpush.msk.msrb.mxu0 %vm218_vm0, %v2686_v11  ;;  %v1763_v11 = vld.sshfl [vmem:[#allocation1] sm:$0xff pattern:$0x75316420]  ;;  %2496 = vset.pattern.permute.xlu0 %v2542_v12 }
 0x1a1   : >> { %1765 = vrot.lane.b32.xlu2 %v1763_v11, %s2541_s14  ;;  %2315 = vmatmul.msk.f32.gmra.mxu3 %vm322_vm5, %v2751_v30 }
 0x1a2   : >> { %1134 = vperm.xlu0 %2496, %v3657_v15   ;;  %2310 = vmatmul.msk.f32.gmra.mxu2 %vm322_vm5, %v2751_v30  ;;  %v3031_v30 = vld [vmem:[%s3649_s1 + $0xd8] sm:$0xff] }
 0x1a3   : >> { %2497 = vset.pattern.permute.xlu1 %v2542_v12  ;;  %2498 = vset.pattern.permute.xlu2 %v2542_v12 }
 0x1a4   : >> { %1139 = vperm.xlu1 %2497, %v3658_v16  }
 0x1a6   : >> { %2276 = vmatmul.msk.f32.gmra.mxu1 %vm322_vm5, %v2990_v21 }
 0x1a7   : >> { %2271 = vmatmul.msk.f32.gmra.mxu0 %vm322_vm5, %v2990_v21 }
 0x1a9   : >> { %1689 = vrot.lane.b32.xlu2 %v1686_v19, %s2540_s13  ;;  %2316 = vmatmul.msk.f32.gmra.mxu3 %vm322_vm5, %v2777_v38  ;;  %v647_v19 = vpop.f32.mrf.mxu3 }
 0x1aa   : >> { %2311 = vmatmul.msk.f32.gmra.mxu2 %vm322_vm5, %v2777_v38 }
 0x1ac   : >> { %1149 = vperm.xlu1 %2497, %v3659_v18  }
 0x1ae   : >> { %2277 = vmatmul.msk.f32.gmra.mxu1 %vm322_vm5, %v3009_v40 }
 0x1af   : >> { %2272 = vmatmul.msk.f32.gmra.mxu0 %vm322_vm5, %v3009_v40 }
 0x1b1   : >> { %1144 = vperm.xlu2 %2498, %v3660_v17   ;;  %2333 = vmatmul.msk.f32.vlgmr.msrb.gmra.mxu3 %vm322_vm5, %v2803_v46  ;;  %v650_v26 = vpop.f32.mrf.mxu3 }
 0x1b2   : >> { %2328 = vmatmul.msk.f32.vlgmr.msrb.gmra.mxu2 %vm322_vm5, %v2803_v46 }
 0x1b6   : >> { %2278 = vmatmul.msk.f32.gmra.mxu1 %vm322_vm5, %v3031_v30 }
 0x1b7   : >> { %2273 = vmatmul.msk.f32.gmra.mxu0 %vm322_vm5, %v3031_v30 }
 0x1b9   : >> { %2334 = vmatmul.msk.f32.gmra.mxu3 %vm322_vm5, %v2826_v49 }
 0x1ba   : >> { %2329 = vmatmul.msk.f32.gmra.mxu2 %vm322_vm5, %v2826_v49 }
 0x1bb   : >> { %v385_v38 = vpop.f32.mrf.mxu1 }
 0x1bc   : >> { %v356_v59 = vpop.f32.mrf.mxu0 }
 0x1bd   : >> { %v434_v41 = vadd.f32 %v2973_v33, %v356_v59 }
 0x1be   : >> { %2303 = vmatmul.msk.f32.vlgmr.msra.gmra.mxu1 %vm322_vm5, %v3050_v55 }
 0x1bf   : >> { %2298 = vmatmul.msk.f32.vlgmr.msra.gmra.mxu0 %vm322_vm5, %v3050_v55  ;;  %2342 = vmatpush.msk.msra.mxu1 %vm218_vm0, %v2786_v43  ;;  %v615_v43 = vpop.f32.mrf.mxu2 }
 0x1c0   : >> { %2337 = vmatpush.msk.msra.mxu0 %vm218_vm0, %v2784_v42  ;;  %v1460_v42 = vpop.permute.xlu2 %1459 }
 0x1c1   : >> { %2335 = vmatmul.msk.f32.gmra.mxu3 %vm322_vm5, %v2844_v52 }
 0x1c2   : >> { %2352 = vmatpush.msk.msra.mxu3 %vm218_vm0, %v1460_v42  ;;  %2330 = vmatmul.msk.f32.gmra.mxu2 %vm322_vm5, %v2844_v52  ;;  %v1461_v52 = vsel %vm320_vm6, %v1458_v27, %v1460_v42 }
 0x1c3   : >> { %v388_v46 = vpop.f32.mrf.mxu1  ;;  %2347 = vmatpush.msk.msra.mxu2 %vm218_vm0, %v1461_v52 }
 0x1c4   : >> { %v359_v4 = vpop.f32.mrf.mxu0  ;;  %2372 = vmatpush.msk.msrb.mxu3 %vm218_vm0, %v2901_v1  ;;  %v3097_v1 = vld [vmem:[%s3649_s1 + $0x118] sm:$0xff] }
 0x1c5   : >> { %2367 = vmatpush.msk.msrb.mxu2 %vm218_vm0, %v2899_v0 }
 0x1c6   : >> { %2304 = vmatmul.msk.f32.gmra.mxu1 %vm322_vm5, %v3067_v2 }
 0x1c7   : >> { %2299 = vmatmul.msk.f32.gmra.mxu0 %vm322_vm5, %v3067_v2  ;;  %v618_v22 = vpop.f32.mrf.mxu2 }
 0x1c9   : >> { %2336 = vmatmul.msk.f32.gmra.mxu3 %vm322_vm5, %v2867_v57 }
 0x1ca   : >> { %2331 = vmatmul.msk.f32.gmra.mxu2 %vm322_vm5, %v2867_v57  ;;  %v463_v57 = vadd.f32 %v2971_v32, %v385_v38  ;;  %v437_v32 = vadd.f32 %v2994_v36, %v359_v4 }
 0x1cb   : >> { %v391_v49 = vpop.f32.mrf.mxu1 }
 0x1cc   : >> { %v362_v14 = vpop.f32.mrf.mxu0 }
 0x1ce   : >> { %2305 = vmatmul.msk.f32.gmra.mxu1 %vm322_vm5, %v3081_v10 }
 0x1cf   : >> { %2300 = vmatmul.msk.f32.gmra.mxu0 %vm322_vm5, %v3081_v10  ;;  %v621_v39 = vpop.f32.mrf.mxu2 }
 0x1d1   : >> { %2353 = vmatmul.msk.f32.vlgmr.msra.gmra.mxu3 %vm322_vm5, %v2888_v61 }
 0x1d2   : >> { %2348 = vmatmul.msk.f32.vlgmr.msra.gmra.mxu2 %vm322_vm5, %v2888_v61  ;;  %v466_v61 = vadd.f32 %v2992_v35, %v388_v46  ;;  %v440_v35 = vadd.f32 %v3017_v51, %v362_v14 }
 0x1d3   : >> { %v394_v11 = vpop.f32.mrf.mxu1  ;;  %v831_v15 = vpop.f32.mrf.mxu3 }
 0x1d4   : >> { %v365_v12 = vpop.f32.mrf.mxu0 }
 0x1d5   : >> { %v443_v51 = vadd.f32 %v3038_v54, %v365_v12 }
 0x1d6   : >> { %2306 = vmatmul.msk.f32.gmra.mxu1 %vm322_vm5, %v3097_v1 }
 0x1d7   : >> { %2301 = vmatmul.msk.f32.gmra.mxu0 %vm322_vm5, %v3097_v1  ;;  %v802_v17 = vpop.f32.mrf.mxu2 }
 0x1d9   : >> { %2354 = vmatmul.msk.f32.gmra.mxu3 %vm322_vm5, %v2911_v3 }
 0x1da   : >> { %2349 = vmatmul.msk.f32.gmra.mxu2 %vm322_vm5, %v2911_v3  ;;  %v469_v3 = vadd.f32 %v3015_v47, %v391_v49 }
 0x1db   : >> { %v550_v42 = vpop.f32.mrf.mxu1 }
 0x1dc   : >> { %v563_v0 = vadd.f32 %v550_v42, %v463_v57  ;;  %v521_v27 = vpop.f32.mrf.mxu0  ;;  %v834_v57 = vpop.f32.mrf.mxu3 }
 0x1dd   : >> { %v562_v52 = vadd.f32 %v521_v27, %v434_v41  ;;  %v1538_v42 = vpop.permute.xlu1 %1537 }
 0x1de   : >> { %v654_v16 = vadd.f32 %v641_v60, %v563_v0  ;;  %2323 = vmatmul.msk.f32.vlgmr.msrb.gmra.mxu1 %vm322_vm5, %v2661_v7  ;;  %v1536_v0 = vpop.permute.xlu0 %1535 }
 0x1df   : >> { %v653_v18 = vadd.f32 %v612_v63, %v562_v52  ;;  %2318 = vmatmul.msk.f32.vlgmr.msrb.gmra.mxu0 %vm322_vm5, %v2661_v7  ;;  %v805_v7 = vpop.f32.mrf.mxu2  ;;  %2362 = vmatpush.msk.msrb.mxu1 %vm218_vm0, %v1538_v42 }
 0x1e1   : >> { %2355 = vmatmul.msk.f32.gmra.mxu3 %vm322_vm5, %v2937_v24 }
 0x1e2   : >> { %2350 = vmatmul.msk.f32.gmra.mxu2 %vm322_vm5, %v2937_v24  ;;  %v472_v24 = vadd.f32 %v3034_v53, %v394_v11 }
 0x1e3   : >> { %v553_v33 = vpop.f32.mrf.mxu1 }
 0x1e4   : >> { %v565_v38 = vadd.f32 %v553_v33, %v466_v61  ;;  %v524_v59 = vpop.f32.mrf.mxu0  ;;  %v837_v27 = vpop.f32.mrf.mxu3 }
 0x1e5   : >> { %v564_v60 = vadd.f32 %v524_v59, %v437_v32 }
 0x1e6   : >> { %v656_v41 = vadd.f32 %v644_v6, %v565_v38  ;;  %2324 = vmatmul.msk.f32.gmra.mxu1 %vm322_vm5, %v2670_v8 }
 0x1e7   : >> { %v655_v63 = vadd.f32 %v615_v43, %v564_v60  ;;  %2319 = vmatmul.msk.f32.gmra.mxu0 %vm322_vm5, %v2670_v8  ;;  %v1539_v8 = vsel %vm486_vm7, %v1536_v0, %v1538_v42  ;;  %v808_v52 = vpop.f32.mrf.mxu2 }
 0x1e8   : >> { %2357 = vmatpush.msk.msrb.mxu0 %vm218_vm0, %v1539_v8 }
 0x1e9   : >> { %2356 = vmatmul.msk.f32.gmra.mxu3 %vm322_vm5, %v2956_v28 }
 0x1ea   : >> { %2351 = vmatmul.msk.f32.gmra.mxu2 %vm322_vm5, %v2956_v28 }
 0x1eb   : >> { %v556_v36 = vpop.f32.mrf.mxu1 }
 0x1ec   : >> { %v567_v46 = vadd.f32 %v556_v36, %v469_v3  ;;  %v527_v4 = vpop.f32.mrf.mxu0 }
 0x1ed   : >> { %v566_v6 = vadd.f32 %v527_v4, %v440_v35  ;;  %v1688_v35 = vpop.permute.xlu1 %1687 }
 0x1ee   : >> { %v658_v43 = vadd.f32 %v647_v19, %v567_v46  ;;  %2325 = vmatmul.msk.f32.gmra.mxu1 %vm322_vm5, %v2679_v9 }
 0x1ef   : >> { %v657_v47 = vadd.f32 %v618_v22, %v566_v6  ;;  %2320 = vmatmul.msk.f32.gmra.mxu0 %vm322_vm5, %v2679_v9  ;;  %v840_v9 = vpop.f32.mrf.mxu3  ;;  %v811_v32 = vpop.f32.mrf.mxu2 }
 0x1f1   : >> { %2373 = vmatmul.msk.f32.vlgmr.msrb.gmra.mxu3 %vm322_vm5, %v2969_v31 }
 0x1f2   : >> { %2368 = vmatmul.msk.f32.vlgmr.msrb.gmra.mxu2 %vm322_vm5, %v2969_v31  ;;  %v1768_v31 = vpop.permute.xlu0 %1767 }
 0x1f3   : >> { %v559_v49 = vpop.f32.mrf.mxu1  ;;  %2392 = vmatpush.msk.msra.mxu3 %vm218_vm0, %v1768_v31 }
 0x1f4   : >> { %v569_v14 = vadd.f32 %v559_v49, %v472_v24  ;;  %v530_v19 = vpop.f32.mrf.mxu0 }
 0x1f5   : >> { %v568_v22 = vadd.f32 %v530_v19, %v443_v51 }
 0x1f6   : >> { %v660_v61 = vadd.f32 %v650_v26, %v569_v14  ;;  %2326 = vmatmul.msk.f32.gmra.mxu1 %vm322_vm5, %v2693_v13 }
 0x1f7   : >> { %v659_v33 = vadd.f32 %v621_v39, %v568_v22  ;;  %2321 = vmatmul.msk.f32.gmra.mxu0 %vm322_vm5, %v2693_v13  ;;  %v3157_v26 = vpop.f32.mrf.mxu3  ;;  %v3159_v39 = vpop.f32.mrf.mxu2 }
 0x1f9   : >> { %2374 = vmatmul.msk.f32.gmra.mxu3 %vm322_vm5, %v2990_v21 }
 0x1fa   : >> { %2369 = vmatmul.msk.f32.gmra.mxu2 %vm322_vm5, %v2990_v21 }
 0x1fb   : >> { %v736_v28 = vpop.f32.mrf.mxu1  ;;  %v1766_v59 = vpop.permute.xlu2 %1765 }
 0x1fc   : >> { %v749_v53 = vadd.f32 %v736_v28, %v654_v16  ;;  %v707_v54 = vpop.f32.mrf.mxu0 }
 0x1fd   : >> { %v748_v11 = vadd.f32 %v707_v54, %v653_v18 }
 0x1fe   : >> { %v3153_v12 = vadd.f32 %v831_v15, %v749_v53  ;;  %2343 = vmatmul.msk.f32.vlgmr.msra.gmra.mxu1 %vm322_vm5, %v2702_v20 }
 0x1ff   : >> { %v3161_v13 = vadd.f32 %v802_v17, %v748_v11  ;;  %2338 = vmatmul.msk.f32.vlgmr.msra.gmra.mxu0 %vm322_vm5, %v2702_v20  ;;  %v1769_v17 = vsel %vm486_vm7, %v1766_v59, %v1768_v31  ;;  %v3175_v20 = vpop.f32.mrf.mxu3  ;;  %v3177_v3 = vpop.f32.mrf.mxu2 }
 0x200   : >> { %2387 = vmatpush.msk.msra.mxu2 %vm218_vm0, %v1769_v17 }
 0x201   : >> { %2375 = vmatmul.msk.f32.gmra.mxu3 %vm322_vm5, %v3009_v40 }
 0x202   : >> { %2370 = vmatmul.msk.f32.gmra.mxu2 %vm322_vm5, %v3009_v40 }
 0x203   : >> { %v739_v15 = vpop.f32.mrf.mxu1  ;;  %v1690_v46 = vpop.permute.xlu2 %1689 }
 0x204   : >> { %v751_v16 = vadd.f32 %v739_v15, %v656_v41  ;;  %v710_v18 = vpop.f32.mrf.mxu0  ;;  %2382 = vmatpush.msk.msra.mxu1 %vm218_vm0, %v1690_v46 }
 0x205   : >> { %v750_v38 = vadd.f32 %v710_v18, %v655_v63 }
 0x206   : >> { %v3170_v60 = vadd.f32 %v834_v57, %v751_v16  ;;  %2344 = vmatmul.msk.f32.gmra.mxu1 %vm322_vm5, %v2724_v25 }
 0x207   : >> { %v3179_v21 = vadd.f32 %v805_v7, %v750_v38  ;;  %2339 = vmatmul.msk.f32.gmra.mxu0 %vm322_vm5, %v2724_v25  ;;  %v1691_v25 = vsel %vm320_vm6, %v1688_v35, %v1690_v46  ;;  %v3193_v7 = vpop.f32.mrf.mxu3  ;;  %v3195_v6 = vpop.f32.mrf.mxu2 }
 0x208   : >> { %2377 = vmatpush.msk.msra.mxu0 %vm218_vm0, %v1691_v25 }
 0x209   : >> { %2376 = vmatmul.msk.f32.gmra.mxu3 %vm322_vm5, %v3031_v30 }
 0x20a   : >> { %2371 = vmatmul.msk.f32.gmra.mxu2 %vm322_vm5, %v3031_v30 }
 0x20b   : >> { %v742_v57 = vpop.f32.mrf.mxu1 }
 0x20c   : >> { %v753_v41 = vadd.f32 %v742_v57, %v658_v43  ;;  %v713_v63 = vpop.f32.mrf.mxu0 }
 0x20d   : >> { %v752_v36 = vadd.f32 %v713_v63, %v657_v47 }
 0x20e   : >> { %v3188_v4 = vadd.f32 %v837_v27, %v753_v41  ;;  %2345 = vmatmul.msk.f32.gmra.mxu1 %vm322_vm5, %v2742_v29 }
 0x20f   : >> { %v3197_v42 = vadd.f32 %v808_v52, %v752_v36  ;;  %2340 = vmatmul.msk.f32.gmra.mxu0 %vm322_vm5, %v2742_v29  ;;  %v3211_v29 = vpop.f32.mrf.mxu3  ;;  %v3213_v52 = vpop.f32.mrf.mxu2 }
 0x211   : >> { %2393 = vmatmul.msk.f32.vlgmr.msra.gmra.mxu3 %vm322_vm5, %v3050_v55 }
 0x212   : >> { %2388 = vmatmul.msk.f32.vlgmr.msra.gmra.mxu2 %vm322_vm5, %v3050_v55 }
 0x213   : >> { %v745_v40 = vpop.f32.mrf.mxu1 }
 0x214   : >> { %v755_v0 = vadd.f32 %v745_v40, %v660_v61  ;;  %v716_v43 = vpop.f32.mrf.mxu0 }
 0x215   : >> { %v754_v8 = vadd.f32 %v716_v43, %v659_v33 }
 0x216   : >> { %v3207_v27 = vadd.f32 %v840_v9, %v755_v0  ;;  %2346 = vmatmul.msk.f32.gmra.mxu1 %vm322_vm5, %v2767_v37 }
 0x217   : >> { %v3215_v47 = vadd.f32 %v811_v32, %v754_v8  ;;  %2341 = vmatmul.msk.f32.gmra.mxu0 %vm322_vm5, %v2767_v37  ;;  %v3225_v51 = vpop.f32.mrf.mxu3  ;;  %v3227_v49 = vpop.f32.mrf.mxu2 }
 0x219   : >> { %2394 = vmatmul.msk.f32.gmra.mxu3 %vm322_vm5, %v3067_v2 }
 0x21a   : >> { %2389 = vmatmul.msk.f32.gmra.mxu2 %vm322_vm5, %v3067_v2 }
 0x21b   : >> { %v922_v30 = vpop.f32.mrf.mxu1 }
 0x21c   : >> { %v893_v24 = vpop.f32.mrf.mxu0  ;;  %v935_v9 = vadd.f32 %v922_v30, %v3153_v12 }
 0x21d   : >> { %v934_v28 = vadd.f32 %v893_v24, %v3161_v13 }
 0x21e   : >> { %2363 = vmatmul.msk.f32.vlgmr.msrb.gmra.mxu1 %vm322_vm5, %v2794_v44 }
 0x21f   : >> { %2358 = vmatmul.msk.f32.vlgmr.msrb.gmra.mxu0 %vm322_vm5, %v2794_v44  ;;  %v3237_v14 = vpop.f32.mrf.mxu3  ;;  %v3239_v19 = vpop.f32.mrf.mxu2 }
 0x221   : >> { %2395 = vmatmul.msk.f32.gmra.mxu3 %vm322_vm5, %v3081_v10 }
 0x222   : >> { %2390 = vmatmul.msk.f32.gmra.mxu2 %vm322_vm5, %v3081_v10 }
 0x223   : >> { %v925_v37 = vpop.f32.mrf.mxu1 }
 0x224   : >> { %v896_v55 = vpop.f32.mrf.mxu0  ;;  %v937_v15 = vadd.f32 %v925_v37, %v3170_v60 }
 0x225   : >> { %v936_v18 = vadd.f32 %v896_v55, %v3179_v21 }
 0x226   : >> { %2364 = vmatmul.msk.f32.gmra.mxu1 %vm322_vm5, %v2813_v48 }
 0x227   : >> { %2359 = vmatmul.msk.f32.gmra.mxu0 %vm322_vm5, %v2813_v48  ;;  %v3249_v22 = vpop.f32.mrf.mxu3  ;;  %v3251_v61 = vpop.f32.mrf.mxu2 }
 0x229   : >> { %2396 = vmatmul.msk.f32.gmra.mxu3 %vm322_vm5, %v3097_v1 }
 0x22a   : >> { %2391 = vmatmul.msk.f32.gmra.mxu2 %vm322_vm5, %v3097_v1  ;;  %v1029_v1 = vadd.f32 %v3159_v39, %v934_v28 }
 0x22b   : >> { %v928_v44 = vpop.f32.mrf.mxu1 }
 0x22c   : >> { %v899_v2 = vpop.f32.mrf.mxu0  ;;  %v939_v60 = vadd.f32 %v928_v44, %v3188_v4 }
 0x22d   : >> { %v938_v17 = vadd.f32 %v899_v2, %v3197_v42 }
 0x22e   : >> { %2365 = vmatmul.msk.f32.gmra.mxu1 %vm322_vm5, %v2835_v50 }
 0x22f   : >> { %2360 = vmatmul.msk.f32.gmra.mxu0 %vm322_vm5, %v2835_v50  ;;  %v3262_v32 = vpop.f32.mrf.mxu3  ;;  %v3264_v33 = vpop.f32.mrf.mxu2  ;;  %v1030_v50 = vadd.f32 %v3157_v26, %v935_v9  ;;  %v1031_v26 = vadd.f32 %v3177_v3, %v936_v18  ;;  %v1034_v3 = vadd.f32 %v3193_v7, %v939_v60  ;;  %v1033_v21 = vadd.f32 %v3195_v6, %v938_v17  ;;  %v2433_v17 = vld [vmem:[%s3651_s3 + $0x1f8] sm:$0x3f] }
 0x230   : >> { %2434 = vmatpush.msk.msrb.mxu3 %vm1908_vm8, %v2433_v17  ;;  %v2426_v17 = vld [vmem:[%s3651_s3 + $0x1c0] sm:$0xff] }
 0x233   : >> { %v931_v48 = vpop.f32.mrf.mxu1 }
 0x234   : >> { %v902_v10 = vpop.f32.mrf.mxu0  ;;  %v941_v36 = vadd.f32 %v931_v48, %v3207_v27 }
 0x235   : >> { %v940_v46 = vadd.f32 %v902_v10, %v3215_v47 }
 0x236   : >> { %2366 = vmatmul.msk.f32.gmra.mxu1 %vm322_vm5, %v2858_v56  ;;  %v1036_v4 = vadd.f32 %v3211_v29, %v941_v36  ;;  %v1893_v36 = vld [vmem:[%s3651_s3 + $0xe8] sm:$0xff] }
 0x237   : >> { %2361 = vmatmul.msk.f32.gmra.mxu0 %vm322_vm5, %v2858_v56  ;;  %v1361_v16 = vpop.f32.mrf.mxu3  ;;  %v1332_v13 = vpop.f32.mrf.mxu2  ;;  %v1032_v56 = vadd.f32 %v3175_v20, %v937_v15  ;;  %v1035_v7 = vadd.f32 %v3213_v52, %v940_v46  ;;  %v2431_v46 = vld [vmem:[%s3651_s3 + $0x1e8] sm:$0xff] }
 0x23b   : >> { %v1112_v53 = vpop.f32.mrf.mxu1 }
 0x23c   : >> { %v3271_v54 = vadd.f32 %v1112_v53, %v1030_v50  ;;  %v1083_v11 = vpop.f32.mrf.mxu0 }
 0x23d   : >> { %v3273_v12 = vadd.f32 %v1083_v11, %v1029_v1 }
 0x23e   : >> { %2383 = vmatmul.msk.f32.vlgmr.msra.gmra.mxu1 %vm322_vm5, %v2876_v58 }
 0x23f   : >> { %2378 = vmatmul.msk.f32.vlgmr.msra.gmra.mxu0 %vm322_vm5, %v2876_v58  ;;  %v1364_v58 = vpop.f32.mrf.mxu3  ;;  %v1335_v20 = vpop.f32.mrf.mxu2 }
 0x243   : >> { %v1115_v39 = vpop.f32.mrf.mxu1 }
 0x244   : >> { %v3283_v31 = vadd.f32 %v1115_v39, %v1032_v56  ;;  %v1086_v38 = vpop.f32.mrf.mxu0 }
 0x245   : >> { %v3285_v59 = vadd.f32 %v1086_v38, %v1031_v26 }
 0x246   : >> { %2384 = vmatmul.msk.f32.gmra.mxu1 %vm322_vm5, %v2897_v62 }
 0x247   : >> { %2379 = vmatmul.msk.f32.gmra.mxu0 %vm322_vm5, %v2897_v62  ;;  %v1367_v62 = vpop.f32.mrf.mxu3  ;;  %v1338_v25 = vpop.f32.mrf.mxu2 }
 0x24b   : >> { %v1118_v57 = vpop.f32.mrf.mxu1 }
 0x24c   : >> { %v3295_v41 = vadd.f32 %v1118_v57, %v1034_v3  ;;  %v1089_v63 = vpop.f32.mrf.mxu0  ;;  %v1894_v3 = vld [vmem:[%s3651_s3 + $0xf0] sm:$0xff] }
 0x24d   : >> { %v3297_v35 = vadd.f32 %v1089_v63, %v1033_v21  ;;  %v2432_v21 = vld [vmem:[%s3651_s3 + $0x1f0] sm:$0xff] }
 0x24e   : >> { %2385 = vmatmul.msk.f32.gmra.mxu1 %vm322_vm5, %v2923_v5  ;;  %v1878_v57 = vld [vmem:[%s3651_s3 + $0x70] sm:$0xff]  ;;  %2036 = vmatpush.msrb.mxu3 %v2432_v21  ;;  %v2425_v21 = vld [vmem:[%s3651_s3 + $0x1b8] sm:$0xff] }
 0x24f   : >> { %2380 = vmatmul.msk.f32.gmra.mxu0 %vm322_vm5, %v2923_v5  ;;  %v1370_v5 = vpop.f32.mrf.mxu3  ;;  %v1341_v29 = vpop.f32.mrf.mxu2  ;;  %v2416_v63 = vld [vmem:[%s3651_s3 + $0x170] sm:$0xff] }
 0x250   : >> { %2037 = vmatpush.msrb.mxu3 %v2431_v46  ;;  %v1886_v46 = vld [vmem:[%s3651_s3 + $0xb0] sm:$0xff] }
 0x253   : >> { %v1121_v6 = vpop.f32.mrf.mxu1 }
 0x254   : >> { %v3307_v42 = vadd.f32 %v1121_v6, %v1036_v4  ;;  %v1092_v40 = vpop.f32.mrf.mxu0  ;;  %v1877_v4 = vld [vmem:[%s3651_s3 + $0x68] sm:$0xff]  ;;  %v1892_v6 = vld [vmem:[%s3651_s3 + $0xe0] sm:$0xff] }
 0x255   : >> { %v3309_v0 = vadd.f32 %v1092_v40, %v1035_v7  ;;  %v2430_v40 = vld [vmem:[%s3651_s3 + $0x1e0] sm:$0xff] }
 0x256   : >> { %2386 = vmatmul.msk.f32.gmra.mxu1 %vm322_vm5, %v2946_v45  ;;  %2038 = vmatpush.msrb.mxu3 %v2430_v40  ;;  %v2408_v40 = vld [vmem:[%s3651_s3 + $0x130] sm:$0xff] }
 0x257   : >> { %2381 = vmatmul.msk.f32.gmra.mxu0 %vm322_vm5, %v2946_v45  ;;  %v3323_v2 = vpop.f32.mrf.mxu3  ;;  %v3327_v48 = vpop.f32.mrf.mxu2 }
 0x25b   : >> { %v1291_v43 = vpop.f32.mrf.mxu1 }
 0x25c   : >> { %v1292_v8 = vadd.f32 %v1291_v43, %v3225_v51  ;;  %v1262_v27 = vpop.f32.mrf.mxu0 }
 0x25d   : >> { %v1263_v52 = vadd.f32 %v1262_v27, %v3227_v49 }
 0x25e   : >> { %v3317_v47 = vadd.f32 %v1361_v16, %v1292_v8  ;;  %v2414_v8 = vld [vmem:[%s3651_s3 + $0x160] sm:$0xff] }
 0x25f   : >> { %v3319_v30 = vadd.f32 %v1332_v13, %v1263_v52  ;;  %v3337_v1 = vpop.f32.mrf.mxu3  ;;  %v2429_v52 = vld [vmem:[%s3651_s3 + $0x1d8] sm:$0xff] }
 0x260   : >> { %2039 = vmatpush.msrb.mxu3 %v2429_v52  ;;  %v1869_v52 = vld [vmem:[%s3651_s3 + $0x28] sm:$0xff] }
 0x263   : >> { %v1294_v24 = vpop.f32.mrf.mxu1 }
 0x264   : >> { %v1295_v37 = vadd.f32 %v1294_v24, %v3237_v14  ;;  %v1265_v55 = vpop.f32.mrf.mxu0  ;;  %v1875_v24 = vld [vmem:[%s3651_s3 + $0x58] sm:$0xff] }
 0x265   : >> { %v1266_v44 = vadd.f32 %v1265_v55, %v3239_v19  ;;  %v3339_v19 = vpop.f32.mrf.mxu2  ;;  %v1890_v55 = vld [vmem:[%s3651_s3 + $0xd0] sm:$0xff] }
 0x266   : >> { %v3325_v45 = vadd.f32 %v1364_v58, %v1295_v37  ;;  %v1879_v58 = vld [vmem:[%s3651_s3 + $0x78] sm:$0xff] }
 0x267   : >> { %v3329_v51 = vadd.f32 %v1335_v20, %v1266_v44  ;;  %v3347_v18 = vpop.f32.mrf.mxu3  ;;  %v2417_v20 = vld [vmem:[%s3651_s3 + $0x178] sm:$0xff]  ;;  %1912 = vmatpush.msrb.mxu0 %v1879_v58  ;;  %v2428_v44 = vld [vmem:[%s3651_s3 + $0x1d0] sm:$0xff]  ;;  %v1872_v58 = vld [vmem:[%s3651_s3 + $0x40] sm:$0xff] }
 0x268   : >> { %2006 = vmatpush.msrb.mxu2 %v2417_v20  ;;  %v2413_v37 = vld [vmem:[%s3651_s3 + $0x158] sm:$0xff]  ;;  %2040 = vmatpush.msrb.mxu3 %v2428_v44  ;;  %v2410_v20 = vld [vmem:[%s3651_s3 + $0x140] sm:$0xff] }
 0x269   : >> { %1913 = vmatpush.msrb.mxu0 %v1878_v57  ;;  %v2422_v44 = vld [vmem:[%s3651_s3 + $0x1a0] sm:$0xff] }
 0x26a   : >> { %2007 = vmatpush.msrb.mxu2 %v2416_v63  ;;  %v1871_v63 = vld [vmem:[%s3651_s3 + $0x38] sm:$0xff] }
 0x26b   : >> { %v1297_v10 = vpop.f32.mrf.mxu1  ;;  %1914 = vmatpush.msrb.mxu0 %v1877_v4 }
 0x26c   : >> { %v1298_v49 = vadd.f32 %v1297_v10, %v3249_v22  ;;  %v1268_v9 = vpop.f32.mrf.mxu0  ;;  %v1874_v10 = vld [vmem:[%s3651_s3 + $0x50] sm:$0xff] }
 0x26d   : >> { %v1269_v28 = vadd.f32 %v1268_v9, %v3251_v61  ;;  %v3349_v61 = vpop.f32.mrf.mxu2  ;;  %v1889_v9 = vld [vmem:[%s3651_s3 + $0xc8] sm:$0xff] }
 0x26e   : >> { %v3333_v50 = vadd.f32 %v1367_v62, %v1298_v49  ;;  %v2412_v49 = vld [vmem:[%s3651_s3 + $0x150] sm:$0xff] }
 0x26f   : >> { %v3335_v14 = vadd.f32 %v1338_v25, %v1269_v28  ;;  %v3357_v38 = vpop.f32.mrf.mxu3  ;;  %v2415_v25 = vld [vmem:[%s3651_s3 + $0x168] sm:$0xff] }
 0x270   : >> { %2008 = vmatpush.msrb.mxu2 %v2415_v25  ;;  %v2427_v28 = vld [vmem:[%s3651_s3 + $0x1c8] sm:$0xff]  ;;  %v2424_v25 = vld [vmem:[%s3651_s3 + $0x1b0] sm:$0xff] }
 0x271   : >> { %2041 = vmatpush.msrb.mxu3 %v2427_v28  ;;  %v2421_v28 = vld [vmem:[%s3651_s3 + $0x198] sm:$0xff] }
 0x272   : >> { %2009 = vmatpush.msrb.mxu2 %v2414_v8  ;;  %v2423_v8 = vld [vmem:[%s3651_s3 + $0x1a8] sm:$0xff] }
 0x273   : >> { %v1300_v53 = vpop.f32.mrf.mxu1  ;;  %2042 = vmatpush.msrb.mxu3 %v2426_v17  ;;  %v2420_v17 = vld [vmem:[%s3651_s3 + $0x190] sm:$0xff] }
 0x274   : >> { %v1301_v11 = vadd.f32 %v1300_v53, %v3262_v32  ;;  %v1271_v15 = vpop.f32.mrf.mxu0  ;;  %2010 = vmatpush.msrb.mxu2 %v2413_v37 }
 0x275   : >> { %v1272_v16 = vadd.f32 %v1271_v15, %v3264_v33  ;;  %v3361_v60 = vpop.f32.mrf.mxu2  ;;  %v1895_v33 = vld [vmem:[%s3651_s3 + $0xf8] sm:$0x3f]  ;;  %v2411_v15 = vld [vmem:[%s3651_s3 + $0x148] sm:$0xff]  ;;  %2043 = vmatpush.msrb.mxu3 %v2425_v21 }
 0x276   : >> { %v3343_v13 = vadd.f32 %v1370_v5, %v1301_v11  ;;  %2397 = vmatpush.msk.msrb.mxu1 %vm1908_vm8, %v1895_v33  ;;  %v1876_v5 = vld [vmem:[%s3651_s3 + $0x60] sm:$0xff]  ;;  %2011 = vmatpush.msrb.mxu2 %v2412_v49  ;;  %v1873_v11 = vld [vmem:[%s3651_s3 + $0x48] sm:$0xff] }
 0x277   : >> { %v3345_v22 = vadd.f32 %v1341_v29, %v1272_v16  ;;  %v3409_v43 = vpop.f32.mrf.mxu3  ;;  %1915 = vmatpush.msrb.mxu0 %v1876_v5  ;;  %v1891_v29 = vld [vmem:[%s3651_s3 + $0xd8] sm:$0xff]  ;;  %v1888_v33 = vld [vmem:[%s3651_s3 + $0xc0] sm:$0xff]  ;;  %2044 = vmatpush.msrb.mxu3 %v2424_v25  ;;  %v1885_v5 = vld [vmem:[%s3651_s3 + $0xa8] sm:$0xff] }
 0x278   : >> { %1942 = vmatpush.msrb.mxu1 %v1894_v3  ;;  %2012 = vmatpush.msrb.mxu2 %v2411_v15  ;;  %v1887_v3 = vld [vmem:[%s3651_s3 + $0xb8] sm:$0xff]  ;;  %v2406_v49 = vld [vmem:[%s3651_s3 + $0x120] sm:$0xff]  ;;  %v1865_v25 = vld [vmem:[%s3651_s3 + $0x8] sm:$0xff] }
 0x279   : >> { %1916 = vmatpush.msrb.mxu0 %v1875_v24  ;;  %2045 = vmatpush.msrb.mxu3 %v2423_v8  ;;  %v2407_v24 = vld [vmem:[%s3651_s3 + $0x128] sm:$0xff]  ;;  %v2405_v15 = vld [vmem:[%s3651_s3 + $0x118] sm:$0xff]  ;;  %v2418_v8 = vld [vmem:[%s3651_s3 + $0x180] sm:$0xff] }
 0x27a   : >> { %1943 = vmatpush.msrb.mxu1 %v1893_v36  ;;  %2013 = vmatpush.msrb.mxu2 %v2410_v20  ;;  %v2409_v36 = vld [vmem:[%s3651_s3 + $0x138] sm:$0xff]  ;;  %v1866_v20 = vld [vmem:[%s3651_s3 + $0x10] sm:$0xff] }
 0x27b   : >> { %v3351_v56 = vpop.f32.mrf.mxu1  ;;  %1917 = vmatpush.msrb.mxu0 %v1874_v10  ;;  %2046 = vmatpush.msrb.mxu3 %v2422_v44  ;;  %v1868_v10 = vld [vmem:[%s3651_s3 + $0x20] sm:$0xff] }
 0x27c   : >> { %v3353_v26 = vpop.f32.mrf.mxu0  ;;  %1944 = vmatpush.msrb.mxu1 %v1892_v6  ;;  %2014 = vmatpush.msrb.mxu2 %v2409_v36  ;;  %v1870_v6 = vld [vmem:[%s3651_s3 + $0x30] sm:$0xff]  ;;  %v2419_v36 = vld [vmem:[%s3651_s3 + $0x188] sm:$0xff] }
 0x27d   : >> { %v3417_v27 = vpop.f32.mrf.mxu2  ;;  %1918 = vmatpush.msrb.mxu0 %v1873_v11  ;;  %2047 = vmatpush.msrb.mxu3 %v2421_v28  ;;  %v1867_v11 = vld [vmem:[%s3651_s3 + $0x18] sm:$0xff]  ;;  %v1446_v28 = vadd.f32 %v3353_v26, %v3319_v30 }
 0x27e   : >> { %1945 = vmatpush.msrb.mxu1 %v1891_v29  ;;  %2015 = vmatpush.msrb.mxu2 %v2408_v40 }
 0x27f   : >> { %1919 = vmatpush.msrb.mxu0 %v1872_v58  ;;  %v3477_v57 = vpop.f32.mrf.mxu3  ;;  %2048 = vmatpush.msrb.mxu3 %v2420_v17  ;;  %v1524_v17 = vadd.f32 %v3327_v48, %v1446_v28 }
 0x280   : >> { %1946 = vmatpush.msrb.mxu1 %v1890_v55  ;;  %2016 = vmatpush.msrb.mxu2 %v2407_v24  ;;  %v1884_v55 = vld [vmem:[%s3651_s3 + $0xa0] sm:$0xff] }
 0x281   : >> { %1920 = vmatpush.msrb.mxu0 %v1871_v63  ;;  %v1881_v63 = vld [vmem:[%s3651_s3 + $0x88] sm:$0xff]  ;;  %2049 = vmatpush.msrb.mxu3 %v2419_v36  ;;  %v2402_v24 = vld [vmem:[%s3651_s3 + $0x100] sm:$0xff] }
 0x282   : >> { %1947 = vmatpush.msrb.mxu1 %v1889_v9  ;;  %2017 = vmatpush.msrb.mxu2 %v2406_v49  ;;  %v1883_v9 = vld [vmem:[%s3651_s3 + $0x98] sm:$0xff] }
 0x283   : >> { %v3355_v39 = vpop.f32.mrf.mxu1  ;;  %1921 = vmatpush.msrb.mxu0 %v1870_v6  ;;  %v2403_v6 = vld [vmem:[%s3651_s3 + $0x108] sm:$0xff]  ;;  %2050 = vmatpush.msrb.mxu3 %v2418_v8 }
 0x284   : >> { %v3359_v32 = vpop.f32.mrf.mxu0  ;;  %1948 = vmatpush.msrb.mxu1 %v1888_v33  ;;  %2018 = vmatpush.msrb.mxu2 %v2405_v15  ;;  %v1882_v33 = vld [vmem:[%s3651_s3 + $0x90] sm:$0xff] }
 0x285   : >> { %v3488_v4 = vpop.f32.mrf.mxu2  ;;  %1922 = vmatpush.msrb.mxu0 %v1869_v52  ;;  %v1864_v52 = vld [vmem:[%s3651_s3] sm:$0xff] }
 0x286   : >> { %1949 = vmatpush.msrb.mxu1 %v1887_v3  ;;  %v2404_v3 = vld [vmem:[%s3651_s3 + $0x110] sm:$0xff] }
 0x287   : >> { %1923 = vmatpush.msrb.mxu0 %v1868_v10  ;;  %v3543_v58 = vpop.f32.mrf.mxu3  ;;  %2019 = vmatpush.msrb.mxu2 %v2404_v3 }
 0x288   : >> { %1950 = vmatpush.msrb.mxu1 %v1886_v46 }
 0x289   : >> { %1924 = vmatpush.msrb.mxu0 %v1867_v11  ;;  %2020 = vmatpush.msrb.mxu2 %v2403_v6 }
 0x28a   : >> { %1951 = vmatpush.msrb.mxu1 %v1885_v5  ;;  %v1880_v5 = vld [vmem:[%s3651_s3 + $0x80] sm:$0xff] }
 0x28b   : >> { %v3393_v62 = vpop.f32.mrf.mxu1  ;;  %1925 = vmatpush.msrb.mxu0 %v1866_v20  ;;  %2021 = vmatpush.msrb.mxu2 %v2402_v24 }
 0x28c   : >> { %v3401_v7 = vpop.f32.mrf.mxu0  ;;  %1952 = vmatpush.msrb.mxu1 %v1884_v55 }
 0x28d   : >> { %v3551_v21 = vpop.f32.mrf.mxu2  ;;  %1926 = vmatpush.msrb.mxu0 %v1865_v25  ;;  %v1449_v25 = vadd.f32 %v3355_v39, %v3325_v45 }
 0x28e   : >> { %1953 = vmatpush.msrb.mxu1 %v1883_v9  ;;  %v1447_v9 = vadd.f32 %v3351_v56, %v3317_v47  ;;  %v1448_v47 = vadd.f32 %v3359_v32, %v3329_v51  ;;  %v1135_v56 = vpop.permute.xlu0 %1134 }
 0x28f   : >> { %1927 = vmatpush.msrb.mxu0 %v1864_v52  ;;  %v3577_v44 = vpop.f32.mrf.mxu3  ;;  %v1527_v6 = vadd.f32 %v3337_v1, %v1449_v25  ;;  %v1152_v39 = vadd.f32 %v1135_v56, %v3273_v12  ;;  %v1450_v1 = vadd.f32 %v3401_v7, %v3335_v14 }
 0x290   : >> { %1954 = vmatpush.msrb.mxu1 %v1882_v33  ;;  %v1525_v15 = vadd.f32 %v3323_v2, %v1447_v9 }
 0x292   : >> { %1955 = vmatpush.msrb.mxu1 %v1881_v63 }
 0x293   : >> { %v3449_v53 = vpop.f32.mrf.mxu1 }
 0x294   : >> { %v3457_v16 = vpop.f32.mrf.mxu0  ;;  %1956 = vmatpush.msrb.mxu1 %v1880_v5 }
 0x295   : >> { %v3579_v49 = vpop.f32.mrf.mxu2 }
 0x297   : >> { %v1820_v20 = vpop.f32.mrf.mxu3 }
 0x29b   : >> { %v3505_v29 = vpop.f32.mrf.mxu1 }
 0x29c   : >> { %v1561_v37 = vpop.f32.mrf.mxu0  ;;  %v1603_v3 = vadd.f32 %v3505_v29, %v1525_v15  ;;  %v1526_v29 = vadd.f32 %v3339_v19, %v1448_v47 }
 0x29d   : >> { %v1791_v63 = vpop.f32.mrf.mxu2  ;;  %v1602_v36 = vadd.f32 %v1561_v37, %v1524_v17  ;;  %v1153_v37 = vadd.f32 %v1135_v56, %v3271_v54  ;;  %v1140_v17 = vpop.permute.xlu1 %1139 }
 0x29e   : >> { %v1677_v30 = vadd.f32 %v3409_v43, %v1603_v3  ;;  %v1155_v7 = vadd.f32 %v1140_v17, %v3283_v31 }
 0x29f   : >> { %v1676_v2 = vadd.f32 %v3417_v27, %v1602_v36  ;;  %v1823_v43 = vpop.f32.mrf.mxu3  ;;  %v1451_v27 = vadd.f32 %v3393_v62, %v3333_v50  ;;  %v1161_v19 = vmax.f32 %v1153_v37, 0.0  ;;  %v1528_v36 = vadd.f32 %v3349_v61, %v1450_v1 }
 0x2a1   : >> { %v1529_v3 = vadd.f32 %v3347_v18, %v1451_v27  ;;  %v1453_v18 = vadd.f32 %v3449_v53, %v3343_v13 }
 0x2a3   : >> { %v1593_v46 = vpop.f32.mrf.mxu1 }
 0x2a4   : >> { %v1564_v40 = vpop.f32.mrf.mxu0  ;;  %v1605_v52 = vadd.f32 %v1593_v46, %v1527_v6  ;;  %v1160_v46 = vmax.f32 %v1152_v39, 0.0 }
 0x2a5   : >> { %v1604_v51 = vadd.f32 %v1564_v40, %v1526_v29  ;;  %v1794_v9 = vpop.f32.mrf.mxu2  ;;  %v1145_v29 = vpop.permute.xlu2 %1144 }
 0x2a6   : >> { %v1679_v15 = vadd.f32 %v3477_v57, %v1605_v52  ;;  %v1531_v52 = vadd.f32 %v3357_v38, %v1453_v18 }
 0x2a7   : >> { %v1678_v12 = vadd.f32 %v3488_v4, %v1604_v51  ;;  %v1154_v4 = vadd.f32 %v1140_v17, %v3285_v59  ;;  %v1157_v51 = vadd.f32 %v1145_v29, %v3295_v41 }
 0x2a9   : >> { %v1162_v37 = vmax.f32 %v1154_v4, 0.0 }
 0x2ab   : >> { %v1596_v55 = vpop.f32.mrf.mxu1 }
 0x2ac   : >> { %v1567_v10 = vpop.f32.mrf.mxu0  ;;  %v1607_v47 = vadd.f32 %v1596_v55, %v1529_v3  ;;  %v1826_v55 = vpop.f32.mrf.mxu3 }
 0x2ae   : >> { %v1681_v6 = vadd.f32 %v3543_v58, %v1607_v47 }
 0x2b3   : >> { %v3585_v11 = vpop.f32.mrf.mxu1 }
 0x2b4   : >> { %v3588_v33 = vpop.f32.mrf.mxu0  ;;  %v1609_v58 = vadd.f32 %v3585_v11, %v1531_v52 }
 0x2b6   : >> { %v1683_v41 = vadd.f32 %v3577_v44, %v1609_v58 }
 0x2bb   : >> { %v1742_v26 = vpop.f32.mrf.mxu1 }
 0x2bc   : >> { %v1755_v48 = vadd.f32 %v1742_v26, %v1677_v30  ;;  %v1713_v5 = vpop.f32.mrf.mxu0  ;;  %v1606_v30 = vadd.f32 %v1567_v10, %v1528_v36  ;;  %v1163_v26 = vmax.f32 %v1155_v7, 0.0 }
 0x2bd   : >> { %v1754_v8 = vadd.f32 %v1713_v5, %v1676_v2  ;;  %v1452_v2 = vadd.f32 %v3457_v16, %v3345_v22  ;;  %v1797_v5 = vpop.f32.mrf.mxu2 }
 0x2be   : >> { %v1833_v45 = vadd.f32 %v1820_v20, %v1755_v48  ;;  %v1680_v59 = vadd.f32 %v3551_v21, %v1606_v30  ;;  %v1156_v21 = vadd.f32 %v1145_v29, %v3297_v35 }
 0x2bf   : >> { %v1832_v32 = vadd.f32 %v1791_v63, %v1754_v8  ;;  %v1530_v22 = vadd.f32 %v3361_v60, %v1452_v2 }
 0x2c0   : >> { %v1841_v24 = vadd.f32 %v1833_v45, %v1135_v56  ;;  %v1164_v11 = vmax.f32 %v1156_v21, 0.0 }
 0x2c1   : >> { %v1840_v28 = vadd.f32 %v1832_v32, %v1135_v56  ;;  %v1608_v38 = vadd.f32 %v3588_v33, %v1530_v22 }
 0x2c2   : >> { %v1849_v54 = vmax.f32 %v1841_v24, 0.0  ;;  %v1165_v24 = vmax.f32 %v1157_v51, 0.0 }
 0x2c3   : >> { %v1848_v40 = vmax.f32 %v1840_v28, 0.0  ;;  %v1745_v20 = vpop.f32.mrf.mxu1  ;;  %v1682_v28 = vadd.f32 %v3579_v49, %v1608_v38 }
 0x2c4   : >> { %v1857_v63 = vmax.f32 %v1161_v19, %v1849_v54  ;;  %v1757_v50 = vadd.f32 %v1745_v20, %v1679_v15  ;;  %v1716_v62 = vpop.f32.mrf.mxu0  ;;  %v1829_v54 = vpop.f32.mrf.mxu3 }
 0x2c5   : >> { %v1856_v25 = vmax.f32 %v1160_v46, %v1848_v40  ;;  %v1756_v14 = vadd.f32 %v1716_v62, %v1678_v12  ;;  %v1800_v33 = vpop.f32.mrf.mxu2 }
 0x2c6   : >> { %v1835_v57 = vadd.f32 %v1823_v43, %v1757_v50  ;;  %2398 = vmatmul.msk.f32.vlgmr.msrb.gmra.mxu1 %vm486_vm7, %v1857_v63  ;;  %2435 = vmatmul.msk.f32.vlgmr.msrb.gmra.mxu3 %vm486_vm7, %v1857_v63 }
 0x2c7   : >> { %v1834_v56 = vadd.f32 %v1794_v9, %v1756_v14  ;;  %1928 = vmatmul.f32.vlgmr.msrb.gmra.mxu0 %v1856_v25  ;;  %2022 = vmatmul.f32.vlgmr.msrb.gmra.mxu2 %v1856_v25  ;;  %v1150_v9 = vpop.permute.xlu1 %1149 }
 0x2c8   : >> { %v1843_v61 = vadd.f32 %v1835_v57, %v1140_v17  ;;  %v1159_v20 = vadd.f32 %v1150_v9, %v3307_v42  ;;  %v1158_v44 = vadd.f32 %v1150_v9, %v3309_v0 }
 0x2c9   : >> { %v1842_v31 = vadd.f32 %v1834_v56, %v1140_v17 }
 0x2ca   : >> { %v1851_v48 = vmax.f32 %v1843_v61, 0.0  ;;  %v1167_v62 = vmax.f32 %v1159_v20, 0.0  ;;  %v1166_v25 = vmax.f32 %v1158_v44, 0.0 }
 0x2cb   : >> { %v1850_v10 = vmax.f32 %v1842_v31, 0.0  ;;  %v1748_v8 = vpop.f32.mrf.mxu1 }
 0x2cc   : >> { %v1859_v13 = vmax.f32 %v1163_v26, %v1851_v48  ;;  %v1759_v53 = vadd.f32 %v1748_v8, %v1681_v6  ;;  %v1719_v45 = vpop.f32.mrf.mxu0 }
 0x2cd   : >> { %v1758_v16 = vadd.f32 %v1719_v45, %v1680_v59  ;;  %v1858_v39 = vmax.f32 %v1162_v37, %v1850_v10 }
 0x2ce   : >> { %v1837_v32 = vadd.f32 %v1826_v55, %v1759_v53  ;;  %2399 = vmatmul.msk.f32.gmra.mxu1 %vm486_vm7, %v1859_v13  ;;  %2436 = vmatmul.msk.f32.gmra.mxu3 %vm486_vm7, %v1859_v13 }
 0x2cf   : >> { %v1836_v43 = vadd.f32 %v1797_v5, %v1758_v16  ;;  %1931 = vmatmul.f32.gmra.mxu0 %v1858_v39  ;;  %2025 = vmatmul.f32.gmra.mxu2 %v1858_v39 }
 0x2d0   : >> { %v1845_v27 = vadd.f32 %v1837_v32, %v1145_v29 }
 0x2d1   : >> { %v1844_v60 = vadd.f32 %v1836_v43, %v1145_v29 }
 0x2d2   : >> { %v1853_v1 = vmax.f32 %v1845_v27, 0.0 }
 0x2d3   : >> { %v1852_v19 = vmax.f32 %v1844_v60, 0.0  ;;  %v1751_v15 = vpop.f32.mrf.mxu1 }
 0x2d4   : >> { %v1861_v46 = vmax.f32 %v1165_v24, %v1853_v1  ;;  %v1761_v35 = vadd.f32 %v1751_v15, %v1683_v41  ;;  %v1722_v17 = vpop.f32.mrf.mxu0 }
 0x2d5   : >> { %v1760_v12 = vadd.f32 %v1722_v17, %v1682_v28  ;;  %v1860_v40 = vmax.f32 %v1164_v11, %v1852_v19 }
 0x2d6   : >> { %v1839_v3 = vadd.f32 %v1829_v54, %v1761_v35  ;;  %2400 = vmatmul.msk.f32.gmra.mxu1 %vm486_vm7, %v1861_v46  ;;  %2437 = vmatmul.msk.f32.gmra.mxu3 %vm486_vm7, %v1861_v46 }
 0x2d7   : >> { %v1838_v63 = vadd.f32 %v1800_v33, %v1760_v12  ;;  %1934 = vmatmul.f32.gmra.mxu0 %v1860_v40  ;;  %2028 = vmatmul.f32.gmra.mxu2 %v1860_v40 }
 0x2d8   : >> { %v1847_v49 = vadd.f32 %v1839_v3, %v1150_v9 }
 0x2d9   : >> { %v1846_v50 = vadd.f32 %v1838_v63, %v1150_v9 }
 0x2da   : >> { %v1855_v36 = vmax.f32 %v1847_v49, 0.0 }
 0x2db   : >> { %v1854_v14 = vmax.f32 %v1846_v50, 0.0 }
 0x2dc   : >> { %v1863_v7 = vmax.f32 %v1167_v62, %v1855_v36 }
 0x2dd   : >> { %v1862_v42 = vmax.f32 %v1166_v25, %v1854_v14 }
 0x2de   : >> { %2401 = vmatmul.msk.f32.gmra.mxu1 %vm486_vm7, %v1863_v7  ;;  %2438 = vmatmul.msk.f32.gmra.mxu3 %vm486_vm7, %v1863_v7 }
 0x2df   : >> { %1937 = vmatmul.f32.gmra.mxu0 %v1862_v42  ;;  %2031 = vmatmul.f32.gmra.mxu2 %v1862_v42 }
 0x343   : >> { %v1958_v0 = vpop.f32.mrf.mxu1 }
 0x344   : >> { %v1929_v47 = vpop.f32.mrf.mxu0 }
 0x345   : >> { %v1959_v30 = vadd.f32 %v1958_v0, %v1929_v47 }
 0x349   : >> { %v2052_v57 = vpop.f32.mrf.mxu3 }
 0x34a   : >> { %v2023_v4 = vpop.f32.mrf.mxu2 }
 0x34b   : >> { %v2053_v56 = vadd.f32 %v2052_v57, %v2023_v4  ;;  %v1961_v18 = vpop.f32.mrf.mxu1 }
 0x34c   : >> { %v1932_v61 = vpop.f32.mrf.mxu0 }
 0x34d   : >> { %v2064_v2 = vmax.f32 %v1959_v30, %v2053_v56  ;;  %v1962_v26 = vadd.f32 %v1961_v18, %v1932_v61 }
 0x34f   : >> { %2070 = vst.msk [vmem:[%s2069_s25] sm:$0xff] %vm320_vm6, %v2064_v2 }
 0x351   : >> { %v2055_v31 = vpop.f32.mrf.mxu3 }
 0x352   : >> { %v2026_v55 = vpop.f32.mrf.mxu2 }
 0x353   : >> { %v2056_v6 = vadd.f32 %v2055_v31, %v2026_v55  ;;  %v1964_v5 = vpop.f32.mrf.mxu1 }
 0x354   : >> { %v1935_v29 = vpop.f32.mrf.mxu0 }
 0x355   : >> { %v2065_v48 = vmax.f32 %v1962_v26, %v2056_v6  ;;  %v1965_v8 = vadd.f32 %v1964_v5, %v1935_v29 }
 0x357   : >> { %2071 = vst.msk [vmem:[%s2069_s25 + $0x8] sm:$0xff] %vm320_vm6, %v2065_v48 }
 0x359   : >> { %v2058_v59 = vpop.f32.mrf.mxu3 }
 0x35a   : >> { %v2029_v10 = vpop.f32.mrf.mxu2 }
 0x35b   : >> { %v2059_v37 = vadd.f32 %v2058_v59, %v2029_v10  ;;  %v1967_v13 = vpop.f32.mrf.mxu1 }
 0x35c   : >> { %v1938_v53 = vpop.f32.mrf.mxu0 }
 0x35d   : >> { %v2066_v52 = vmax.f32 %v1965_v8, %v2059_v37  ;;  %v1968_v16 = vadd.f32 %v1967_v13, %v1938_v53 }
 0x35f   : >> { %2072 = vst.msk [vmem:[%s2069_s25 + $0x10] sm:$0xff] %vm320_vm6, %v2066_v52 }
 0x361   : >> { %v2061_v45 = vpop.f32.mrf.mxu3 }
 0x362   : >> { %v2032_v22 = vpop.f32.mrf.mxu2 }
 0x363   : >> { %v2062_v39 = vadd.f32 %v2061_v45, %v2032_v22  ;;  %261 = sbr.rel (!%p259_p5) target bundleno = 175 (0xaf), region = 106 }
 0x365   : >> { %v2067_v51 = vmax.f32 %v1968_v16, %v2062_v39 }
 0x367   : >> { %2073 = vst.msk [vmem:[%s2069_s25 + $0x18] sm:$0xff] %vm320_vm6, %v2067_v51 }
 0x368 PF: > { %s14_s15 = sadd.s32 1, %s2521_s15  }
 0x369   : > { %p11_p6 = scmp.ge.s32.totalorder %s14_s15, 4  }
 0x36b   :  { %13 = sbr.rel (!%p11_p6) target bundleno = 1 (0x1), region = 117 }

// kernel: network_forward.8
= control target key start
LH: loop header
LB: loop body
LE: loop exit
PB: predicated region body
PF: predicated region fallthrough
CT: control target
= control target key end

     0   :  { %s1820_s15 = smov 0   ;;  %s2303_s0 = inlined_call_operand.vmem [shape: f32[2,30,16,30], index: 0, kind: input, shape index: {}]   ;;  %s2304_s1 = inlined_call_operand.vmem [shape: f32[9,16,16], index: 1, kind: input, shape index: {}]   ;;  %s2305_s2 = inlined_call_operand.vmem [shape: f32[16,1], index: 2, kind: input, shape index: {}]   ;;  %s2306_s3 = inlined_call_operand.vmem [shape: f32[4,28,7], index: 3, kind: input, shape index: {}]   ;;  %s2307_s4 = inlined_call_operand.vmem [shape: f32[2,7,16,7], index: 4, kind: output, shape index: {}]  }
   0x1 LB: > { %s1543_s16 = sadd.s32 4294967295, %s1786_s15   ;;  %p1547_p0 = scmp.ge.s32.totalorder %s1786_s15, 1  ;;  %s1786_s15 = sphi %s1820_s15, %s14_s15  }
   0x2   : > { %p162_p1 = scmp.lt.s32.totalorder %s1786_s15, 3 }
   0x4   : > { %p163_p2 = pnand %p1547_p0, %p162_p1 }
   0x5   : > { %p188_p3 = scmp.lt.s32.totalorder (!%p163_p2), %s1543_s16, 1  ;;  %s1848_s29 = smov (!%p163_p2), 0  }
   0x6   : > { %166 = sbr.rel (%p163_p2) target bundleno = 564 (0x234), region = 36 }
   0xb   : > { %v1831_v0 = vld [vmem:[%s2305_s2] sm:$0xff]  ;;  %v1836_v1 = vld [vmem:[%s2305_s2 + $0x8] sm:$0xff]  ;;  %s2309_s16 = smov (!%p188_p3, %s1543_s16), 1 }
   0xc   : > { %s1693_s21 = smul.u32 480, %s2309_s16 }
   0xd   : > { %s1694_s22 = smul.u32 112, %s2309_s16 }
   0xe   : > { %s1841_s25 = scalar_lea.vmem %s2303_s0, %s1693_s21 }
   0xf   : > { %s1846_s28 = scalar_lea.vmem %s2307_s4, %s1694_s22 }
  0x10 LB: >> { %s1687_s30 = sshll.u32 %s1790_s29, 6  ;;  %s1792_s6 = smov 127   ;;  %v1877_v10 = vld [vmem:[%s2304_s1] sm:$0xff]  ;;  %vm249_vm0 = vcmask 130048   ;;  %v1895_v14 = vld [vmem:[%s2304_s1 + $0x8] sm:$0xff]  ;;  %v1923_v21 = vld [vmem:[%s2304_s1 + $0x30] sm:$0xff]  ;;  %s1790_s29 = sphi %s1848_s29, %s205_s29  }
  0x11   : >> { %s1855_s5 = scalar_lea.vmem %s1841_s25, %s1687_s30  ;;  %s1793_s9 = smov 126   ;;  %v1931_v22 = vld [vmem:[%s2304_s1 + $0x38] sm:$0xff]  ;;  %v1947_v29 = vld [vmem:[%s2304_s1 + $0x50] sm:$0xff]  ;;  %v1965_v37 = vld [vmem:[%s2304_s1 + $0x20] sm:$0xff]  ;;  %v1794_v56 = vmov 0   ;;  %vm1328_vm1 = vcmask 1043456  }
  0x12   : >> { %v1858_v2 = vld [vmem:[%s1855_s5 + $0x18] sm:$0xff]  ;;  %v1861_v3 = vld [vmem:[%s1855_s5 + $0x28] sm:$0xff]  ;;  %v209_v4 = vld [vmem:[%s1855_s5] sm:$0xff]  ;;  %1774 = vset.pattern.permute.xlu0 %v1794_v56  ;;  %1775 = vset.pattern.permute.xlu1 %v1794_v56  ;;  %vm1321_vm2 = vcmask 228352   ;;  %s1684_s10 = sshll.u32 %s1790_s29, 4  ;;  %vm1456_vm3 = vcmask 56320  }
  0x13   : >> { %v1724_v5 = vpack.i.bf16 %v1861_v3, %v1858_v2  ;;  %v210_v6 = vld [vmem:[%s1855_s5 + $0x8] sm:$0xff]  ;;  %v1868_v7 = vld [vmem:[%s1855_s5 + $0x10] sm:$0xff]  ;;  %371 = vmatpush.msra.mxu3 %v1858_v2  ;;  %v1882_v11 = vld [vmem:[%s1855_s5 + $0x20] sm:$0xff]  ;;  %s1455_s11 = scalar_lea.vmem %s1846_s28, %s1684_s10  ;;  %s205_s29 = sadd.s32 1, %s1790_s29  }
  0x14   : >> { %v1714_v8 = vpack.i.bf16 %v209_v4, %v210_v6  ;;  %v1734_v9 = vpack.i.bf16 %v1868_v7, %v1858_v2  ;;  %299 = vmatpush.msra.mxu1 %v210_v6  ;;  %v1729_v12 = vpack.i.bf16 %v1882_v11, %v1868_v7  ;;  %v1739_v13 = vpack.i.bf16 %v1882_v11, %v1861_v3  ;;  %v1899_v15 = vld [vmem:[%s1855_s5 + $0x30] sm:$0xff]  ;;  %v1902_v16 = vld [vmem:[%s1855_s5 + $0x38] sm:$0xff]  ;;  %v1912_v18 = vld [vmem:[%s1855_s5 + $0x40] sm:$0xff]  ;;  %p202_p4 = scmp.ge.s32.totalorder %s205_s29, 7  }
  0x15   : >> { %1725 = vrot.lane.b32.xlu1 %v1724_v5, %s1792_s6  ;;  %372 = vmatpush.msra.mxu3 %v1868_v7  ;;  %v1749_v17 = vpack.i.bf16 %v1899_v15, %v1902_v16  ;;  %v1915_v19 = vld [vmem:[%s1855_s5 + $0x48] sm:$0xff]  ;;  %v1934_v23 = vld [vmem:[%s1855_s5 + $0x50] sm:$0xff]  ;;  %v1937_v24 = vld [vmem:[%s1855_s5 + $0x58] sm:$0xff] }
  0x16   : >> { %1715 = vrot.lane.b32.xlu0 %v1714_v8, %s1793_s9  ;;  %1735 = vrot.lane.b32.xlu2 %v1734_v9, %s1793_s9  ;;  %v1759_v20 = vpack.i.bf16 %v1912_v18, %v1915_v19  ;;  %v1764_v25 = vpack.i.bf16 %v1934_v23, %v1937_v24  ;;  %v1954_v30 = vld [vmem:[%s2304_s1 + $0x58] sm:$0xff]  ;;  %v1975_v42 = vld [vmem:[%s2304_s1 + $0x70] sm:$0xff] }
  0x17   : >> { %300 = vmatpush.msra.mxu1 %v209_v4  ;;  %1584 = vmatmul.msk.f32.vlgmr.msra.gmra.mxu3 %vm249_vm0, %v1923_v21  ;;  %v1984_v45 = vld [vmem:[%s2304_s1 + $0x10] sm:$0xff]  ;;  %v1989_v46 = vld [vmem:[%s2304_s1 + $0x28] sm:$0xff]  ;;  %v2001_v49 = vld [vmem:[%s2304_s1 + $0x78] sm:$0xff] }
  0x18   : >> { %1576 = vmatmul.msk.f32.vlgmr.msra.gmra.mxu1 %vm249_vm0, %v1877_v10  ;;  %v2021_v54 = vld [vmem:[%s2304_s1 + $0x18] sm:$0xff]  ;;  %v2026_v55 = vld [vmem:[%s2304_s1 + $0x60] sm:$0xff]  ;;  %v2052_v58 = vld [vmem:[%s2304_s1 + $0x68] sm:$0xff] }
  0x19   : >> { %v2047_v57 = vld [vmem:[%s2304_s1 + $0x40] sm:$0xff]  ;;  %v2071_v60 = vld [vmem:[%s2304_s1 + $0x48] sm:$0xff] }
  0x1a   : >> { %v2086_v63 = vld [vmem:[%s2304_s1 + $0x80] sm:$0xff]  ;;  %v2101_v5 = vld [vmem:[%s2304_s1 + $0x88] sm:$0xff] }
  0x1d   : >> { %1730 = vrot.lane.b32.xlu1 %v1729_v12, %s1792_s6 }
  0x1e   : >> { %1720 = vrot.lane.b32.xlu0 %v1714_v8, %s1792_s6  ;;  %1740 = vrot.lane.b32.xlu2 %v1739_v13, %s1793_s9 }
  0x1f   : >> { %1585 = vmatmul.msk.f32.gmra.mxu3 %vm249_vm0, %v1931_v22 }
  0x20   : >> { %1577 = vmatmul.msk.f32.gmra.mxu1 %vm249_vm0, %v1895_v14 }
  0x25   : >> { %1750 = vrot.lane.b32.xlu1 %v1749_v17, %s1793_s9 }
  0x26   : >> { %1745 = vrot.lane.b32.xlu0 %v1749_v17, %s1792_s6  ;;  %1755 = vrot.lane.b32.xlu2 %v1759_v20, %s1793_s9 }
  0x2d   : >> { %1765 = vrot.lane.b32.xlu1 %v1764_v25, %s1792_s6 }
  0x2e   : >> { %1760 = vrot.lane.b32.xlu0 %v1759_v20, %s1792_s6  ;;  %1770 = vrot.lane.b32.xlu2 %v1764_v25, %s1793_s9 }
  0x35   : >> { %587 = vperm.xlu1 %1775, %v1836_v1  }
  0x36   : >> { %582 = vperm.xlu0 %1774, %v1831_v0  }
  0x70   : >> { %v1736_v26 = vpop.permute.xlu2 %1735 }
  0x71   : >> { %v1737_v27 = vunpack.i.l.bf16 %v1736_v26  ;;  %v1738_v28 = vunpack.i.h.bf16 %v1736_v26 }
  0x73   : >> { %453 = vmatpush.msrb.mxu1 %v1737_v27 }
  0x75   : >> { %454 = vmatpush.msrb.mxu1 %v1738_v28 }
  0x76   : >> { %1592 = vmatmul.msk.f32.vlgmr.msrb.gmra.mxu1 %vm249_vm0, %v1947_v29 }
  0x78   : >> { %v1741_v47 = vpop.permute.xlu2 %1740 }
  0x79   : >> { %v2004_v50 = vunpack.i.l.bf16 %v1741_v47  ;;  %v2012_v53 = vunpack.i.h.bf16 %v1741_v47 }
  0x7e   : >> { %1593 = vmatmul.msk.f32.gmra.mxu1 %vm249_vm0, %v1954_v30 }
  0x80   : >> { %v1756_v6 = vpop.permute.xlu2 %1755 }
  0x81   : >> { %v1758_v8 = vunpack.i.h.bf16 %v1756_v6 }
  0x87   : >> { %v1726_v31 = vpop.permute.xlu1 %1725 }
  0x88   : >> { %v1958_v32 = vunpack.i.h.bf16 %v1726_v31  ;;  %v1727_v33 = vunpack.i.l.bf16 %v1726_v31  ;;  %v1716_v34 = vpop.permute.xlu0 %1715  ;;  %v1771_v9 = vpop.permute.xlu2 %1770 }
  0x89   : >> { %v1717_v35 = vunpack.i.l.bf16 %v1716_v34  ;;  %v1718_v36 = vunpack.i.h.bf16 %v1716_v34  ;;  %v1772_v12 = vunpack.i.l.bf16 %v1771_v9 }
  0x8a   : >> { %529 = vmatpush.msrb.mxu3 %v1958_v32  ;;  %608 = vmatpush.msra.mxu1 %v1727_v33 }
  0x8b   : >> { %337 = vmatpush.msra.mxu2 %v1717_v35 }
  0x8d   : >> { %338 = vmatpush.msra.mxu2 %v1718_v36 }
  0x8e   : >> { %1580 = vmatmul.msk.f32.vlgmr.msra.gmra.mxu2 %vm249_vm0, %v1965_v37 }
  0x8f   : >> { %v1731_v38 = vpop.permute.xlu1 %1730  ;;  %487 = vmatpush.msrb.mxu2 %v1861_v3 }
  0x90   : >> { %v1970_v39 = vunpack.i.h.bf16 %v1731_v38  ;;  %v1732_v40 = vunpack.i.l.bf16 %v1731_v38  ;;  %v1721_v41 = vpop.permute.xlu0 %1720 }
  0x91   : >> { %v1722_v43 = vunpack.i.l.bf16 %v1721_v41  ;;  %488 = vmatpush.msrb.mxu2 %v1882_v11  ;;  %v1723_v44 = vunpack.i.h.bf16 %v1721_v41 }
  0x92   : >> { %530 = vmatpush.msrb.mxu3 %v1970_v39  ;;  %609 = vmatpush.msra.mxu1 %v1732_v40 }
  0x93   : >> { %270 = vmatpush.msra.mxu0 %v1722_v43  ;;  %1600 = vmatmul.msk.f32.vlgmr.msrb.gmra.mxu3 %vm249_vm0, %v1975_v42 }
  0x94   : >> { %1606 = vmatmul.msk.f32.vlgmr.msra.gmra.mxu1 %vm249_vm0, %v1984_v45  ;;  %654 = vmatpush.msra.mxu3 %v1737_v27 }
  0x95   : >> { %271 = vmatpush.msra.mxu0 %v1723_v44  ;;  %704 = vmatpush.msrb.mxu1 %v1958_v32 }
  0x96   : >> { %1574 = vmatmul.msk.f32.vlgmr.msra.gmra.mxu0 %vm249_vm0, %v1984_v45  ;;  %1581 = vmatmul.msk.f32.gmra.mxu2 %vm249_vm0, %v1989_v46 }
  0x97   : >> { %413 = vmatpush.msrb.mxu0 %v1727_v33  ;;  %655 = vmatpush.msra.mxu3 %v1738_v28  ;;  %v1751_v48 = vpop.permute.xlu1 %1750 }
  0x98   : >> { %705 = vmatpush.msrb.mxu1 %v1970_v39  ;;  %631 = vmatpush.msra.mxu2 %v1858_v2  ;;  %v2007_v51 = vunpack.i.l.bf16 %v1751_v48  ;;  %v2009_v52 = vunpack.i.h.bf16 %v1751_v48  ;;  %v1746_v59 = vpop.permute.xlu0 %1745 }
  0x99   : >> { %414 = vmatpush.msrb.mxu0 %v1732_v40  ;;  %754 = vmatpush.msrb.mxu3 %v1902_v16  ;;  %v1747_v2 = vunpack.i.l.bf16 %v1746_v59  ;;  %v1748_v4 = vunpack.i.h.bf16 %v1746_v59 }
  0x9a   : >> { %632 = vmatpush.msra.mxu2 %v1868_v7  ;;  %818 = vmatpush.msra.mxu1 %v2007_v51  ;;  %v1757_v7 = vunpack.i.l.bf16 %v1756_v6 }
  0x9b   : >> { %569 = vmatpush.msra.mxu0 %v2004_v50  ;;  %1601 = vmatmul.msk.f32.gmra.mxu3 %vm249_vm0, %v2001_v49 }
  0x9c   : >> { %1607 = vmatmul.msk.f32.gmra.mxu1 %vm249_vm0, %v2021_v54  ;;  %755 = vmatpush.msrb.mxu3 %v1899_v15 }
  0x9d   : >> { %570 = vmatpush.msra.mxu0 %v2012_v53  ;;  %819 = vmatpush.msra.mxu1 %v2009_v52 }
  0x9e   : >> { %1575 = vmatmul.msk.f32.gmra.mxu0 %vm249_vm0, %v2021_v54  ;;  %1596 = vmatmul.msk.f32.vlgmr.msrb.gmra.mxu2 %vm249_vm0, %v2026_v55 }
  0x9f   : >> { %729 = vmatpush.msrb.mxu2 %v2004_v50  ;;  %v1766_v13 = vpop.permute.xlu1 %1765 }
  0xa0   : >> { %v1761_v61 = vpop.permute.xlu0 %1760  ;;  %v1767_v17 = vunpack.i.l.bf16 %v1766_v13 }
  0xa1   : >> { %730 = vmatpush.msrb.mxu2 %v2012_v53  ;;  %v1762_v62 = vunpack.i.l.bf16 %v1761_v61 }
  0xa3   : >> { %1610 = vmatmul.msk.f32.vlgmr.msra.gmra.mxu3 %vm249_vm0, %v1965_v37 }
  0xa4   : >> { %1614 = vmatmul.msk.f32.vlgmr.msrb.gmra.mxu1 %vm249_vm0, %v2047_v57  ;;  %872 = vmatpush.msra.mxu3 %v1861_v3 }
  0xa5   : >> { %920 = vmatpush.msrb.mxu1 %v1902_v16 }
  0xa6   : >> { %1588 = vmatmul.msk.f32.vlgmr.msrb.gmra.mxu0 %vm249_vm0, %v2047_v57  ;;  %1597 = vmatmul.msk.f32.gmra.mxu2 %vm249_vm0, %v2052_v58 }
  0xa7   : >> { %679 = vmatpush.msrb.mxu0 %v1861_v3  ;;  %873 = vmatpush.msra.mxu3 %v1882_v11  ;;  %v1763_v3 = vunpack.i.h.bf16 %v1761_v61 }
  0xa8   : >> { %921 = vmatpush.msrb.mxu1 %v1899_v15 }
  0xa9   : >> { %680 = vmatpush.msrb.mxu0 %v1882_v11  ;;  %v1773_v11 = vunpack.i.h.bf16 %v1771_v9 }
  0xab   : >> { %1611 = vmatmul.msk.f32.gmra.mxu3 %vm249_vm0, %v1989_v46 }
  0xac   : >> { %1615 = vmatmul.msk.f32.gmra.mxu1 %vm249_vm0, %v2071_v60 }
  0xae   : >> { %1589 = vmatmul.msk.f32.gmra.mxu0 %vm249_vm0, %v2071_v60  ;;  %1608 = vmatmul.msk.f32.vlgmr.msra.gmra.mxu2 %vm249_vm0, %v1877_v10 }
  0xaf   : >> { %849 = vmatpush.msra.mxu2 %v1958_v32 }
  0xb1   : >> { %850 = vmatpush.msra.mxu2 %v1970_v39 }
  0xb3   : >> { %1618 = vmatmul.msk.f32.vlgmr.msrb.gmra.mxu3 %vm249_vm0, %v2026_v55 }
  0xb4   : >> { %1622 = vmatmul.msk.f32.vlgmr.msra.gmra.mxu1 %vm249_vm0, %v2086_v63  ;;  %970 = vmatpush.msrb.mxu3 %v2007_v51 }
  0xb5   : >> { %1028 = vmatpush.msra.mxu1 %v1762_v62 }
  0xb6   : >> { %1604 = vmatmul.msk.f32.vlgmr.msra.gmra.mxu0 %vm249_vm0, %v2086_v63  ;;  %1609 = vmatmul.msk.f32.gmra.mxu2 %vm249_vm0, %v1895_v14 }
  0xb7   : >> { %971 = vmatpush.msrb.mxu3 %v2009_v52  ;;  %787 = vmatpush.msra.mxu0 %v1747_v2 }
  0xb8   : >> { %1029 = vmatpush.msra.mxu1 %v1763_v3 }
  0xb9   : >> { %788 = vmatpush.msra.mxu0 %v1748_v4 }
  0xbb   : >> { %1619 = vmatmul.msk.f32.gmra.mxu3 %vm249_vm0, %v2052_v58 }
  0xbc   : >> { %1623 = vmatmul.msk.f32.gmra.mxu1 %vm249_vm0, %v2101_v5 }
  0xbe   : >> { %1605 = vmatmul.msk.f32.gmra.mxu0 %vm249_vm0, %v2101_v5  ;;  %1616 = vmatmul.msk.f32.vlgmr.msrb.gmra.mxu2 %vm249_vm0, %v1947_v29 }
  0xbf   : >> { %945 = vmatpush.msrb.mxu2 %v1747_v2 }
  0xc1   : >> { %946 = vmatpush.msrb.mxu2 %v1748_v4 }
  0xc3   : >> { %1626 = vmatmul.msk.f32.vlgmr.msra.gmra.mxu3 %vm249_vm0, %v1877_v10 }
  0xc4   : >> { %1090 = vmatpush.msra.mxu3 %v1747_v2  ;;  %1630 = vmatmul.msk.f32.vlgmr.msrb.gmra.mxu1 %vm249_vm0, %v1923_v21 }
  0xc5   : >> { %1136 = vmatpush.msrb.mxu1 %v2007_v51 }
  0xc6   : >> { %1612 = vmatmul.msk.f32.vlgmr.msrb.gmra.mxu0 %vm249_vm0, %v1923_v21  ;;  %1091 = vmatpush.msra.mxu3 %v1748_v4 }
  0xc7   : >> { %895 = vmatpush.msrb.mxu0 %v2004_v50  ;;  %1137 = vmatpush.msrb.mxu1 %v2009_v52 }
  0xc8   : >> { %1617 = vmatmul.msk.f32.gmra.mxu2 %vm249_vm0, %v1954_v30 }
  0xc9   : >> { %896 = vmatpush.msrb.mxu0 %v2012_v53 }
  0xcb   : >> { %1627 = vmatmul.msk.f32.gmra.mxu3 %vm249_vm0, %v1895_v14 }
  0xcc   : >> { %1631 = vmatmul.msk.f32.gmra.mxu1 %vm249_vm0, %v1931_v22 }
  0xce   : >> { %1613 = vmatmul.msk.f32.gmra.mxu0 %vm249_vm0, %v1931_v22 }
  0xd0   : >> { %1624 = vmatmul.msk.f32.vlgmr.msra.gmra.mxu2 %vm249_vm0, %v1984_v45 }
  0xd1   : >> { %1059 = vmatpush.msra.mxu2 %v1757_v7 }
  0xd3   : >> { %1060 = vmatpush.msra.mxu2 %v1758_v8  ;;  %1634 = vmatmul.msk.f32.vlgmr.msrb.gmra.mxu3 %vm249_vm0, %v1947_v29 }
  0xd4   : >> { %1186 = vmatpush.msrb.mxu3 %v1762_v62  ;;  %1638 = vmatmul.msk.f32.vlgmr.msra.gmra.mxu1 %vm249_vm0, %v1975_v42 }
  0xd5   : >> { %1236 = vmatpush.msra.mxu1 %v1937_v24 }
  0xd6   : >> { %1620 = vmatmul.msk.f32.vlgmr.msra.gmra.mxu0 %vm249_vm0, %v1975_v42  ;;  %1187 = vmatpush.msrb.mxu3 %v1763_v3 }
  0xd7   : >> { %995 = vmatpush.msra.mxu0 %v1915_v19  ;;  %1237 = vmatpush.msra.mxu1 %v1934_v23 }
  0xd8   : >> { %1625 = vmatmul.msk.f32.gmra.mxu2 %vm249_vm0, %v2021_v54 }
  0xd9   : >> { %996 = vmatpush.msra.mxu0 %v1912_v18 }
  0xdb   : >> { %1635 = vmatmul.msk.f32.gmra.mxu3 %vm249_vm0, %v1954_v30 }
  0xdc   : >> { %1639 = vmatmul.msk.f32.gmra.mxu1 %vm249_vm0, %v2001_v49 }
  0xde   : >> { %1621 = vmatmul.msk.f32.gmra.mxu0 %vm249_vm0, %v2001_v49 }
  0xe0   : >> { %1632 = vmatmul.msk.f32.vlgmr.msrb.gmra.mxu2 %vm249_vm0, %v2047_v57 }
  0xe1   : >> { %1161 = vmatpush.msrb.mxu2 %v1915_v19  ;;  %v374_v19 = vpop.f32.mrf.mxu3 }
  0xe3   : >> { %1642 = vmatmul.msk.f32.vlgmr.msra.gmra.mxu3 %vm249_vm0, %v1984_v45  ;;  %1162 = vmatpush.msrb.mxu2 %v1912_v18  ;;  %v1768_v18 = vunpack.i.h.bf16 %v1766_v13 }
  0xe4   : >> { %1646 = vmatmul.msk.f32.vlgmr.msrb.gmra.mxu1 %vm249_vm0, %v1965_v37  ;;  %1300 = vmatpush.msra.mxu3 %v1772_v12 }
  0xe6   : >> { %1628 = vmatmul.msk.f32.vlgmr.msrb.gmra.mxu0 %vm249_vm0, %v1965_v37  ;;  %1301 = vmatpush.msra.mxu3 %v1773_v11 }
  0xe7   : >> { %1113 = vmatpush.msrb.mxu0 %v1902_v16 }
  0xe8   : >> { %1633 = vmatmul.msk.f32.gmra.mxu2 %vm249_vm0, %v2071_v60 }
  0xe9   : >> { %1114 = vmatpush.msrb.mxu0 %v1899_v15  ;;  %v302_v15 = vpop.f32.mrf.mxu1  ;;  %v377_v23 = vpop.f32.mrf.mxu3 }
  0xeb   : >> { %1643 = vmatmul.msk.f32.gmra.mxu3 %vm249_vm0, %v2021_v54 }
  0xec   : >> { %1647 = vmatmul.msk.f32.gmra.mxu1 %vm249_vm0, %v1989_v46 }
  0xee   : >> { %1629 = vmatmul.msk.f32.gmra.mxu0 %vm249_vm0, %v1989_v46 }
  0xf0   : >> { %1640 = vmatmul.msk.f32.vlgmr.msra.gmra.mxu2 %vm249_vm0, %v2086_v63 }
  0xf1   : >> { %1269 = vmatpush.msra.mxu2 %v1767_v17  ;;  %v305_v16 = vpop.f32.mrf.mxu1 }
  0xf3   : >> { %1270 = vmatpush.msra.mxu2 %v1768_v18  ;;  %1650 = vmatmul.msk.f32.vlgmr.msrb.gmra.mxu3 %vm249_vm0, %v2047_v57 }
  0xf4   : >> { %1654 = vmatmul.msk.f32.vlgmr.msra.gmra.mxu1 %vm249_vm0, %v2026_v55 }
  0xf6   : >> { %1636 = vmatmul.msk.f32.vlgmr.msra.gmra.mxu0 %vm249_vm0, %v2026_v55 }
  0xf7   : >> { %1211 = vmatpush.msra.mxu0 %v1757_v7 }
  0xf8   : >> { %1641 = vmatmul.msk.f32.gmra.mxu2 %vm249_vm0, %v2101_v5 }
  0xf9   : >> { %1212 = vmatpush.msra.mxu0 %v1758_v8  ;;  %v456_v20 = vpop.f32.mrf.mxu1 }
  0xfb   : >> { %1651 = vmatmul.msk.f32.gmra.mxu3 %vm249_vm0, %v2071_v60 }
  0xfc   : >> { %1655 = vmatmul.msk.f32.gmra.mxu1 %vm249_vm0, %v2052_v58 }
  0xfe   : >> { %1637 = vmatmul.msk.f32.gmra.mxu0 %vm249_vm0, %v2052_v58 }
 0x100   : >> { %1648 = vmatmul.msk.f32.vlgmr.msrb.gmra.mxu2 %vm249_vm0, %v1923_v21 }
 0x101   : >> { %v459_v24 = vpop.f32.mrf.mxu1 }
 0x103   : >> { %1658 = vmatmul.msk.f32.vlgmr.msra.gmra.mxu3 %vm249_vm0, %v2086_v63 }
 0x106   : >> { %1644 = vmatmul.msk.f32.vlgmr.msrb.gmra.mxu0 %vm249_vm0, %v1877_v10 }
 0x108   : >> { %1649 = vmatmul.msk.f32.gmra.mxu2 %vm249_vm0, %v1931_v22 }
 0x10b   : >> { %1659 = vmatmul.msk.f32.gmra.mxu3 %vm249_vm0, %v2101_v5 }
 0x10e   : >> { %1645 = vmatmul.msk.f32.gmra.mxu0 %vm249_vm0, %v1895_v14 }
 0x110   : >> { %1656 = vmatmul.msk.f32.vlgmr.msra.gmra.mxu2 %vm249_vm0, %v1975_v42 }
 0x111   : >> { %v340_v21 = vpop.f32.mrf.mxu2  ;;  %v611_v28 = vpop.f32.mrf.mxu1 }
 0x113   : >> { %v273_v25 = vpop.f32.mrf.mxu0 }
 0x114   : >> { %v303_v26 = vadd.f32 %v302_v15, %v273_v25 }
 0x116   : >> { %v346_v27 = vadd.f32 %v340_v21, %v303_v26  ;;  %1652 = vmatmul.msk.f32.vlgmr.msra.gmra.mxu0 %vm249_vm0, %v1947_v29  ;;  %v532_v10 = vpop.f32.mrf.mxu3 }
 0x118   : >> { %v380_v22 = vadd.f32 %v374_v19, %v346_v27  ;;  %1657 = vmatmul.msk.f32.gmra.mxu2 %vm249_vm0, %v2001_v49 }
 0x119   : >> { %v343_v31 = vpop.f32.mrf.mxu2  ;;  %v614_v37 = vpop.f32.mrf.mxu1 }
 0x11b   : >> { %v276_v32 = vpop.f32.mrf.mxu0 }
 0x11c   : >> { %v306_v14 = vadd.f32 %v305_v16, %v276_v32  ;;  %v2205_v16 = vpop.permute.xlu0 %582 }
 0x11e   : >> { %v347_v33 = vadd.f32 %v343_v31, %v306_v14  ;;  %1653 = vmatmul.msk.f32.gmra.mxu0 %vm249_vm0, %v1954_v30  ;;  %v535_v34 = vpop.f32.mrf.mxu3 }
 0x120   : >> { %v381_v35 = vadd.f32 %v377_v23, %v347_v33 }
 0x121   : >> { %v490_v36 = vpop.f32.mrf.mxu2  ;;  %v707_v46 = vpop.f32.mrf.mxu1 }
 0x123   : >> { %v416_v38 = vpop.f32.mrf.mxu0 }
 0x124   : >> { %v422_v39 = vadd.f32 %v416_v38, %v380_v22 }
 0x126   : >> { %v462_v29 = vadd.f32 %v456_v20, %v422_v39  ;;  %v657_v40 = vpop.f32.mrf.mxu3 }
 0x128   : >> { %v496_v41 = vadd.f32 %v490_v36, %v462_v29 }
 0x129   : >> { %v493_v42 = vpop.f32.mrf.mxu2  ;;  %v710_v56 = vpop.f32.mrf.mxu1 }
 0x12a   : >> { %v538_v43 = vadd.f32 %v532_v10, %v496_v41 }
 0x12b   : >> { %v419_v44 = vpop.f32.mrf.mxu0 }
 0x12c   : >> { %v423_v45 = vadd.f32 %v419_v44, %v381_v35 }
 0x12e   : >> { %v463_v47 = vadd.f32 %v459_v24, %v423_v45  ;;  %v660_v48 = vpop.f32.mrf.mxu3 }
 0x130   : >> { %v497_v49 = vadd.f32 %v493_v42, %v463_v47 }
 0x131   : >> { %v634_v50 = vpop.f32.mrf.mxu2  ;;  %v821_v63 = vpop.f32.mrf.mxu1 }
 0x132   : >> { %v539_v51 = vadd.f32 %v535_v34, %v497_v49  ;;  %v635_v30 = vadd.f32 %v634_v50, %v611_v28  ;;  %v2211_v28 = vpop.permute.xlu1 %587  ;;  %v1673_v49 = vld [vmem:[%s2306_s3 + $0x58] sm:$0xf] }
 0x133   : >> { %v572_v52 = vpop.f32.mrf.mxu0  ;;  %1674 = vmatpush.msk.msrb.mxu2 %vm1328_vm1, %v1673_v49 }
 0x134   : >> { %v578_v53 = vadd.f32 %v572_v52, %v538_v43  ;;  %v663_v54 = vadd.f32 %v657_v40, %v635_v30  ;;  %v1680_v30 = vld [vmem:[%s2306_s3 + $0x78] sm:$0xf] }
 0x135   : >> { %1681 = vmatpush.msk.msrb.mxu3 %vm1328_vm1, %v1680_v30 }
 0x136   : >> { %v757_v55 = vpop.f32.mrf.mxu3  ;;  %v590_v25 = vadd.f32 %v2205_v16, %v578_v53  ;;  %v1320_v53 = vld [vmem:[%s2306_s3 + $0x18] sm:$0xf] }
 0x137   : >> { %1660 = vmatpush.msk.msrb.mxu0 %vm1328_vm1, %v1320_v53 }
 0x138   : >> { %v592_v22 = vmax.f32 %v590_v25, 0.0 }
 0x139   : >> { %v637_v57 = vpop.f32.mrf.mxu2  ;;  %v824_v9 = vpop.f32.mrf.mxu1 }
 0x13a   : >> { %v638_v58 = vadd.f32 %v637_v57, %v614_v37 }
 0x13b   : >> { %v575_v59 = vpop.f32.mrf.mxu0 }
 0x13c   : >> { %v579_v60 = vadd.f32 %v575_v59, %v539_v51  ;;  %v664_v61 = vadd.f32 %v660_v48, %v638_v58 }
 0x13e   : >> { %v760_v62 = vpop.f32.mrf.mxu3  ;;  %v591_v35 = vadd.f32 %v2211_v28, %v579_v60 }
 0x140   : >> { %v593_v39 = vmax.f32 %v591_v35, 0.0 }
 0x141   : >> { %v732_v2 = vpop.f32.mrf.mxu2  ;;  %v923_v21 = vpop.f32.mrf.mxu1 }
 0x143   : >> { %v682_v3 = vpop.f32.mrf.mxu0 }
 0x144   : >> { %v688_v4 = vadd.f32 %v682_v3, %v663_v54  ;;  %v1666_v54 = vld [vmem:[%s2306_s3 + $0x38] sm:$0xf]  ;;  %v1678_v3 = vld [vmem:[%s2306_s3 + $0x68] sm:$0xff] }
 0x145   : >> { %1667 = vmatpush.msk.msrb.mxu1 %vm1328_vm1, %v1666_v54 }
 0x146   : >> { %v713_v5 = vadd.f32 %v707_v46, %v688_v4  ;;  %v875_v6 = vpop.f32.mrf.mxu3  ;;  %v1318_v4 = vld [vmem:[%s2306_s3 + $0x8] sm:$0xff] }
 0x148   : >> { %v738_v7 = vadd.f32 %v732_v2, %v713_v5  ;;  %v1671_v2 = vld [vmem:[%s2306_s3 + $0x48] sm:$0xff] }
 0x149   : >> { %v2216_v37 = vpop.f32.mrf.mxu1 }
 0x14a   : >> { %v763_v8 = vadd.f32 %v757_v55, %v738_v7  ;;  %v1672_v55 = vld [vmem:[%s2306_s3 + $0x50] sm:$0xff]  ;;  %v1664_v7 = vld [vmem:[%s2306_s3 + $0x28] sm:$0xff] }
 0x14b   : >> { %v685_v11 = vpop.f32.mrf.mxu0  ;;  %v735_v12 = vpop.f32.mrf.mxu2  ;;  %1409 = vmatpush.msrb.mxu2 %v1672_v55 }
 0x14c   : >> { %v689_v13 = vadd.f32 %v685_v11, %v664_v61  ;;  %v1317_v11 = vld [vmem:[%s2306_s3] sm:$0xff] }
 0x14d   : >> { %1410 = vmatpush.msrb.mxu2 %v1671_v2 }
 0x14e   : >> { %v714_v17 = vadd.f32 %v710_v56, %v689_v13  ;;  %v2203_v15 = vpop.f32.mrf.mxu3  ;;  %v1679_v56 = vld [vmem:[%s2306_s3 + $0x70] sm:$0xff] }
 0x14f   : >> { %1442 = vmatpush.msrb.mxu3 %v1679_v56 }
 0x150   : >> { %v739_v18 = vadd.f32 %v735_v12, %v714_v17  ;;  %v1663_v12 = vld [vmem:[%s2306_s3 + $0x20] sm:$0xff] }
 0x151   : >> { %v2223_v44 = vpop.f32.mrf.mxu1  ;;  %1443 = vmatpush.msrb.mxu3 %v1678_v3 }
 0x152   : >> { %v764_v19 = vadd.f32 %v760_v62, %v739_v18  ;;  %v1319_v62 = vld [vmem:[%s2306_s3 + $0x10] sm:$0xff] }
 0x153   : >> { %v790_v20 = vpop.f32.mrf.mxu0  ;;  %v852_v23 = vpop.f32.mrf.mxu2  ;;  %1345 = vmatpush.msrb.mxu0 %v1319_v62 }
 0x154   : >> { %v796_v24 = vadd.f32 %v790_v20, %v763_v8  ;;  %v876_v57 = vadd.f32 %v875_v6, %v852_v23  ;;  %v1670_v8 = vld [vmem:[%s2306_s3 + $0x40] sm:$0xff] }
 0x155   : >> { %1346 = vmatpush.msrb.mxu0 %v1318_v4  ;;  %1411 = vmatpush.msrb.mxu2 %v1670_v8 }
 0x156   : >> { %v827_v26 = vadd.f32 %v821_v63, %v796_v24  ;;  %v2209_v10 = vpop.f32.mrf.mxu3  ;;  %v1665_v63 = vld [vmem:[%s2306_s3 + $0x30] sm:$0xff] }
 0x157   : >> { %1376 = vmatpush.msrb.mxu1 %v1665_v63  ;;  %1347 = vmatpush.msrb.mxu0 %v1317_v11 }
 0x158   : >> { %v829_v27 = vadd.f32 %v827_v26, %v2205_v16 }
 0x159   : >> { %v2225_v48 = vpop.f32.mrf.mxu1  ;;  %1377 = vmatpush.msrb.mxu1 %v1664_v7 }
 0x15a   : >> { %v831_v31 = vmax.f32 %v829_v27, 0.0 }
 0x15b   : >> { %v793_v32 = vpop.f32.mrf.mxu0  ;;  %v855_v14 = vpop.f32.mrf.mxu2  ;;  %1378 = vmatpush.msrb.mxu1 %v1663_v12 }
 0x15c   : >> { %v2213_v33 = vmax.f32 %v592_v22, %v831_v31  ;;  %v797_v34 = vadd.f32 %v793_v32, %v764_v19  ;;  %v879_v13 = vadd.f32 %v2203_v15, %v855_v14 }
 0x15e   : >> { %v828_v36 = vadd.f32 %v824_v9, %v797_v34  ;;  %v2219_v40 = vpop.f32.mrf.mxu3  ;;  %v1677_v9 = vld [vmem:[%s2306_s3 + $0x60] sm:$0xff] }
 0x15f   : >> { %1444 = vmatpush.msrb.mxu3 %v1677_v9 }
 0x160   : >> { %v830_v38 = vadd.f32 %v828_v36, %v2211_v28 }
 0x161   : >> { %v1139_v61 = vpop.f32.mrf.mxu1 }
 0x162   : >> { %v832_v29 = vmax.f32 %v830_v38, 0.0 }
 0x163   : >> { %v898_v41 = vpop.f32.mrf.mxu0  ;;  %v948_v42 = vpop.f32.mrf.mxu2 }
 0x164   : >> { %v2221_v43 = vmax.f32 %v593_v39, %v832_v29  ;;  %v904_v60 = vadd.f32 %v898_v41, %v876_v57 }
 0x166   : >> { %v1093_v47 = vpop.f32.mrf.mxu3  ;;  %v929_v5 = vadd.f32 %v923_v21, %v904_v60 }
 0x168   : >> { %v954_v19 = vadd.f32 %v948_v42, %v929_v5 }
 0x169   : >> { %v1142_v24 = vpop.f32.mrf.mxu1 }
 0x16a   : >> { %v979_v21 = vadd.f32 %v2209_v10, %v954_v19 }
 0x16b   : >> { %v901_v45 = vpop.f32.mrf.mxu0  ;;  %v951_v46 = vpop.f32.mrf.mxu2 }
 0x16c   : >> { %v905_v20 = vadd.f32 %v901_v45, %v879_v13 }
 0x16e   : >> { %v1096_v52 = vpop.f32.mrf.mxu3  ;;  %v930_v25 = vadd.f32 %v2216_v37, %v905_v20 }
 0x170   : >> { %v955_v15 = vadd.f32 %v951_v46, %v930_v25 }
 0x171   : >> { %v1239_v38 = vpop.f32.mrf.mxu1 }
 0x172   : >> { %v980_v36 = vadd.f32 %v2219_v40, %v955_v15 }
 0x173   : >> { %v998_v50 = vpop.f32.mrf.mxu0  ;;  %v1062_v51 = vpop.f32.mrf.mxu2 }
 0x174   : >> { %v1004_v26 = vadd.f32 %v998_v50, %v979_v21 }
 0x176   : >> { %v1189_v6 = vpop.f32.mrf.mxu3  ;;  %v1037_v14 = vadd.f32 %v2223_v44, %v1004_v26 }
 0x178   : >> { %v1068_v39 = vadd.f32 %v1062_v51, %v1037_v14 }
 0x179   : >> { %v1242_v51 = vpop.f32.mrf.mxu1 }
 0x17a   : >> { %v1070_v49 = vadd.f32 %v1068_v39, %v2205_v16 }
 0x17b   : >> { %v1001_v58 = vpop.f32.mrf.mxu0  ;;  %v1065_v59 = vpop.f32.mrf.mxu2 }
 0x17c   : >> { %v1005_v29 = vadd.f32 %v1001_v58, %v980_v36  ;;  %v1072_v53 = vmax.f32 %v1070_v49, 0.0 }
 0x17e   : >> { %v1192_v22 = vpop.f32.mrf.mxu3  ;;  %v1038_v50 = vadd.f32 %v2225_v48, %v1005_v29  ;;  %v1074_v60 = vmax.f32 %v2213_v33, %v1072_v53 }
 0x183   : >> { %v1116_v17 = vpop.f32.mrf.mxu0  ;;  %v1164_v18 = vpop.f32.mrf.mxu2 }
 0x184   : >> { %v1117_v23 = vadd.f32 %v1116_v17, %v1093_v47 }
 0x186   : >> { %v1145_v27 = vadd.f32 %v1139_v61, %v1117_v23  ;;  %v1303_v47 = vpop.f32.mrf.mxu3 }
 0x188   : >> { %v1170_v34 = vadd.f32 %v1164_v18, %v1145_v27 }
 0x18a   : >> { %v1195_v41 = vadd.f32 %v1189_v6, %v1170_v34 }
 0x18b   : >> { %v1119_v31 = vpop.f32.mrf.mxu0  ;;  %v1167_v32 = vpop.f32.mrf.mxu2 }
 0x18c   : >> { %v1120_v35 = vadd.f32 %v1119_v31, %v1096_v52  ;;  %v1069_v52 = vadd.f32 %v1065_v59, %v1038_v50 }
 0x18e   : >> { %v1146_v42 = vadd.f32 %v1142_v24, %v1120_v35  ;;  %v1071_v61 = vadd.f32 %v1069_v52, %v2211_v28  ;;  %v1306_v48 = vpop.f32.mrf.mxu3 }
 0x190   : >> { %v1171_v46 = vadd.f32 %v1167_v32, %v1146_v42  ;;  %v1073_v4 = vmax.f32 %v1071_v61, 0.0 }
 0x192   : >> { %v1196_v54 = vadd.f32 %v1192_v22, %v1171_v46  ;;  %v1075_v33 = vmax.f32 %v2221_v43, %v1073_v4 }
 0x193   : >> { %v1214_v10 = vpop.f32.mrf.mxu0  ;;  %v1272_v45 = vpop.f32.mrf.mxu2 }
 0x194   : >> { %v1220_v37 = vadd.f32 %v1214_v10, %v1195_v41 }
 0x196   : >> { %v1245_v30 = vadd.f32 %v1239_v38, %v1220_v37 }
 0x198   : >> { %v1278_v44 = vadd.f32 %v1272_v45, %v1245_v30 }
 0x19a   : >> { %v1309_v40 = vadd.f32 %v1303_v47, %v1278_v44 }
 0x19b   : >> { %v1217_v55 = vpop.f32.mrf.mxu0  ;;  %v1275_v58 = vpop.f32.mrf.mxu2 }
 0x19c   : >> { %v1311_v56 = vadd.f32 %v1309_v40, %v2205_v16  ;;  %v1221_v57 = vadd.f32 %v1217_v55, %v1196_v54 }
 0x19e   : >> { %v1313_v62 = vmax.f32 %v1311_v56, 0.0  ;;  %v1246_v63 = vadd.f32 %v1242_v51, %v1221_v57 }
 0x1a0   : >> { %v1315_v2 = vmax.f32 %v1074_v60, %v1313_v62  ;;  %v1279_v3 = vadd.f32 %v1275_v58, %v1246_v63 }
 0x1a2   : >> { %v1310_v59 = vadd.f32 %v1306_v48, %v1279_v3  ;;  %1661 = vmatmul.msk.f32.vlgmr.msrb.gmra.mxu0 %vm1321_vm2, %v1315_v2  ;;  %1668 = vmatmul.msk.f32.vlgmr.msrb.gmra.mxu1 %vm1321_vm2, %v1315_v2 }
 0x1a3   : >> { %1675 = vmatmul.msk.f32.vlgmr.msrb.gmra.mxu2 %vm1321_vm2, %v1315_v2  ;;  %1682 = vmatmul.msk.f32.vlgmr.msrb.gmra.mxu3 %vm1321_vm2, %v1315_v2 }
 0x1a4   : >> { %v1312_v16 = vadd.f32 %v1310_v59, %v2211_v28 }
 0x1a6   : >> { %v1314_v5 = vmax.f32 %v1312_v16, 0.0 }
 0x1a8   : >> { %v1316_v6 = vmax.f32 %v1075_v33, %v1314_v5 }
 0x1aa   : >> { %1662 = vmatmul.msk.f32.gmra.mxu0 %vm1321_vm2, %v1316_v6  ;;  %1669 = vmatmul.msk.f32.gmra.mxu1 %vm1321_vm2, %v1316_v6 }
 0x1ab   : >> { %1676 = vmatmul.msk.f32.gmra.mxu2 %vm1321_vm2, %v1316_v6  ;;  %1683 = vmatmul.msk.f32.gmra.mxu3 %vm1321_vm2, %v1316_v6 }
 0x21f   : >> { %v1349_v7 = vpop.f32.mrf.mxu0  ;;  %v1380_v8 = vpop.f32.mrf.mxu1 }
 0x220   : >> { %v1386_v9 = vmax.f32 %v1349_v7, %v1380_v8 }
 0x226   : >> { %v1413_v11 = vpop.f32.mrf.mxu2  ;;  %v1446_v12 = vpop.f32.mrf.mxu3 }
 0x227   : >> { %v1419_v13 = vmax.f32 %v1386_v9, %v1413_v11  ;;  %v1352_v43 = vpop.f32.mrf.mxu0  ;;  %v1383_v17 = vpop.f32.mrf.mxu1 }
 0x228   : >> { %v1387_v18 = vmax.f32 %v1352_v43, %v1383_v17 }
 0x229   : >> { %v1452_v28 = vmax.f32 %v1419_v13, %v1446_v12 }
 0x22b   : >> { %1457 = vst.msk [vmem:[%s1455_s11] sm:$0xff] %vm1456_vm3, %v1452_v28 }
 0x22e   : >> { %v1416_v19 = vpop.f32.mrf.mxu2  ;;  %v1449_v23 = vpop.f32.mrf.mxu3 }
 0x22f   : >> { %v1420_v20 = vmax.f32 %v1387_v18, %v1416_v19  ;;  %204 = sbr.rel (!%p202_p4) target bundleno = 16 (0x10), region = 91 }
 0x231   : >> { %v1453_v24 = vmax.f32 %v1420_v20, %v1449_v23 }
 0x233   : >> { %1458 = vst.msk [vmem:[%s1455_s11 + $0x8] sm:$0xff] %vm1456_vm3, %v1453_v24 }
 0x234 PF: > { %s14_s15 = sadd.s32 1, %s1786_s15  }
 0x235   : > { %p11_p5 = scmp.ge.s32.totalorder %s14_s15, 4  }
 0x237   :  { %13 = sbr.rel (!%p11_p5) target bundleno = 1 (0x1), region = 102 }

// kernel: network_forward.9
= control target key start
LH: loop header
LB: loop body
LE: loop exit
PB: predicated region body
PF: predicated region fallthrough
CT: control target
= control target key end

     0   :  { %s691_s0 = inlined_call_operand.vmem [shape: f32[2,784], index: 0, kind: input, shape index: {}]   ;;  %s692_s1 = inlined_call_operand.vmem [shape: f32[784,2], index: 1, kind: input, shape index: {}]   ;;  %s693_s2 = inlined_call_operand.vmem [shape: f32[1,2], index: 2, kind: input, shape index: {}]   ;;  %s694_s3 = inlined_call_operand.hbm [shape: f32[2,2], index: 3, kind: output, shape index: {}]  }
   0x1   :  { %v32_v0 = vld [vmem:[%s692_s1 + $0x78] sm:$0xff]  ;;  %v31_v1 = vld [vmem:[%s692_s1 + $0x70] sm:$0xff]  ;;  %v30_v4 = vld [vmem:[%s692_s1 + $0x68] sm:$0xff] }
   0x2   :  { %v48_v2 = vld [vmem:[%s692_s1 + $0xf8] sm:$0xff]  ;;  %140 = vmatpush.msra.mxu0 %v32_v0  ;;  %v47_v3 = vld [vmem:[%s692_s1 + $0xf0] sm:$0xff]  ;;  %v46_v5 = vld [vmem:[%s692_s1 + $0xe8] sm:$0xff] }
   0x3   :  { %160 = vmatpush.msra.mxu1 %v48_v2  ;;  %v29_v6 = vld [vmem:[%s692_s1 + $0x60] sm:$0xff]  ;;  %v28_v8 = vld [vmem:[%s692_s1 + $0x58] sm:$0xff]  ;;  %v27_v10 = vld [vmem:[%s692_s1 + $0x50] sm:$0xff] }
   0x4   :  { %141 = vmatpush.msra.mxu0 %v31_v1  ;;  %v45_v7 = vld [vmem:[%s692_s1 + $0xe0] sm:$0xff]  ;;  %v44_v9 = vld [vmem:[%s692_s1 + $0xd8] sm:$0xff]  ;;  %v43_v12 = vld [vmem:[%s692_s1 + $0xd0] sm:$0xff] }
   0x5   :  { %161 = vmatpush.msra.mxu1 %v47_v3  ;;  %v64_v11 = vld [vmem:[%s692_s1 + $0x178] sm:$0xff]  ;;  %v63_v13 = vld [vmem:[%s692_s1 + $0x170] sm:$0xff]  ;;  %v62_v15 = vld [vmem:[%s692_s1 + $0x168] sm:$0xff] }
   0x6   :  { %142 = vmatpush.msra.mxu0 %v30_v4  ;;  %180 = vmatpush.msra.mxu2 %v64_v11  ;;  %v80_v14 = vld [vmem:[%s692_s1 + $0x1f8] sm:$0xff]  ;;  %v79_v16 = vld [vmem:[%s692_s1 + $0x1f0] sm:$0xff]  ;;  %v26_v17 = vld [vmem:[%s692_s1 + $0x48] sm:$0xff] }
   0x7   :  { %162 = vmatpush.msra.mxu1 %v46_v5  ;;  %v42_v18 = vld [vmem:[%s692_s1 + $0xc8] sm:$0xff]  ;;  %200 = vmatpush.msra.mxu3 %v80_v14  ;;  %v61_v19 = vld [vmem:[%s692_s1 + $0x160] sm:$0xff]  ;;  %v60_v23 = vld [vmem:[%s692_s1 + $0x158] sm:$0xff] }
   0x8   :  { %143 = vmatpush.msra.mxu0 %v29_v6  ;;  %181 = vmatpush.msra.mxu2 %v63_v13  ;;  %v78_v20 = vld [vmem:[%s692_s1 + $0x1e8] sm:$0xff]  ;;  %v25_v21 = vld [vmem:[%s692_s1 + $0x40] sm:$0xff]  ;;  %v24_v25 = vld [vmem:[%s692_s1 + $0x38] sm:$0xff] }
   0x9   :  { %163 = vmatpush.msra.mxu1 %v45_v7  ;;  %v41_v22 = vld [vmem:[%s692_s1 + $0xc0] sm:$0xff]  ;;  %201 = vmatpush.msra.mxu3 %v79_v16  ;;  %v40_v26 = vld [vmem:[%s692_s1 + $0xb8] sm:$0xff]  ;;  %v59_v27 = vld [vmem:[%s692_s1 + $0x150] sm:$0xff] }
   0xa   :  { %144 = vmatpush.msra.mxu0 %v28_v8  ;;  %182 = vmatpush.msra.mxu2 %v62_v15  ;;  %v77_v24 = vld [vmem:[%s692_s1 + $0x1e0] sm:$0xff]  ;;  %v76_v28 = vld [vmem:[%s692_s1 + $0x1d8] sm:$0xff]  ;;  %v23_v29 = vld [vmem:[%s692_s1 + $0x30] sm:$0xff] }
   0xb   :  { %164 = vmatpush.msra.mxu1 %v44_v9  ;;  %202 = vmatpush.msra.mxu3 %v78_v20  ;;  %v39_v30 = vld [vmem:[%s692_s1 + $0xb0] sm:$0xff]  ;;  %v58_v31 = vld [vmem:[%s692_s1 + $0x148] sm:$0xff]  ;;  %v57_v35 = vld [vmem:[%s692_s1 + $0x140] sm:$0xff] }
   0xc   :  { %145 = vmatpush.msra.mxu0 %v27_v10  ;;  %183 = vmatpush.msra.mxu2 %v61_v19  ;;  %v75_v32 = vld [vmem:[%s692_s1 + $0x1d0] sm:$0xff]  ;;  %v22_v33 = vld [vmem:[%s692_s1 + $0x28] sm:$0xff]  ;;  %v21_v37 = vld [vmem:[%s692_s1 + $0x20] sm:$0xff] }
   0xd   :  { %165 = vmatpush.msra.mxu1 %v43_v12  ;;  %203 = vmatpush.msra.mxu3 %v77_v24  ;;  %v38_v34 = vld [vmem:[%s692_s1 + $0xa8] sm:$0xff]  ;;  %v37_v38 = vld [vmem:[%s692_s1 + $0xa0] sm:$0xff]  ;;  %v56_v39 = vld [vmem:[%s692_s1 + $0x138] sm:$0xff] }
   0xe   :  { %146 = vmatpush.msra.mxu0 %v26_v17  ;;  %184 = vmatpush.msra.mxu2 %v60_v23  ;;  %v74_v36 = vld [vmem:[%s692_s1 + $0x1c8] sm:$0xff]  ;;  %v73_v40 = vld [vmem:[%s692_s1 + $0x1c0] sm:$0xff]  ;;  %v20_v41 = vld [vmem:[%s692_s1 + $0x18] sm:$0xff] }
   0xf   :  { %166 = vmatpush.msra.mxu1 %v42_v18  ;;  %204 = vmatpush.msra.mxu3 %v76_v28  ;;  %v36_v42 = vld [vmem:[%s692_s1 + $0x98] sm:$0xff]  ;;  %v55_v43 = vld [vmem:[%s692_s1 + $0x130] sm:$0xff]  ;;  %v54_v47 = vld [vmem:[%s692_s1 + $0x128] sm:$0xff] }
  0x10   :  { %147 = vmatpush.msra.mxu0 %v25_v21  ;;  %185 = vmatpush.msra.mxu2 %v59_v27  ;;  %v72_v44 = vld [vmem:[%s692_s1 + $0x1b8] sm:$0xff]  ;;  %v19_v45 = vld [vmem:[%s692_s1 + $0x10] sm:$0xff]  ;;  %v18_v49 = vld [vmem:[%s692_s1 + $0x8] sm:$0xff] }
  0x11   :  { %167 = vmatpush.msra.mxu1 %v41_v22  ;;  %205 = vmatpush.msra.mxu3 %v75_v32  ;;  %v35_v46 = vld [vmem:[%s692_s1 + $0x90] sm:$0xff]  ;;  %v34_v50 = vld [vmem:[%s692_s1 + $0x88] sm:$0xff]  ;;  %v53_v51 = vld [vmem:[%s692_s1 + $0x120] sm:$0xff] }
  0x12   :  { %148 = vmatpush.msra.mxu0 %v24_v25  ;;  %186 = vmatpush.msra.mxu2 %v58_v31  ;;  %v71_v48 = vld [vmem:[%s692_s1 + $0x1b0] sm:$0xff]  ;;  %v70_v52 = vld [vmem:[%s692_s1 + $0x1a8] sm:$0xff]  ;;  %v17_v53 = vld [vmem:[%s692_s1] sm:$0xff] }
  0x13   :  { %168 = vmatpush.msra.mxu1 %v40_v26  ;;  %206 = vmatpush.msra.mxu3 %v74_v36  ;;  %v33_v54 = vld [vmem:[%s692_s1 + $0x80] sm:$0xff]  ;;  %v96_v56 = vld [vmem:[%s692_s1 + $0x278] sm:$0xff]  ;;  %v95_v60 = vld [vmem:[%s692_s1 + $0x270] sm:$0xff] }
  0x14   :  { %149 = vmatpush.msra.mxu0 %v23_v29  ;;  %187 = vmatpush.msra.mxu2 %v57_v35  ;;  %v15_v55 = vld [vmem:[%s691_s0] sm:$0xff]  ;;  %v112_v57 = vld [vmem:[%s692_s1 + $0x2f8] sm:$0xff]  ;;  %v111_v61 = vld [vmem:[%s692_s1 + $0x2f0] sm:$0xff] }
  0x15   :  { %169 = vmatpush.msra.mxu1 %v39_v30  ;;  %207 = vmatpush.msra.mxu3 %v73_v40  ;;  %121 = vst [vmem:[#allocation1] ss:$4 sm:$0xff] %v15_v55  ;;  %v52_v58 = vld [vmem:[%s692_s1 + $0x118] sm:$0xff]  ;;  %v69_v59 = vld [vmem:[%s692_s1 + $0x1a0] sm:$0xff]  ;;  %v51_v62 = vld [vmem:[%s692_s1 + $0x110] sm:$0xff] }
  0x16   :  { %150 = vmatpush.msra.mxu0 %v22_v33  ;;  %188 = vmatpush.msra.mxu2 %v56_v39  ;;  %v68_v63 = vld [vmem:[%s692_s1 + $0x198] sm:$0xff]  ;;  %v16_v0 = vld [vmem:[%s691_s0 + $0x8] sm:$0x3f]  ;;  %v67_v4 = vld [vmem:[%s692_s1 + $0x190] sm:$0xff] }
  0x17   :  { %170 = vmatpush.msra.mxu1 %v38_v34  ;;  %208 = vmatpush.msra.mxu3 %v72_v44  ;;  %v94_v1 = vld [vmem:[%s692_s1 + $0x268] sm:$0xff]  ;;  %123 = vst [vmem:[#allocation1 + $0x20] ss:$4 sm:$0xff] %v16_v0 }
  0x18   :  { %151 = vmatpush.msra.mxu0 %v21_v37  ;;  %189 = vmatpush.msra.mxu2 %v55_v43  ;;  %v110_v2 = vld [vmem:[%s692_s1 + $0x2e8] sm:$0xff] }
  0x19   :  { %171 = vmatpush.msra.mxu1 %v37_v38  ;;  %209 = vmatpush.msra.mxu3 %v71_v48  ;;  %v50_v3 = vld [vmem:[%s692_s1 + $0x108] sm:$0xff] }
  0x1a   :  { %152 = vmatpush.msra.mxu0 %v20_v41  ;;  %190 = vmatpush.msra.mxu2 %v54_v47 }
  0x1b   :  { %172 = vmatpush.msra.mxu1 %v36_v42  ;;  %210 = vmatpush.msra.mxu3 %v70_v52 }
  0x1c   :  { %153 = vmatpush.msra.mxu0 %v19_v45  ;;  %191 = vmatpush.msra.mxu2 %v53_v51 }
  0x1d   :  { %173 = vmatpush.msra.mxu1 %v35_v46  ;;  %211 = vmatpush.msra.mxu3 %v69_v59 }
  0x1e   :  { %154 = vmatpush.msra.mxu0 %v18_v49  ;;  %192 = vmatpush.msra.mxu2 %v52_v58 }
  0x1f   :  { %174 = vmatpush.msra.mxu1 %v34_v50 }
  0x20   :  { %155 = vmatpush.msra.mxu0 %v17_v53 }
  0x21   :  { %175 = vmatpush.msra.mxu1 %v33_v54 }
  0x22   :  { %220 = vmatpush.msrb.mxu0 %v96_v56 }
  0x23   :  { %240 = vmatpush.msrb.mxu1 %v112_v57 }
  0x24   :  { %221 = vmatpush.msrb.mxu0 %v95_v60 }
  0x25   :  { %241 = vmatpush.msrb.mxu1 %v111_v61 }
  0x26   :  { %8 = vsyncpa [#allocation3], 0  ;;  %v93_v5 = vld [vmem:[%s692_s1 + $0x260] sm:$0xff]  ;;  %193 = vmatpush.msra.mxu2 %v51_v62  ;;  %212 = vmatpush.msra.mxu3 %v68_v63  ;;  %v66_v8 = vld [vmem:[%s692_s1 + $0x188] sm:$0xff]  ;;  %vm137_vm0 = vcmask 130048   ;;  %vm281_vm1 = vcmask 9216  }
  0x27   :  { %v109_v6 = vld [vmem:[%s692_s1 + $0x2e0] sm:$0xff]  ;;  %222 = vmatpush.msrb.mxu0 %v94_v1  ;;  %242 = vmatpush.msrb.mxu1 %v110_v2  ;;  %v92_v9 = vld [vmem:[%s692_s1 + $0x258] sm:$0xff]  ;;  %v126_v11 = vld.sshfl [vmem:[#allocation1 + $0x10] sm:$0xff pattern:$0x73625140]  ;;  %s320_s24 = sshll.u32 %s694_s3, 4  ;;  %s321_s24 = int_to_ptr.hbm [resolvable:$true] %s320_s24 }
  0x28   :  { %v49_v7 = vld [vmem:[%s692_s1 + $0x100] sm:$0xff]  ;;  %v108_v10 = vld [vmem:[%s692_s1 + $0x2d8] sm:$0xff]  ;;  %194 = vmatpush.msra.mxu2 %v50_v3  ;;  %213 = vmatpush.msra.mxu3 %v67_v4  ;;  %v91_v13 = vld [vmem:[%s692_s1 + $0x250] sm:$0xff] }
  0x29   :  { %223 = vmatpush.msrb.mxu0 %v93_v5  ;;  %243 = vmatpush.msrb.mxu1 %v109_v6  ;;  %v65_v12 = vld [vmem:[%s692_s1 + $0x180] sm:$0xff]  ;;  %v107_v14 = vld [vmem:[%s692_s1 + $0x2d0] sm:$0xff]  ;;  %v114_v15 = vld [vmem:[%s692_s1 + $0x308] sm:$0xff] }
  0x2a   :  { %195 = vmatpush.msra.mxu2 %v49_v7  ;;  %214 = vmatpush.msra.mxu3 %v66_v8  ;;  %v124_v16 = vld.sshfl [vmem:[#allocation1] sm:$0xff pattern:$0x73625140]  ;;  %v90_v17 = vld [vmem:[%s692_s1 + $0x248] sm:$0xff]  ;;  %v88_v24 = vld [vmem:[%s692_s1 + $0x238] sm:$0xff] }
  0x2b   :  { %224 = vmatpush.msrb.mxu0 %v92_v9  ;;  %244 = vmatpush.msrb.mxu1 %v108_v10  ;;  %v106_v18 = vld [vmem:[%s692_s1 + $0x2c8] sm:$0xff]  ;;  %v127_v19 = vld.sshfl [vmem:[#allocation1 + $0x18] sm:$0xff pattern:$0x73625140]  ;;  %v89_v21 = vld [vmem:[%s692_s1 + $0x240] sm:$0xff] }
  0x2c   :  { %196 = vmatmul.f32.vlgmr.msra.gmra.mxu2 %v126_v11  ;;  %215 = vmatpush.msra.mxu3 %v65_v12  ;;  %v125_v20 = vld.sshfl [vmem:[#allocation1 + $0x8] sm:$0xff pattern:$0x73625140]  ;;  %v105_v22 = vld [vmem:[%s692_s1 + $0x2c0] sm:$0xff]  ;;  %v104_v25 = vld [vmem:[%s692_s1 + $0x2b8] sm:$0xff] }
  0x2d   :  { %225 = vmatpush.msrb.mxu0 %v91_v13  ;;  %245 = vmatpush.msrb.mxu1 %v107_v14  ;;  %v113_v23 = vld [vmem:[%s692_s1 + $0x300] sm:$0xff]  ;;  %v130_v26 = vld.sshfl [vmem:[#allocation1 + $0x30] sm:$0xff pattern:$0x73625140]  ;;  %v86_v29 = vld [vmem:[%s692_s1 + $0x228] sm:$0xff] }
  0x2e   :  { %274 = vmatpush.msrb.mxu2 %v114_v15  ;;  %156 = vmatmul.f32.vlgmr.msra.gmra.mxu0 %v124_v16  ;;  %v87_v27 = vld [vmem:[%s692_s1 + $0x230] sm:$0xff]  ;;  %v102_v30 = vld [vmem:[%s692_s1 + $0x2a8] sm:$0xff]  ;;  %v85_v31 = vld [vmem:[%s692_s1 + $0x220] sm:$0xff] }
  0x2f   :  { %226 = vmatpush.msrb.mxu0 %v90_v17  ;;  %246 = vmatpush.msrb.mxu1 %v106_v18  ;;  %v103_v28 = vld [vmem:[%s692_s1 + $0x2b0] sm:$0xff]  ;;  %v101_v32 = vld [vmem:[%s692_s1 + $0x2a0] sm:$0xff]  ;;  %v84_v33 = vld [vmem:[%s692_s1 + $0x218] sm:$0xff] }
  0x30   :  { %216 = vmatmul.f32.vlgmr.msra.gmra.mxu3 %v127_v19  ;;  %176 = vmatmul.f32.vlgmr.msra.gmra.mxu1 %v125_v20  ;;  %v100_v34 = vld [vmem:[%s692_s1 + $0x298] sm:$0xff]  ;;  %v83_v35 = vld [vmem:[%s692_s1 + $0x210] sm:$0xff]  ;;  %v82_v37 = vld [vmem:[%s692_s1 + $0x208] sm:$0xff] }
  0x31   :  { %227 = vmatpush.msrb.mxu0 %v89_v21  ;;  %247 = vmatpush.msrb.mxu1 %v105_v22  ;;  %v99_v36 = vld [vmem:[%s692_s1 + $0x290] sm:$0xff]  ;;  %v98_v38 = vld [vmem:[%s692_s1 + $0x288] sm:$0xff]  ;;  %v81_v39 = vld [vmem:[%s692_s1 + $0x200] sm:$0xff] }
  0x32   :  { %275 = vmatpush.msrb.mxu2 %v113_v23  ;;  %v97_v40 = vld [vmem:[%s692_s1 + $0x280] sm:$0xff]  ;;  %v129_v42 = vld.sshfl [vmem:[#allocation1 + $0x28] sm:$0xff pattern:$0x73625140]  ;;  %s362_s1 = smov [#allocation2]  }
  0x33   :  { %228 = vmatpush.msrb.mxu0 %v88_v24  ;;  %248 = vmatpush.msrb.mxu1 %v104_v25  ;;  %v128_v41 = vld.sshfl [vmem:[#allocation1 + $0x20] sm:$0xff pattern:$0x73625140] }
  0x34   :  { %329 = vmatmul.msk.f32.vlgmr.msrb.gmra.mxu2 %vm137_vm0, %v130_v26  ;;  %v331_v43 = vld [vmem:[%s693_s2] ss:$0 sm:$0xff]  ;;  %s318_s2 = sshll.u32 %s362_s1, 4  ;;  %s319_s2 = int_to_ptr.vmem [resolvable:$true] %s318_s2 }
  0x35   :  { %229 = vmatpush.msrb.mxu0 %v87_v27  ;;  %249 = vmatpush.msrb.mxu1 %v103_v28 }
  0x37   :  { %230 = vmatpush.msrb.mxu0 %v86_v29  ;;  %250 = vmatpush.msrb.mxu1 %v102_v30 }
  0x39   :  { %231 = vmatpush.msrb.mxu0 %v85_v31  ;;  %251 = vmatpush.msrb.mxu1 %v101_v32 }
  0x3b   :  { %232 = vmatpush.msrb.mxu0 %v84_v33  ;;  %252 = vmatpush.msrb.mxu1 %v100_v34 }
  0x3d   :  { %233 = vmatpush.msrb.mxu0 %v83_v35  ;;  %253 = vmatpush.msrb.mxu1 %v99_v36 }
  0x3f   :  { %234 = vmatpush.msrb.mxu0 %v82_v37  ;;  %254 = vmatpush.msrb.mxu1 %v98_v38 }
  0x41   :  { %235 = vmatpush.msrb.mxu0 %v81_v39  ;;  %255 = vmatpush.msrb.mxu1 %v97_v40 }
  0x42   :  { %236 = vmatmul.f32.vlgmr.msrb.gmra.mxu0 %v128_v41  ;;  %256 = vmatmul.f32.vlgmr.msrb.gmra.mxu1 %v129_v42 }
  0xab   :  { %v157_v44 = vpop.f32.mrf.mxu0 }
  0xac   :  { %v158_v45 = vadd.f32 %v331_v43, %v157_v44 }
  0xad   :  { %v177_v46 = vpop.f32.mrf.mxu1 }
  0xae   :  { %v178_v47 = vadd.f32 %v177_v46, %v158_v45 }
  0xaf   :  { %v197_v48 = vpop.f32.mrf.mxu2 }
  0xb0   :  { %v198_v49 = vadd.f32 %v197_v48, %v178_v47 }
  0xb3   :  { %v217_v50 = vpop.f32.mrf.mxu3 }
  0xb4   :  { %v218_v51 = vadd.f32 %v217_v50, %v198_v49 }
  0xb7   :  { %v277_v55 = vpop.f32.mrf.mxu2 }
  0xbf   :  { %v237_v52 = vpop.f32.mrf.mxu0  ;;  %v257_v53 = vpop.f32.mrf.mxu1 }
  0xc0   :  { %v238_v54 = vadd.f32 %v237_v52, %v218_v51 }
  0xc2   :  { %v258_v56 = vadd.f32 %v257_v53, %v238_v54 }
  0xc4   :  { %v278_v57 = vadd.f32 %v277_v55, %v258_v56 }
  0xc6   :  { %v280_v58 = vmul.f32 %v278_v57, %v278_v57 }
  0xc8   :  { %v282_v59 = vsel %vm281_vm1, %v280_v58, 0.0 }
  0xc9   :  { %283 = vadd.xlane.f32.xlu0 %v282_v59 }
 0x13c   :  { %v284_v60 = vpop.xlane.xlu0 %283 }
 0x13d   :  { %332 = vrsqrt.f32 %v284_v60  ;;  %vm292_vm2 = vcmp.eq.f32.partialorder %v284_v60, inf  ;;  %v295_v4 = vand.u32 2147483648, %v284_v60  ;;  %vm294_vm3 = vcmp.eq.f32.partialorder %v284_v60, 0.0 }
 0x143   :  { %v333_v61 = vpop.eup %332 }
 0x144   :  { %v286_v62 = vmul.f32 %v333_v61, %v284_v60 }
 0x146   :  { %v287_v63 = vmul.f32 %v333_v61, %v286_v62 }
 0x148   :  { %v288_v0 = vmul.f32 0.5, %v287_v63 }
 0x14a   :  { %v289_v1 = vsub.f32 1.5, %v288_v0 }
 0x14c   :  { %v290_v2 = vmul.f32 %v333_v61, %v289_v1 }
 0x14e   :  { %v291_v3 = vmul.f32 %v290_v2, %v284_v60 }
 0x150   :  { %v293_v5 = vsel %vm292_vm2, %v284_v60, %v291_v3 }
 0x151   :  { %v296_v6 = vsel %vm294_vm3, %v295_v4, %v293_v5 }
 0x152   :  { %334 = vrcp.f32 %v296_v6  ;;  %v308_v10 = vand.u32 2147483648, %v296_v6  ;;  %v306_v12 = vand.u32 2147483647, %v296_v6  ;;  %vm302_vm5 = vweird.f32 %v296_v6 }
 0x154   :  { %v309_v14 = vor.u32 1.1754944e-38, %v308_v10  ;;  %vm307_vm7 = vcmp.eq.f32.partialorder %v306_v12, 8.507059e+37 }
 0x158   :  { %v335_v7 = vpop.eup %334 }
 0x159   :  { %v298_v8 = vmul.f32 %v335_v7, %v296_v6  ;;  %vm303_vm4 = vweird.f32 %v335_v7 }
 0x15a   :  { %vm304_vm6 = vmor %vm302_vm5, %vm303_vm4 }
 0x15b   :  { %v299_v9 = vsub.f32 1.0, %v298_v8 }
 0x15d   :  { %v300_v11 = vmul.f32 %v335_v7, %v299_v9 }
 0x15f   :  { %v301_v13 = vadd.f32 %v335_v7, %v300_v11 }
 0x161   :  { %v305_v15 = vsel %vm304_vm6, %v335_v7, %v301_v13 }
 0x162   :  { %v310_v16 = vsel %vm307_vm7, %v309_v14, %v305_v15 }
 0x163   :  { %v311_v17 = vmul.f32 %v310_v16, %v278_v57 }
 0x165   :  { %312 = vst.msk [vmem:[#allocation2] sm:$0x3] %vm281_vm1, %v311_v17 }
 0x166   :  { %323 = dma.vmem_to_hbm [thread:$0]  %s319_s2, 32, %s321_s24, [#allocation3]  }
 0x167   :  { %360 = dma.done.wait [#allocation3], 32  }
 0x168   :  { %361 = vsyncadd [#allocation3], 4294967264 }
 0x169   :  { %328 = vsyncpa [#allocation3], 1 }

</bundles_post_ra>
